<compile_context>
chip_gen: v7x
topology: tpu7x:2x2x1
jax: 0.10.0
libtpu: 0.0.40
codegen_flags: <defaults>
</compile_context>

<pallas_src>
import functools

import jax
import jax.numpy as jnp
from jax.experimental import pallas as pl
from jax.experimental.pallas import tpu as pltpu


_CONV_NAMES = (
    "conv1", "conv2", "conv3", "conv1_2", "conv2_2", "conv2_3", "conv3_3",
    "att1_0", "att1_2", "att3_0", "att3_2",
    "align_mul1", "align_add1", "align_mul3", "align_add3",
    "convOut1_0", "convOut1_2", "convOut2_0", "convOut2_2",
    "convOut3_0", "convOut3_2", "convOut3_4",
    "convOut4",                                    # final 1x1 conv
)
_TAPS = tuple((dh, dw) for dh in (-1, 0, 1) for dw in (-1, 0, 1))


# ----------------------------------------------------------------------------
# Fused kernel: the entire forward pass for one batch element.
# ----------------------------------------------------------------------------
def _fused_kernel(*refs, H, W):
    """Activations are [C, H*W] (channels on sublanes, pixels on lanes).
    3x3-conv weights are tap-major [Cout, 9*Cin]; biases are [Cout, 1]."""
    (x1_ref, x2_ref, x3_ref, xa11_ref, xa21_ref, xa23_ref, xa33_ref,
     mask_ref) = refs[:8]
    o_ref = refs[-1]
    wb = {name: (refs[8 + 2 * i], refs[9 + 2 * i])
          for i, name in enumerate(_CONV_NAMES)}

    # Boundary-validity masks for the 9 taps ([1, H*W] each), precomputed
    # on the host and shared by every 3x3 conv in the network.
    tap_masks = [mask_ref[pl.ds(t, 1), :] for t in range(9)]

    def patches(x):
        # im2col: [Cin, HW] -> [9*Cin, HW] via flat lane shifts + masking
        # (zero "same" padding is realised by the masks).
        cols = []
        for t, (dh, dw) in enumerate(_TAPS):
            off = dh * W + dw
            if off == 0:
                cols.append(x)                       # centre tap: no shift
            else:
                cols.append(jnp.roll(x, -off, axis=1) * tap_masks[t])
        return jnp.concatenate(cols, axis=0)

    def mm(p, name):
        w_ref, b_ref = wb[name]
        return jnp.dot(w_ref[...], p,
                       preferred_element_type=jnp.float32) + b_ref[...]

    def conv(x, name, act="relu"):
        y = mm(patches(x), name)
        if act == "relu":
            return jnp.maximum(y, 0.0)
        if act == "sigmoid":
            return jax.nn.sigmoid(y)
        return y

    x1, x2, x3 = x1_ref[0], x2_ref[0], x3_ref[0]
    xa11, xa21, xa23, xa33 = xa11_ref[0], xa21_ref[0], xa23_ref[0], xa33_ref[0]

    F1 = conv(x1, "conv1")
    F2 = conv(x2, "conv2")
    F3 = conv(x3, "conv3")
    F1A2 = conv(xa11, "conv1_2")
    F2A2 = conv(xa21, "conv2_2")
    F2A3 = conv(xa23, "conv2_3")
    F3A3 = conv(xa33, "conv3_3")

    # torch.cat along channels == sublane concat (stays in VMEM).
    F12 = jnp.concatenate([F1A2, F2A2], axis=0)
    F23 = jnp.concatenate([F2A3, F3A3], axis=0)

    # Attention branches: relu conv -> sigmoid conv fused with the gating mul.
    F1g = F1 * conv(conv(F12, "att1_0"), "att1_2", "sigmoid")
    F3g = F3 * conv(conv(F23, "att3_0"), "att3_2", "sigmoid")

    # Align heads: both convs of a pair share one patch matrix.
    p1 = patches(F1g)
    F12A = (jnp.maximum(mm(p1, "align_mul1"), 0.0) * F2
            + jnp.maximum(mm(p1, "align_add1"), 0.0))
    p3 = patches(F3g)
    F23A = (jnp.maximum(mm(p3, "align_mul3"), 0.0) * F2
            + jnp.maximum(mm(p3, "align_add3"), 0.0))

    F12A = conv(conv(F12A, "convOut1_0"), "convOut1_2")
    F23A = conv(conv(F23A, "convOut2_0"), "convOut2_2")

    out = jnp.concatenate([F12A, F23A, F2], axis=0)
    out = conv(out, "convOut3_0")
    out = conv(out, "convOut3_2")
    out = conv(out, "convOut3_4")

    # Final 1x1 conv + sigmoid: a single [C, 3F] @ [3F, HW] matmul.
    w4, b4 = wb["convOut4"]
    out = jax.nn.sigmoid(
        jnp.dot(w4[...], out, preferred_element_type=jnp.float32) + b4[...])
    o_ref[0] = out


# ----------------------------------------------------------------------------
# Host-side packing (done once per parameter set — outside the hot path)
# ----------------------------------------------------------------------------
def pack_params(p):
    """PyTorch OIHW conv weights -> kernel matmul layout."""
    packed = {}
    for name in _CONV_NAMES[:-1]:
        w = p[name + "_w"]                               # [Cout, Cin, 3, 3]
        cout, cin = w.shape[0], w.shape[1]
        packed[name + "_w"] = jnp.transpose(w, (0, 2, 3, 1)).reshape(cout,
                                                                     9 * cin)
        packed[name + "_b"] = p[name + "_b"].reshape(cout, 1)
    w4 = p["convOut4_w"]                                 # [C, 3F, 1, 1]
    packed["convOut4_w"] = w4[:, :, 0, 0]
    packed["convOut4_b"] = p["convOut4_b"].reshape(-1, 1)
    return packed


def _tap_masks(h, w):
    hw = h * w
    hi, wi = jnp.meshgrid(jnp.arange(h), jnp.arange(w), indexing="ij")
    hi = hi.reshape(1, hw)
    wi = wi.reshape(1, hw)
    rows = []
    for dh, dw in _TAPS:
        valid = ((hi + dh >= 0) & (hi + dh < h) &
                 (wi + dw >= 0) & (wi + dw < w))
        rows.append(valid)
    return jnp.concatenate(rows, axis=0).astype(jnp.float32)   # [9, H*W]


# ----------------------------------------------------------------------------
# Forward (one pallas_call; NCHW in / NCHW out, only free reshapes outside)
# ----------------------------------------------------------------------------
def forward(x1, x2, x3, x1_att_in_1, x2_att_in_1, x2_att_in_3, x3_att_in_3,
            packed):
    n, c, h, w = x1.shape
    hw = h * w
    c_out = packed["convOut4_w"].shape[0]
    xs = [t.reshape(n, c, hw)
          for t in (x1, x2, x3, x1_att_in_1, x2_att_in_1, x2_att_in_3,
                    x3_att_in_3)]
    masks = _tap_masks(h, w)

    operands = list(xs) + [masks]
    in_specs = ([pl.BlockSpec((1, c, hw), lambda i: (i, 0, 0))] * 7
                + [pl.BlockSpec(masks.shape, lambda i: (0, 0))])
    for name in _CONV_NAMES:
        for sfx in ("_w", "_b"):
            arr = packed[name + sfx]
            operands.append(arr)
            in_specs.append(pl.BlockSpec(arr.shape, lambda i: (0, 0)))

    out = pl.pallas_call(
        functools.partial(_fused_kernel, H=h, W=w),
        out_shape=jax.ShapeDtypeStruct((n, c_out, hw), jnp.float32),
        grid=(n,),
        in_specs=in_specs,
        out_specs=pl.BlockSpec((1, c_out, hw), lambda i: (i, 0, 0)),
        compiler_params=pltpu.CompilerParams(
            dimension_semantics=("parallel",)),
    )(*operands)
    return out.reshape(n, c_out, h, w)


# ----------------------------------------------------------------------------
# Pure-JAX reference (lax conv, NCHW), for correctness check only
# ----------------------------------------------------------------------------
def _conv_ref(x, w, b, pad):
    out = jax.lax.conv_general_dilated(
        x, w, window_strides=(1, 1),
        padding=[(pad, pad), (pad, pad)],
        dimension_numbers=("NCHW", "OIHW", "NCHW"),
        precision=jax.lax.Precision.HIGHEST)
    return out + b[None, :, None, None]


def reference_forward(x1, x2, x3, x1a1, x2a1, x2a3, x3a3, p):
    relu, sig = jax.nn.relu, jax.nn.sigmoid
    F1 = relu(_conv_ref(x1, p["conv1_w"], p["conv1_b"], 1))
    F2 = relu(_conv_ref(x2, p["conv2_w"], p["conv2_b"], 1))
    F3 = relu(_conv_ref(x3, p["conv3_w"], p["conv3_b"], 1))
    F1A2 = relu(_conv_ref(x1a1, p["conv1_2_w"], p["conv1_2_b"], 1))
    F2A2 = relu(_conv_ref(x2a1, p["conv2_2_w"], p["conv2_2_b"], 1))
    F2A3 = relu(_conv_ref(x2a3, p["conv2_3_w"], p["conv2_3_b"], 1))
    F3A3 = relu(_conv_ref(x3a3, p["conv3_3_w"], p["conv3_3_b"], 1))
    F12 = jnp.concatenate([F1A2, F2A2], axis=1)
    F23 = jnp.concatenate([F2A3, F3A3], axis=1)
    F1_att = sig(_conv_ref(relu(_conv_ref(F12, p["att1_0_w"], p["att1_0_b"], 1)),
                           p["att1_2_w"], p["att1_2_b"], 1))
    F3_att = sig(_conv_ref(relu(_conv_ref(F23, p["att3_0_w"], p["att3_0_b"], 1)),
                           p["att3_2_w"], p["att3_2_b"], 1))
    F1 = F1 * F1_att
    F3 = F3 * F3_att
    F1_MUL = relu(_conv_ref(F1, p["align_mul1_w"], p["align_mul1_b"], 1))
    F1_ADD = relu(_conv_ref(F1, p["align_add1_w"], p["align_add1_b"], 1))
    F3_MUL = relu(_conv_ref(F3, p["align_mul3_w"], p["align_mul3_b"], 1))
    F3_ADD = relu(_conv_ref(F3, p["align_add3_w"], p["align_add3_b"], 1))
    F12A = F1_MUL * F2 + F1_ADD
    F12A = relu(_conv_ref(F12A, p["convOut1_0_w"], p["convOut1_0_b"], 1))
    F12A = relu(_conv_ref(F12A, p["convOut1_2_w"], p["convOut1_2_b"], 1))
    F23A = F3_MUL * F2 + F3_ADD
    F23A = relu(_conv_ref(F23A, p["convOut2_0_w"], p["convOut2_0_b"], 1))
    F23A = relu(_conv_ref(F23A, p["convOut2_2_w"], p["convOut2_2_b"], 1))
    out = jnp.concatenate([F12A, F23A, F2], axis=1)
    out = relu(_conv_ref(out, p["convOut3_0_w"], p["convOut3_0_b"], 1))
    out = relu(_conv_ref(out, p["convOut3_2_w"], p["convOut3_2_b"], 1))
    out = relu(_conv_ref(out, p["convOut3_4_w"], p["convOut3_4_b"], 1))
    return sig(_conv_ref(out, p["convOut4_w"], p["convOut4_b"], 0))


# ----------------------------------------------------------------------------
# Deterministic parameter init (PyTorch Conv2d OIHW shapes)
# ----------------------------------------------------------------------------
def init_params(key, n_channel, n_feat):
    layers = [
        ("conv1", n_feat, n_channel), ("conv2", n_feat, n_channel),
        ("conv3", n_feat, n_channel), ("conv1_2", n_feat, n_channel),
        ("conv2_2", n_feat, n_channel), ("conv2_3", n_feat, n_channel),
        ("conv3_3", n_feat, n_channel),
        ("att1_0", 2 * n_feat, 2 * n_feat), ("att1_2", n_feat, 2 * n_feat),
        ("att3_0", 2 * n_feat, 2 * n_feat), ("att3_2", n_feat, 2 * n_feat),
        ("align_mul1", n_feat, n_feat), ("align_add1", n_feat, n_feat),
        ("align_mul3", n_feat, n_feat), ("align_add3", n_feat, n_feat),
        ("convOut1_0", n_feat, n_feat), ("convOut1_2", n_feat, n_feat),
        ("convOut2_0", n_feat, n_feat), ("convOut2_2", n_feat, n_feat),
        ("convOut3_0", 3 * n_feat, 3 * n_feat),
        ("convOut3_2", 3 * n_feat, 3 * n_feat),
        ("convOut3_4", 3 * n_feat, 3 * n_feat),
    ]
    keys = jax.random.split(key, 2 * len(layers) + 2)
    p, idx = {}, 0
    for name, cout, cin in layers:
        p[name + "_w"] = 0.1 * jax.random.normal(keys[idx], (cout, cin, 3, 3),
                                                 jnp.float32)
        p[name + "_b"] = 0.1 * jax.random.normal(keys[idx + 1], (cout,),
                                                 jnp.float32)
        idx += 2
    p["convOut4_w"] = 0.1 * jax.random.normal(keys[idx],
                                              (n_channel, 3 * n_feat, 1, 1),
                                              jnp.float32)
    p["convOut4_b"] = 0.1 * jax.random.normal(keys[idx + 1], (n_channel,),
                                              jnp.float32)
    return p


if __name__ == "__main__":
    key = jax.random.PRNGKey(0)
    N, H, W = 2, 16, 16
    nChannel, nFeat = 4, 8

    kin = jax.random.split(key, 8)
    mk = lambda k: jax.random.uniform(k, (N, nChannel, H, W), jnp.float32)
    x1, x2, x3 = mk(kin[0]), mk(kin[1]), mk(kin[2])
    x1a1, x2a1, x2a3, x3a3 = mk(kin[3]), mk(kin[4]), mk(kin[5]), mk(kin[6])
    params = init_params(kin[7], nChannel, nFeat)
    packed = pack_params(params)          # weight repack hoisted out of hot path

    fwd = jax.jit(forward)
    out = jax.block_until_ready(
        fwd(x1, x2, x3, x1a1, x2a1, x2a3, x3a3, packed))
    ref = jax.block_until_ready(
        reference_forward(x1, x2, x3, x1a1, x2a1, x2a3, x3a3, params))

    assert out.shape == (N, nChannel, H, W), out.shape
    if not bool(jnp.allclose(out, ref, atol=2e-3, rtol=2e-3)):
        err = float(jnp.max(jnp.abs(out - ref)))
        raise RuntimeError(f"Pallas output does not match JAX reference "
                           f"(max abs err {err})")
    print("KERNEL_OK")
</pallas_src>

<mosaic_0001>
module attributes {stable_mosaic.version = 11 : i64} {
  func.func @_fused_kernel(%arg0: i32, %arg1: memref<1x4x256xf32, #tpu.memory_space<vmem>>, %arg2: memref<1x4x256xf32, #tpu.memory_space<vmem>>, %arg3: memref<1x4x256xf32, #tpu.memory_space<vmem>>, %arg4: memref<1x4x256xf32, #tpu.memory_space<vmem>>, %arg5: memref<1x4x256xf32, #tpu.memory_space<vmem>>, %arg6: memref<1x4x256xf32, #tpu.memory_space<vmem>>, %arg7: memref<1x4x256xf32, #tpu.memory_space<vmem>>, %arg8: memref<9x256xf32, #tpu.memory_space<vmem>>, %arg9: memref<8x36xf32, #tpu.memory_space<vmem>>, %arg10: memref<8x1xf32, #tpu.memory_space<vmem>>, %arg11: memref<8x36xf32, #tpu.memory_space<vmem>>, %arg12: memref<8x1xf32, #tpu.memory_space<vmem>>, %arg13: memref<8x36xf32, #tpu.memory_space<vmem>>, %arg14: memref<8x1xf32, #tpu.memory_space<vmem>>, %arg15: memref<8x36xf32, #tpu.memory_space<vmem>>, %arg16: memref<8x1xf32, #tpu.memory_space<vmem>>, %arg17: memref<8x36xf32, #tpu.memory_space<vmem>>, %arg18: memref<8x1xf32, #tpu.memory_space<vmem>>, %arg19: memref<8x36xf32, #tpu.memory_space<vmem>>, %arg20: memref<8x1xf32, #tpu.memory_space<vmem>>, %arg21: memref<8x36xf32, #tpu.memory_space<vmem>>, %arg22: memref<8x1xf32, #tpu.memory_space<vmem>>, %arg23: memref<16x144xf32, #tpu.memory_space<vmem>>, %arg24: memref<16x1xf32, #tpu.memory_space<vmem>>, %arg25: memref<8x144xf32, #tpu.memory_space<vmem>>, %arg26: memref<8x1xf32, #tpu.memory_space<vmem>>, %arg27: memref<16x144xf32, #tpu.memory_space<vmem>>, %arg28: memref<16x1xf32, #tpu.memory_space<vmem>>, %arg29: memref<8x144xf32, #tpu.memory_space<vmem>>, %arg30: memref<8x1xf32, #tpu.memory_space<vmem>>, %arg31: memref<8x72xf32, #tpu.memory_space<vmem>>, %arg32: memref<8x1xf32, #tpu.memory_space<vmem>>, %arg33: memref<8x72xf32, #tpu.memory_space<vmem>>, %arg34: memref<8x1xf32, #tpu.memory_space<vmem>>, %arg35: memref<8x72xf32, #tpu.memory_space<vmem>>, %arg36: memref<8x1xf32, #tpu.memory_space<vmem>>, %arg37: memref<8x72xf32, #tpu.memory_space<vmem>>, %arg38: memref<8x1xf32, #tpu.memory_space<vmem>>, %arg39: memref<8x72xf32, #tpu.memory_space<vmem>>, %arg40: memref<8x1xf32, #tpu.memory_space<vmem>>, %arg41: memref<8x72xf32, #tpu.memory_space<vmem>>, %arg42: memref<8x1xf32, #tpu.memory_space<vmem>>, %arg43: memref<8x72xf32, #tpu.memory_space<vmem>>, %arg44: memref<8x1xf32, #tpu.memory_space<vmem>>, %arg45: memref<8x72xf32, #tpu.memory_space<vmem>>, %arg46: memref<8x1xf32, #tpu.memory_space<vmem>>, %arg47: memref<24x216xf32, #tpu.memory_space<vmem>>, %arg48: memref<24x1xf32, #tpu.memory_space<vmem>>, %arg49: memref<24x216xf32, #tpu.memory_space<vmem>>, %arg50: memref<24x1xf32, #tpu.memory_space<vmem>>, %arg51: memref<24x216xf32, #tpu.memory_space<vmem>>, %arg52: memref<24x1xf32, #tpu.memory_space<vmem>>, %arg53: memref<4x24xf32, #tpu.memory_space<vmem>>, %arg54: memref<4x1xf32, #tpu.memory_space<vmem>>, %arg55: memref<1x4x256xf32, #tpu.memory_space<vmem>>) attributes {dimension_semantics = [#tpu.dimension_semantics<parallel>], iteration_bounds = array<i64: 2>, scalar_prefetch = 0 : i64, scratch_operands = 0 : i64, tpu.core_type = #tpu.core_type<tc>, window_params = [{transform_indices = @transform_0, window_bounds = array<i64: 1, 4, 256>}, {transform_indices = @transform_1, window_bounds = array<i64: 1, 4, 256>}, {transform_indices = @transform_2, window_bounds = array<i64: 1, 4, 256>}, {transform_indices = @transform_3, window_bounds = array<i64: 1, 4, 256>}, {transform_indices = @transform_4, window_bounds = array<i64: 1, 4, 256>}, {transform_indices = @transform_5, window_bounds = array<i64: 1, 4, 256>}, {transform_indices = @transform_6, window_bounds = array<i64: 1, 4, 256>}, {pipeline_mode = #tpu.pipeline_mode<synchronous>, transform_indices = @transform_7, window_bounds = array<i64: 9, 256>}, {pipeline_mode = #tpu.pipeline_mode<synchronous>, transform_indices = @transform_8, window_bounds = array<i64: 8, 36>}, {pipeline_mode = #tpu.pipeline_mode<synchronous>, transform_indices = @transform_9, window_bounds = array<i64: 8, 1>}, {pipeline_mode = #tpu.pipeline_mode<synchronous>, transform_indices = @transform_10, window_bounds = array<i64: 8, 36>}, {pipeline_mode = #tpu.pipeline_mode<synchronous>, transform_indices = @transform_11, window_bounds = array<i64: 8, 1>}, {pipeline_mode = #tpu.pipeline_mode<synchronous>, transform_indices = @transform_12, window_bounds = array<i64: 8, 36>}, {pipeline_mode = #tpu.pipeline_mode<synchronous>, transform_indices = @transform_13, window_bounds = array<i64: 8, 1>}, {pipeline_mode = #tpu.pipeline_mode<synchronous>, transform_indices = @transform_14, window_bounds = array<i64: 8, 36>}, {pipeline_mode = #tpu.pipeline_mode<synchronous>, transform_indices = @transform_15, window_bounds = array<i64: 8, 1>}, {pipeline_mode = #tpu.pipeline_mode<synchronous>, transform_indices = @transform_16, window_bounds = array<i64: 8, 36>}, {pipeline_mode = #tpu.pipeline_mode<synchronous>, transform_indices = @transform_17, window_bounds = array<i64: 8, 1>}, {pipeline_mode = #tpu.pipeline_mode<synchronous>, transform_indices = @transform_18, window_bounds = array<i64: 8, 36>}, {pipeline_mode = #tpu.pipeline_mode<synchronous>, transform_indices = @transform_19, window_bounds = array<i64: 8, 1>}, {pipeline_mode = #tpu.pipeline_mode<synchronous>, transform_indices = @transform_20, window_bounds = array<i64: 8, 36>}, {pipeline_mode = #tpu.pipeline_mode<synchronous>, transform_indices = @transform_21, window_bounds = array<i64: 8, 1>}, {pipeline_mode = #tpu.pipeline_mode<synchronous>, transform_indices = @transform_22, window_bounds = array<i64: 16, 144>}, {pipeline_mode = #tpu.pipeline_mode<synchronous>, transform_indices = @transform_23, window_bounds = array<i64: 16, 1>}, {pipeline_mode = #tpu.pipeline_mode<synchronous>, transform_indices = @transform_24, window_bounds = array<i64: 8, 144>}, {pipeline_mode = #tpu.pipeline_mode<synchronous>, transform_indices = @transform_25, window_bounds = array<i64: 8, 1>}, {pipeline_mode = #tpu.pipeline_mode<synchronous>, transform_indices = @transform_26, window_bounds = array<i64: 16, 144>}, {pipeline_mode = #tpu.pipeline_mode<synchronous>, transform_indices = @transform_27, window_bounds = array<i64: 16, 1>}, {pipeline_mode = #tpu.pipeline_mode<synchronous>, transform_indices = @transform_28, window_bounds = array<i64: 8, 144>}, {pipeline_mode = #tpu.pipeline_mode<synchronous>, transform_indices = @transform_29, window_bounds = array<i64: 8, 1>}, {pipeline_mode = #tpu.pipeline_mode<synchronous>, transform_indices = @transform_30, window_bounds = array<i64: 8, 72>}, {pipeline_mode = #tpu.pipeline_mode<synchronous>, transform_indices = @transform_31, window_bounds = array<i64: 8, 1>}, {pipeline_mode = #tpu.pipeline_mode<synchronous>, transform_indices = @transform_32, window_bounds = array<i64: 8, 72>}, {pipeline_mode = #tpu.pipeline_mode<synchronous>, transform_indices = @transform_33, window_bounds = array<i64: 8, 1>}, {pipeline_mode = #tpu.pipeline_mode<synchronous>, transform_indices = @transform_34, window_bounds = array<i64: 8, 72>}, {pipeline_mode = #tpu.pipeline_mode<synchronous>, transform_indices = @transform_35, window_bounds = array<i64: 8, 1>}, {pipeline_mode = #tpu.pipeline_mode<synchronous>, transform_indices = @transform_36, window_bounds = array<i64: 8, 72>}, {pipeline_mode = #tpu.pipeline_mode<synchronous>, transform_indices = @transform_37, window_bounds = array<i64: 8, 1>}, {pipeline_mode = #tpu.pipeline_mode<synchronous>, transform_indices = @transform_38, window_bounds = array<i64: 8, 72>}, {pipeline_mode = #tpu.pipeline_mode<synchronous>, transform_indices = @transform_39, window_bounds = array<i64: 8, 1>}, {pipeline_mode = #tpu.pipeline_mode<synchronous>, transform_indices = @transform_40, window_bounds = array<i64: 8, 72>}, {pipeline_mode = #tpu.pipeline_mode<synchronous>, transform_indices = @transform_41, window_bounds = array<i64: 8, 1>}, {pipeline_mode = #tpu.pipeline_mode<synchronous>, transform_indices = @transform_42, window_bounds = array<i64: 8, 72>}, {pipeline_mode = #tpu.pipeline_mode<synchronous>, transform_indices = @transform_43, window_bounds = array<i64: 8, 1>}, {pipeline_mode = #tpu.pipeline_mode<synchronous>, transform_indices = @transform_44, window_bounds = array<i64: 8, 72>}, {pipeline_mode = #tpu.pipeline_mode<synchronous>, transform_indices = @transform_45, window_bounds = array<i64: 8, 1>}, {pipeline_mode = #tpu.pipeline_mode<synchronous>, transform_indices = @transform_46, window_bounds = array<i64: 24, 216>}, {pipeline_mode = #tpu.pipeline_mode<synchronous>, transform_indices = @transform_47, window_bounds = array<i64: 24, 1>}, {pipeline_mode = #tpu.pipeline_mode<synchronous>, transform_indices = @transform_48, window_bounds = array<i64: 24, 216>}, {pipeline_mode = #tpu.pipeline_mode<synchronous>, transform_indices = @transform_49, window_bounds = array<i64: 24, 1>}, {pipeline_mode = #tpu.pipeline_mode<synchronous>, transform_indices = @transform_50, window_bounds = array<i64: 24, 216>}, {pipeline_mode = #tpu.pipeline_mode<synchronous>, transform_indices = @transform_51, window_bounds = array<i64: 24, 1>}, {pipeline_mode = #tpu.pipeline_mode<synchronous>, transform_indices = @transform_52, window_bounds = array<i64: 4, 24>}, {pipeline_mode = #tpu.pipeline_mode<synchronous>, transform_indices = @transform_53, window_bounds = array<i64: 4, 1>}, {transform_indices = @transform_54, window_bounds = array<i64: 1, 4, 256>}]} {
    %c0 = arith.constant 0 : index
    %c0_0 = arith.constant 0 : index
    %0 = vector.load %arg8[%c0, %c0_0] : memref<9x256xf32, #tpu.memory_space<vmem>>, vector<1x256xf32>
    %c1 = arith.constant 1 : index
    %c0_1 = arith.constant 0 : index
    %1 = vector.load %arg8[%c1, %c0_1] : memref<9x256xf32, #tpu.memory_space<vmem>>, vector<1x256xf32>
    %c2 = arith.constant 2 : index
    %c0_2 = arith.constant 0 : index
    %2 = vector.load %arg8[%c2, %c0_2] : memref<9x256xf32, #tpu.memory_space<vmem>>, vector<1x256xf32>
    %c3 = arith.constant 3 : index
    %c0_3 = arith.constant 0 : index
    %3 = vector.load %arg8[%c3, %c0_3] : memref<9x256xf32, #tpu.memory_space<vmem>>, vector<1x256xf32>
    %c5 = arith.constant 5 : index
    %c0_4 = arith.constant 0 : index
    %4 = vector.load %arg8[%c5, %c0_4] : memref<9x256xf32, #tpu.memory_space<vmem>>, vector<1x256xf32>
    %c6 = arith.constant 6 : index
    %c0_5 = arith.constant 0 : index
    %5 = vector.load %arg8[%c6, %c0_5] : memref<9x256xf32, #tpu.memory_space<vmem>>, vector<1x256xf32>
    %c7 = arith.constant 7 : index
    %c0_6 = arith.constant 0 : index
    %6 = vector.load %arg8[%c7, %c0_6] : memref<9x256xf32, #tpu.memory_space<vmem>>, vector<1x256xf32>
    %c8 = arith.constant 8 : index
    %c0_7 = arith.constant 0 : index
    %7 = vector.load %arg8[%c8, %c0_7] : memref<9x256xf32, #tpu.memory_space<vmem>>, vector<1x256xf32>
    %c0_8 = arith.constant 0 : index
    %c0_9 = arith.constant 0 : index
    %c0_10 = arith.constant 0 : index
    %8 = vector.load %arg1[%c0_8, %c0_9, %c0_10] : memref<1x4x256xf32, #tpu.memory_space<vmem>>, vector<1x4x256xf32>
    %9 = vector.shape_cast %8 : vector<1x4x256xf32> to vector<4x256xf32>
    %c0_11 = arith.constant 0 : index
    %c0_12 = arith.constant 0 : index
    %c0_13 = arith.constant 0 : index
    %10 = vector.load %arg2[%c0_11, %c0_12, %c0_13] : memref<1x4x256xf32, #tpu.memory_space<vmem>>, vector<1x4x256xf32>
    %11 = vector.shape_cast %10 : vector<1x4x256xf32> to vector<4x256xf32>
    %c0_14 = arith.constant 0 : index
    %c0_15 = arith.constant 0 : index
    %c0_16 = arith.constant 0 : index
    %12 = vector.load %arg3[%c0_14, %c0_15, %c0_16] : memref<1x4x256xf32, #tpu.memory_space<vmem>>, vector<1x4x256xf32>
    %13 = vector.shape_cast %12 : vector<1x4x256xf32> to vector<4x256xf32>
    %c0_17 = arith.constant 0 : index
    %c0_18 = arith.constant 0 : index
    %c0_19 = arith.constant 0 : index
    %14 = vector.load %arg4[%c0_17, %c0_18, %c0_19] : memref<1x4x256xf32, #tpu.memory_space<vmem>>, vector<1x4x256xf32>
    %15 = vector.shape_cast %14 : vector<1x4x256xf32> to vector<4x256xf32>
    %c0_20 = arith.constant 0 : index
    %c0_21 = arith.constant 0 : index
    %c0_22 = arith.constant 0 : index
    %16 = vector.load %arg5[%c0_20, %c0_21, %c0_22] : memref<1x4x256xf32, #tpu.memory_space<vmem>>, vector<1x4x256xf32>
    %17 = vector.shape_cast %16 : vector<1x4x256xf32> to vector<4x256xf32>
    %c0_23 = arith.constant 0 : index
    %c0_24 = arith.constant 0 : index
    %c0_25 = arith.constant 0 : index
    %18 = vector.load %arg6[%c0_23, %c0_24, %c0_25] : memref<1x4x256xf32, #tpu.memory_space<vmem>>, vector<1x4x256xf32>
    %19 = vector.shape_cast %18 : vector<1x4x256xf32> to vector<4x256xf32>
    %c0_26 = arith.constant 0 : index
    %c0_27 = arith.constant 0 : index
    %c0_28 = arith.constant 0 : index
    %20 = vector.load %arg7[%c0_26, %c0_27, %c0_28] : memref<1x4x256xf32, #tpu.memory_space<vmem>>, vector<1x4x256xf32>
    %21 = vector.shape_cast %20 : vector<1x4x256xf32> to vector<4x256xf32>
    %22 = vector.extract_strided_slice %9 {offsets = [0, 239], sizes = [4, 17], strides = [1, 1]} : vector<4x256xf32> to vector<4x17xf32>
    %23 = vector.extract_strided_slice %9 {offsets = [0, 0], sizes = [4, 239], strides = [1, 1]} : vector<4x256xf32> to vector<4x239xf32>
    %24 = tpu.concatenate %22, %23 in 1 : vector<4x17xf32>, vector<4x239xf32> -> vector<4x256xf32>
    %25 = vector.broadcast %0 : vector<1x256xf32> to vector<4x256xf32>
    %26 = arith.mulf %24, %25 : vector<4x256xf32>
    %27 = vector.extract_strided_slice %9 {offsets = [0, 240], sizes = [4, 16], strides = [1, 1]} : vector<4x256xf32> to vector<4x16xf32>
    %28 = vector.extract_strided_slice %9 {offsets = [0, 0], sizes = [4, 240], strides = [1, 1]} : vector<4x256xf32> to vector<4x240xf32>
    %29 = tpu.concatenate %27, %28 in 1 : vector<4x16xf32>, vector<4x240xf32> -> vector<4x256xf32>
    %30 = vector.broadcast %1 : vector<1x256xf32> to vector<4x256xf32>
    %31 = arith.mulf %29, %30 : vector<4x256xf32>
    %32 = vector.extract_strided_slice %9 {offsets = [0, 241], sizes = [4, 15], strides = [1, 1]} : vector<4x256xf32> to vector<4x15xf32>
    %33 = vector.extract_strided_slice %9 {offsets = [0, 0], sizes = [4, 241], strides = [1, 1]} : vector<4x256xf32> to vector<4x241xf32>
    %34 = tpu.concatenate %32, %33 in 1 : vector<4x15xf32>, vector<4x241xf32> -> vector<4x256xf32>
    %35 = vector.broadcast %2 : vector<1x256xf32> to vector<4x256xf32>
    %36 = arith.mulf %34, %35 : vector<4x256xf32>
    %37 = vector.extract_strided_slice %9 {offsets = [0, 255], sizes = [4, 1], strides = [1, 1]} : vector<4x256xf32> to vector<4x1xf32>
    %38 = vector.extract_strided_slice %9 {offsets = [0, 0], sizes = [4, 255], strides = [1, 1]} : vector<4x256xf32> to vector<4x255xf32>
    %39 = tpu.concatenate %37, %38 in 1 : vector<4x1xf32>, vector<4x255xf32> -> vector<4x256xf32>
    %40 = vector.broadcast %3 : vector<1x256xf32> to vector<4x256xf32>
    %41 = arith.mulf %39, %40 : vector<4x256xf32>
    %42 = vector.extract_strided_slice %9 {offsets = [0, 1], sizes = [4, 255], strides = [1, 1]} : vector<4x256xf32> to vector<4x255xf32>
    %43 = vector.extract_strided_slice %9 {offsets = [0, 0], sizes = [4, 1], strides = [1, 1]} : vector<4x256xf32> to vector<4x1xf32>
    %44 = tpu.concatenate %42, %43 in 1 : vector<4x255xf32>, vector<4x1xf32> -> vector<4x256xf32>
    %45 = vector.broadcast %4 : vector<1x256xf32> to vector<4x256xf32>
    %46 = arith.mulf %44, %45 : vector<4x256xf32>
    %47 = vector.extract_strided_slice %9 {offsets = [0, 15], sizes = [4, 241], strides = [1, 1]} : vector<4x256xf32> to vector<4x241xf32>
    %48 = vector.extract_strided_slice %9 {offsets = [0, 0], sizes = [4, 15], strides = [1, 1]} : vector<4x256xf32> to vector<4x15xf32>
    %49 = tpu.concatenate %47, %48 in 1 : vector<4x241xf32>, vector<4x15xf32> -> vector<4x256xf32>
    %50 = vector.broadcast %5 : vector<1x256xf32> to vector<4x256xf32>
    %51 = arith.mulf %49, %50 : vector<4x256xf32>
    %52 = vector.extract_strided_slice %9 {offsets = [0, 16], sizes = [4, 240], strides = [1, 1]} : vector<4x256xf32> to vector<4x240xf32>
    %53 = vector.extract_strided_slice %9 {offsets = [0, 0], sizes = [4, 16], strides = [1, 1]} : vector<4x256xf32> to vector<4x16xf32>
    %54 = tpu.concatenate %52, %53 in 1 : vector<4x240xf32>, vector<4x16xf32> -> vector<4x256xf32>
    %55 = vector.broadcast %6 : vector<1x256xf32> to vector<4x256xf32>
    %56 = arith.mulf %54, %55 : vector<4x256xf32>
    %57 = vector.extract_strided_slice %9 {offsets = [0, 17], sizes = [4, 239], strides = [1, 1]} : vector<4x256xf32> to vector<4x239xf32>
    %58 = vector.extract_strided_slice %9 {offsets = [0, 0], sizes = [4, 17], strides = [1, 1]} : vector<4x256xf32> to vector<4x17xf32>
    %59 = tpu.concatenate %57, %58 in 1 : vector<4x239xf32>, vector<4x17xf32> -> vector<4x256xf32>
    %60 = vector.broadcast %7 : vector<1x256xf32> to vector<4x256xf32>
    %61 = arith.mulf %59, %60 : vector<4x256xf32>
    %62 = tpu.concatenate %26, %31, %36, %41, %9, %46, %51, %56, %61 in 0 : vector<4x256xf32>, vector<4x256xf32>, vector<4x256xf32>, vector<4x256xf32>, vector<4x256xf32>, vector<4x256xf32>, vector<4x256xf32>, vector<4x256xf32>, vector<4x256xf32> -> vector<36x256xf32>
    %c0_29 = arith.constant 0 : index
    %c0_30 = arith.constant 0 : index
    %63 = vector.load %arg9[%c0_29, %c0_30] : memref<8x36xf32, #tpu.memory_space<vmem>>, vector<8x36xf32>
    %cst = arith.constant dense<0.000000e+00> : vector<8x256xf32>
    %64 = tpu.matmul %63, %62, %cst {dimension_numbers = #tpu.dot_dimension_numbers<[1], [0], [0], [1], [0, 0, 1, 1], [], []>} : vector<8x36xf32>, vector<36x256xf32>, vector<8x256xf32> -> vector<8x256xf32>
    %c0_31 = arith.constant 0 : index
    %c0_32 = arith.constant 0 : index
    %65 = vector.load %arg10[%c0_31, %c0_32] : memref<8x1xf32, #tpu.memory_space<vmem>>, vector<8x1xf32>
    %66 = vector.broadcast %65 : vector<8x1xf32> to vector<8x256xf32>
    %67 = arith.addf %64, %66 : vector<8x256xf32>
    %cst_33 = arith.constant 0.000000e+00 : f32
    %68 = vector.broadcast %cst_33 : f32 to vector<8x256xf32>
    %69 = arith.maximumf %67, %68 : vector<8x256xf32>
    %70 = vector.extract_strided_slice %11 {offsets = [0, 239], sizes = [4, 17], strides = [1, 1]} : vector<4x256xf32> to vector<4x17xf32>
    %71 = vector.extract_strided_slice %11 {offsets = [0, 0], sizes = [4, 239], strides = [1, 1]} : vector<4x256xf32> to vector<4x239xf32>
    %72 = tpu.concatenate %70, %71 in 1 : vector<4x17xf32>, vector<4x239xf32> -> vector<4x256xf32>
    %73 = vector.broadcast %0 : vector<1x256xf32> to vector<4x256xf32>
    %74 = arith.mulf %72, %73 : vector<4x256xf32>
    %75 = vector.extract_strided_slice %11 {offsets = [0, 240], sizes = [4, 16], strides = [1, 1]} : vector<4x256xf32> to vector<4x16xf32>
    %76 = vector.extract_strided_slice %11 {offsets = [0, 0], sizes = [4, 240], strides = [1, 1]} : vector<4x256xf32> to vector<4x240xf32>
    %77 = tpu.concatenate %75, %76 in 1 : vector<4x16xf32>, vector<4x240xf32> -> vector<4x256xf32>
    %78 = vector.broadcast %1 : vector<1x256xf32> to vector<4x256xf32>
    %79 = arith.mulf %77, %78 : vector<4x256xf32>
    %80 = vector.extract_strided_slice %11 {offsets = [0, 241], sizes = [4, 15], strides = [1, 1]} : vector<4x256xf32> to vector<4x15xf32>
    %81 = vector.extract_strided_slice %11 {offsets = [0, 0], sizes = [4, 241], strides = [1, 1]} : vector<4x256xf32> to vector<4x241xf32>
    %82 = tpu.concatenate %80, %81 in 1 : vector<4x15xf32>, vector<4x241xf32> -> vector<4x256xf32>
    %83 = vector.broadcast %2 : vector<1x256xf32> to vector<4x256xf32>
    %84 = arith.mulf %82, %83 : vector<4x256xf32>
    %85 = vector.extract_strided_slice %11 {offsets = [0, 255], sizes = [4, 1], strides = [1, 1]} : vector<4x256xf32> to vector<4x1xf32>
    %86 = vector.extract_strided_slice %11 {offsets = [0, 0], sizes = [4, 255], strides = [1, 1]} : vector<4x256xf32> to vector<4x255xf32>
    %87 = tpu.concatenate %85, %86 in 1 : vector<4x1xf32>, vector<4x255xf32> -> vector<4x256xf32>
    %88 = vector.broadcast %3 : vector<1x256xf32> to vector<4x256xf32>
    %89 = arith.mulf %87, %88 : vector<4x256xf32>
    %90 = vector.extract_strided_slice %11 {offsets = [0, 1], sizes = [4, 255], strides = [1, 1]} : vector<4x256xf32> to vector<4x255xf32>
    %91 = vector.extract_strided_slice %11 {offsets = [0, 0], sizes = [4, 1], strides = [1, 1]} : vector<4x256xf32> to vector<4x1xf32>
    %92 = tpu.concatenate %90, %91 in 1 : vector<4x255xf32>, vector<4x1xf32> -> vector<4x256xf32>
    %93 = vector.broadcast %4 : vector<1x256xf32> to vector<4x256xf32>
    %94 = arith.mulf %92, %93 : vector<4x256xf32>
    %95 = vector.extract_strided_slice %11 {offsets = [0, 15], sizes = [4, 241], strides = [1, 1]} : vector<4x256xf32> to vector<4x241xf32>
    %96 = vector.extract_strided_slice %11 {offsets = [0, 0], sizes = [4, 15], strides = [1, 1]} : vector<4x256xf32> to vector<4x15xf32>
    %97 = tpu.concatenate %95, %96 in 1 : vector<4x241xf32>, vector<4x15xf32> -> vector<4x256xf32>
    %98 = vector.broadcast %5 : vector<1x256xf32> to vector<4x256xf32>
    %99 = arith.mulf %97, %98 : vector<4x256xf32>
    %100 = vector.extract_strided_slice %11 {offsets = [0, 16], sizes = [4, 240], strides = [1, 1]} : vector<4x256xf32> to vector<4x240xf32>
    %101 = vector.extract_strided_slice %11 {offsets = [0, 0], sizes = [4, 16], strides = [1, 1]} : vector<4x256xf32> to vector<4x16xf32>
    %102 = tpu.concatenate %100, %101 in 1 : vector<4x240xf32>, vector<4x16xf32> -> vector<4x256xf32>
    %103 = vector.broadcast %6 : vector<1x256xf32> to vector<4x256xf32>
    %104 = arith.mulf %102, %103 : vector<4x256xf32>
    %105 = vector.extract_strided_slice %11 {offsets = [0, 17], sizes = [4, 239], strides = [1, 1]} : vector<4x256xf32> to vector<4x239xf32>
    %106 = vector.extract_strided_slice %11 {offsets = [0, 0], sizes = [4, 17], strides = [1, 1]} : vector<4x256xf32> to vector<4x17xf32>
    %107 = tpu.concatenate %105, %106 in 1 : vector<4x239xf32>, vector<4x17xf32> -> vector<4x256xf32>
    %108 = vector.broadcast %7 : vector<1x256xf32> to vector<4x256xf32>
    %109 = arith.mulf %107, %108 : vector<4x256xf32>
    %110 = tpu.concatenate %74, %79, %84, %89, %11, %94, %99, %104, %109 in 0 : vector<4x256xf32>, vector<4x256xf32>, vector<4x256xf32>, vector<4x256xf32>, vector<4x256xf32>, vector<4x256xf32>, vector<4x256xf32>, vector<4x256xf32>, vector<4x256xf32> -> vector<36x256xf32>
    %c0_34 = arith.constant 0 : index
    %c0_35 = arith.constant 0 : index
    %111 = vector.load %arg11[%c0_34, %c0_35] : memref<8x36xf32, #tpu.memory_space<vmem>>, vector<8x36xf32>
    %cst_36 = arith.constant dense<0.000000e+00> : vector<8x256xf32>
    %112 = tpu.matmul %111, %110, %cst_36 {dimension_numbers = #tpu.dot_dimension_numbers<[1], [0], [0], [1], [0, 0, 1, 1], [], []>} : vector<8x36xf32>, vector<36x256xf32>, vector<8x256xf32> -> vector<8x256xf32>
    %c0_37 = arith.constant 0 : index
    %c0_38 = arith.constant 0 : index
    %113 = vector.load %arg12[%c0_37, %c0_38] : memref<8x1xf32, #tpu.memory_space<vmem>>, vector<8x1xf32>
    %114 = vector.broadcast %113 : vector<8x1xf32> to vector<8x256xf32>
    %115 = arith.addf %112, %114 : vector<8x256xf32>
    %cst_39 = arith.constant 0.000000e+00 : f32
    %116 = vector.broadcast %cst_39 : f32 to vector<8x256xf32>
    %117 = arith.maximumf %115, %116 : vector<8x256xf32>
    %118 = vector.extract_strided_slice %13 {offsets = [0, 239], sizes = [4, 17], strides = [1, 1]} : vector<4x256xf32> to vector<4x17xf32>
    %119 = vector.extract_strided_slice %13 {offsets = [0, 0], sizes = [4, 239], strides = [1, 1]} : vector<4x256xf32> to vector<4x239xf32>
    %120 = tpu.concatenate %118, %119 in 1 : vector<4x17xf32>, vector<4x239xf32> -> vector<4x256xf32>
    %121 = vector.broadcast %0 : vector<1x256xf32> to vector<4x256xf32>
    %122 = arith.mulf %120, %121 : vector<4x256xf32>
    %123 = vector.extract_strided_slice %13 {offsets = [0, 240], sizes = [4, 16], strides = [1, 1]} : vector<4x256xf32> to vector<4x16xf32>
    %124 = vector.extract_strided_slice %13 {offsets = [0, 0], sizes = [4, 240], strides = [1, 1]} : vector<4x256xf32> to vector<4x240xf32>
    %125 = tpu.concatenate %123, %124 in 1 : vector<4x16xf32>, vector<4x240xf32> -> vector<4x256xf32>
    %126 = vector.broadcast %1 : vector<1x256xf32> to vector<4x256xf32>
    %127 = arith.mulf %125, %126 : vector<4x256xf32>
    %128 = vector.extract_strided_slice %13 {offsets = [0, 241], sizes = [4, 15], strides = [1, 1]} : vector<4x256xf32> to vector<4x15xf32>
    %129 = vector.extract_strided_slice %13 {offsets = [0, 0], sizes = [4, 241], strides = [1, 1]} : vector<4x256xf32> to vector<4x241xf32>
    %130 = tpu.concatenate %128, %129 in 1 : vector<4x15xf32>, vector<4x241xf32> -> vector<4x256xf32>
    %131 = vector.broadcast %2 : vector<1x256xf32> to vector<4x256xf32>
    %132 = arith.mulf %130, %131 : vector<4x256xf32>
    %133 = vector.extract_strided_slice %13 {offsets = [0, 255], sizes = [4, 1], strides = [1, 1]} : vector<4x256xf32> to vector<4x1xf32>
    %134 = vector.extract_strided_slice %13 {offsets = [0, 0], sizes = [4, 255], strides = [1, 1]} : vector<4x256xf32> to vector<4x255xf32>
    %135 = tpu.concatenate %133, %134 in 1 : vector<4x1xf32>, vector<4x255xf32> -> vector<4x256xf32>
    %136 = vector.broadcast %3 : vector<1x256xf32> to vector<4x256xf32>
    %137 = arith.mulf %135, %136 : vector<4x256xf32>
    %138 = vector.extract_strided_slice %13 {offsets = [0, 1], sizes = [4, 255], strides = [1, 1]} : vector<4x256xf32> to vector<4x255xf32>
    %139 = vector.extract_strided_slice %13 {offsets = [0, 0], sizes = [4, 1], strides = [1, 1]} : vector<4x256xf32> to vector<4x1xf32>
    %140 = tpu.concatenate %138, %139 in 1 : vector<4x255xf32>, vector<4x1xf32> -> vector<4x256xf32>
    %141 = vector.broadcast %4 : vector<1x256xf32> to vector<4x256xf32>
    %142 = arith.mulf %140, %141 : vector<4x256xf32>
    %143 = vector.extract_strided_slice %13 {offsets = [0, 15], sizes = [4, 241], strides = [1, 1]} : vector<4x256xf32> to vector<4x241xf32>
    %144 = vector.extract_strided_slice %13 {offsets = [0, 0], sizes = [4, 15], strides = [1, 1]} : vector<4x256xf32> to vector<4x15xf32>
    %145 = tpu.concatenate %143, %144 in 1 : vector<4x241xf32>, vector<4x15xf32> -> vector<4x256xf32>
    %146 = vector.broadcast %5 : vector<1x256xf32> to vector<4x256xf32>
    %147 = arith.mulf %145, %146 : vector<4x256xf32>
    %148 = vector.extract_strided_slice %13 {offsets = [0, 16], sizes = [4, 240], strides = [1, 1]} : vector<4x256xf32> to vector<4x240xf32>
    %149 = vector.extract_strided_slice %13 {offsets = [0, 0], sizes = [4, 16], strides = [1, 1]} : vector<4x256xf32> to vector<4x16xf32>
    %150 = tpu.concatenate %148, %149 in 1 : vector<4x240xf32>, vector<4x16xf32> -> vector<4x256xf32>
    %151 = vector.broadcast %6 : vector<1x256xf32> to vector<4x256xf32>
    %152 = arith.mulf %150, %151 : vector<4x256xf32>
    %153 = vector.extract_strided_slice %13 {offsets = [0, 17], sizes = [4, 239], strides = [1, 1]} : vector<4x256xf32> to vector<4x239xf32>
    %154 = vector.extract_strided_slice %13 {offsets = [0, 0], sizes = [4, 17], strides = [1, 1]} : vector<4x256xf32> to vector<4x17xf32>
    %155 = tpu.concatenate %153, %154 in 1 : vector<4x239xf32>, vector<4x17xf32> -> vector<4x256xf32>
    %156 = vector.broadcast %7 : vector<1x256xf32> to vector<4x256xf32>
    %157 = arith.mulf %155, %156 : vector<4x256xf32>
    %158 = tpu.concatenate %122, %127, %132, %137, %13, %142, %147, %152, %157 in 0 : vector<4x256xf32>, vector<4x256xf32>, vector<4x256xf32>, vector<4x256xf32>, vector<4x256xf32>, vector<4x256xf32>, vector<4x256xf32>, vector<4x256xf32>, vector<4x256xf32> -> vector<36x256xf32>
    %c0_40 = arith.constant 0 : index
    %c0_41 = arith.constant 0 : index
    %159 = vector.load %arg13[%c0_40, %c0_41] : memref<8x36xf32, #tpu.memory_space<vmem>>, vector<8x36xf32>
    %cst_42 = arith.constant dense<0.000000e+00> : vector<8x256xf32>
    %160 = tpu.matmul %159, %158, %cst_42 {dimension_numbers = #tpu.dot_dimension_numbers<[1], [0], [0], [1], [0, 0, 1, 1], [], []>} : vector<8x36xf32>, vector<36x256xf32>, vector<8x256xf32> -> vector<8x256xf32>
    %c0_43 = arith.constant 0 : index
    %c0_44 = arith.constant 0 : index
    %161 = vector.load %arg14[%c0_43, %c0_44] : memref<8x1xf32, #tpu.memory_space<vmem>>, vector<8x1xf32>
    %162 = vector.broadcast %161 : vector<8x1xf32> to vector<8x256xf32>
    %163 = arith.addf %160, %162 : vector<8x256xf32>
    %cst_45 = arith.constant 0.000000e+00 : f32
    %164 = vector.broadcast %cst_45 : f32 to vector<8x256xf32>
    %165 = arith.maximumf %163, %164 : vector<8x256xf32>
    %166 = vector.extract_strided_slice %15 {offsets = [0, 239], sizes = [4, 17], strides = [1, 1]} : vector<4x256xf32> to vector<4x17xf32>
    %167 = vector.extract_strided_slice %15 {offsets = [0, 0], sizes = [4, 239], strides = [1, 1]} : vector<4x256xf32> to vector<4x239xf32>
    %168 = tpu.concatenate %166, %167 in 1 : vector<4x17xf32>, vector<4x239xf32> -> vector<4x256xf32>
    %169 = vector.broadcast %0 : vector<1x256xf32> to vector<4x256xf32>
    %170 = arith.mulf %168, %169 : vector<4x256xf32>
    %171 = vector.extract_strided_slice %15 {offsets = [0, 240], sizes = [4, 16], strides = [1, 1]} : vector<4x256xf32> to vector<4x16xf32>
    %172 = vector.extract_strided_slice %15 {offsets = [0, 0], sizes = [4, 240], strides = [1, 1]} : vector<4x256xf32> to vector<4x240xf32>
    %173 = tpu.concatenate %171, %172 in 1 : vector<4x16xf32>, vector<4x240xf32> -> vector<4x256xf32>
    %174 = vector.broadcast %1 : vector<1x256xf32> to vector<4x256xf32>
    %175 = arith.mulf %173, %174 : vector<4x256xf32>
    %176 = vector.extract_strided_slice %15 {offsets = [0, 241], sizes = [4, 15], strides = [1, 1]} : vector<4x256xf32> to vector<4x15xf32>
    %177 = vector.extract_strided_slice %15 {offsets = [0, 0], sizes = [4, 241], strides = [1, 1]} : vector<4x256xf32> to vector<4x241xf32>
    %178 = tpu.concatenate %176, %177 in 1 : vector<4x15xf32>, vector<4x241xf32> -> vector<4x256xf32>
    %179 = vector.broadcast %2 : vector<1x256xf32> to vector<4x256xf32>
    %180 = arith.mulf %178, %179 : vector<4x256xf32>
    %181 = vector.extract_strided_slice %15 {offsets = [0, 255], sizes = [4, 1], strides = [1, 1]} : vector<4x256xf32> to vector<4x1xf32>
    %182 = vector.extract_strided_slice %15 {offsets = [0, 0], sizes = [4, 255], strides = [1, 1]} : vector<4x256xf32> to vector<4x255xf32>
    %183 = tpu.concatenate %181, %182 in 1 : vector<4x1xf32>, vector<4x255xf32> -> vector<4x256xf32>
    %184 = vector.broadcast %3 : vector<1x256xf32> to vector<4x256xf32>
    %185 = arith.mulf %183, %184 : vector<4x256xf32>
    %186 = vector.extract_strided_slice %15 {offsets = [0, 1], sizes = [4, 255], strides = [1, 1]} : vector<4x256xf32> to vector<4x255xf32>
    %187 = vector.extract_strided_slice %15 {offsets = [0, 0], sizes = [4, 1], strides = [1, 1]} : vector<4x256xf32> to vector<4x1xf32>
    %188 = tpu.concatenate %186, %187 in 1 : vector<4x255xf32>, vector<4x1xf32> -> vector<4x256xf32>
    %189 = vector.broadcast %4 : vector<1x256xf32> to vector<4x256xf32>
    %190 = arith.mulf %188, %189 : vector<4x256xf32>
    %191 = vector.extract_strided_slice %15 {offsets = [0, 15], sizes = [4, 241], strides = [1, 1]} : vector<4x256xf32> to vector<4x241xf32>
    %192 = vector.extract_strided_slice %15 {offsets = [0, 0], sizes = [4, 15], strides = [1, 1]} : vector<4x256xf32> to vector<4x15xf32>
    %193 = tpu.concatenate %191, %192 in 1 : vector<4x241xf32>, vector<4x15xf32> -> vector<4x256xf32>
    %194 = vector.broadcast %5 : vector<1x256xf32> to vector<4x256xf32>
    %195 = arith.mulf %193, %194 : vector<4x256xf32>
    %196 = vector.extract_strided_slice %15 {offsets = [0, 16], sizes = [4, 240], strides = [1, 1]} : vector<4x256xf32> to vector<4x240xf32>
    %197 = vector.extract_strided_slice %15 {offsets = [0, 0], sizes = [4, 16], strides = [1, 1]} : vector<4x256xf32> to vector<4x16xf32>
    %198 = tpu.concatenate %196, %197 in 1 : vector<4x240xf32>, vector<4x16xf32> -> vector<4x256xf32>
    %199 = vector.broadcast %6 : vector<1x256xf32> to vector<4x256xf32>
    %200 = arith.mulf %198, %199 : vector<4x256xf32>
    %201 = vector.extract_strided_slice %15 {offsets = [0, 17], sizes = [4, 239], strides = [1, 1]} : vector<4x256xf32> to vector<4x239xf32>
    %202 = vector.extract_strided_slice %15 {offsets = [0, 0], sizes = [4, 17], strides = [1, 1]} : vector<4x256xf32> to vector<4x17xf32>
    %203 = tpu.concatenate %201, %202 in 1 : vector<4x239xf32>, vector<4x17xf32> -> vector<4x256xf32>
    %204 = vector.broadcast %7 : vector<1x256xf32> to vector<4x256xf32>
    %205 = arith.mulf %203, %204 : vector<4x256xf32>
    %206 = tpu.concatenate %170, %175, %180, %185, %15, %190, %195, %200, %205 in 0 : vector<4x256xf32>, vector<4x256xf32>, vector<4x256xf32>, vector<4x256xf32>, vector<4x256xf32>, vector<4x256xf32>, vector<4x256xf32>, vector<4x256xf32>, vector<4x256xf32> -> vector<36x256xf32>
    %c0_46 = arith.constant 0 : index
    %c0_47 = arith.constant 0 : index
    %207 = vector.load %arg15[%c0_46, %c0_47] : memref<8x36xf32, #tpu.memory_space<vmem>>, vector<8x36xf32>
    %cst_48 = arith.constant dense<0.000000e+00> : vector<8x256xf32>
    %208 = tpu.matmul %207, %206, %cst_48 {dimension_numbers = #tpu.dot_dimension_numbers<[1], [0], [0], [1], [0, 0, 1, 1], [], []>} : vector<8x36xf32>, vector<36x256xf32>, vector<8x256xf32> -> vector<8x256xf32>
    %c0_49 = arith.constant 0 : index
    %c0_50 = arith.constant 0 : index
    %209 = vector.load %arg16[%c0_49, %c0_50] : memref<8x1xf32, #tpu.memory_space<vmem>>, vector<8x1xf32>
    %210 = vector.broadcast %209 : vector<8x1xf32> to vector<8x256xf32>
    %211 = arith.addf %208, %210 : vector<8x256xf32>
    %cst_51 = arith.constant 0.000000e+00 : f32
    %212 = vector.broadcast %cst_51 : f32 to vector<8x256xf32>
    %213 = arith.maximumf %211, %212 : vector<8x256xf32>
    %214 = vector.extract_strided_slice %17 {offsets = [0, 239], sizes = [4, 17], strides = [1, 1]} : vector<4x256xf32> to vector<4x17xf32>
    %215 = vector.extract_strided_slice %17 {offsets = [0, 0], sizes = [4, 239], strides = [1, 1]} : vector<4x256xf32> to vector<4x239xf32>
    %216 = tpu.concatenate %214, %215 in 1 : vector<4x17xf32>, vector<4x239xf32> -> vector<4x256xf32>
    %217 = vector.broadcast %0 : vector<1x256xf32> to vector<4x256xf32>
    %218 = arith.mulf %216, %217 : vector<4x256xf32>
    %219 = vector.extract_strided_slice %17 {offsets = [0, 240], sizes = [4, 16], strides = [1, 1]} : vector<4x256xf32> to vector<4x16xf32>
    %220 = vector.extract_strided_slice %17 {offsets = [0, 0], sizes = [4, 240], strides = [1, 1]} : vector<4x256xf32> to vector<4x240xf32>
    %221 = tpu.concatenate %219, %220 in 1 : vector<4x16xf32>, vector<4x240xf32> -> vector<4x256xf32>
    %222 = vector.broadcast %1 : vector<1x256xf32> to vector<4x256xf32>
    %223 = arith.mulf %221, %222 : vector<4x256xf32>
    %224 = vector.extract_strided_slice %17 {offsets = [0, 241], sizes = [4, 15], strides = [1, 1]} : vector<4x256xf32> to vector<4x15xf32>
    %225 = vector.extract_strided_slice %17 {offsets = [0, 0], sizes = [4, 241], strides = [1, 1]} : vector<4x256xf32> to vector<4x241xf32>
    %226 = tpu.concatenate %224, %225 in 1 : vector<4x15xf32>, vector<4x241xf32> -> vector<4x256xf32>
    %227 = vector.broadcast %2 : vector<1x256xf32> to vector<4x256xf32>
    %228 = arith.mulf %226, %227 : vector<4x256xf32>
    %229 = vector.extract_strided_slice %17 {offsets = [0, 255], sizes = [4, 1], strides = [1, 1]} : vector<4x256xf32> to vector<4x1xf32>
    %230 = vector.extract_strided_slice %17 {offsets = [0, 0], sizes = [4, 255], strides = [1, 1]} : vector<4x256xf32> to vector<4x255xf32>
    %231 = tpu.concatenate %229, %230 in 1 : vector<4x1xf32>, vector<4x255xf32> -> vector<4x256xf32>
    %232 = vector.broadcast %3 : vector<1x256xf32> to vector<4x256xf32>
    %233 = arith.mulf %231, %232 : vector<4x256xf32>
    %234 = vector.extract_strided_slice %17 {offsets = [0, 1], sizes = [4, 255], strides = [1, 1]} : vector<4x256xf32> to vector<4x255xf32>
    %235 = vector.extract_strided_slice %17 {offsets = [0, 0], sizes = [4, 1], strides = [1, 1]} : vector<4x256xf32> to vector<4x1xf32>
    %236 = tpu.concatenate %234, %235 in 1 : vector<4x255xf32>, vector<4x1xf32> -> vector<4x256xf32>
    %237 = vector.broadcast %4 : vector<1x256xf32> to vector<4x256xf32>
    %238 = arith.mulf %236, %237 : vector<4x256xf32>
    %239 = vector.extract_strided_slice %17 {offsets = [0, 15], sizes = [4, 241], strides = [1, 1]} : vector<4x256xf32> to vector<4x241xf32>
    %240 = vector.extract_strided_slice %17 {offsets = [0, 0], sizes = [4, 15], strides = [1, 1]} : vector<4x256xf32> to vector<4x15xf32>
    %241 = tpu.concatenate %239, %240 in 1 : vector<4x241xf32>, vector<4x15xf32> -> vector<4x256xf32>
    %242 = vector.broadcast %5 : vector<1x256xf32> to vector<4x256xf32>
    %243 = arith.mulf %241, %242 : vector<4x256xf32>
    %244 = vector.extract_strided_slice %17 {offsets = [0, 16], sizes = [4, 240], strides = [1, 1]} : vector<4x256xf32> to vector<4x240xf32>
    %245 = vector.extract_strided_slice %17 {offsets = [0, 0], sizes = [4, 16], strides = [1, 1]} : vector<4x256xf32> to vector<4x16xf32>
    %246 = tpu.concatenate %244, %245 in 1 : vector<4x240xf32>, vector<4x16xf32> -> vector<4x256xf32>
    %247 = vector.broadcast %6 : vector<1x256xf32> to vector<4x256xf32>
    %248 = arith.mulf %246, %247 : vector<4x256xf32>
    %249 = vector.extract_strided_slice %17 {offsets = [0, 17], sizes = [4, 239], strides = [1, 1]} : vector<4x256xf32> to vector<4x239xf32>
    %250 = vector.extract_strided_slice %17 {offsets = [0, 0], sizes = [4, 17], strides = [1, 1]} : vector<4x256xf32> to vector<4x17xf32>
    %251 = tpu.concatenate %249, %250 in 1 : vector<4x239xf32>, vector<4x17xf32> -> vector<4x256xf32>
    %252 = vector.broadcast %7 : vector<1x256xf32> to vector<4x256xf32>
    %253 = arith.mulf %251, %252 : vector<4x256xf32>
    %254 = tpu.concatenate %218, %223, %228, %233, %17, %238, %243, %248, %253 in 0 : vector<4x256xf32>, vector<4x256xf32>, vector<4x256xf32>, vector<4x256xf32>, vector<4x256xf32>, vector<4x256xf32>, vector<4x256xf32>, vector<4x256xf32>, vector<4x256xf32> -> vector<36x256xf32>
    %c0_52 = arith.constant 0 : index
    %c0_53 = arith.constant 0 : index
    %255 = vector.load %arg17[%c0_52, %c0_53] : memref<8x36xf32, #tpu.memory_space<vmem>>, vector<8x36xf32>
    %cst_54 = arith.constant dense<0.000000e+00> : vector<8x256xf32>
    %256 = tpu.matmul %255, %254, %cst_54 {dimension_numbers = #tpu.dot_dimension_numbers<[1], [0], [0], [1], [0, 0, 1, 1], [], []>} : vector<8x36xf32>, vector<36x256xf32>, vector<8x256xf32> -> vector<8x256xf32>
    %c0_55 = arith.constant 0 : index
    %c0_56 = arith.constant 0 : index
    %257 = vector.load %arg18[%c0_55, %c0_56] : memref<8x1xf32, #tpu.memory_space<vmem>>, vector<8x1xf32>
    %258 = vector.broadcast %257 : vector<8x1xf32> to vector<8x256xf32>
    %259 = arith.addf %256, %258 : vector<8x256xf32>
    %cst_57 = arith.constant 0.000000e+00 : f32
    %260 = vector.broadcast %cst_57 : f32 to vector<8x256xf32>
    %261 = arith.maximumf %259, %260 : vector<8x256xf32>
    %262 = vector.extract_strided_slice %19 {offsets = [0, 239], sizes = [4, 17], strides = [1, 1]} : vector<4x256xf32> to vector<4x17xf32>
    %263 = vector.extract_strided_slice %19 {offsets = [0, 0], sizes = [4, 239], strides = [1, 1]} : vector<4x256xf32> to vector<4x239xf32>
    %264 = tpu.concatenate %262, %263 in 1 : vector<4x17xf32>, vector<4x239xf32> -> vector<4x256xf32>
    %265 = vector.broadcast %0 : vector<1x256xf32> to vector<4x256xf32>
    %266 = arith.mulf %264, %265 : vector<4x256xf32>
    %267 = vector.extract_strided_slice %19 {offsets = [0, 240], sizes = [4, 16], strides = [1, 1]} : vector<4x256xf32> to vector<4x16xf32>
    %268 = vector.extract_strided_slice %19 {offsets = [0, 0], sizes = [4, 240], strides = [1, 1]} : vector<4x256xf32> to vector<4x240xf32>
    %269 = tpu.concatenate %267, %268 in 1 : vector<4x16xf32>, vector<4x240xf32> -> vector<4x256xf32>
    %270 = vector.broadcast %1 : vector<1x256xf32> to vector<4x256xf32>
    %271 = arith.mulf %269, %270 : vector<4x256xf32>
    %272 = vector.extract_strided_slice %19 {offsets = [0, 241], sizes = [4, 15], strides = [1, 1]} : vector<4x256xf32> to vector<4x15xf32>
    %273 = vector.extract_strided_slice %19 {offsets = [0, 0], sizes = [4, 241], strides = [1, 1]} : vector<4x256xf32> to vector<4x241xf32>
    %274 = tpu.concatenate %272, %273 in 1 : vector<4x15xf32>, vector<4x241xf32> -> vector<4x256xf32>
    %275 = vector.broadcast %2 : vector<1x256xf32> to vector<4x256xf32>
    %276 = arith.mulf %274, %275 : vector<4x256xf32>
    %277 = vector.extract_strided_slice %19 {offsets = [0, 255], sizes = [4, 1], strides = [1, 1]} : vector<4x256xf32> to vector<4x1xf32>
    %278 = vector.extract_strided_slice %19 {offsets = [0, 0], sizes = [4, 255], strides = [1, 1]} : vector<4x256xf32> to vector<4x255xf32>
    %279 = tpu.concatenate %277, %278 in 1 : vector<4x1xf32>, vector<4x255xf32> -> vector<4x256xf32>
    %280 = vector.broadcast %3 : vector<1x256xf32> to vector<4x256xf32>
    %281 = arith.mulf %279, %280 : vector<4x256xf32>
    %282 = vector.extract_strided_slice %19 {offsets = [0, 1], sizes = [4, 255], strides = [1, 1]} : vector<4x256xf32> to vector<4x255xf32>
    %283 = vector.extract_strided_slice %19 {offsets = [0, 0], sizes = [4, 1], strides = [1, 1]} : vector<4x256xf32> to vector<4x1xf32>
    %284 = tpu.concatenate %282, %283 in 1 : vector<4x255xf32>, vector<4x1xf32> -> vector<4x256xf32>
    %285 = vector.broadcast %4 : vector<1x256xf32> to vector<4x256xf32>
    %286 = arith.mulf %284, %285 : vector<4x256xf32>
    %287 = vector.extract_strided_slice %19 {offsets = [0, 15], sizes = [4, 241], strides = [1, 1]} : vector<4x256xf32> to vector<4x241xf32>
    %288 = vector.extract_strided_slice %19 {offsets = [0, 0], sizes = [4, 15], strides = [1, 1]} : vector<4x256xf32> to vector<4x15xf32>
    %289 = tpu.concatenate %287, %288 in 1 : vector<4x241xf32>, vector<4x15xf32> -> vector<4x256xf32>
    %290 = vector.broadcast %5 : vector<1x256xf32> to vector<4x256xf32>
    %291 = arith.mulf %289, %290 : vector<4x256xf32>
    %292 = vector.extract_strided_slice %19 {offsets = [0, 16], sizes = [4, 240], strides = [1, 1]} : vector<4x256xf32> to vector<4x240xf32>
    %293 = vector.extract_strided_slice %19 {offsets = [0, 0], sizes = [4, 16], strides = [1, 1]} : vector<4x256xf32> to vector<4x16xf32>
    %294 = tpu.concatenate %292, %293 in 1 : vector<4x240xf32>, vector<4x16xf32> -> vector<4x256xf32>
    %295 = vector.broadcast %6 : vector<1x256xf32> to vector<4x256xf32>
    %296 = arith.mulf %294, %295 : vector<4x256xf32>
    %297 = vector.extract_strided_slice %19 {offsets = [0, 17], sizes = [4, 239], strides = [1, 1]} : vector<4x256xf32> to vector<4x239xf32>
    %298 = vector.extract_strided_slice %19 {offsets = [0, 0], sizes = [4, 17], strides = [1, 1]} : vector<4x256xf32> to vector<4x17xf32>
    %299 = tpu.concatenate %297, %298 in 1 : vector<4x239xf32>, vector<4x17xf32> -> vector<4x256xf32>
    %300 = vector.broadcast %7 : vector<1x256xf32> to vector<4x256xf32>
    %301 = arith.mulf %299, %300 : vector<4x256xf32>
    %302 = tpu.concatenate %266, %271, %276, %281, %19, %286, %291, %296, %301 in 0 : vector<4x256xf32>, vector<4x256xf32>, vector<4x256xf32>, vector<4x256xf32>, vector<4x256xf32>, vector<4x256xf32>, vector<4x256xf32>, vector<4x256xf32>, vector<4x256xf32> -> vector<36x256xf32>
    %c0_58 = arith.constant 0 : index
    %c0_59 = arith.constant 0 : index
    %303 = vector.load %arg19[%c0_58, %c0_59] : memref<8x36xf32, #tpu.memory_space<vmem>>, vector<8x36xf32>
    %cst_60 = arith.constant dense<0.000000e+00> : vector<8x256xf32>
    %304 = tpu.matmul %303, %302, %cst_60 {dimension_numbers = #tpu.dot_dimension_numbers<[1], [0], [0], [1], [0, 0, 1, 1], [], []>} : vector<8x36xf32>, vector<36x256xf32>, vector<8x256xf32> -> vector<8x256xf32>
    %c0_61 = arith.constant 0 : index
    %c0_62 = arith.constant 0 : index
    %305 = vector.load %arg20[%c0_61, %c0_62] : memref<8x1xf32, #tpu.memory_space<vmem>>, vector<8x1xf32>
    %306 = vector.broadcast %305 : vector<8x1xf32> to vector<8x256xf32>
    %307 = arith.addf %304, %306 : vector<8x256xf32>
    %cst_63 = arith.constant 0.000000e+00 : f32
    %308 = vector.broadcast %cst_63 : f32 to vector<8x256xf32>
    %309 = arith.maximumf %307, %308 : vector<8x256xf32>
    %310 = vector.extract_strided_slice %21 {offsets = [0, 239], sizes = [4, 17], strides = [1, 1]} : vector<4x256xf32> to vector<4x17xf32>
    %311 = vector.extract_strided_slice %21 {offsets = [0, 0], sizes = [4, 239], strides = [1, 1]} : vector<4x256xf32> to vector<4x239xf32>
    %312 = tpu.concatenate %310, %311 in 1 : vector<4x17xf32>, vector<4x239xf32> -> vector<4x256xf32>
    %313 = vector.broadcast %0 : vector<1x256xf32> to vector<4x256xf32>
    %314 = arith.mulf %312, %313 : vector<4x256xf32>
    %315 = vector.extract_strided_slice %21 {offsets = [0, 240], sizes = [4, 16], strides = [1, 1]} : vector<4x256xf32> to vector<4x16xf32>
    %316 = vector.extract_strided_slice %21 {offsets = [0, 0], sizes = [4, 240], strides = [1, 1]} : vector<4x256xf32> to vector<4x240xf32>
    %317 = tpu.concatenate %315, %316 in 1 : vector<4x16xf32>, vector<4x240xf32> -> vector<4x256xf32>
    %318 = vector.broadcast %1 : vector<1x256xf32> to vector<4x256xf32>
    %319 = arith.mulf %317, %318 : vector<4x256xf32>
    %320 = vector.extract_strided_slice %21 {offsets = [0, 241], sizes = [4, 15], strides = [1, 1]} : vector<4x256xf32> to vector<4x15xf32>
    %321 = vector.extract_strided_slice %21 {offsets = [0, 0], sizes = [4, 241], strides = [1, 1]} : vector<4x256xf32> to vector<4x241xf32>
    %322 = tpu.concatenate %320, %321 in 1 : vector<4x15xf32>, vector<4x241xf32> -> vector<4x256xf32>
    %323 = vector.broadcast %2 : vector<1x256xf32> to vector<4x256xf32>
    %324 = arith.mulf %322, %323 : vector<4x256xf32>
    %325 = vector.extract_strided_slice %21 {offsets = [0, 255], sizes = [4, 1], strides = [1, 1]} : vector<4x256xf32> to vector<4x1xf32>
    %326 = vector.extract_strided_slice %21 {offsets = [0, 0], sizes = [4, 255], strides = [1, 1]} : vector<4x256xf32> to vector<4x255xf32>
    %327 = tpu.concatenate %325, %326 in 1 : vector<4x1xf32>, vector<4x255xf32> -> vector<4x256xf32>
    %328 = vector.broadcast %3 : vector<1x256xf32> to vector<4x256xf32>
    %329 = arith.mulf %327, %328 : vector<4x256xf32>
    %330 = vector.extract_strided_slice %21 {offsets = [0, 1], sizes = [4, 255], strides = [1, 1]} : vector<4x256xf32> to vector<4x255xf32>
    %331 = vector.extract_strided_slice %21 {offsets = [0, 0], sizes = [4, 1], strides = [1, 1]} : vector<4x256xf32> to vector<4x1xf32>
    %332 = tpu.concatenate %330, %331 in 1 : vector<4x255xf32>, vector<4x1xf32> -> vector<4x256xf32>
    %333 = vector.broadcast %4 : vector<1x256xf32> to vector<4x256xf32>
    %334 = arith.mulf %332, %333 : vector<4x256xf32>
    %335 = vector.extract_strided_slice %21 {offsets = [0, 15], sizes = [4, 241], strides = [1, 1]} : vector<4x256xf32> to vector<4x241xf32>
    %336 = vector.extract_strided_slice %21 {offsets = [0, 0], sizes = [4, 15], strides = [1, 1]} : vector<4x256xf32> to vector<4x15xf32>
    %337 = tpu.concatenate %335, %336 in 1 : vector<4x241xf32>, vector<4x15xf32> -> vector<4x256xf32>
    %338 = vector.broadcast %5 : vector<1x256xf32> to vector<4x256xf32>
    %339 = arith.mulf %337, %338 : vector<4x256xf32>
    %340 = vector.extract_strided_slice %21 {offsets = [0, 16], sizes = [4, 240], strides = [1, 1]} : vector<4x256xf32> to vector<4x240xf32>
    %341 = vector.extract_strided_slice %21 {offsets = [0, 0], sizes = [4, 16], strides = [1, 1]} : vector<4x256xf32> to vector<4x16xf32>
    %342 = tpu.concatenate %340, %341 in 1 : vector<4x240xf32>, vector<4x16xf32> -> vector<4x256xf32>
    %343 = vector.broadcast %6 : vector<1x256xf32> to vector<4x256xf32>
    %344 = arith.mulf %342, %343 : vector<4x256xf32>
    %345 = vector.extract_strided_slice %21 {offsets = [0, 17], sizes = [4, 239], strides = [1, 1]} : vector<4x256xf32> to vector<4x239xf32>
    %346 = vector.extract_strided_slice %21 {offsets = [0, 0], sizes = [4, 17], strides = [1, 1]} : vector<4x256xf32> to vector<4x17xf32>
    %347 = tpu.concatenate %345, %346 in 1 : vector<4x239xf32>, vector<4x17xf32> -> vector<4x256xf32>
    %348 = vector.broadcast %7 : vector<1x256xf32> to vector<4x256xf32>
    %349 = arith.mulf %347, %348 : vector<4x256xf32>
    %350 = tpu.concatenate %314, %319, %324, %329, %21, %334, %339, %344, %349 in 0 : vector<4x256xf32>, vector<4x256xf32>, vector<4x256xf32>, vector<4x256xf32>, vector<4x256xf32>, vector<4x256xf32>, vector<4x256xf32>, vector<4x256xf32>, vector<4x256xf32> -> vector<36x256xf32>
    %c0_64 = arith.constant 0 : index
    %c0_65 = arith.constant 0 : index
    %351 = vector.load %arg21[%c0_64, %c0_65] : memref<8x36xf32, #tpu.memory_space<vmem>>, vector<8x36xf32>
    %cst_66 = arith.constant dense<0.000000e+00> : vector<8x256xf32>
    %352 = tpu.matmul %351, %350, %cst_66 {dimension_numbers = #tpu.dot_dimension_numbers<[1], [0], [0], [1], [0, 0, 1, 1], [], []>} : vector<8x36xf32>, vector<36x256xf32>, vector<8x256xf32> -> vector<8x256xf32>
    %c0_67 = arith.constant 0 : index
    %c0_68 = arith.constant 0 : index
    %353 = vector.load %arg22[%c0_67, %c0_68] : memref<8x1xf32, #tpu.memory_space<vmem>>, vector<8x1xf32>
    %354 = vector.broadcast %353 : vector<8x1xf32> to vector<8x256xf32>
    %355 = arith.addf %352, %354 : vector<8x256xf32>
    %cst_69 = arith.constant 0.000000e+00 : f32
    %356 = vector.broadcast %cst_69 : f32 to vector<8x256xf32>
    %357 = arith.maximumf %355, %356 : vector<8x256xf32>
    %358 = tpu.concatenate %213, %261 in 0 : vector<8x256xf32>, vector<8x256xf32> -> vector<16x256xf32>
    %359 = tpu.concatenate %309, %357 in 0 : vector<8x256xf32>, vector<8x256xf32> -> vector<16x256xf32>
    %360 = vector.extract_strided_slice %358 {offsets = [0, 239], sizes = [16, 17], strides = [1, 1]} : vector<16x256xf32> to vector<16x17xf32>
    %361 = vector.extract_strided_slice %358 {offsets = [0, 0], sizes = [16, 239], strides = [1, 1]} : vector<16x256xf32> to vector<16x239xf32>
    %362 = tpu.concatenate %360, %361 in 1 : vector<16x17xf32>, vector<16x239xf32> -> vector<16x256xf32>
    %363 = vector.broadcast %0 : vector<1x256xf32> to vector<16x256xf32>
    %364 = arith.mulf %362, %363 : vector<16x256xf32>
    %365 = vector.extract_strided_slice %358 {offsets = [0, 240], sizes = [16, 16], strides = [1, 1]} : vector<16x256xf32> to vector<16x16xf32>
    %366 = vector.extract_strided_slice %358 {offsets = [0, 0], sizes = [16, 240], strides = [1, 1]} : vector<16x256xf32> to vector<16x240xf32>
    %367 = tpu.concatenate %365, %366 in 1 : vector<16x16xf32>, vector<16x240xf32> -> vector<16x256xf32>
    %368 = vector.broadcast %1 : vector<1x256xf32> to vector<16x256xf32>
    %369 = arith.mulf %367, %368 : vector<16x256xf32>
    %370 = vector.extract_strided_slice %358 {offsets = [0, 241], sizes = [16, 15], strides = [1, 1]} : vector<16x256xf32> to vector<16x15xf32>
    %371 = vector.extract_strided_slice %358 {offsets = [0, 0], sizes = [16, 241], strides = [1, 1]} : vector<16x256xf32> to vector<16x241xf32>
    %372 = tpu.concatenate %370, %371 in 1 : vector<16x15xf32>, vector<16x241xf32> -> vector<16x256xf32>
    %373 = vector.broadcast %2 : vector<1x256xf32> to vector<16x256xf32>
    %374 = arith.mulf %372, %373 : vector<16x256xf32>
    %375 = vector.extract_strided_slice %358 {offsets = [0, 255], sizes = [16, 1], strides = [1, 1]} : vector<16x256xf32> to vector<16x1xf32>
    %376 = vector.extract_strided_slice %358 {offsets = [0, 0], sizes = [16, 255], strides = [1, 1]} : vector<16x256xf32> to vector<16x255xf32>
    %377 = tpu.concatenate %375, %376 in 1 : vector<16x1xf32>, vector<16x255xf32> -> vector<16x256xf32>
    %378 = vector.broadcast %3 : vector<1x256xf32> to vector<16x256xf32>
    %379 = arith.mulf %377, %378 : vector<16x256xf32>
    %380 = vector.extract_strided_slice %358 {offsets = [0, 1], sizes = [16, 255], strides = [1, 1]} : vector<16x256xf32> to vector<16x255xf32>
    %381 = vector.extract_strided_slice %358 {offsets = [0, 0], sizes = [16, 1], strides = [1, 1]} : vector<16x256xf32> to vector<16x1xf32>
    %382 = tpu.concatenate %380, %381 in 1 : vector<16x255xf32>, vector<16x1xf32> -> vector<16x256xf32>
    %383 = vector.broadcast %4 : vector<1x256xf32> to vector<16x256xf32>
    %384 = arith.mulf %382, %383 : vector<16x256xf32>
    %385 = vector.extract_strided_slice %358 {offsets = [0, 15], sizes = [16, 241], strides = [1, 1]} : vector<16x256xf32> to vector<16x241xf32>
    %386 = vector.extract_strided_slice %358 {offsets = [0, 0], sizes = [16, 15], strides = [1, 1]} : vector<16x256xf32> to vector<16x15xf32>
    %387 = tpu.concatenate %385, %386 in 1 : vector<16x241xf32>, vector<16x15xf32> -> vector<16x256xf32>
    %388 = vector.broadcast %5 : vector<1x256xf32> to vector<16x256xf32>
    %389 = arith.mulf %387, %388 : vector<16x256xf32>
    %390 = vector.extract_strided_slice %358 {offsets = [0, 16], sizes = [16, 240], strides = [1, 1]} : vector<16x256xf32> to vector<16x240xf32>
    %391 = vector.extract_strided_slice %358 {offsets = [0, 0], sizes = [16, 16], strides = [1, 1]} : vector<16x256xf32> to vector<16x16xf32>
    %392 = tpu.concatenate %390, %391 in 1 : vector<16x240xf32>, vector<16x16xf32> -> vector<16x256xf32>
    %393 = vector.broadcast %6 : vector<1x256xf32> to vector<16x256xf32>
    %394 = arith.mulf %392, %393 : vector<16x256xf32>
    %395 = vector.extract_strided_slice %358 {offsets = [0, 17], sizes = [16, 239], strides = [1, 1]} : vector<16x256xf32> to vector<16x239xf32>
    %396 = vector.extract_strided_slice %358 {offsets = [0, 0], sizes = [16, 17], strides = [1, 1]} : vector<16x256xf32> to vector<16x17xf32>
    %397 = tpu.concatenate %395, %396 in 1 : vector<16x239xf32>, vector<16x17xf32> -> vector<16x256xf32>
    %398 = vector.broadcast %7 : vector<1x256xf32> to vector<16x256xf32>
    %399 = arith.mulf %397, %398 : vector<16x256xf32>
    %400 = tpu.concatenate %364, %369, %374, %379, %358, %384, %389, %394, %399 in 0 : vector<16x256xf32>, vector<16x256xf32>, vector<16x256xf32>, vector<16x256xf32>, vector<16x256xf32>, vector<16x256xf32>, vector<16x256xf32>, vector<16x256xf32>, vector<16x256xf32> -> vector<144x256xf32>
    %c0_70 = arith.constant 0 : index
    %c0_71 = arith.constant 0 : index
    %401 = vector.load %arg23[%c0_70, %c0_71] : memref<16x144xf32, #tpu.memory_space<vmem>>, vector<16x144xf32>
    %cst_72 = arith.constant dense<0.000000e+00> : vector<16x256xf32>
    %402 = tpu.matmul %401, %400, %cst_72 {dimension_numbers = #tpu.dot_dimension_numbers<[1], [0], [0], [1], [0, 0, 1, 1], [], []>} : vector<16x144xf32>, vector<144x256xf32>, vector<16x256xf32> -> vector<16x256xf32>
    %c0_73 = arith.constant 0 : index
    %c0_74 = arith.constant 0 : index
    %403 = vector.load %arg24[%c0_73, %c0_74] : memref<16x1xf32, #tpu.memory_space<vmem>>, vector<16x1xf32>
    %404 = vector.broadcast %403 : vector<16x1xf32> to vector<16x256xf32>
    %405 = arith.addf %402, %404 : vector<16x256xf32>
    %cst_75 = arith.constant 0.000000e+00 : f32
    %406 = vector.broadcast %cst_75 : f32 to vector<16x256xf32>
    %407 = arith.maximumf %405, %406 : vector<16x256xf32>
    %408 = vector.extract_strided_slice %407 {offsets = [0, 239], sizes = [16, 17], strides = [1, 1]} : vector<16x256xf32> to vector<16x17xf32>
    %409 = vector.extract_strided_slice %407 {offsets = [0, 0], sizes = [16, 239], strides = [1, 1]} : vector<16x256xf32> to vector<16x239xf32>
    %410 = tpu.concatenate %408, %409 in 1 : vector<16x17xf32>, vector<16x239xf32> -> vector<16x256xf32>
    %411 = vector.broadcast %0 : vector<1x256xf32> to vector<16x256xf32>
    %412 = arith.mulf %410, %411 : vector<16x256xf32>
    %413 = vector.extract_strided_slice %407 {offsets = [0, 240], sizes = [16, 16], strides = [1, 1]} : vector<16x256xf32> to vector<16x16xf32>
    %414 = vector.extract_strided_slice %407 {offsets = [0, 0], sizes = [16, 240], strides = [1, 1]} : vector<16x256xf32> to vector<16x240xf32>
    %415 = tpu.concatenate %413, %414 in 1 : vector<16x16xf32>, vector<16x240xf32> -> vector<16x256xf32>
    %416 = vector.broadcast %1 : vector<1x256xf32> to vector<16x256xf32>
    %417 = arith.mulf %415, %416 : vector<16x256xf32>
    %418 = vector.extract_strided_slice %407 {offsets = [0, 241], sizes = [16, 15], strides = [1, 1]} : vector<16x256xf32> to vector<16x15xf32>
    %419 = vector.extract_strided_slice %407 {offsets = [0, 0], sizes = [16, 241], strides = [1, 1]} : vector<16x256xf32> to vector<16x241xf32>
    %420 = tpu.concatenate %418, %419 in 1 : vector<16x15xf32>, vector<16x241xf32> -> vector<16x256xf32>
    %421 = vector.broadcast %2 : vector<1x256xf32> to vector<16x256xf32>
    %422 = arith.mulf %420, %421 : vector<16x256xf32>
    %423 = vector.extract_strided_slice %407 {offsets = [0, 255], sizes = [16, 1], strides = [1, 1]} : vector<16x256xf32> to vector<16x1xf32>
    %424 = vector.extract_strided_slice %407 {offsets = [0, 0], sizes = [16, 255], strides = [1, 1]} : vector<16x256xf32> to vector<16x255xf32>
    %425 = tpu.concatenate %423, %424 in 1 : vector<16x1xf32>, vector<16x255xf32> -> vector<16x256xf32>
    %426 = vector.broadcast %3 : vector<1x256xf32> to vector<16x256xf32>
    %427 = arith.mulf %425, %426 : vector<16x256xf32>
    %428 = vector.extract_strided_slice %407 {offsets = [0, 1], sizes = [16, 255], strides = [1, 1]} : vector<16x256xf32> to vector<16x255xf32>
    %429 = vector.extract_strided_slice %407 {offsets = [0, 0], sizes = [16, 1], strides = [1, 1]} : vector<16x256xf32> to vector<16x1xf32>
    %430 = tpu.concatenate %428, %429 in 1 : vector<16x255xf32>, vector<16x1xf32> -> vector<16x256xf32>
    %431 = vector.broadcast %4 : vector<1x256xf32> to vector<16x256xf32>
    %432 = arith.mulf %430, %431 : vector<16x256xf32>
    %433 = vector.extract_strided_slice %407 {offsets = [0, 15], sizes = [16, 241], strides = [1, 1]} : vector<16x256xf32> to vector<16x241xf32>
    %434 = vector.extract_strided_slice %407 {offsets = [0, 0], sizes = [16, 15], strides = [1, 1]} : vector<16x256xf32> to vector<16x15xf32>
    %435 = tpu.concatenate %433, %434 in 1 : vector<16x241xf32>, vector<16x15xf32> -> vector<16x256xf32>
    %436 = vector.broadcast %5 : vector<1x256xf32> to vector<16x256xf32>
    %437 = arith.mulf %435, %436 : vector<16x256xf32>
    %438 = vector.extract_strided_slice %407 {offsets = [0, 16], sizes = [16, 240], strides = [1, 1]} : vector<16x256xf32> to vector<16x240xf32>
    %439 = vector.extract_strided_slice %407 {offsets = [0, 0], sizes = [16, 16], strides = [1, 1]} : vector<16x256xf32> to vector<16x16xf32>
    %440 = tpu.concatenate %438, %439 in 1 : vector<16x240xf32>, vector<16x16xf32> -> vector<16x256xf32>
    %441 = vector.broadcast %6 : vector<1x256xf32> to vector<16x256xf32>
    %442 = arith.mulf %440, %441 : vector<16x256xf32>
    %443 = vector.extract_strided_slice %407 {offsets = [0, 17], sizes = [16, 239], strides = [1, 1]} : vector<16x256xf32> to vector<16x239xf32>
    %444 = vector.extract_strided_slice %407 {offsets = [0, 0], sizes = [16, 17], strides = [1, 1]} : vector<16x256xf32> to vector<16x17xf32>
    %445 = tpu.concatenate %443, %444 in 1 : vector<16x239xf32>, vector<16x17xf32> -> vector<16x256xf32>
    %446 = vector.broadcast %7 : vector<1x256xf32> to vector<16x256xf32>
    %447 = arith.mulf %445, %446 : vector<16x256xf32>
    %448 = tpu.concatenate %412, %417, %422, %427, %407, %432, %437, %442, %447 in 0 : vector<16x256xf32>, vector<16x256xf32>, vector<16x256xf32>, vector<16x256xf32>, vector<16x256xf32>, vector<16x256xf32>, vector<16x256xf32>, vector<16x256xf32>, vector<16x256xf32> -> vector<144x256xf32>
    %c0_76 = arith.constant 0 : index
    %c0_77 = arith.constant 0 : index
    %449 = vector.load %arg25[%c0_76, %c0_77] : memref<8x144xf32, #tpu.memory_space<vmem>>, vector<8x144xf32>
    %cst_78 = arith.constant dense<0.000000e+00> : vector<8x256xf32>
    %450 = tpu.matmul %449, %448, %cst_78 {dimension_numbers = #tpu.dot_dimension_numbers<[1], [0], [0], [1], [0, 0, 1, 1], [], []>} : vector<8x144xf32>, vector<144x256xf32>, vector<8x256xf32> -> vector<8x256xf32>
    %c0_79 = arith.constant 0 : index
    %c0_80 = arith.constant 0 : index
    %451 = vector.load %arg26[%c0_79, %c0_80] : memref<8x1xf32, #tpu.memory_space<vmem>>, vector<8x1xf32>
    %452 = vector.broadcast %451 : vector<8x1xf32> to vector<8x256xf32>
    %453 = arith.addf %450, %452 : vector<8x256xf32>
    %454 = arith.negf %453 : vector<8x256xf32>
    %455 = math.exp %454 : vector<8x256xf32>
    %cst_81 = arith.constant 1.000000e+00 : f32
    %456 = vector.broadcast %cst_81 : f32 to vector<8x256xf32>
    %457 = arith.addf %456, %455 : vector<8x256xf32>
    %458 = arith.divf %456, %457 : vector<8x256xf32>
    %459 = arith.mulf %69, %458 : vector<8x256xf32>
    %460 = vector.extract_strided_slice %359 {offsets = [0, 239], sizes = [16, 17], strides = [1, 1]} : vector<16x256xf32> to vector<16x17xf32>
    %461 = vector.extract_strided_slice %359 {offsets = [0, 0], sizes = [16, 239], strides = [1, 1]} : vector<16x256xf32> to vector<16x239xf32>
    %462 = tpu.concatenate %460, %461 in 1 : vector<16x17xf32>, vector<16x239xf32> -> vector<16x256xf32>
    %463 = vector.broadcast %0 : vector<1x256xf32> to vector<16x256xf32>
    %464 = arith.mulf %462, %463 : vector<16x256xf32>
    %465 = vector.extract_strided_slice %359 {offsets = [0, 240], sizes = [16, 16], strides = [1, 1]} : vector<16x256xf32> to vector<16x16xf32>
    %466 = vector.extract_strided_slice %359 {offsets = [0, 0], sizes = [16, 240], strides = [1, 1]} : vector<16x256xf32> to vector<16x240xf32>
    %467 = tpu.concatenate %465, %466 in 1 : vector<16x16xf32>, vector<16x240xf32> -> vector<16x256xf32>
    %468 = vector.broadcast %1 : vector<1x256xf32> to vector<16x256xf32>
    %469 = arith.mulf %467, %468 : vector<16x256xf32>
    %470 = vector.extract_strided_slice %359 {offsets = [0, 241], sizes = [16, 15], strides = [1, 1]} : vector<16x256xf32> to vector<16x15xf32>
    %471 = vector.extract_strided_slice %359 {offsets = [0, 0], sizes = [16, 241], strides = [1, 1]} : vector<16x256xf32> to vector<16x241xf32>
    %472 = tpu.concatenate %470, %471 in 1 : vector<16x15xf32>, vector<16x241xf32> -> vector<16x256xf32>
    %473 = vector.broadcast %2 : vector<1x256xf32> to vector<16x256xf32>
    %474 = arith.mulf %472, %473 : vector<16x256xf32>
    %475 = vector.extract_strided_slice %359 {offsets = [0, 255], sizes = [16, 1], strides = [1, 1]} : vector<16x256xf32> to vector<16x1xf32>
    %476 = vector.extract_strided_slice %359 {offsets = [0, 0], sizes = [16, 255], strides = [1, 1]} : vector<16x256xf32> to vector<16x255xf32>
    %477 = tpu.concatenate %475, %476 in 1 : vector<16x1xf32>, vector<16x255xf32> -> vector<16x256xf32>
    %478 = vector.broadcast %3 : vector<1x256xf32> to vector<16x256xf32>
    %479 = arith.mulf %477, %478 : vector<16x256xf32>
    %480 = vector.extract_strided_slice %359 {offsets = [0, 1], sizes = [16, 255], strides = [1, 1]} : vector<16x256xf32> to vector<16x255xf32>
    %481 = vector.extract_strided_slice %359 {offsets = [0, 0], sizes = [16, 1], strides = [1, 1]} : vector<16x256xf32> to vector<16x1xf32>
    %482 = tpu.concatenate %480, %481 in 1 : vector<16x255xf32>, vector<16x1xf32> -> vector<16x256xf32>
    %483 = vector.broadcast %4 : vector<1x256xf32> to vector<16x256xf32>
    %484 = arith.mulf %482, %483 : vector<16x256xf32>
    %485 = vector.extract_strided_slice %359 {offsets = [0, 15], sizes = [16, 241], strides = [1, 1]} : vector<16x256xf32> to vector<16x241xf32>
    %486 = vector.extract_strided_slice %359 {offsets = [0, 0], sizes = [16, 15], strides = [1, 1]} : vector<16x256xf32> to vector<16x15xf32>
    %487 = tpu.concatenate %485, %486 in 1 : vector<16x241xf32>, vector<16x15xf32> -> vector<16x256xf32>
    %488 = vector.broadcast %5 : vector<1x256xf32> to vector<16x256xf32>
    %489 = arith.mulf %487, %488 : vector<16x256xf32>
    %490 = vector.extract_strided_slice %359 {offsets = [0, 16], sizes = [16, 240], strides = [1, 1]} : vector<16x256xf32> to vector<16x240xf32>
    %491 = vector.extract_strided_slice %359 {offsets = [0, 0], sizes = [16, 16], strides = [1, 1]} : vector<16x256xf32> to vector<16x16xf32>
    %492 = tpu.concatenate %490, %491 in 1 : vector<16x240xf32>, vector<16x16xf32> -> vector<16x256xf32>
    %493 = vector.broadcast %6 : vector<1x256xf32> to vector<16x256xf32>
    %494 = arith.mulf %492, %493 : vector<16x256xf32>
    %495 = vector.extract_strided_slice %359 {offsets = [0, 17], sizes = [16, 239], strides = [1, 1]} : vector<16x256xf32> to vector<16x239xf32>
    %496 = vector.extract_strided_slice %359 {offsets = [0, 0], sizes = [16, 17], strides = [1, 1]} : vector<16x256xf32> to vector<16x17xf32>
    %497 = tpu.concatenate %495, %496 in 1 : vector<16x239xf32>, vector<16x17xf32> -> vector<16x256xf32>
    %498 = vector.broadcast %7 : vector<1x256xf32> to vector<16x256xf32>
    %499 = arith.mulf %497, %498 : vector<16x256xf32>
    %500 = tpu.concatenate %464, %469, %474, %479, %359, %484, %489, %494, %499 in 0 : vector<16x256xf32>, vector<16x256xf32>, vector<16x256xf32>, vector<16x256xf32>, vector<16x256xf32>, vector<16x256xf32>, vector<16x256xf32>, vector<16x256xf32>, vector<16x256xf32> -> vector<144x256xf32>
    %c0_82 = arith.constant 0 : index
    %c0_83 = arith.constant 0 : index
    %501 = vector.load %arg27[%c0_82, %c0_83] : memref<16x144xf32, #tpu.memory_space<vmem>>, vector<16x144xf32>
    %cst_84 = arith.constant dense<0.000000e+00> : vector<16x256xf32>
    %502 = tpu.matmul %501, %500, %cst_84 {dimension_numbers = #tpu.dot_dimension_numbers<[1], [0], [0], [1], [0, 0, 1, 1], [], []>} : vector<16x144xf32>, vector<144x256xf32>, vector<16x256xf32> -> vector<16x256xf32>
    %c0_85 = arith.constant 0 : index
    %c0_86 = arith.constant 0 : index
    %503 = vector.load %arg28[%c0_85, %c0_86] : memref<16x1xf32, #tpu.memory_space<vmem>>, vector<16x1xf32>
    %504 = vector.broadcast %503 : vector<16x1xf32> to vector<16x256xf32>
    %505 = arith.addf %502, %504 : vector<16x256xf32>
    %cst_87 = arith.constant 0.000000e+00 : f32
    %506 = vector.broadcast %cst_87 : f32 to vector<16x256xf32>
    %507 = arith.maximumf %505, %506 : vector<16x256xf32>
    %508 = vector.extract_strided_slice %507 {offsets = [0, 239], sizes = [16, 17], strides = [1, 1]} : vector<16x256xf32> to vector<16x17xf32>
    %509 = vector.extract_strided_slice %507 {offsets = [0, 0], sizes = [16, 239], strides = [1, 1]} : vector<16x256xf32> to vector<16x239xf32>
    %510 = tpu.concatenate %508, %509 in 1 : vector<16x17xf32>, vector<16x239xf32> -> vector<16x256xf32>
    %511 = vector.broadcast %0 : vector<1x256xf32> to vector<16x256xf32>
    %512 = arith.mulf %510, %511 : vector<16x256xf32>
    %513 = vector.extract_strided_slice %507 {offsets = [0, 240], sizes = [16, 16], strides = [1, 1]} : vector<16x256xf32> to vector<16x16xf32>
    %514 = vector.extract_strided_slice %507 {offsets = [0, 0], sizes = [16, 240], strides = [1, 1]} : vector<16x256xf32> to vector<16x240xf32>
    %515 = tpu.concatenate %513, %514 in 1 : vector<16x16xf32>, vector<16x240xf32> -> vector<16x256xf32>
    %516 = vector.broadcast %1 : vector<1x256xf32> to vector<16x256xf32>
    %517 = arith.mulf %515, %516 : vector<16x256xf32>
    %518 = vector.extract_strided_slice %507 {offsets = [0, 241], sizes = [16, 15], strides = [1, 1]} : vector<16x256xf32> to vector<16x15xf32>
    %519 = vector.extract_strided_slice %507 {offsets = [0, 0], sizes = [16, 241], strides = [1, 1]} : vector<16x256xf32> to vector<16x241xf32>
    %520 = tpu.concatenate %518, %519 in 1 : vector<16x15xf32>, vector<16x241xf32> -> vector<16x256xf32>
    %521 = vector.broadcast %2 : vector<1x256xf32> to vector<16x256xf32>
    %522 = arith.mulf %520, %521 : vector<16x256xf32>
    %523 = vector.extract_strided_slice %507 {offsets = [0, 255], sizes = [16, 1], strides = [1, 1]} : vector<16x256xf32> to vector<16x1xf32>
    %524 = vector.extract_strided_slice %507 {offsets = [0, 0], sizes = [16, 255], strides = [1, 1]} : vector<16x256xf32> to vector<16x255xf32>
    %525 = tpu.concatenate %523, %524 in 1 : vector<16x1xf32>, vector<16x255xf32> -> vector<16x256xf32>
    %526 = vector.broadcast %3 : vector<1x256xf32> to vector<16x256xf32>
    %527 = arith.mulf %525, %526 : vector<16x256xf32>
    %528 = vector.extract_strided_slice %507 {offsets = [0, 1], sizes = [16, 255], strides = [1, 1]} : vector<16x256xf32> to vector<16x255xf32>
    %529 = vector.extract_strided_slice %507 {offsets = [0, 0], sizes = [16, 1], strides = [1, 1]} : vector<16x256xf32> to vector<16x1xf32>
    %530 = tpu.concatenate %528, %529 in 1 : vector<16x255xf32>, vector<16x1xf32> -> vector<16x256xf32>
    %531 = vector.broadcast %4 : vector<1x256xf32> to vector<16x256xf32>
    %532 = arith.mulf %530, %531 : vector<16x256xf32>
    %533 = vector.extract_strided_slice %507 {offsets = [0, 15], sizes = [16, 241], strides = [1, 1]} : vector<16x256xf32> to vector<16x241xf32>
    %534 = vector.extract_strided_slice %507 {offsets = [0, 0], sizes = [16, 15], strides = [1, 1]} : vector<16x256xf32> to vector<16x15xf32>
    %535 = tpu.concatenate %533, %534 in 1 : vector<16x241xf32>, vector<16x15xf32> -> vector<16x256xf32>
    %536 = vector.broadcast %5 : vector<1x256xf32> to vector<16x256xf32>
    %537 = arith.mulf %535, %536 : vector<16x256xf32>
    %538 = vector.extract_strided_slice %507 {offsets = [0, 16], sizes = [16, 240], strides = [1, 1]} : vector<16x256xf32> to vector<16x240xf32>
    %539 = vector.extract_strided_slice %507 {offsets = [0, 0], sizes = [16, 16], strides = [1, 1]} : vector<16x256xf32> to vector<16x16xf32>
    %540 = tpu.concatenate %538, %539 in 1 : vector<16x240xf32>, vector<16x16xf32> -> vector<16x256xf32>
    %541 = vector.broadcast %6 : vector<1x256xf32> to vector<16x256xf32>
    %542 = arith.mulf %540, %541 : vector<16x256xf32>
    %543 = vector.extract_strided_slice %507 {offsets = [0, 17], sizes = [16, 239], strides = [1, 1]} : vector<16x256xf32> to vector<16x239xf32>
    %544 = vector.extract_strided_slice %507 {offsets = [0, 0], sizes = [16, 17], strides = [1, 1]} : vector<16x256xf32> to vector<16x17xf32>
    %545 = tpu.concatenate %543, %544 in 1 : vector<16x239xf32>, vector<16x17xf32> -> vector<16x256xf32>
    %546 = vector.broadcast %7 : vector<1x256xf32> to vector<16x256xf32>
    %547 = arith.mulf %545, %546 : vector<16x256xf32>
    %548 = tpu.concatenate %512, %517, %522, %527, %507, %532, %537, %542, %547 in 0 : vector<16x256xf32>, vector<16x256xf32>, vector<16x256xf32>, vector<16x256xf32>, vector<16x256xf32>, vector<16x256xf32>, vector<16x256xf32>, vector<16x256xf32>, vector<16x256xf32> -> vector<144x256xf32>
    %c0_88 = arith.constant 0 : index
    %c0_89 = arith.constant 0 : index
    %549 = vector.load %arg29[%c0_88, %c0_89] : memref<8x144xf32, #tpu.memory_space<vmem>>, vector<8x144xf32>
    %cst_90 = arith.constant dense<0.000000e+00> : vector<8x256xf32>
    %550 = tpu.matmul %549, %548, %cst_90 {dimension_numbers = #tpu.dot_dimension_numbers<[1], [0], [0], [1], [0, 0, 1, 1], [], []>} : vector<8x144xf32>, vector<144x256xf32>, vector<8x256xf32> -> vector<8x256xf32>
    %c0_91 = arith.constant 0 : index
    %c0_92 = arith.constant 0 : index
    %551 = vector.load %arg30[%c0_91, %c0_92] : memref<8x1xf32, #tpu.memory_space<vmem>>, vector<8x1xf32>
    %552 = vector.broadcast %551 : vector<8x1xf32> to vector<8x256xf32>
    %553 = arith.addf %550, %552 : vector<8x256xf32>
    %554 = arith.negf %553 : vector<8x256xf32>
    %555 = math.exp %554 : vector<8x256xf32>
    %cst_93 = arith.constant 1.000000e+00 : f32
    %556 = vector.broadcast %cst_93 : f32 to vector<8x256xf32>
    %557 = arith.addf %556, %555 : vector<8x256xf32>
    %558 = arith.divf %556, %557 : vector<8x256xf32>
    %559 = arith.mulf %165, %558 : vector<8x256xf32>
    %560 = vector.extract_strided_slice %459 {offsets = [0, 239], sizes = [8, 17], strides = [1, 1]} : vector<8x256xf32> to vector<8x17xf32>
    %561 = vector.extract_strided_slice %459 {offsets = [0, 0], sizes = [8, 239], strides = [1, 1]} : vector<8x256xf32> to vector<8x239xf32>
    %562 = tpu.concatenate %560, %561 in 1 : vector<8x17xf32>, vector<8x239xf32> -> vector<8x256xf32>
    %563 = vector.broadcast %0 : vector<1x256xf32> to vector<8x256xf32>
    %564 = arith.mulf %562, %563 : vector<8x256xf32>
    %565 = vector.extract_strided_slice %459 {offsets = [0, 240], sizes = [8, 16], strides = [1, 1]} : vector<8x256xf32> to vector<8x16xf32>
    %566 = vector.extract_strided_slice %459 {offsets = [0, 0], sizes = [8, 240], strides = [1, 1]} : vector<8x256xf32> to vector<8x240xf32>
    %567 = tpu.concatenate %565, %566 in 1 : vector<8x16xf32>, vector<8x240xf32> -> vector<8x256xf32>
    %568 = vector.broadcast %1 : vector<1x256xf32> to vector<8x256xf32>
    %569 = arith.mulf %567, %568 : vector<8x256xf32>
    %570 = vector.extract_strided_slice %459 {offsets = [0, 241], sizes = [8, 15], strides = [1, 1]} : vector<8x256xf32> to vector<8x15xf32>
    %571 = vector.extract_strided_slice %459 {offsets = [0, 0], sizes = [8, 241], strides = [1, 1]} : vector<8x256xf32> to vector<8x241xf32>
    %572 = tpu.concatenate %570, %571 in 1 : vector<8x15xf32>, vector<8x241xf32> -> vector<8x256xf32>
    %573 = vector.broadcast %2 : vector<1x256xf32> to vector<8x256xf32>
    %574 = arith.mulf %572, %573 : vector<8x256xf32>
    %575 = vector.extract_strided_slice %459 {offsets = [0, 255], sizes = [8, 1], strides = [1, 1]} : vector<8x256xf32> to vector<8x1xf32>
    %576 = vector.extract_strided_slice %459 {offsets = [0, 0], sizes = [8, 255], strides = [1, 1]} : vector<8x256xf32> to vector<8x255xf32>
    %577 = tpu.concatenate %575, %576 in 1 : vector<8x1xf32>, vector<8x255xf32> -> vector<8x256xf32>
    %578 = vector.broadcast %3 : vector<1x256xf32> to vector<8x256xf32>
    %579 = arith.mulf %577, %578 : vector<8x256xf32>
    %580 = vector.extract_strided_slice %459 {offsets = [0, 1], sizes = [8, 255], strides = [1, 1]} : vector<8x256xf32> to vector<8x255xf32>
    %581 = vector.extract_strided_slice %459 {offsets = [0, 0], sizes = [8, 1], strides = [1, 1]} : vector<8x256xf32> to vector<8x1xf32>
    %582 = tpu.concatenate %580, %581 in 1 : vector<8x255xf32>, vector<8x1xf32> -> vector<8x256xf32>
    %583 = vector.broadcast %4 : vector<1x256xf32> to vector<8x256xf32>
    %584 = arith.mulf %582, %583 : vector<8x256xf32>
    %585 = vector.extract_strided_slice %459 {offsets = [0, 15], sizes = [8, 241], strides = [1, 1]} : vector<8x256xf32> to vector<8x241xf32>
    %586 = vector.extract_strided_slice %459 {offsets = [0, 0], sizes = [8, 15], strides = [1, 1]} : vector<8x256xf32> to vector<8x15xf32>
    %587 = tpu.concatenate %585, %586 in 1 : vector<8x241xf32>, vector<8x15xf32> -> vector<8x256xf32>
    %588 = vector.broadcast %5 : vector<1x256xf32> to vector<8x256xf32>
    %589 = arith.mulf %587, %588 : vector<8x256xf32>
    %590 = vector.extract_strided_slice %459 {offsets = [0, 16], sizes = [8, 240], strides = [1, 1]} : vector<8x256xf32> to vector<8x240xf32>
    %591 = vector.extract_strided_slice %459 {offsets = [0, 0], sizes = [8, 16], strides = [1, 1]} : vector<8x256xf32> to vector<8x16xf32>
    %592 = tpu.concatenate %590, %591 in 1 : vector<8x240xf32>, vector<8x16xf32> -> vector<8x256xf32>
    %593 = vector.broadcast %6 : vector<1x256xf32> to vector<8x256xf32>
    %594 = arith.mulf %592, %593 : vector<8x256xf32>
    %595 = vector.extract_strided_slice %459 {offsets = [0, 17], sizes = [8, 239], strides = [1, 1]} : vector<8x256xf32> to vector<8x239xf32>
    %596 = vector.extract_strided_slice %459 {offsets = [0, 0], sizes = [8, 17], strides = [1, 1]} : vector<8x256xf32> to vector<8x17xf32>
    %597 = tpu.concatenate %595, %596 in 1 : vector<8x239xf32>, vector<8x17xf32> -> vector<8x256xf32>
    %598 = vector.broadcast %7 : vector<1x256xf32> to vector<8x256xf32>
    %599 = arith.mulf %597, %598 : vector<8x256xf32>
    %600 = tpu.concatenate %564, %569, %574, %579, %459, %584, %589, %594, %599 in 0 : vector<8x256xf32>, vector<8x256xf32>, vector<8x256xf32>, vector<8x256xf32>, vector<8x256xf32>, vector<8x256xf32>, vector<8x256xf32>, vector<8x256xf32>, vector<8x256xf32> -> vector<72x256xf32>
    %c0_94 = arith.constant 0 : index
    %c0_95 = arith.constant 0 : index
    %601 = vector.load %arg31[%c0_94, %c0_95] : memref<8x72xf32, #tpu.memory_space<vmem>>, vector<8x72xf32>
    %cst_96 = arith.constant dense<0.000000e+00> : vector<8x256xf32>
    %602 = tpu.matmul %601, %600, %cst_96 {dimension_numbers = #tpu.dot_dimension_numbers<[1], [0], [0], [1], [0, 0, 1, 1], [], []>} : vector<8x72xf32>, vector<72x256xf32>, vector<8x256xf32> -> vector<8x256xf32>
    %c0_97 = arith.constant 0 : index
    %c0_98 = arith.constant 0 : index
    %603 = vector.load %arg32[%c0_97, %c0_98] : memref<8x1xf32, #tpu.memory_space<vmem>>, vector<8x1xf32>
    %604 = vector.broadcast %603 : vector<8x1xf32> to vector<8x256xf32>
    %605 = arith.addf %602, %604 : vector<8x256xf32>
    %cst_99 = arith.constant 0.000000e+00 : f32
    %606 = vector.broadcast %cst_99 : f32 to vector<8x256xf32>
    %607 = arith.maximumf %605, %606 : vector<8x256xf32>
    %608 = arith.mulf %607, %117 : vector<8x256xf32>
    %c0_100 = arith.constant 0 : index
    %c0_101 = arith.constant 0 : index
    %609 = vector.load %arg33[%c0_100, %c0_101] : memref<8x72xf32, #tpu.memory_space<vmem>>, vector<8x72xf32>
    %cst_102 = arith.constant dense<0.000000e+00> : vector<8x256xf32>
    %610 = tpu.matmul %609, %600, %cst_102 {dimension_numbers = #tpu.dot_dimension_numbers<[1], [0], [0], [1], [0, 0, 1, 1], [], []>} : vector<8x72xf32>, vector<72x256xf32>, vector<8x256xf32> -> vector<8x256xf32>
    %c0_103 = arith.constant 0 : index
    %c0_104 = arith.constant 0 : index
    %611 = vector.load %arg34[%c0_103, %c0_104] : memref<8x1xf32, #tpu.memory_space<vmem>>, vector<8x1xf32>
    %612 = vector.broadcast %611 : vector<8x1xf32> to vector<8x256xf32>
    %613 = arith.addf %610, %612 : vector<8x256xf32>
    %cst_105 = arith.constant 0.000000e+00 : f32
    %614 = vector.broadcast %cst_105 : f32 to vector<8x256xf32>
    %615 = arith.maximumf %613, %614 : vector<8x256xf32>
    %616 = arith.addf %608, %615 : vector<8x256xf32>
    %617 = vector.extract_strided_slice %559 {offsets = [0, 239], sizes = [8, 17], strides = [1, 1]} : vector<8x256xf32> to vector<8x17xf32>
    %618 = vector.extract_strided_slice %559 {offsets = [0, 0], sizes = [8, 239], strides = [1, 1]} : vector<8x256xf32> to vector<8x239xf32>
    %619 = tpu.concatenate %617, %618 in 1 : vector<8x17xf32>, vector<8x239xf32> -> vector<8x256xf32>
    %620 = vector.broadcast %0 : vector<1x256xf32> to vector<8x256xf32>
    %621 = arith.mulf %619, %620 : vector<8x256xf32>
    %622 = vector.extract_strided_slice %559 {offsets = [0, 240], sizes = [8, 16], strides = [1, 1]} : vector<8x256xf32> to vector<8x16xf32>
    %623 = vector.extract_strided_slice %559 {offsets = [0, 0], sizes = [8, 240], strides = [1, 1]} : vector<8x256xf32> to vector<8x240xf32>
    %624 = tpu.concatenate %622, %623 in 1 : vector<8x16xf32>, vector<8x240xf32> -> vector<8x256xf32>
    %625 = vector.broadcast %1 : vector<1x256xf32> to vector<8x256xf32>
    %626 = arith.mulf %624, %625 : vector<8x256xf32>
    %627 = vector.extract_strided_slice %559 {offsets = [0, 241], sizes = [8, 15], strides = [1, 1]} : vector<8x256xf32> to vector<8x15xf32>
    %628 = vector.extract_strided_slice %559 {offsets = [0, 0], sizes = [8, 241], strides = [1, 1]} : vector<8x256xf32> to vector<8x241xf32>
    %629 = tpu.concatenate %627, %628 in 1 : vector<8x15xf32>, vector<8x241xf32> -> vector<8x256xf32>
    %630 = vector.broadcast %2 : vector<1x256xf32> to vector<8x256xf32>
    %631 = arith.mulf %629, %630 : vector<8x256xf32>
    %632 = vector.extract_strided_slice %559 {offsets = [0, 255], sizes = [8, 1], strides = [1, 1]} : vector<8x256xf32> to vector<8x1xf32>
    %633 = vector.extract_strided_slice %559 {offsets = [0, 0], sizes = [8, 255], strides = [1, 1]} : vector<8x256xf32> to vector<8x255xf32>
    %634 = tpu.concatenate %632, %633 in 1 : vector<8x1xf32>, vector<8x255xf32> -> vector<8x256xf32>
    %635 = vector.broadcast %3 : vector<1x256xf32> to vector<8x256xf32>
    %636 = arith.mulf %634, %635 : vector<8x256xf32>
    %637 = vector.extract_strided_slice %559 {offsets = [0, 1], sizes = [8, 255], strides = [1, 1]} : vector<8x256xf32> to vector<8x255xf32>
    %638 = vector.extract_strided_slice %559 {offsets = [0, 0], sizes = [8, 1], strides = [1, 1]} : vector<8x256xf32> to vector<8x1xf32>
    %639 = tpu.concatenate %637, %638 in 1 : vector<8x255xf32>, vector<8x1xf32> -> vector<8x256xf32>
    %640 = vector.broadcast %4 : vector<1x256xf32> to vector<8x256xf32>
    %641 = arith.mulf %639, %640 : vector<8x256xf32>
    %642 = vector.extract_strided_slice %559 {offsets = [0, 15], sizes = [8, 241], strides = [1, 1]} : vector<8x256xf32> to vector<8x241xf32>
    %643 = vector.extract_strided_slice %559 {offsets = [0, 0], sizes = [8, 15], strides = [1, 1]} : vector<8x256xf32> to vector<8x15xf32>
    %644 = tpu.concatenate %642, %643 in 1 : vector<8x241xf32>, vector<8x15xf32> -> vector<8x256xf32>
    %645 = vector.broadcast %5 : vector<1x256xf32> to vector<8x256xf32>
    %646 = arith.mulf %644, %645 : vector<8x256xf32>
    %647 = vector.extract_strided_slice %559 {offsets = [0, 16], sizes = [8, 240], strides = [1, 1]} : vector<8x256xf32> to vector<8x240xf32>
    %648 = vector.extract_strided_slice %559 {offsets = [0, 0], sizes = [8, 16], strides = [1, 1]} : vector<8x256xf32> to vector<8x16xf32>
    %649 = tpu.concatenate %647, %648 in 1 : vector<8x240xf32>, vector<8x16xf32> -> vector<8x256xf32>
    %650 = vector.broadcast %6 : vector<1x256xf32> to vector<8x256xf32>
    %651 = arith.mulf %649, %650 : vector<8x256xf32>
    %652 = vector.extract_strided_slice %559 {offsets = [0, 17], sizes = [8, 239], strides = [1, 1]} : vector<8x256xf32> to vector<8x239xf32>
    %653 = vector.extract_strided_slice %559 {offsets = [0, 0], sizes = [8, 17], strides = [1, 1]} : vector<8x256xf32> to vector<8x17xf32>
    %654 = tpu.concatenate %652, %653 in 1 : vector<8x239xf32>, vector<8x17xf32> -> vector<8x256xf32>
    %655 = vector.broadcast %7 : vector<1x256xf32> to vector<8x256xf32>
    %656 = arith.mulf %654, %655 : vector<8x256xf32>
    %657 = tpu.concatenate %621, %626, %631, %636, %559, %641, %646, %651, %656 in 0 : vector<8x256xf32>, vector<8x256xf32>, vector<8x256xf32>, vector<8x256xf32>, vector<8x256xf32>, vector<8x256xf32>, vector<8x256xf32>, vector<8x256xf32>, vector<8x256xf32> -> vector<72x256xf32>
    %c0_106 = arith.constant 0 : index
    %c0_107 = arith.constant 0 : index
    %658 = vector.load %arg35[%c0_106, %c0_107] : memref<8x72xf32, #tpu.memory_space<vmem>>, vector<8x72xf32>
    %cst_108 = arith.constant dense<0.000000e+00> : vector<8x256xf32>
    %659 = tpu.matmul %658, %657, %cst_108 {dimension_numbers = #tpu.dot_dimension_numbers<[1], [0], [0], [1], [0, 0, 1, 1], [], []>} : vector<8x72xf32>, vector<72x256xf32>, vector<8x256xf32> -> vector<8x256xf32>
    %c0_109 = arith.constant 0 : index
    %c0_110 = arith.constant 0 : index
    %660 = vector.load %arg36[%c0_109, %c0_110] : memref<8x1xf32, #tpu.memory_space<vmem>>, vector<8x1xf32>
    %661 = vector.broadcast %660 : vector<8x1xf32> to vector<8x256xf32>
    %662 = arith.addf %659, %661 : vector<8x256xf32>
    %cst_111 = arith.constant 0.000000e+00 : f32
    %663 = vector.broadcast %cst_111 : f32 to vector<8x256xf32>
    %664 = arith.maximumf %662, %663 : vector<8x256xf32>
    %665 = arith.mulf %664, %117 : vector<8x256xf32>
    %c0_112 = arith.constant 0 : index
    %c0_113 = arith.constant 0 : index
    %666 = vector.load %arg37[%c0_112, %c0_113] : memref<8x72xf32, #tpu.memory_space<vmem>>, vector<8x72xf32>
    %cst_114 = arith.constant dense<0.000000e+00> : vector<8x256xf32>
    %667 = tpu.matmul %666, %657, %cst_114 {dimension_numbers = #tpu.dot_dimension_numbers<[1], [0], [0], [1], [0, 0, 1, 1], [], []>} : vector<8x72xf32>, vector<72x256xf32>, vector<8x256xf32> -> vector<8x256xf32>
    %c0_115 = arith.constant 0 : index
    %c0_116 = arith.constant 0 : index
    %668 = vector.load %arg38[%c0_115, %c0_116] : memref<8x1xf32, #tpu.memory_space<vmem>>, vector<8x1xf32>
    %669 = vector.broadcast %668 : vector<8x1xf32> to vector<8x256xf32>
    %670 = arith.addf %667, %669 : vector<8x256xf32>
    %cst_117 = arith.constant 0.000000e+00 : f32
    %671 = vector.broadcast %cst_117 : f32 to vector<8x256xf32>
    %672 = arith.maximumf %670, %671 : vector<8x256xf32>
    %673 = arith.addf %665, %672 : vector<8x256xf32>
    %674 = vector.extract_strided_slice %616 {offsets = [0, 239], sizes = [8, 17], strides = [1, 1]} : vector<8x256xf32> to vector<8x17xf32>
    %675 = vector.extract_strided_slice %616 {offsets = [0, 0], sizes = [8, 239], strides = [1, 1]} : vector<8x256xf32> to vector<8x239xf32>
    %676 = tpu.concatenate %674, %675 in 1 : vector<8x17xf32>, vector<8x239xf32> -> vector<8x256xf32>
    %677 = vector.broadcast %0 : vector<1x256xf32> to vector<8x256xf32>
    %678 = arith.mulf %676, %677 : vector<8x256xf32>
    %679 = vector.extract_strided_slice %616 {offsets = [0, 240], sizes = [8, 16], strides = [1, 1]} : vector<8x256xf32> to vector<8x16xf32>
    %680 = vector.extract_strided_slice %616 {offsets = [0, 0], sizes = [8, 240], strides = [1, 1]} : vector<8x256xf32> to vector<8x240xf32>
    %681 = tpu.concatenate %679, %680 in 1 : vector<8x16xf32>, vector<8x240xf32> -> vector<8x256xf32>
    %682 = vector.broadcast %1 : vector<1x256xf32> to vector<8x256xf32>
    %683 = arith.mulf %681, %682 : vector<8x256xf32>
    %684 = vector.extract_strided_slice %616 {offsets = [0, 241], sizes = [8, 15], strides = [1, 1]} : vector<8x256xf32> to vector<8x15xf32>
    %685 = vector.extract_strided_slice %616 {offsets = [0, 0], sizes = [8, 241], strides = [1, 1]} : vector<8x256xf32> to vector<8x241xf32>
    %686 = tpu.concatenate %684, %685 in 1 : vector<8x15xf32>, vector<8x241xf32> -> vector<8x256xf32>
    %687 = vector.broadcast %2 : vector<1x256xf32> to vector<8x256xf32>
    %688 = arith.mulf %686, %687 : vector<8x256xf32>
    %689 = vector.extract_strided_slice %616 {offsets = [0, 255], sizes = [8, 1], strides = [1, 1]} : vector<8x256xf32> to vector<8x1xf32>
    %690 = vector.extract_strided_slice %616 {offsets = [0, 0], sizes = [8, 255], strides = [1, 1]} : vector<8x256xf32> to vector<8x255xf32>
    %691 = tpu.concatenate %689, %690 in 1 : vector<8x1xf32>, vector<8x255xf32> -> vector<8x256xf32>
    %692 = vector.broadcast %3 : vector<1x256xf32> to vector<8x256xf32>
    %693 = arith.mulf %691, %692 : vector<8x256xf32>
    %694 = vector.extract_strided_slice %616 {offsets = [0, 1], sizes = [8, 255], strides = [1, 1]} : vector<8x256xf32> to vector<8x255xf32>
    %695 = vector.extract_strided_slice %616 {offsets = [0, 0], sizes = [8, 1], strides = [1, 1]} : vector<8x256xf32> to vector<8x1xf32>
    %696 = tpu.concatenate %694, %695 in 1 : vector<8x255xf32>, vector<8x1xf32> -> vector<8x256xf32>
    %697 = vector.broadcast %4 : vector<1x256xf32> to vector<8x256xf32>
    %698 = arith.mulf %696, %697 : vector<8x256xf32>
    %699 = vector.extract_strided_slice %616 {offsets = [0, 15], sizes = [8, 241], strides = [1, 1]} : vector<8x256xf32> to vector<8x241xf32>
    %700 = vector.extract_strided_slice %616 {offsets = [0, 0], sizes = [8, 15], strides = [1, 1]} : vector<8x256xf32> to vector<8x15xf32>
    %701 = tpu.concatenate %699, %700 in 1 : vector<8x241xf32>, vector<8x15xf32> -> vector<8x256xf32>
    %702 = vector.broadcast %5 : vector<1x256xf32> to vector<8x256xf32>
    %703 = arith.mulf %701, %702 : vector<8x256xf32>
    %704 = vector.extract_strided_slice %616 {offsets = [0, 16], sizes = [8, 240], strides = [1, 1]} : vector<8x256xf32> to vector<8x240xf32>
    %705 = vector.extract_strided_slice %616 {offsets = [0, 0], sizes = [8, 16], strides = [1, 1]} : vector<8x256xf32> to vector<8x16xf32>
    %706 = tpu.concatenate %704, %705 in 1 : vector<8x240xf32>, vector<8x16xf32> -> vector<8x256xf32>
    %707 = vector.broadcast %6 : vector<1x256xf32> to vector<8x256xf32>
    %708 = arith.mulf %706, %707 : vector<8x256xf32>
    %709 = vector.extract_strided_slice %616 {offsets = [0, 17], sizes = [8, 239], strides = [1, 1]} : vector<8x256xf32> to vector<8x239xf32>
    %710 = vector.extract_strided_slice %616 {offsets = [0, 0], sizes = [8, 17], strides = [1, 1]} : vector<8x256xf32> to vector<8x17xf32>
    %711 = tpu.concatenate %709, %710 in 1 : vector<8x239xf32>, vector<8x17xf32> -> vector<8x256xf32>
    %712 = vector.broadcast %7 : vector<1x256xf32> to vector<8x256xf32>
    %713 = arith.mulf %711, %712 : vector<8x256xf32>
    %714 = tpu.concatenate %678, %683, %688, %693, %616, %698, %703, %708, %713 in 0 : vector<8x256xf32>, vector<8x256xf32>, vector<8x256xf32>, vector<8x256xf32>, vector<8x256xf32>, vector<8x256xf32>, vector<8x256xf32>, vector<8x256xf32>, vector<8x256xf32> -> vector<72x256xf32>
    %c0_118 = arith.constant 0 : index
    %c0_119 = arith.constant 0 : index
    %715 = vector.load %arg39[%c0_118, %c0_119] : memref<8x72xf32, #tpu.memory_space<vmem>>, vector<8x72xf32>
    %cst_120 = arith.constant dense<0.000000e+00> : vector<8x256xf32>
    %716 = tpu.matmul %715, %714, %cst_120 {dimension_numbers = #tpu.dot_dimension_numbers<[1], [0], [0], [1], [0, 0, 1, 1], [], []>} : vector<8x72xf32>, vector<72x256xf32>, vector<8x256xf32> -> vector<8x256xf32>
    %c0_121 = arith.constant 0 : index
    %c0_122 = arith.constant 0 : index
    %717 = vector.load %arg40[%c0_121, %c0_122] : memref<8x1xf32, #tpu.memory_space<vmem>>, vector<8x1xf32>
    %718 = vector.broadcast %717 : vector<8x1xf32> to vector<8x256xf32>
    %719 = arith.addf %716, %718 : vector<8x256xf32>
    %cst_123 = arith.constant 0.000000e+00 : f32
    %720 = vector.broadcast %cst_123 : f32 to vector<8x256xf32>
    %721 = arith.maximumf %719, %720 : vector<8x256xf32>
    %722 = vector.extract_strided_slice %721 {offsets = [0, 239], sizes = [8, 17], strides = [1, 1]} : vector<8x256xf32> to vector<8x17xf32>
    %723 = vector.extract_strided_slice %721 {offsets = [0, 0], sizes = [8, 239], strides = [1, 1]} : vector<8x256xf32> to vector<8x239xf32>
    %724 = tpu.concatenate %722, %723 in 1 : vector<8x17xf32>, vector<8x239xf32> -> vector<8x256xf32>
    %725 = vector.broadcast %0 : vector<1x256xf32> to vector<8x256xf32>
    %726 = arith.mulf %724, %725 : vector<8x256xf32>
    %727 = vector.extract_strided_slice %721 {offsets = [0, 240], sizes = [8, 16], strides = [1, 1]} : vector<8x256xf32> to vector<8x16xf32>
    %728 = vector.extract_strided_slice %721 {offsets = [0, 0], sizes = [8, 240], strides = [1, 1]} : vector<8x256xf32> to vector<8x240xf32>
    %729 = tpu.concatenate %727, %728 in 1 : vector<8x16xf32>, vector<8x240xf32> -> vector<8x256xf32>
    %730 = vector.broadcast %1 : vector<1x256xf32> to vector<8x256xf32>
    %731 = arith.mulf %729, %730 : vector<8x256xf32>
    %732 = vector.extract_strided_slice %721 {offsets = [0, 241], sizes = [8, 15], strides = [1, 1]} : vector<8x256xf32> to vector<8x15xf32>
    %733 = vector.extract_strided_slice %721 {offsets = [0, 0], sizes = [8, 241], strides = [1, 1]} : vector<8x256xf32> to vector<8x241xf32>
    %734 = tpu.concatenate %732, %733 in 1 : vector<8x15xf32>, vector<8x241xf32> -> vector<8x256xf32>
    %735 = vector.broadcast %2 : vector<1x256xf32> to vector<8x256xf32>
    %736 = arith.mulf %734, %735 : vector<8x256xf32>
    %737 = vector.extract_strided_slice %721 {offsets = [0, 255], sizes = [8, 1], strides = [1, 1]} : vector<8x256xf32> to vector<8x1xf32>
    %738 = vector.extract_strided_slice %721 {offsets = [0, 0], sizes = [8, 255], strides = [1, 1]} : vector<8x256xf32> to vector<8x255xf32>
    %739 = tpu.concatenate %737, %738 in 1 : vector<8x1xf32>, vector<8x255xf32> -> vector<8x256xf32>
    %740 = vector.broadcast %3 : vector<1x256xf32> to vector<8x256xf32>
    %741 = arith.mulf %739, %740 : vector<8x256xf32>
    %742 = vector.extract_strided_slice %721 {offsets = [0, 1], sizes = [8, 255], strides = [1, 1]} : vector<8x256xf32> to vector<8x255xf32>
    %743 = vector.extract_strided_slice %721 {offsets = [0, 0], sizes = [8, 1], strides = [1, 1]} : vector<8x256xf32> to vector<8x1xf32>
    %744 = tpu.concatenate %742, %743 in 1 : vector<8x255xf32>, vector<8x1xf32> -> vector<8x256xf32>
    %745 = vector.broadcast %4 : vector<1x256xf32> to vector<8x256xf32>
    %746 = arith.mulf %744, %745 : vector<8x256xf32>
    %747 = vector.extract_strided_slice %721 {offsets = [0, 15], sizes = [8, 241], strides = [1, 1]} : vector<8x256xf32> to vector<8x241xf32>
    %748 = vector.extract_strided_slice %721 {offsets = [0, 0], sizes = [8, 15], strides = [1, 1]} : vector<8x256xf32> to vector<8x15xf32>
    %749 = tpu.concatenate %747, %748 in 1 : vector<8x241xf32>, vector<8x15xf32> -> vector<8x256xf32>
    %750 = vector.broadcast %5 : vector<1x256xf32> to vector<8x256xf32>
    %751 = arith.mulf %749, %750 : vector<8x256xf32>
    %752 = vector.extract_strided_slice %721 {offsets = [0, 16], sizes = [8, 240], strides = [1, 1]} : vector<8x256xf32> to vector<8x240xf32>
    %753 = vector.extract_strided_slice %721 {offsets = [0, 0], sizes = [8, 16], strides = [1, 1]} : vector<8x256xf32> to vector<8x16xf32>
    %754 = tpu.concatenate %752, %753 in 1 : vector<8x240xf32>, vector<8x16xf32> -> vector<8x256xf32>
    %755 = vector.broadcast %6 : vector<1x256xf32> to vector<8x256xf32>
    %756 = arith.mulf %754, %755 : vector<8x256xf32>
    %757 = vector.extract_strided_slice %721 {offsets = [0, 17], sizes = [8, 239], strides = [1, 1]} : vector<8x256xf32> to vector<8x239xf32>
    %758 = vector.extract_strided_slice %721 {offsets = [0, 0], sizes = [8, 17], strides = [1, 1]} : vector<8x256xf32> to vector<8x17xf32>
    %759 = tpu.concatenate %757, %758 in 1 : vector<8x239xf32>, vector<8x17xf32> -> vector<8x256xf32>
    %760 = vector.broadcast %7 : vector<1x256xf32> to vector<8x256xf32>
    %761 = arith.mulf %759, %760 : vector<8x256xf32>
    %762 = tpu.concatenate %726, %731, %736, %741, %721, %746, %751, %756, %761 in 0 : vector<8x256xf32>, vector<8x256xf32>, vector<8x256xf32>, vector<8x256xf32>, vector<8x256xf32>, vector<8x256xf32>, vector<8x256xf32>, vector<8x256xf32>, vector<8x256xf32> -> vector<72x256xf32>
    %c0_124 = arith.constant 0 : index
    %c0_125 = arith.constant 0 : index
    %763 = vector.load %arg41[%c0_124, %c0_125] : memref<8x72xf32, #tpu.memory_space<vmem>>, vector<8x72xf32>
    %cst_126 = arith.constant dense<0.000000e+00> : vector<8x256xf32>
    %764 = tpu.matmul %763, %762, %cst_126 {dimension_numbers = #tpu.dot_dimension_numbers<[1], [0], [0], [1], [0, 0, 1, 1], [], []>} : vector<8x72xf32>, vector<72x256xf32>, vector<8x256xf32> -> vector<8x256xf32>
    %c0_127 = arith.constant 0 : index
    %c0_128 = arith.constant 0 : index
    %765 = vector.load %arg42[%c0_127, %c0_128] : memref<8x1xf32, #tpu.memory_space<vmem>>, vector<8x1xf32>
    %766 = vector.broadcast %765 : vector<8x1xf32> to vector<8x256xf32>
    %767 = arith.addf %764, %766 : vector<8x256xf32>
    %cst_129 = arith.constant 0.000000e+00 : f32
    %768 = vector.broadcast %cst_129 : f32 to vector<8x256xf32>
    %769 = arith.maximumf %767, %768 : vector<8x256xf32>
    %770 = vector.extract_strided_slice %673 {offsets = [0, 239], sizes = [8, 17], strides = [1, 1]} : vector<8x256xf32> to vector<8x17xf32>
    %771 = vector.extract_strided_slice %673 {offsets = [0, 0], sizes = [8, 239], strides = [1, 1]} : vector<8x256xf32> to vector<8x239xf32>
    %772 = tpu.concatenate %770, %771 in 1 : vector<8x17xf32>, vector<8x239xf32> -> vector<8x256xf32>
    %773 = vector.broadcast %0 : vector<1x256xf32> to vector<8x256xf32>
    %774 = arith.mulf %772, %773 : vector<8x256xf32>
    %775 = vector.extract_strided_slice %673 {offsets = [0, 240], sizes = [8, 16], strides = [1, 1]} : vector<8x256xf32> to vector<8x16xf32>
    %776 = vector.extract_strided_slice %673 {offsets = [0, 0], sizes = [8, 240], strides = [1, 1]} : vector<8x256xf32> to vector<8x240xf32>
    %777 = tpu.concatenate %775, %776 in 1 : vector<8x16xf32>, vector<8x240xf32> -> vector<8x256xf32>
    %778 = vector.broadcast %1 : vector<1x256xf32> to vector<8x256xf32>
    %779 = arith.mulf %777, %778 : vector<8x256xf32>
    %780 = vector.extract_strided_slice %673 {offsets = [0, 241], sizes = [8, 15], strides = [1, 1]} : vector<8x256xf32> to vector<8x15xf32>
    %781 = vector.extract_strided_slice %673 {offsets = [0, 0], sizes = [8, 241], strides = [1, 1]} : vector<8x256xf32> to vector<8x241xf32>
    %782 = tpu.concatenate %780, %781 in 1 : vector<8x15xf32>, vector<8x241xf32> -> vector<8x256xf32>
    %783 = vector.broadcast %2 : vector<1x256xf32> to vector<8x256xf32>
    %784 = arith.mulf %782, %783 : vector<8x256xf32>
    %785 = vector.extract_strided_slice %673 {offsets = [0, 255], sizes = [8, 1], strides = [1, 1]} : vector<8x256xf32> to vector<8x1xf32>
    %786 = vector.extract_strided_slice %673 {offsets = [0, 0], sizes = [8, 255], strides = [1, 1]} : vector<8x256xf32> to vector<8x255xf32>
    %787 = tpu.concatenate %785, %786 in 1 : vector<8x1xf32>, vector<8x255xf32> -> vector<8x256xf32>
    %788 = vector.broadcast %3 : vector<1x256xf32> to vector<8x256xf32>
    %789 = arith.mulf %787, %788 : vector<8x256xf32>
    %790 = vector.extract_strided_slice %673 {offsets = [0, 1], sizes = [8, 255], strides = [1, 1]} : vector<8x256xf32> to vector<8x255xf32>
    %791 = vector.extract_strided_slice %673 {offsets = [0, 0], sizes = [8, 1], strides = [1, 1]} : vector<8x256xf32> to vector<8x1xf32>
    %792 = tpu.concatenate %790, %791 in 1 : vector<8x255xf32>, vector<8x1xf32> -> vector<8x256xf32>
    %793 = vector.broadcast %4 : vector<1x256xf32> to vector<8x256xf32>
    %794 = arith.mulf %792, %793 : vector<8x256xf32>
    %795 = vector.extract_strided_slice %673 {offsets = [0, 15], sizes = [8, 241], strides = [1, 1]} : vector<8x256xf32> to vector<8x241xf32>
    %796 = vector.extract_strided_slice %673 {offsets = [0, 0], sizes = [8, 15], strides = [1, 1]} : vector<8x256xf32> to vector<8x15xf32>
    %797 = tpu.concatenate %795, %796 in 1 : vector<8x241xf32>, vector<8x15xf32> -> vector<8x256xf32>
    %798 = vector.broadcast %5 : vector<1x256xf32> to vector<8x256xf32>
    %799 = arith.mulf %797, %798 : vector<8x256xf32>
    %800 = vector.extract_strided_slice %673 {offsets = [0, 16], sizes = [8, 240], strides = [1, 1]} : vector<8x256xf32> to vector<8x240xf32>
    %801 = vector.extract_strided_slice %673 {offsets = [0, 0], sizes = [8, 16], strides = [1, 1]} : vector<8x256xf32> to vector<8x16xf32>
    %802 = tpu.concatenate %800, %801 in 1 : vector<8x240xf32>, vector<8x16xf32> -> vector<8x256xf32>
    %803 = vector.broadcast %6 : vector<1x256xf32> to vector<8x256xf32>
    %804 = arith.mulf %802, %803 : vector<8x256xf32>
    %805 = vector.extract_strided_slice %673 {offsets = [0, 17], sizes = [8, 239], strides = [1, 1]} : vector<8x256xf32> to vector<8x239xf32>
    %806 = vector.extract_strided_slice %673 {offsets = [0, 0], sizes = [8, 17], strides = [1, 1]} : vector<8x256xf32> to vector<8x17xf32>
    %807 = tpu.concatenate %805, %806 in 1 : vector<8x239xf32>, vector<8x17xf32> -> vector<8x256xf32>
    %808 = vector.broadcast %7 : vector<1x256xf32> to vector<8x256xf32>
    %809 = arith.mulf %807, %808 : vector<8x256xf32>
    %810 = tpu.concatenate %774, %779, %784, %789, %673, %794, %799, %804, %809 in 0 : vector<8x256xf32>, vector<8x256xf32>, vector<8x256xf32>, vector<8x256xf32>, vector<8x256xf32>, vector<8x256xf32>, vector<8x256xf32>, vector<8x256xf32>, vector<8x256xf32> -> vector<72x256xf32>
    %c0_130 = arith.constant 0 : index
    %c0_131 = arith.constant 0 : index
    %811 = vector.load %arg43[%c0_130, %c0_131] : memref<8x72xf32, #tpu.memory_space<vmem>>, vector<8x72xf32>
    %cst_132 = arith.constant dense<0.000000e+00> : vector<8x256xf32>
    %812 = tpu.matmul %811, %810, %cst_132 {dimension_numbers = #tpu.dot_dimension_numbers<[1], [0], [0], [1], [0, 0, 1, 1], [], []>} : vector<8x72xf32>, vector<72x256xf32>, vector<8x256xf32> -> vector<8x256xf32>
    %c0_133 = arith.constant 0 : index
    %c0_134 = arith.constant 0 : index
    %813 = vector.load %arg44[%c0_133, %c0_134] : memref<8x1xf32, #tpu.memory_space<vmem>>, vector<8x1xf32>
    %814 = vector.broadcast %813 : vector<8x1xf32> to vector<8x256xf32>
    %815 = arith.addf %812, %814 : vector<8x256xf32>
    %cst_135 = arith.constant 0.000000e+00 : f32
    %816 = vector.broadcast %cst_135 : f32 to vector<8x256xf32>
    %817 = arith.maximumf %815, %816 : vector<8x256xf32>
    %818 = vector.extract_strided_slice %817 {offsets = [0, 239], sizes = [8, 17], strides = [1, 1]} : vector<8x256xf32> to vector<8x17xf32>
    %819 = vector.extract_strided_slice %817 {offsets = [0, 0], sizes = [8, 239], strides = [1, 1]} : vector<8x256xf32> to vector<8x239xf32>
    %820 = tpu.concatenate %818, %819 in 1 : vector<8x17xf32>, vector<8x239xf32> -> vector<8x256xf32>
    %821 = vector.broadcast %0 : vector<1x256xf32> to vector<8x256xf32>
    %822 = arith.mulf %820, %821 : vector<8x256xf32>
    %823 = vector.extract_strided_slice %817 {offsets = [0, 240], sizes = [8, 16], strides = [1, 1]} : vector<8x256xf32> to vector<8x16xf32>
    %824 = vector.extract_strided_slice %817 {offsets = [0, 0], sizes = [8, 240], strides = [1, 1]} : vector<8x256xf32> to vector<8x240xf32>
    %825 = tpu.concatenate %823, %824 in 1 : vector<8x16xf32>, vector<8x240xf32> -> vector<8x256xf32>
    %826 = vector.broadcast %1 : vector<1x256xf32> to vector<8x256xf32>
    %827 = arith.mulf %825, %826 : vector<8x256xf32>
    %828 = vector.extract_strided_slice %817 {offsets = [0, 241], sizes = [8, 15], strides = [1, 1]} : vector<8x256xf32> to vector<8x15xf32>
    %829 = vector.extract_strided_slice %817 {offsets = [0, 0], sizes = [8, 241], strides = [1, 1]} : vector<8x256xf32> to vector<8x241xf32>
    %830 = tpu.concatenate %828, %829 in 1 : vector<8x15xf32>, vector<8x241xf32> -> vector<8x256xf32>
    %831 = vector.broadcast %2 : vector<1x256xf32> to vector<8x256xf32>
    %832 = arith.mulf %830, %831 : vector<8x256xf32>
    %833 = vector.extract_strided_slice %817 {offsets = [0, 255], sizes = [8, 1], strides = [1, 1]} : vector<8x256xf32> to vector<8x1xf32>
    %834 = vector.extract_strided_slice %817 {offsets = [0, 0], sizes = [8, 255], strides = [1, 1]} : vector<8x256xf32> to vector<8x255xf32>
    %835 = tpu.concatenate %833, %834 in 1 : vector<8x1xf32>, vector<8x255xf32> -> vector<8x256xf32>
    %836 = vector.broadcast %3 : vector<1x256xf32> to vector<8x256xf32>
    %837 = arith.mulf %835, %836 : vector<8x256xf32>
    %838 = vector.extract_strided_slice %817 {offsets = [0, 1], sizes = [8, 255], strides = [1, 1]} : vector<8x256xf32> to vector<8x255xf32>
    %839 = vector.extract_strided_slice %817 {offsets = [0, 0], sizes = [8, 1], strides = [1, 1]} : vector<8x256xf32> to vector<8x1xf32>
    %840 = tpu.concatenate %838, %839 in 1 : vector<8x255xf32>, vector<8x1xf32> -> vector<8x256xf32>
    %841 = vector.broadcast %4 : vector<1x256xf32> to vector<8x256xf32>
    %842 = arith.mulf %840, %841 : vector<8x256xf32>
    %843 = vector.extract_strided_slice %817 {offsets = [0, 15], sizes = [8, 241], strides = [1, 1]} : vector<8x256xf32> to vector<8x241xf32>
    %844 = vector.extract_strided_slice %817 {offsets = [0, 0], sizes = [8, 15], strides = [1, 1]} : vector<8x256xf32> to vector<8x15xf32>
    %845 = tpu.concatenate %843, %844 in 1 : vector<8x241xf32>, vector<8x15xf32> -> vector<8x256xf32>
    %846 = vector.broadcast %5 : vector<1x256xf32> to vector<8x256xf32>
    %847 = arith.mulf %845, %846 : vector<8x256xf32>
    %848 = vector.extract_strided_slice %817 {offsets = [0, 16], sizes = [8, 240], strides = [1, 1]} : vector<8x256xf32> to vector<8x240xf32>
    %849 = vector.extract_strided_slice %817 {offsets = [0, 0], sizes = [8, 16], strides = [1, 1]} : vector<8x256xf32> to vector<8x16xf32>
    %850 = tpu.concatenate %848, %849 in 1 : vector<8x240xf32>, vector<8x16xf32> -> vector<8x256xf32>
    %851 = vector.broadcast %6 : vector<1x256xf32> to vector<8x256xf32>
    %852 = arith.mulf %850, %851 : vector<8x256xf32>
    %853 = vector.extract_strided_slice %817 {offsets = [0, 17], sizes = [8, 239], strides = [1, 1]} : vector<8x256xf32> to vector<8x239xf32>
    %854 = vector.extract_strided_slice %817 {offsets = [0, 0], sizes = [8, 17], strides = [1, 1]} : vector<8x256xf32> to vector<8x17xf32>
    %855 = tpu.concatenate %853, %854 in 1 : vector<8x239xf32>, vector<8x17xf32> -> vector<8x256xf32>
    %856 = vector.broadcast %7 : vector<1x256xf32> to vector<8x256xf32>
    %857 = arith.mulf %855, %856 : vector<8x256xf32>
    %858 = tpu.concatenate %822, %827, %832, %837, %817, %842, %847, %852, %857 in 0 : vector<8x256xf32>, vector<8x256xf32>, vector<8x256xf32>, vector<8x256xf32>, vector<8x256xf32>, vector<8x256xf32>, vector<8x256xf32>, vector<8x256xf32>, vector<8x256xf32> -> vector<72x256xf32>
    %c0_136 = arith.constant 0 : index
    %c0_137 = arith.constant 0 : index
    %859 = vector.load %arg45[%c0_136, %c0_137] : memref<8x72xf32, #tpu.memory_space<vmem>>, vector<8x72xf32>
    %cst_138 = arith.constant dense<0.000000e+00> : vector<8x256xf32>
    %860 = tpu.matmul %859, %858, %cst_138 {dimension_numbers = #tpu.dot_dimension_numbers<[1], [0], [0], [1], [0, 0, 1, 1], [], []>} : vector<8x72xf32>, vector<72x256xf32>, vector<8x256xf32> -> vector<8x256xf32>
    %c0_139 = arith.constant 0 : index
    %c0_140 = arith.constant 0 : index
    %861 = vector.load %arg46[%c0_139, %c0_140] : memref<8x1xf32, #tpu.memory_space<vmem>>, vector<8x1xf32>
    %862 = vector.broadcast %861 : vector<8x1xf32> to vector<8x256xf32>
    %863 = arith.addf %860, %862 : vector<8x256xf32>
    %cst_141 = arith.constant 0.000000e+00 : f32
    %864 = vector.broadcast %cst_141 : f32 to vector<8x256xf32>
    %865 = arith.maximumf %863, %864 : vector<8x256xf32>
    %866 = tpu.concatenate %769, %865, %117 in 0 : vector<8x256xf32>, vector<8x256xf32>, vector<8x256xf32> -> vector<24x256xf32>
    %867 = vector.extract_strided_slice %866 {offsets = [0, 239], sizes = [24, 17], strides = [1, 1]} : vector<24x256xf32> to vector<24x17xf32>
    %868 = vector.extract_strided_slice %866 {offsets = [0, 0], sizes = [24, 239], strides = [1, 1]} : vector<24x256xf32> to vector<24x239xf32>
    %869 = tpu.concatenate %867, %868 in 1 : vector<24x17xf32>, vector<24x239xf32> -> vector<24x256xf32>
    %870 = vector.broadcast %0 : vector<1x256xf32> to vector<24x256xf32>
    %871 = arith.mulf %869, %870 : vector<24x256xf32>
    %872 = vector.extract_strided_slice %866 {offsets = [0, 240], sizes = [24, 16], strides = [1, 1]} : vector<24x256xf32> to vector<24x16xf32>
    %873 = vector.extract_strided_slice %866 {offsets = [0, 0], sizes = [24, 240], strides = [1, 1]} : vector<24x256xf32> to vector<24x240xf32>
    %874 = tpu.concatenate %872, %873 in 1 : vector<24x16xf32>, vector<24x240xf32> -> vector<24x256xf32>
    %875 = vector.broadcast %1 : vector<1x256xf32> to vector<24x256xf32>
    %876 = arith.mulf %874, %875 : vector<24x256xf32>
    %877 = vector.extract_strided_slice %866 {offsets = [0, 241], sizes = [24, 15], strides = [1, 1]} : vector<24x256xf32> to vector<24x15xf32>
    %878 = vector.extract_strided_slice %866 {offsets = [0, 0], sizes = [24, 241], strides = [1, 1]} : vector<24x256xf32> to vector<24x241xf32>
    %879 = tpu.concatenate %877, %878 in 1 : vector<24x15xf32>, vector<24x241xf32> -> vector<24x256xf32>
    %880 = vector.broadcast %2 : vector<1x256xf32> to vector<24x256xf32>
    %881 = arith.mulf %879, %880 : vector<24x256xf32>
    %882 = vector.extract_strided_slice %866 {offsets = [0, 255], sizes = [24, 1], strides = [1, 1]} : vector<24x256xf32> to vector<24x1xf32>
    %883 = vector.extract_strided_slice %866 {offsets = [0, 0], sizes = [24, 255], strides = [1, 1]} : vector<24x256xf32> to vector<24x255xf32>
    %884 = tpu.concatenate %882, %883 in 1 : vector<24x1xf32>, vector<24x255xf32> -> vector<24x256xf32>
    %885 = vector.broadcast %3 : vector<1x256xf32> to vector<24x256xf32>
    %886 = arith.mulf %884, %885 : vector<24x256xf32>
    %887 = vector.extract_strided_slice %866 {offsets = [0, 1], sizes = [24, 255], strides = [1, 1]} : vector<24x256xf32> to vector<24x255xf32>
    %888 = vector.extract_strided_slice %866 {offsets = [0, 0], sizes = [24, 1], strides = [1, 1]} : vector<24x256xf32> to vector<24x1xf32>
    %889 = tpu.concatenate %887, %888 in 1 : vector<24x255xf32>, vector<24x1xf32> -> vector<24x256xf32>
    %890 = vector.broadcast %4 : vector<1x256xf32> to vector<24x256xf32>
    %891 = arith.mulf %889, %890 : vector<24x256xf32>
    %892 = vector.extract_strided_slice %866 {offsets = [0, 15], sizes = [24, 241], strides = [1, 1]} : vector<24x256xf32> to vector<24x241xf32>
    %893 = vector.extract_strided_slice %866 {offsets = [0, 0], sizes = [24, 15], strides = [1, 1]} : vector<24x256xf32> to vector<24x15xf32>
    %894 = tpu.concatenate %892, %893 in 1 : vector<24x241xf32>, vector<24x15xf32> -> vector<24x256xf32>
    %895 = vector.broadcast %5 : vector<1x256xf32> to vector<24x256xf32>
    %896 = arith.mulf %894, %895 : vector<24x256xf32>
    %897 = vector.extract_strided_slice %866 {offsets = [0, 16], sizes = [24, 240], strides = [1, 1]} : vector<24x256xf32> to vector<24x240xf32>
    %898 = vector.extract_strided_slice %866 {offsets = [0, 0], sizes = [24, 16], strides = [1, 1]} : vector<24x256xf32> to vector<24x16xf32>
    %899 = tpu.concatenate %897, %898 in 1 : vector<24x240xf32>, vector<24x16xf32> -> vector<24x256xf32>
    %900 = vector.broadcast %6 : vector<1x256xf32> to vector<24x256xf32>
    %901 = arith.mulf %899, %900 : vector<24x256xf32>
    %902 = vector.extract_strided_slice %866 {offsets = [0, 17], sizes = [24, 239], strides = [1, 1]} : vector<24x256xf32> to vector<24x239xf32>
    %903 = vector.extract_strided_slice %866 {offsets = [0, 0], sizes = [24, 17], strides = [1, 1]} : vector<24x256xf32> to vector<24x17xf32>
    %904 = tpu.concatenate %902, %903 in 1 : vector<24x239xf32>, vector<24x17xf32> -> vector<24x256xf32>
    %905 = vector.broadcast %7 : vector<1x256xf32> to vector<24x256xf32>
    %906 = arith.mulf %904, %905 : vector<24x256xf32>
    %907 = tpu.concatenate %871, %876, %881, %886, %866, %891, %896, %901, %906 in 0 : vector<24x256xf32>, vector<24x256xf32>, vector<24x256xf32>, vector<24x256xf32>, vector<24x256xf32>, vector<24x256xf32>, vector<24x256xf32>, vector<24x256xf32>, vector<24x256xf32> -> vector<216x256xf32>
    %c0_142 = arith.constant 0 : index
    %c0_143 = arith.constant 0 : index
    %908 = vector.load %arg47[%c0_142, %c0_143] : memref<24x216xf32, #tpu.memory_space<vmem>>, vector<24x216xf32>
    %cst_144 = arith.constant dense<0.000000e+00> : vector<24x256xf32>
    %909 = tpu.matmul %908, %907, %cst_144 {dimension_numbers = #tpu.dot_dimension_numbers<[1], [0], [0], [1], [0, 0, 1, 1], [], []>} : vector<24x216xf32>, vector<216x256xf32>, vector<24x256xf32> -> vector<24x256xf32>
    %c0_145 = arith.constant 0 : index
    %c0_146 = arith.constant 0 : index
    %910 = vector.load %arg48[%c0_145, %c0_146] : memref<24x1xf32, #tpu.memory_space<vmem>>, vector<24x1xf32>
    %911 = vector.broadcast %910 : vector<24x1xf32> to vector<24x256xf32>
    %912 = arith.addf %909, %911 : vector<24x256xf32>
    %cst_147 = arith.constant 0.000000e+00 : f32
    %913 = vector.broadcast %cst_147 : f32 to vector<24x256xf32>
    %914 = arith.maximumf %912, %913 : vector<24x256xf32>
    %915 = vector.extract_strided_slice %914 {offsets = [0, 239], sizes = [24, 17], strides = [1, 1]} : vector<24x256xf32> to vector<24x17xf32>
    %916 = vector.extract_strided_slice %914 {offsets = [0, 0], sizes = [24, 239], strides = [1, 1]} : vector<24x256xf32> to vector<24x239xf32>
    %917 = tpu.concatenate %915, %916 in 1 : vector<24x17xf32>, vector<24x239xf32> -> vector<24x256xf32>
    %918 = vector.broadcast %0 : vector<1x256xf32> to vector<24x256xf32>
    %919 = arith.mulf %917, %918 : vector<24x256xf32>
    %920 = vector.extract_strided_slice %914 {offsets = [0, 240], sizes = [24, 16], strides = [1, 1]} : vector<24x256xf32> to vector<24x16xf32>
    %921 = vector.extract_strided_slice %914 {offsets = [0, 0], sizes = [24, 240], strides = [1, 1]} : vector<24x256xf32> to vector<24x240xf32>
    %922 = tpu.concatenate %920, %921 in 1 : vector<24x16xf32>, vector<24x240xf32> -> vector<24x256xf32>
    %923 = vector.broadcast %1 : vector<1x256xf32> to vector<24x256xf32>
    %924 = arith.mulf %922, %923 : vector<24x256xf32>
    %925 = vector.extract_strided_slice %914 {offsets = [0, 241], sizes = [24, 15], strides = [1, 1]} : vector<24x256xf32> to vector<24x15xf32>
    %926 = vector.extract_strided_slice %914 {offsets = [0, 0], sizes = [24, 241], strides = [1, 1]} : vector<24x256xf32> to vector<24x241xf32>
    %927 = tpu.concatenate %925, %926 in 1 : vector<24x15xf32>, vector<24x241xf32> -> vector<24x256xf32>
    %928 = vector.broadcast %2 : vector<1x256xf32> to vector<24x256xf32>
    %929 = arith.mulf %927, %928 : vector<24x256xf32>
    %930 = vector.extract_strided_slice %914 {offsets = [0, 255], sizes = [24, 1], strides = [1, 1]} : vector<24x256xf32> to vector<24x1xf32>
    %931 = vector.extract_strided_slice %914 {offsets = [0, 0], sizes = [24, 255], strides = [1, 1]} : vector<24x256xf32> to vector<24x255xf32>
    %932 = tpu.concatenate %930, %931 in 1 : vector<24x1xf32>, vector<24x255xf32> -> vector<24x256xf32>
    %933 = vector.broadcast %3 : vector<1x256xf32> to vector<24x256xf32>
    %934 = arith.mulf %932, %933 : vector<24x256xf32>
    %935 = vector.extract_strided_slice %914 {offsets = [0, 1], sizes = [24, 255], strides = [1, 1]} : vector<24x256xf32> to vector<24x255xf32>
    %936 = vector.extract_strided_slice %914 {offsets = [0, 0], sizes = [24, 1], strides = [1, 1]} : vector<24x256xf32> to vector<24x1xf32>
    %937 = tpu.concatenate %935, %936 in 1 : vector<24x255xf32>, vector<24x1xf32> -> vector<24x256xf32>
    %938 = vector.broadcast %4 : vector<1x256xf32> to vector<24x256xf32>
    %939 = arith.mulf %937, %938 : vector<24x256xf32>
    %940 = vector.extract_strided_slice %914 {offsets = [0, 15], sizes = [24, 241], strides = [1, 1]} : vector<24x256xf32> to vector<24x241xf32>
    %941 = vector.extract_strided_slice %914 {offsets = [0, 0], sizes = [24, 15], strides = [1, 1]} : vector<24x256xf32> to vector<24x15xf32>
    %942 = tpu.concatenate %940, %941 in 1 : vector<24x241xf32>, vector<24x15xf32> -> vector<24x256xf32>
    %943 = vector.broadcast %5 : vector<1x256xf32> to vector<24x256xf32>
    %944 = arith.mulf %942, %943 : vector<24x256xf32>
    %945 = vector.extract_strided_slice %914 {offsets = [0, 16], sizes = [24, 240], strides = [1, 1]} : vector<24x256xf32> to vector<24x240xf32>
    %946 = vector.extract_strided_slice %914 {offsets = [0, 0], sizes = [24, 16], strides = [1, 1]} : vector<24x256xf32> to vector<24x16xf32>
    %947 = tpu.concatenate %945, %946 in 1 : vector<24x240xf32>, vector<24x16xf32> -> vector<24x256xf32>
    %948 = vector.broadcast %6 : vector<1x256xf32> to vector<24x256xf32>
    %949 = arith.mulf %947, %948 : vector<24x256xf32>
    %950 = vector.extract_strided_slice %914 {offsets = [0, 17], sizes = [24, 239], strides = [1, 1]} : vector<24x256xf32> to vector<24x239xf32>
    %951 = vector.extract_strided_slice %914 {offsets = [0, 0], sizes = [24, 17], strides = [1, 1]} : vector<24x256xf32> to vector<24x17xf32>
    %952 = tpu.concatenate %950, %951 in 1 : vector<24x239xf32>, vector<24x17xf32> -> vector<24x256xf32>
    %953 = vector.broadcast %7 : vector<1x256xf32> to vector<24x256xf32>
    %954 = arith.mulf %952, %953 : vector<24x256xf32>
    %955 = tpu.concatenate %919, %924, %929, %934, %914, %939, %944, %949, %954 in 0 : vector<24x256xf32>, vector<24x256xf32>, vector<24x256xf32>, vector<24x256xf32>, vector<24x256xf32>, vector<24x256xf32>, vector<24x256xf32>, vector<24x256xf32>, vector<24x256xf32> -> vector<216x256xf32>
    %c0_148 = arith.constant 0 : index
    %c0_149 = arith.constant 0 : index
    %956 = vector.load %arg49[%c0_148, %c0_149] : memref<24x216xf32, #tpu.memory_space<vmem>>, vector<24x216xf32>
    %cst_150 = arith.constant dense<0.000000e+00> : vector<24x256xf32>
    %957 = tpu.matmul %956, %955, %cst_150 {dimension_numbers = #tpu.dot_dimension_numbers<[1], [0], [0], [1], [0, 0, 1, 1], [], []>} : vector<24x216xf32>, vector<216x256xf32>, vector<24x256xf32> -> vector<24x256xf32>
    %c0_151 = arith.constant 0 : index
    %c0_152 = arith.constant 0 : index
    %958 = vector.load %arg50[%c0_151, %c0_152] : memref<24x1xf32, #tpu.memory_space<vmem>>, vector<24x1xf32>
    %959 = vector.broadcast %958 : vector<24x1xf32> to vector<24x256xf32>
    %960 = arith.addf %957, %959 : vector<24x256xf32>
    %cst_153 = arith.constant 0.000000e+00 : f32
    %961 = vector.broadcast %cst_153 : f32 to vector<24x256xf32>
    %962 = arith.maximumf %960, %961 : vector<24x256xf32>
    %963 = vector.extract_strided_slice %962 {offsets = [0, 239], sizes = [24, 17], strides = [1, 1]} : vector<24x256xf32> to vector<24x17xf32>
    %964 = vector.extract_strided_slice %962 {offsets = [0, 0], sizes = [24, 239], strides = [1, 1]} : vector<24x256xf32> to vector<24x239xf32>
    %965 = tpu.concatenate %963, %964 in 1 : vector<24x17xf32>, vector<24x239xf32> -> vector<24x256xf32>
    %966 = vector.broadcast %0 : vector<1x256xf32> to vector<24x256xf32>
    %967 = arith.mulf %965, %966 : vector<24x256xf32>
    %968 = vector.extract_strided_slice %962 {offsets = [0, 240], sizes = [24, 16], strides = [1, 1]} : vector<24x256xf32> to vector<24x16xf32>
    %969 = vector.extract_strided_slice %962 {offsets = [0, 0], sizes = [24, 240], strides = [1, 1]} : vector<24x256xf32> to vector<24x240xf32>
    %970 = tpu.concatenate %968, %969 in 1 : vector<24x16xf32>, vector<24x240xf32> -> vector<24x256xf32>
    %971 = vector.broadcast %1 : vector<1x256xf32> to vector<24x256xf32>
    %972 = arith.mulf %970, %971 : vector<24x256xf32>
    %973 = vector.extract_strided_slice %962 {offsets = [0, 241], sizes = [24, 15], strides = [1, 1]} : vector<24x256xf32> to vector<24x15xf32>
    %974 = vector.extract_strided_slice %962 {offsets = [0, 0], sizes = [24, 241], strides = [1, 1]} : vector<24x256xf32> to vector<24x241xf32>
    %975 = tpu.concatenate %973, %974 in 1 : vector<24x15xf32>, vector<24x241xf32> -> vector<24x256xf32>
    %976 = vector.broadcast %2 : vector<1x256xf32> to vector<24x256xf32>
    %977 = arith.mulf %975, %976 : vector<24x256xf32>
    %978 = vector.extract_strided_slice %962 {offsets = [0, 255], sizes = [24, 1], strides = [1, 1]} : vector<24x256xf32> to vector<24x1xf32>
    %979 = vector.extract_strided_slice %962 {offsets = [0, 0], sizes = [24, 255], strides = [1, 1]} : vector<24x256xf32> to vector<24x255xf32>
    %980 = tpu.concatenate %978, %979 in 1 : vector<24x1xf32>, vector<24x255xf32> -> vector<24x256xf32>
    %981 = vector.broadcast %3 : vector<1x256xf32> to vector<24x256xf32>
    %982 = arith.mulf %980, %981 : vector<24x256xf32>
    %983 = vector.extract_strided_slice %962 {offsets = [0, 1], sizes = [24, 255], strides = [1, 1]} : vector<24x256xf32> to vector<24x255xf32>
    %984 = vector.extract_strided_slice %962 {offsets = [0, 0], sizes = [24, 1], strides = [1, 1]} : vector<24x256xf32> to vector<24x1xf32>
    %985 = tpu.concatenate %983, %984 in 1 : vector<24x255xf32>, vector<24x1xf32> -> vector<24x256xf32>
    %986 = vector.broadcast %4 : vector<1x256xf32> to vector<24x256xf32>
    %987 = arith.mulf %985, %986 : vector<24x256xf32>
    %988 = vector.extract_strided_slice %962 {offsets = [0, 15], sizes = [24, 241], strides = [1, 1]} : vector<24x256xf32> to vector<24x241xf32>
    %989 = vector.extract_strided_slice %962 {offsets = [0, 0], sizes = [24, 15], strides = [1, 1]} : vector<24x256xf32> to vector<24x15xf32>
    %990 = tpu.concatenate %988, %989 in 1 : vector<24x241xf32>, vector<24x15xf32> -> vector<24x256xf32>
    %991 = vector.broadcast %5 : vector<1x256xf32> to vector<24x256xf32>
    %992 = arith.mulf %990, %991 : vector<24x256xf32>
    %993 = vector.extract_strided_slice %962 {offsets = [0, 16], sizes = [24, 240], strides = [1, 1]} : vector<24x256xf32> to vector<24x240xf32>
    %994 = vector.extract_strided_slice %962 {offsets = [0, 0], sizes = [24, 16], strides = [1, 1]} : vector<24x256xf32> to vector<24x16xf32>
    %995 = tpu.concatenate %993, %994 in 1 : vector<24x240xf32>, vector<24x16xf32> -> vector<24x256xf32>
    %996 = vector.broadcast %6 : vector<1x256xf32> to vector<24x256xf32>
    %997 = arith.mulf %995, %996 : vector<24x256xf32>
    %998 = vector.extract_strided_slice %962 {offsets = [0, 17], sizes = [24, 239], strides = [1, 1]} : vector<24x256xf32> to vector<24x239xf32>
    %999 = vector.extract_strided_slice %962 {offsets = [0, 0], sizes = [24, 17], strides = [1, 1]} : vector<24x256xf32> to vector<24x17xf32>
    %1000 = tpu.concatenate %998, %999 in 1 : vector<24x239xf32>, vector<24x17xf32> -> vector<24x256xf32>
    %1001 = vector.broadcast %7 : vector<1x256xf32> to vector<24x256xf32>
    %1002 = arith.mulf %1000, %1001 : vector<24x256xf32>
    %1003 = tpu.concatenate %967, %972, %977, %982, %962, %987, %992, %997, %1002 in 0 : vector<24x256xf32>, vector<24x256xf32>, vector<24x256xf32>, vector<24x256xf32>, vector<24x256xf32>, vector<24x256xf32>, vector<24x256xf32>, vector<24x256xf32>, vector<24x256xf32> -> vector<216x256xf32>
    %c0_154 = arith.constant 0 : index
    %c0_155 = arith.constant 0 : index
    %1004 = vector.load %arg51[%c0_154, %c0_155] : memref<24x216xf32, #tpu.memory_space<vmem>>, vector<24x216xf32>
    %cst_156 = arith.constant dense<0.000000e+00> : vector<24x256xf32>
    %1005 = tpu.matmul %1004, %1003, %cst_156 {dimension_numbers = #tpu.dot_dimension_numbers<[1], [0], [0], [1], [0, 0, 1, 1], [], []>} : vector<24x216xf32>, vector<216x256xf32>, vector<24x256xf32> -> vector<24x256xf32>
    %c0_157 = arith.constant 0 : index
    %c0_158 = arith.constant 0 : index
    %1006 = vector.load %arg52[%c0_157, %c0_158] : memref<24x1xf32, #tpu.memory_space<vmem>>, vector<24x1xf32>
    %1007 = vector.broadcast %1006 : vector<24x1xf32> to vector<24x256xf32>
    %1008 = arith.addf %1005, %1007 : vector<24x256xf32>
    %cst_159 = arith.constant 0.000000e+00 : f32
    %1009 = vector.broadcast %cst_159 : f32 to vector<24x256xf32>
    %1010 = arith.maximumf %1008, %1009 : vector<24x256xf32>
    %c0_160 = arith.constant 0 : index
    %c0_161 = arith.constant 0 : index
    %1011 = vector.load %arg53[%c0_160, %c0_161] : memref<4x24xf32, #tpu.memory_space<vmem>>, vector<4x24xf32>
    %cst_162 = arith.constant dense<0.000000e+00> : vector<4x256xf32>
    %1012 = tpu.matmul %1011, %1010, %cst_162 {dimension_numbers = #tpu.dot_dimension_numbers<[1], [0], [0], [1], [0, 0, 1, 1], [], []>} : vector<4x24xf32>, vector<24x256xf32>, vector<4x256xf32> -> vector<4x256xf32>
    %c0_163 = arith.constant 0 : index
    %c0_164 = arith.constant 0 : index
    %1013 = vector.load %arg54[%c0_163, %c0_164] : memref<4x1xf32, #tpu.memory_space<vmem>>, vector<4x1xf32>
    %1014 = vector.broadcast %1013 : vector<4x1xf32> to vector<4x256xf32>
    %1015 = arith.addf %1012, %1014 : vector<4x256xf32>
    %1016 = arith.negf %1015 : vector<4x256xf32>
    %1017 = math.exp %1016 : vector<4x256xf32>
    %cst_165 = arith.constant 1.000000e+00 : f32
    %1018 = vector.broadcast %cst_165 : f32 to vector<4x256xf32>
    %1019 = arith.addf %1018, %1017 : vector<4x256xf32>
    %1020 = arith.divf %1018, %1019 : vector<4x256xf32>
    %c0_166 = arith.constant 0 : index
    %c0_167 = arith.constant 0 : index
    %c0_168 = arith.constant 0 : index
    %1021 = vector.load %arg55[%c0_166, %c0_167, %c0_168] : memref<1x4x256xf32, #tpu.memory_space<vmem>>, vector<1x4x256xf32>
    %1022 = vector.shape_cast %1021 : vector<1x4x256xf32> to vector<4x256xf32>
    %1023 = vector.shape_cast %1020 : vector<4x256xf32> to vector<1x4x256xf32>
    tpu.vector_store %arg55[%c0_166, %c0_167, %c0_168], %1023 {strides = array<i32>} : memref<1x4x256xf32, #tpu.memory_space<vmem>>, vector<1x4x256xf32>,
    return
  }
  func.func @transform_0(%arg0: i32) -> (i32, i32, i32) {
    %c0_i32 = arith.constant 0 : i32
    %c0_i32_0 = arith.constant 0 : i32
    %c0_i32_1 = arith.constant 0 : i32
    return %arg0, %c0_i32, %c0_i32_0 : i32, i32, i32
  }
  func.func @transform_1(%arg0: i32) -> (i32, i32, i32) {
    %c0_i32 = arith.constant 0 : i32
    %c0_i32_0 = arith.constant 0 : i32
    %c0_i32_1 = arith.constant 0 : i32
    return %arg0, %c0_i32, %c0_i32_0 : i32, i32, i32
  }
  func.func @transform_2(%arg0: i32) -> (i32, i32, i32) {
    %c0_i32 = arith.constant 0 : i32
    %c0_i32_0 = arith.constant 0 : i32
    %c0_i32_1 = arith.constant 0 : i32
    return %arg0, %c0_i32, %c0_i32_0 : i32, i32, i32
  }
  func.func @transform_3(%arg0: i32) -> (i32, i32, i32) {
    %c0_i32 = arith.constant 0 : i32
    %c0_i32_0 = arith.constant 0 : i32
    %c0_i32_1 = arith.constant 0 : i32
    return %arg0, %c0_i32, %c0_i32_0 : i32, i32, i32
  }
  func.func @transform_4(%arg0: i32) -> (i32, i32, i32) {
    %c0_i32 = arith.constant 0 : i32
    %c0_i32_0 = arith.constant 0 : i32
    %c0_i32_1 = arith.constant 0 : i32
    return %arg0, %c0_i32, %c0_i32_0 : i32, i32, i32
  }
  func.func @transform_5(%arg0: i32) -> (i32, i32, i32) {
    %c0_i32 = arith.constant 0 : i32
    %c0_i32_0 = arith.constant 0 : i32
    %c0_i32_1 = arith.constant 0 : i32
    return %arg0, %c0_i32, %c0_i32_0 : i32, i32, i32
  }
  func.func @transform_6(%arg0: i32) -> (i32, i32, i32) {
    %c0_i32 = arith.constant 0 : i32
    %c0_i32_0 = arith.constant 0 : i32
    %c0_i32_1 = arith.constant 0 : i32
    return %arg0, %c0_i32, %c0_i32_0 : i32, i32, i32
  }
  func.func @transform_7(%arg0: i32) -> (i32, i32) {
    %c0_i32 = arith.constant 0 : i32
    %c0_i32_0 = arith.constant 0 : i32
    %c0_i32_1 = arith.constant 0 : i32
    return %c0_i32, %c0_i32_0 : i32, i32
  }
  func.func @transform_8(%arg0: i32) -> (i32, i32) {
    %c0_i32 = arith.constant 0 : i32
    %c0_i32_0 = arith.constant 0 : i32
    %c0_i32_1 = arith.constant 0 : i32
    return %c0_i32, %c0_i32_0 : i32, i32
  }
  func.func @transform_9(%arg0: i32) -> (i32, i32) {
    %c0_i32 = arith.constant 0 : i32
    %c0_i32_0 = arith.constant 0 : i32
    %c0_i32_1 = arith.constant 0 : i32
    return %c0_i32, %c0_i32_0 : i32, i32
  }
  func.func @transform_10(%arg0: i32) -> (i32, i32) {
    %c0_i32 = arith.constant 0 : i32
    %c0_i32_0 = arith.constant 0 : i32
    %c0_i32_1 = arith.constant 0 : i32
    return %c0_i32, %c0_i32_0 : i32, i32
  }
  func.func @transform_11(%arg0: i32) -> (i32, i32) {
    %c0_i32 = arith.constant 0 : i32
    %c0_i32_0 = arith.constant 0 : i32
    %c0_i32_1 = arith.constant 0 : i32
    return %c0_i32, %c0_i32_0 : i32, i32
  }
  func.func @transform_12(%arg0: i32) -> (i32, i32) {
    %c0_i32 = arith.constant 0 : i32
    %c0_i32_0 = arith.constant 0 : i32
    %c0_i32_1 = arith.constant 0 : i32
    return %c0_i32, %c0_i32_0 : i32, i32
  }
  func.func @transform_13(%arg0: i32) -> (i32, i32) {
    %c0_i32 = arith.constant 0 : i32
    %c0_i32_0 = arith.constant 0 : i32
    %c0_i32_1 = arith.constant 0 : i32
    return %c0_i32, %c0_i32_0 : i32, i32
  }
  func.func @transform_14(%arg0: i32) -> (i32, i32) {
    %c0_i32 = arith.constant 0 : i32
    %c0_i32_0 = arith.constant 0 : i32
    %c0_i32_1 = arith.constant 0 : i32
    return %c0_i32, %c0_i32_0 : i32, i32
  }
  func.func @transform_15(%arg0: i32) -> (i32, i32) {
    %c0_i32 = arith.constant 0 : i32
    %c0_i32_0 = arith.constant 0 : i32
    %c0_i32_1 = arith.constant 0 : i32
    return %c0_i32, %c0_i32_0 : i32, i32
  }
  func.func @transform_16(%arg0: i32) -> (i32, i32) {
    %c0_i32 = arith.constant 0 : i32
    %c0_i32_0 = arith.constant 0 : i32
    %c0_i32_1 = arith.constant 0 : i32
    return %c0_i32, %c0_i32_0 : i32, i32
  }
  func.func @transform_17(%arg0: i32) -> (i32, i32) {
    %c0_i32 = arith.constant 0 : i32
    %c0_i32_0 = arith.constant 0 : i32
    %c0_i32_1 = arith.constant 0 : i32
    return %c0_i32, %c0_i32_0 : i32, i32
  }
  func.func @transform_18(%arg0: i32) -> (i32, i32) {
    %c0_i32 = arith.constant 0 : i32
    %c0_i32_0 = arith.constant 0 : i32
    %c0_i32_1 = arith.constant 0 : i32
    return %c0_i32, %c0_i32_0 : i32, i32
  }
  func.func @transform_19(%arg0: i32) -> (i32, i32) {
    %c0_i32 = arith.constant 0 : i32
    %c0_i32_0 = arith.constant 0 : i32
    %c0_i32_1 = arith.constant 0 : i32
    return %c0_i32, %c0_i32_0 : i32, i32
  }
  func.func @transform_20(%arg0: i32) -> (i32, i32) {
    %c0_i32 = arith.constant 0 : i32
    %c0_i32_0 = arith.constant 0 : i32
    %c0_i32_1 = arith.constant 0 : i32
    return %c0_i32, %c0_i32_0 : i32, i32
  }
  func.func @transform_21(%arg0: i32) -> (i32, i32) {
    %c0_i32 = arith.constant 0 : i32
    %c0_i32_0 = arith.constant 0 : i32
    %c0_i32_1 = arith.constant 0 : i32
    return %c0_i32, %c0_i32_0 : i32, i32
  }
  func.func @transform_22(%arg0: i32) -> (i32, i32) {
    %c0_i32 = arith.constant 0 : i32
    %c0_i32_0 = arith.constant 0 : i32
    %c0_i32_1 = arith.constant 0 : i32
    return %c0_i32, %c0_i32_0 : i32, i32
  }
  func.func @transform_23(%arg0: i32) -> (i32, i32) {
    %c0_i32 = arith.constant 0 : i32
    %c0_i32_0 = arith.constant 0 : i32
    %c0_i32_1 = arith.constant 0 : i32
    return %c0_i32, %c0_i32_0 : i32, i32
  }
  func.func @transform_24(%arg0: i32) -> (i32, i32) {
    %c0_i32 = arith.constant 0 : i32
    %c0_i32_0 = arith.constant 0 : i32
    %c0_i32_1 = arith.constant 0 : i32
    return %c0_i32, %c0_i32_0 : i32, i32
  }
  func.func @transform_25(%arg0: i32) -> (i32, i32) {
    %c0_i32 = arith.constant 0 : i32
    %c0_i32_0 = arith.constant 0 : i32
    %c0_i32_1 = arith.constant 0 : i32
    return %c0_i32, %c0_i32_0 : i32, i32
  }
  func.func @transform_26(%arg0: i32) -> (i32, i32) {
    %c0_i32 = arith.constant 0 : i32
    %c0_i32_0 = arith.constant 0 : i32
    %c0_i32_1 = arith.constant 0 : i32
    return %c0_i32, %c0_i32_0 : i32, i32
  }
  func.func @transform_27(%arg0: i32) -> (i32, i32) {
    %c0_i32 = arith.constant 0 : i32
    %c0_i32_0 = arith.constant 0 : i32
    %c0_i32_1 = arith.constant 0 : i32
    return %c0_i32, %c0_i32_0 : i32, i32
  }
  func.func @transform_28(%arg0: i32) -> (i32, i32) {
    %c0_i32 = arith.constant 0 : i32
    %c0_i32_0 = arith.constant 0 : i32
    %c0_i32_1 = arith.constant 0 : i32
    return %c0_i32, %c0_i32_0 : i32, i32
  }
  func.func @transform_29(%arg0: i32) -> (i32, i32) {
    %c0_i32 = arith.constant 0 : i32
    %c0_i32_0 = arith.constant 0 : i32
    %c0_i32_1 = arith.constant 0 : i32
    return %c0_i32, %c0_i32_0 : i32, i32
  }
  func.func @transform_30(%arg0: i32) -> (i32, i32) {
    %c0_i32 = arith.constant 0 : i32
    %c0_i32_0 = arith.constant 0 : i32
    %c0_i32_1 = arith.constant 0 : i32
    return %c0_i32, %c0_i32_0 : i32, i32
  }
  func.func @transform_31(%arg0: i32) -> (i32, i32) {
    %c0_i32 = arith.constant 0 : i32
    %c0_i32_0 = arith.constant 0 : i32
    %c0_i32_1 = arith.constant 0 : i32
    return %c0_i32, %c0_i32_0 : i32, i32
  }
  func.func @transform_32(%arg0: i32) -> (i32, i32) {
    %c0_i32 = arith.constant 0 : i32
    %c0_i32_0 = arith.constant 0 : i32
    %c0_i32_1 = arith.constant 0 : i32
    return %c0_i32, %c0_i32_0 : i32, i32
  }
  func.func @transform_33(%arg0: i32) -> (i32, i32) {
    %c0_i32 = arith.constant 0 : i32
    %c0_i32_0 = arith.constant 0 : i32
    %c0_i32_1 = arith.constant 0 : i32
    return %c0_i32, %c0_i32_0 : i32, i32
  }
  func.func @transform_34(%arg0: i32) -> (i32, i32) {
    %c0_i32 = arith.constant 0 : i32
    %c0_i32_0 = arith.constant 0 : i32
    %c0_i32_1 = arith.constant 0 : i32
    return %c0_i32, %c0_i32_0 : i32, i32
  }
  func.func @transform_35(%arg0: i32) -> (i32, i32) {
    %c0_i32 = arith.constant 0 : i32
    %c0_i32_0 = arith.constant 0 : i32
    %c0_i32_1 = arith.constant 0 : i32
    return %c0_i32, %c0_i32_0 : i32, i32
  }
  func.func @transform_36(%arg0: i32) -> (i32, i32) {
    %c0_i32 = arith.constant 0 : i32
    %c0_i32_0 = arith.constant 0 : i32
    %c0_i32_1 = arith.constant 0 : i32
    return %c0_i32, %c0_i32_0 : i32, i32
  }
  func.func @transform_37(%arg0: i32) -> (i32, i32) {
    %c0_i32 = arith.constant 0 : i32
    %c0_i32_0 = arith.constant 0 : i32
    %c0_i32_1 = arith.constant 0 : i32
    return %c0_i32, %c0_i32_0 : i32, i32
  }
  func.func @transform_38(%arg0: i32) -> (i32, i32) {
    %c0_i32 = arith.constant 0 : i32
    %c0_i32_0 = arith.constant 0 : i32
    %c0_i32_1 = arith.constant 0 : i32
    return %c0_i32, %c0_i32_0 : i32, i32
  }
  func.func @transform_39(%arg0: i32) -> (i32, i32) {
    %c0_i32 = arith.constant 0 : i32
    %c0_i32_0 = arith.constant 0 : i32
    %c0_i32_1 = arith.constant 0 : i32
    return %c0_i32, %c0_i32_0 : i32, i32
  }
  func.func @transform_40(%arg0: i32) -> (i32, i32) {
    %c0_i32 = arith.constant 0 : i32
    %c0_i32_0 = arith.constant 0 : i32
    %c0_i32_1 = arith.constant 0 : i32
    return %c0_i32, %c0_i32_0 : i32, i32
  }
  func.func @transform_41(%arg0: i32) -> (i32, i32) {
    %c0_i32 = arith.constant 0 : i32
    %c0_i32_0 = arith.constant 0 : i32
    %c0_i32_1 = arith.constant 0 : i32
    return %c0_i32, %c0_i32_0 : i32, i32
  }
  func.func @transform_42(%arg0: i32) -> (i32, i32) {
    %c0_i32 = arith.constant 0 : i32
    %c0_i32_0 = arith.constant 0 : i32
    %c0_i32_1 = arith.constant 0 : i32
    return %c0_i32, %c0_i32_0 : i32, i32
  }
  func.func @transform_43(%arg0: i32) -> (i32, i32) {
    %c0_i32 = arith.constant 0 : i32
    %c0_i32_0 = arith.constant 0 : i32
    %c0_i32_1 = arith.constant 0 : i32
    return %c0_i32, %c0_i32_0 : i32, i32
  }
  func.func @transform_44(%arg0: i32) -> (i32, i32) {
    %c0_i32 = arith.constant 0 : i32
    %c0_i32_0 = arith.constant 0 : i32
    %c0_i32_1 = arith.constant 0 : i32
    return %c0_i32, %c0_i32_0 : i32, i32
  }
  func.func @transform_45(%arg0: i32) -> (i32, i32) {
    %c0_i32 = arith.constant 0 : i32
    %c0_i32_0 = arith.constant 0 : i32
    %c0_i32_1 = arith.constant 0 : i32
    return %c0_i32, %c0_i32_0 : i32, i32
  }
  func.func @transform_46(%arg0: i32) -> (i32, i32) {
    %c0_i32 = arith.constant 0 : i32
    %c0_i32_0 = arith.constant 0 : i32
    %c0_i32_1 = arith.constant 0 : i32
    return %c0_i32, %c0_i32_0 : i32, i32
  }
  func.func @transform_47(%arg0: i32) -> (i32, i32) {
    %c0_i32 = arith.constant 0 : i32
    %c0_i32_0 = arith.constant 0 : i32
    %c0_i32_1 = arith.constant 0 : i32
    return %c0_i32, %c0_i32_0 : i32, i32
  }
  func.func @transform_48(%arg0: i32) -> (i32, i32) {
    %c0_i32 = arith.constant 0 : i32
    %c0_i32_0 = arith.constant 0 : i32
    %c0_i32_1 = arith.constant 0 : i32
    return %c0_i32, %c0_i32_0 : i32, i32
  }
  func.func @transform_49(%arg0: i32) -> (i32, i32) {
    %c0_i32 = arith.constant 0 : i32
    %c0_i32_0 = arith.constant 0 : i32
    %c0_i32_1 = arith.constant 0 : i32
    return %c0_i32, %c0_i32_0 : i32, i32
  }
  func.func @transform_50(%arg0: i32) -> (i32, i32) {
    %c0_i32 = arith.constant 0 : i32
    %c0_i32_0 = arith.constant 0 : i32
    %c0_i32_1 = arith.constant 0 : i32
    return %c0_i32, %c0_i32_0 : i32, i32
  }
  func.func @transform_51(%arg0: i32) -> (i32, i32) {
    %c0_i32 = arith.constant 0 : i32
    %c0_i32_0 = arith.constant 0 : i32
    %c0_i32_1 = arith.constant 0 : i32
    return %c0_i32, %c0_i32_0 : i32, i32
  }
  func.func @transform_52(%arg0: i32) -> (i32, i32) {
    %c0_i32 = arith.constant 0 : i32
    %c0_i32_0 = arith.constant 0 : i32
    %c0_i32_1 = arith.constant 0 : i32
    return %c0_i32, %c0_i32_0 : i32, i32
  }
  func.func @transform_53(%arg0: i32) -> (i32, i32) {
    %c0_i32 = arith.constant 0 : i32
    %c0_i32_0 = arith.constant 0 : i32
    %c0_i32_1 = arith.constant 0 : i32
    return %c0_i32, %c0_i32_0 : i32, i32
  }
  func.func @transform_54(%arg0: i32) -> (i32, i32, i32) {
    %c0_i32 = arith.constant 0 : i32
    %c0_i32_0 = arith.constant 0 : i32
    %c0_i32_1 = arith.constant 0 : i32
    return %arg0, %c0_i32, %c0_i32_0 : i32, i32, i32
  }
}

</mosaic_0001>

<bundles_post_ra>
// kernel: forward.1
= control target key start
LH: loop header
LB: loop body
LE: loop exit
PB: predicated region body
PF: predicated region fallthrough
CT: control target
= control target key end

     0   :  { %s7805_s6 = smov 1   ;;  %s7806_s10 = smov 2   ;;  %s10806_s0 = inlined_call_operand.smem [shape: u32[55], index: -1, kind: input, shape index: {}] }
   0x1   :  { %s7877_s5 = sld [smem:[%s10806_s0]]   ;;  %s7807_s14 = smov 3  }
   0x2   :  { %s7882_s9 = sld [smem:[%s10806_s0 + %s7805_s6]]   ;;  %s7808_s18 = smov 4  }
   0x3   :  { %s7887_s13 = sld [smem:[%s10806_s0 + %s7806_s10]]   ;;  %s7809_s22 = smov 5  }
   0x4   :  { %s7892_s17 = sld [smem:[%s10806_s0 + %s7807_s14]]   ;;  %s7810_s26 = smov 6  }
   0x5   :  { %s7897_s21 = sld [smem:[%s10806_s0 + %s7808_s18]]   ;;  %s7811_s30 = smov 7  }
   0x6   :  { %s7902_s25 = sld [smem:[%s10806_s0 + %s7809_s22]]   ;;  %s7812_s4 = smov 8  }
   0x7   :  { %10840 = sst [smem:[#allocation2_spill]] %s7877_s5  ;;  %s7813_s10 = smov 9  }
   0x8   :  { %s7907_s29 = sld [smem:[%s10806_s0 + %s7810_s26]]   ;;  %s7814_s15 = smov 10  }
   0x9   :  { %s7912_s3 = sld [smem:[%s10806_s0 + %s7811_s30]]   ;;  %s7815_s20 = smov 11  }
   0xa   :  { %s7917_s8 = sld [smem:[%s10806_s0 + %s7812_s4]]   ;;  %s7816_s26 = smov 12  }
   0xb   :  { %s7922_s14 = sld [smem:[%s10806_s0 + %s7813_s10]]   ;;  %s7817_s1 = smov 13  }
   0xc   :  { %s7927_s19 = sld [smem:[%s10806_s0 + %s7814_s15]]   ;;  %s7818_s7 = smov 14  }
   0xd   :  { %s7932_s24 = sld [smem:[%s10806_s0 + %s7815_s20]]   ;;  %s7819_s15 = smov 15  }
   0xe   :  { %s7937_s30 = sld [smem:[%s10806_s0 + %s7816_s26]]   ;;  %s7820_s22 = smov 16  }
   0xf   :  { %10841 = sst [smem:[#allocation3_spill]] %s7912_s3  ;;  %s7821_s28 = smov 17  }
  0x10   :  { %10842 = sst [smem:[#allocation4_spill]] %s7917_s8 }
  0x11   :  { %10843 = sst [smem:[#allocation5_spill]] %s7922_s14 }
  0x12   :  { %s7942_s6 = sld [smem:[%s10806_s0 + %s7817_s1]]  }
  0x13   :  { %10844 = sst [smem:[#allocation6_spill]] %s7932_s24 }
  0x14   :  { %10845 = sst [smem:[#allocation7_spill]] %s7937_s30 }
  0x15   :  { %s7947_s12 = sld [smem:[%s10806_s0 + %s7818_s7]]   ;;  %s7822_s7 = smov 18  }
  0x16   :  { %s7952_s20 = sld [smem:[%s10806_s0 + %s7819_s15]]   ;;  %s7823_s15 = smov 19  }
  0x17   :  { %s7957_s27 = sld [smem:[%s10806_s0 + %s7820_s22]]   ;;  %s7824_s22 = smov 20  }
  0x18   :  { %10846 = sst [smem:[#allocation8_spill]] %s7942_s6 }
  0x19   :  { %s7962_s4 = sld [smem:[%s10806_s0 + %s7821_s28]]   ;;  %s7825_s28 = smov 21  }
  0x1a   :  { %s7967_s24 = sld [smem:[%s10806_s0 + %s7822_s7]]   ;;  %s7826_s7 = smov 22  }
  0x1b   :  { %10847 = sst [smem:[#allocation9_spill]] %s7947_s12 }
  0x1c   :  { %s7972_s6 = sld [smem:[%s10806_s0 + %s7823_s15]]   ;;  %s7827_s15 = smov 23  }
  0x1d   :  { %10848 = sst [smem:[#allocation10_spill]] %s7957_s27 }
  0x1e   :  { %s7977_s14 = sld [smem:[%s10806_s0 + %s7824_s22]]   ;;  %s7828_s22 = smov 24  }
  0x1f   :  { %10849 = sst [smem:[#allocation11_spill]] %s7962_s4 }
  0x20   :  { %10850 = sst [smem:[#allocation12_spill]] %s7967_s24 }
  0x21   :  { %s7982_s27 = sld [smem:[%s10806_s0 + %s7825_s28]]   ;;  %s7829_s28 = smov 25  }
  0x22   :  { %10851 = sst [smem:[#allocation13_spill]] %s7972_s6 }
  0x23   :  { %s7987_s24 = sld [smem:[%s10806_s0 + %s7826_s7]]   ;;  %s7830_s7 = smov 26  }
  0x24   :  { %10852 = sst [smem:[#allocation14_spill]] %s7977_s14 }
  0x25   :  { %s7992_s12 = sld [smem:[%s10806_s0 + %s7827_s15]]   ;;  %s7831_s15 = smov 27  }
  0x26   :  { %s7997_s14 = sld [smem:[%s10806_s0 + %s7828_s22]]   ;;  %s7832_s22 = smov 28  }
  0x27   :  { %s8002_s30 = sld [smem:[%s10806_s0 + %s7829_s28]]   ;;  %s7833_s28 = smov 29  }
  0x29   :  { %10853 = sst [smem:[#allocation15_spill]] %s7987_s24 }
  0x2a   :  { %s8007_s24 = sld [smem:[%s10806_s0 + %s7830_s7]]   ;;  %s7834_s7 = smov 30  }
  0x2b   :  { %10854 = sst [smem:[#allocation16_spill]] %s7992_s12 }
  0x2c   :  { %10855 = sst [smem:[#allocation17_spill]] %s7997_s14 }
  0x2d   :  { %10856 = sst [smem:[#allocation18_spill]] %s8002_s30 }
  0x2e   :  { %s8012_s12 = sld [smem:[%s10806_s0 + %s7831_s15]]   ;;  %s7835_s15 = smov 31  }
  0x2f   :  { %s8017_s14 = sld [smem:[%s10806_s0 + %s7832_s22]]   ;;  %s7836_s22 = smov 32  }
  0x30   :  { %10857 = sst [smem:[#allocation19_spill]] %s8007_s24 }
  0x31   :  { %s8022_s30 = sld [smem:[%s10806_s0 + %s7833_s28]]   ;;  %s7837_s28 = smov 33  }
  0x32   :  { %s8027_s24 = sld [smem:[%s10806_s0 + %s7834_s7]]   ;;  %s7838_s7 = smov 34  }
  0x34   :  { %10858 = sst [smem:[#allocation20_spill]] %s8012_s12 }
  0x35   :  { %10859 = sst [smem:[#allocation21_spill]] %s8017_s14 }
  0x36   :  { %s8032_s12 = sld [smem:[%s10806_s0 + %s7835_s15]]   ;;  %s7839_s15 = smov 35  }
  0x37   :  { %10860 = sst [smem:[#allocation22_spill]] %s8022_s30 }
  0x38   :  { %10861 = sst [smem:[#allocation23_spill]] %s8027_s24 }
  0x39   :  { %s8037_s14 = sld [smem:[%s10806_s0 + %s7836_s22]]   ;;  %s7840_s22 = smov 36  }
  0x3a   :  { %s8042_s30 = sld [smem:[%s10806_s0 + %s7837_s28]]   ;;  %s7841_s28 = smov 37  }
  0x3b   :  { %s8047_s24 = sld [smem:[%s10806_s0 + %s7838_s7]]   ;;  %s7842_s7 = smov 38  }
  0x3c   :  { %10862 = sst [smem:[#allocation24_spill]] %s8032_s12 }
  0x3d   :  { %s8052_s12 = sld [smem:[%s10806_s0 + %s7839_s15]]   ;;  %s7843_s15 = smov 39  }
  0x3f   :  { %10863 = sst [smem:[#allocation25_spill]] %s8037_s14 }
  0x40   :  { %10864 = sst [smem:[#allocation26_spill]] %s8042_s30 }
  0x41   :  { %10865 = sst [smem:[#allocation27_spill]] %s8047_s24 }
  0x42   :  { %s8057_s14 = sld [smem:[%s10806_s0 + %s7840_s22]]   ;;  %s7844_s22 = smov 40  }
  0x43   :  { %10866 = sst [smem:[#allocation28_spill]] %s8052_s12 }
  0x44   :  { %s8062_s30 = sld [smem:[%s10806_s0 + %s7841_s28]]   ;;  %s7845_s28 = smov 41  }
  0x45   :  { %s8067_s24 = sld [smem:[%s10806_s0 + %s7842_s7]]   ;;  %s7846_s7 = smov 42  }
  0x46   :  { %s8072_s12 = sld [smem:[%s10806_s0 + %s7843_s15]]   ;;  %s7847_s15 = smov 43  }
  0x48   :  { %10867 = sst [smem:[#allocation29_spill]] %s8057_s14 }
  0x49   :  { %s8077_s14 = sld [smem:[%s10806_s0 + %s7844_s22]]   ;;  %s7848_s22 = smov 44  }
  0x4a   :  { %10868 = sst [smem:[#allocation30_spill]] %s8062_s30 }
  0x4b   :  { %10869 = sst [smem:[#allocation31_spill]] %s8067_s24 }
  0x4c   :  { %10870 = sst [smem:[#allocation32_spill]] %s8072_s12 }
  0x4d   :  { %s8082_s30 = sld [smem:[%s10806_s0 + %s7845_s28]]   ;;  %s7849_s28 = smov 45  }
  0x4e   :  { %s8087_s24 = sld [smem:[%s10806_s0 + %s7846_s7]]   ;;  %s7850_s7 = smov 46  }
  0x4f   :  { %10871 = sst [smem:[#allocation33_spill]] %s8077_s14 }
  0x50   :  { %s8092_s12 = sld [smem:[%s10806_s0 + %s7847_s15]]   ;;  %s7851_s15 = smov 47  }
  0x51   :  { %s8097_s14 = sld [smem:[%s10806_s0 + %s7848_s22]]   ;;  %s7852_s22 = smov 48  }
  0x53   :  { %10872 = sst [smem:[#allocation34_spill]] %s8082_s30 }
  0x54   :  { %10873 = sst [smem:[#allocation35_spill]] %s8087_s24 }
  0x55   :  { %s8102_s30 = sld [smem:[%s10806_s0 + %s7849_s28]]   ;;  %s7853_s28 = smov 49  }
  0x56   :  { %10874 = sst [smem:[#allocation36_spill]] %s8092_s12 }
  0x57   :  { %10875 = sst [smem:[#allocation37_spill]] %s8097_s14 }
  0x58   :  { %s8107_s24 = sld [smem:[%s10806_s0 + %s7850_s7]]   ;;  %s7854_s7 = smov 50  }
  0x59   :  { %s8112_s12 = sld [smem:[%s10806_s0 + %s7851_s15]]   ;;  %s7855_s15 = smov 51  }
  0x5a   :  { %s8117_s14 = sld [smem:[%s10806_s0 + %s7852_s22]]   ;;  %s7856_s22 = smov 52  }
  0x5b   :  { %10876 = sst [smem:[#allocation38_spill]] %s8102_s30 }
  0x5c   :  { %s8122_s30 = sld [smem:[%s10806_s0 + %s7853_s28]]   ;;  %s7857_s28 = smov 53  }
  0x5e   :  { %10877 = sst [smem:[#allocation39_spill]] %s8107_s24 }
  0x5f   :  { %10878 = sst [smem:[#allocation40_spill]] %s8112_s12 }
  0x60   :  { %10879 = sst [smem:[#allocation41_spill]] %s8117_s14 }
  0x61   :  { %s8127_s24 = sld [smem:[%s10806_s0 + %s7854_s7]]   ;;  %s7858_s7 = smov 54  }
  0x62   :  { %10880 = sst [smem:[#allocation42_spill]] %s8122_s30 }
  0x63   :  { %s8132_s12 = sld [smem:[%s10806_s0 + %s7855_s15]]   ;;  %s8149_s15 = smov 0  }
  0x64   :  { %s8137_s14 = sld [smem:[%s10806_s0 + %s7856_s22]]  }
  0x65   :  { %s8142_s30 = sld [smem:[%s10806_s0 + %s7857_s28]]  }
  0x67   :  { %10881 = sst [smem:[#allocation43_spill]] %s8127_s24 }
  0x68   :  { %s8147_s24 = sld [smem:[%s10806_s0 + %s7858_s7]]  }
  0x69 LB: > { %s10882_s3 = sld [smem:[#allocation3_spill]]  ;;  %s7115_s16 = sadd.s32 4294967295, %s7803_s15   ;;  %s7803_s15 = sphi %s8149_s15, %s119_s15  }
  0x6a   : > { %p7119_p0 = scmp.ge.s32.totalorder %s7803_s15, 1  ;;  %p1527_p1 = scmp.lt.s32.totalorder %s7803_s15, 3 }
  0x6c   : > { %p1528_p2 = pnand %p7119_p0, %p1527_p1 }
  0x6d   : > { %p1683_p3 = scmp.lt.s32.totalorder (!%p1528_p2), %s7115_s16, 1  ;;  %s10883_s5 = sld [smem:[#allocation2_spill]] (!%p1528_p2)  ;;  %v10818_v6 = vmov (!%p1528_p2), 0.0   ;;  %v1758_v11 = vlaneseq (!%p1528_p2)  ;;  %vm1775_vm0 = vcmask (!%p1528_p2), 130048   ;;  %vm1821_vm1 = vcmask (!%p1528_p2), 7168  }
  0x6e   : > { %1531 = sbr.rel (%p1528_p2) target bundleno = 4126 (0x101e), region = 236  ;;  %s10831_s22 = smov (!%p1528_p2), 1   ;;  %2046 = vmatprep.mubr.f32.mxu0 (!%p1528_p2), %v10818_v6  ;;  %2258 = vmatprep.mubr.f32.mxu1 (!%p1528_p2), %v10818_v6  ;;  %vm1752_vm2 = vcmask (!%p1528_p2), 138240   ;;  %vm1798_vm3 = vcmask (!%p1528_p2), 121856   ;;  %vm1843_vm4 = vcmask (!%p1528_p2), 1039360   ;;  %vm1956_vm5 = vcmask (!%p1528_p2), 1043456  }
  0x6f   : > { %s10824_s23 = smov (!%p1528_p2), 16   ;;  %s10822_s26 = smov (!%p1528_p2), 17   ;;  %v1759_v12 = vshrl.u32 (!%p1528_p2), %v1758_v11, 7  ;;  %v7136_v17 = vld [vmem:[%s10882_s3 + $0x1] ss:$8 sm:$0x3] (!%p1528_p2) }
  0x70   : > { %s10829_s28 = smov (!%p1528_p2), 15   ;;  %s10836_s1 = smov (!%p1528_p2), 127   ;;  %v7138_v18 = vld [vmem:[%s10882_s3 + $0x3] ss:$8 sm:$0x3] (!%p1528_p2)  ;;  %vm1889_vm6 = vcmask (!%p1528_p2), 916480  }
  0x71   : > { %s10827_s7 = smov (!%p1528_p2), 112   ;;  %s10834_s10 = smov (!%p1528_p2), 113   ;;  %v8317_v15 = vsub.s32 (!%p1528_p2), 0, %v1759_v12  ;;  %v8319_v16 = vsub.s32 (!%p1528_p2), 1, %v1759_v12  ;;  %vm1866_vm7 = vcmask (!%p1528_p2), 924672   ;;  %vm1912_vm8 = vcmask (!%p1528_p2), 908288  }
  0x72   : > { %v1723_v25 = vld [vmem:[%s10882_s3] ss:$8 sm:$0x3] (!%p1528_p2)  ;;  %v7137_v28 = vld [vmem:[%s10882_s3 + $0x2] ss:$8 sm:$0x3] (!%p1528_p2) }
  0x73   : > { %v8328_v20 = vrot.slane (!%p1528_p2), %v7136_v17, %v8317_v15  ;;  %v8331_v21 = vrot.slane (!%p1528_p2), %v7136_v17, %v8319_v16  ;;  %v8341_v26 = vrot.slane (!%p1528_p2), %v7138_v18, %v8317_v15  ;;  %v8344_v27 = vrot.slane (!%p1528_p2), %v7138_v18, %v8319_v16  ;;  %v7139_v47 = vld [vmem:[%s10882_s3 + $0x5] ss:$8 sm:$0x3] (!%p1528_p2)  ;;  %v7141_v58 = vld [vmem:[%s10882_s3 + $0x7] ss:$8 sm:$0x3] (!%p1528_p2) }
  0x74   : > { %v8350_v32 = vrot.slane (!%p1528_p2), %v1723_v25, %v8317_v15  ;;  %v8353_v33 = vrot.slane (!%p1528_p2), %v1723_v25, %v8319_v16  ;;  %v8364_v41 = vrot.slane (!%p1528_p2), %v7137_v28, %v8317_v15  ;;  %v8367_v42 = vrot.slane (!%p1528_p2), %v7137_v28, %v8319_v16  ;;  %s10884_s8 = sld [smem:[#allocation4_spill]] (!%p1528_p2)  ;;  %s10885_s4 = sld [smem:[#allocation11_spill]] (!%p1528_p2) }
  0x75   : > { %s10937_s16 = smov (!%p1683_p3, %s7115_s16), 1  ;;  %v8383_v56 = vrot.slane %v7139_v47, %v8317_v15  ;;  %v8386_v57 = vrot.slane %v7139_v47, %v8319_v16  ;;  %v8398_v18 = vrot.slane %v7141_v58, %v8317_v15  ;;  %vm1972_vm9 = vcmask 293888   ;;  %s10886_s6 = sld [smem:[#allocation13_spill]] }
  0x76   : > { %s8157_s0 = sshll.u32 %s10937_s16, 3  ;;  %s10820_s16 = smov 111   ;;  %vm4542_vm10 = vcmask 588800   ;;  %vm5952_vm11 = vcmask 719872   ;;  %vm6842_vm12 = vcmask 195584  }
  0x77   : > { %s1687_s18 = scalar_lea.vmem %s10883_s5, %s8157_s0  ;;  %s1692_s2 = scalar_lea.vmem %s7882_s9, %s8157_s0 }
  0x78   : > { %v8161_v0 = vld [vmem:[%s1687_s18] sm:$0xff]  ;;  %s1697_s11 = scalar_lea.vmem %s7887_s13, %s8157_s0  ;;  %s1702_s18 = scalar_lea.vmem %s7892_s17, %s8157_s0 }
  0x79   : > { %1819 = vrot.lane.b32.xlu1 %v8161_v0, %s10831_s22  ;;  %1773 = vrot.lane.b32.xlu0 %v8161_v0, %s10824_s23  ;;  %v8169_v1 = vcombine.high %v8161_v0, %v8161_v0  ;;  %v8193_v2 = vld [vmem:[%s1692_s2] sm:$0xff]  ;;  %s1707_s2 = scalar_lea.vmem %s7897_s21, %s8157_s0  ;;  %s10907_s5 = smov 113  }
  0x7a   : > { %v8201_v3 = vcombine.high %v8193_v2, %v8193_v2  ;;  %v8209_v4 = vld [vmem:[%s1697_s11] sm:$0xff]  ;;  %s1712_s11 = scalar_lea.vmem %s7902_s25, %s8157_s0 }
  0x7b   : > { %v8217_v5 = vcombine.high %v8209_v4, %v8209_v4  ;;  %v8271_v7 = vld [vmem:[%s1702_s18] sm:$0xff]  ;;  %s1717_s18 = scalar_lea.vmem %s7907_s29, %s8157_s0 }
  0x7c   : > { %v8279_v8 = vcombine.high %v8271_v7, %v8271_v7  ;;  %v8287_v9 = vld [vmem:[%s1707_s2] sm:$0xff]  ;;  %s10887_s2 = sld [smem:[#allocation7_spill]] }
  0x7d   : > { %1750 = vrot.lane.b32.xlu1 %v8161_v0, %s10822_s26  ;;  %1770 = vrot.lane.b32.xlu0 %v8169_v1, %s10824_s23  ;;  %v8295_v10 = vcombine.high %v8287_v9, %v8287_v9 }
  0x81   : > { %1816 = vrot.lane.b32.xlu1 %v8169_v1, %s10831_s22  ;;  %1747 = vrot.lane.b32.xlu0 %v8169_v1, %s10822_s26 }
  0x85   : > { %1796 = vrot.lane.b32.xlu1 %v8161_v0, %s10829_s28  ;;  %1793 = vrot.lane.b32.xlu0 %v8169_v1, %s10829_s28 }
  0x89   : > { %1841 = vrot.lane.b32.xlu1 %v8169_v1, %s10836_s1  ;;  %1839 = vrot.lane.b32.xlu0 %v8161_v0, %s10836_s1 }
  0x8d   : > { %1887 = vrot.lane.b32.xlu1 %v8169_v1, %s10827_s7  ;;  %1885 = vrot.lane.b32.xlu0 %v8161_v0, %s10827_s7 }
  0x91   : > { %1864 = vrot.lane.b32.xlu1 %v8169_v1, %s10834_s10  ;;  %1862 = vrot.lane.b32.xlu0 %v8161_v0, %s10834_s10 }
  0x95   : > { %2071 = vrot.lane.b32.xlu1 %v8193_v2, %s10824_s23  ;;  %2068 = vrot.lane.b32.xlu0 %v8201_v3, %s10824_s23 }
  0x99   : > { %2093 = vrot.lane.b32.xlu1 %v8193_v2, %s10831_s22  ;;  %2090 = vrot.lane.b32.xlu0 %v8201_v3, %s10831_s22 }
  0x9d   : > { %2283 = vrot.lane.b32.xlu1 %v8209_v4, %s10824_s23  ;;  %2280 = vrot.lane.b32.xlu0 %v8217_v5, %s10824_s23 }
  0xa1   : > { %2305 = vrot.lane.b32.xlu1 %v8209_v4, %s10831_s22  ;;  %2302 = vrot.lane.b32.xlu0 %v8217_v5, %s10831_s22 }
  0xa5   : > { %2060 = vrot.lane.b32.xlu1 %v8193_v2, %s10822_s26  ;;  %2057 = vrot.lane.b32.xlu0 %v8201_v3, %s10822_s26 }
  0xa9   : > { %2082 = vrot.lane.b32.xlu1 %v8193_v2, %s10829_s28  ;;  %2079 = vrot.lane.b32.xlu0 %v8201_v3, %s10829_s28 }
  0xad   : > { %2272 = vrot.lane.b32.xlu1 %v8209_v4, %s10822_s26  ;;  %2269 = vrot.lane.b32.xlu0 %v8217_v5, %s10822_s26 }
  0xb1   : > { %2294 = vrot.lane.b32.xlu1 %v8209_v4, %s10829_s28  ;;  %2291 = vrot.lane.b32.xlu0 %v8217_v5, %s10829_s28 }
  0xb5   : > { %1910 = vrot.lane.b32.xlu1 %v8169_v1, %s10820_s16  ;;  %1908 = vrot.lane.b32.xlu0 %v8161_v0, %s10820_s16 }
  0xb9   : > { %2103 = vrot.lane.b32.xlu1 %v8201_v3, %s10836_s1  ;;  %2101 = vrot.lane.b32.xlu0 %v8193_v2, %s10836_s1 }
  0xbd   : > { %2125 = vrot.lane.b32.xlu1 %v8201_v3, %s10827_s7  ;;  %2123 = vrot.lane.b32.xlu0 %v8193_v2, %s10827_s7 }
  0xc1   : > { %2315 = vrot.lane.b32.xlu1 %v8217_v5, %s10836_s1  ;;  %2313 = vrot.lane.b32.xlu0 %v8209_v4, %s10836_s1 }
  0xc5   : > { %2337 = vrot.lane.b32.xlu1 %v8217_v5, %s10827_s7  ;;  %2335 = vrot.lane.b32.xlu0 %v8209_v4, %s10827_s7 }
  0xc9   : > { %2114 = vrot.lane.b32.xlu1 %v8201_v3, %s10834_s10  ;;  %2112 = vrot.lane.b32.xlu0 %v8193_v2, %s10834_s10 }
  0xcd   : > { %2326 = vrot.lane.b32.xlu1 %v8217_v5, %s10834_s10  ;;  %2324 = vrot.lane.b32.xlu0 %v8209_v4, %s10834_s10 }
  0xd1   : > { %2495 = vrot.lane.b32.xlu1 %v8271_v7, %s10824_s23  ;;  %2492 = vrot.lane.b32.xlu0 %v8279_v8, %s10824_s23 }
  0xd5   : > { %2517 = vrot.lane.b32.xlu1 %v8271_v7, %s10831_s22  ;;  %2514 = vrot.lane.b32.xlu0 %v8279_v8, %s10831_s22 }
  0xd9   : > { %2707 = vrot.lane.b32.xlu1 %v8287_v9, %s10824_s23  ;;  %2704 = vrot.lane.b32.xlu0 %v8295_v10, %s10824_s23 }
  0xdd   : > { %2729 = vrot.lane.b32.xlu1 %v8287_v9, %s10831_s22  ;;  %2726 = vrot.lane.b32.xlu0 %v8295_v10, %s10831_s22 }
  0xe1   : > { %2484 = vrot.lane.b32.xlu1 %v8271_v7, %s10822_s26  ;;  %2481 = vrot.lane.b32.xlu0 %v8279_v8, %s10822_s26 }
  0xe5   : > { %2506 = vrot.lane.b32.xlu1 %v8271_v7, %s10829_s28  ;;  %2503 = vrot.lane.b32.xlu0 %v8279_v8, %s10829_s28 }
  0xe9   : > { %2696 = vrot.lane.b32.xlu1 %v8287_v9, %s10822_s26  ;;  %2693 = vrot.lane.b32.xlu0 %v8295_v10, %s10822_s26 }
  0xeb   : > { %v1820_v13 = vpop.permute.xlu1 %1819  ;;  %v1774_v14 = vpop.permute.xlu0 %1773 }
  0xed   : > { %2718 = vrot.lane.b32.xlu1 %v8287_v9, %s10829_s28  ;;  %2715 = vrot.lane.b32.xlu0 %v8295_v10, %s10829_s28 }
  0xef   : > { %v1751_v19 = vpop.permute.xlu1 %1750  ;;  %v1771_v22 = vpop.permute.xlu0 %1770 }
  0xf0   : > { %v1776_v23 = vsel %vm1775_vm0, %v1774_v14, %v1771_v22  ;;  %v1779_v24 = vsel %vm1775_vm0, %v1771_v22, %v1774_v14  ;;  %v7140_v22 = vld [vmem:[%s10882_s3 + $0x6] ss:$8 sm:$0x3] }
  0xf1   : > { %2136 = vrot.lane.b32.xlu1 %v8201_v3, %s10820_s16  ;;  %2134 = vrot.lane.b32.xlu0 %v8193_v2, %s10820_s16  ;;  %v1791_v29 = vmul.f32 %v8328_v20, %v1779_v24  ;;  %v1792_v30 = vmul.f32 %v8331_v21, %v1776_v23 }
  0xf3   : > { %v1817_v31 = vpop.permute.xlu1 %1816  ;;  %v1748_v34 = vpop.permute.xlu0 %1747  ;;  %v1933_v48 = vrot.slane %v1791_v29, 4  ;;  %v1934_v49 = vrot.slane %v1792_v30, 4 }
  0xf4   : > { %v1822_v35 = vsel %vm1821_vm1, %v1820_v13, %v1817_v31  ;;  %v1825_v36 = vsel %vm1821_vm1, %v1817_v31, %v1820_v13  ;;  %v1753_v37 = vsel %vm1752_vm2, %v1751_v19, %v1748_v34  ;;  %v1756_v38 = vsel %vm1752_vm2, %v1748_v34, %v1751_v19 }
  0xf5   : > { %v1837_v39 = vmul.f32 %v8341_v26, %v1825_v36  ;;  %v1838_v40 = vmul.f32 %v8344_v27, %v1822_v35  ;;  %2348 = vrot.lane.b32.xlu1 %v8217_v5, %s10820_s16  ;;  %2346 = vrot.lane.b32.xlu0 %v8209_v4, %s10820_s16  ;;  %v1768_v43 = vmul.f32 %v8350_v32, %v1756_v38 }
  0xf6   : > { %v1769_v44 = vmul.f32 %v8353_v33, %v1753_v37  ;;  %v8401_v19 = vrot.slane %v7141_v58, %v8319_v16  ;;  %v8415_v35 = vrot.slane %v7140_v22, %v8317_v15  ;;  %v8418_v36 = vrot.slane %v7140_v22, %v8319_v16 }
  0xf7   : > { %v1797_v45 = vpop.permute.xlu1 %1796  ;;  %v1794_v46 = vpop.permute.xlu0 %1793  ;;  %v1939_v52 = vrot.slane %v1837_v39, 4  ;;  %v1940_v53 = vrot.slane %v1838_v40, 4  ;;  %v1957_v63 = vsel %vm1956_vm5, %v1768_v43, %v1933_v48 }
  0xf8   : > { %v1799_v50 = vsel %vm1798_vm3, %v1797_v45, %v1794_v46  ;;  %v1802_v51 = vsel %vm1798_vm3, %v1794_v46, %v1797_v45  ;;  %v1958_v61 = vsel %vm1956_vm5, %v1769_v44, %v1934_v49 }
  0xf9   : > { %v1814_v54 = vmul.f32 %v8364_v41, %v1802_v51  ;;  %v1815_v55 = vmul.f32 %v8367_v42, %v1799_v50  ;;  %2527 = vrot.lane.b32.xlu1 %v8279_v8, %s10836_s1  ;;  %2525 = vrot.lane.b32.xlu0 %v8271_v7, %s10836_s1 }
  0xfb   : > { %v1842_v59 = vpop.permute.xlu1 %1841  ;;  %v1840_v60 = vpop.permute.xlu0 %1839  ;;  %v1960_v62 = vsel %vm1956_vm5, %v1815_v55, %v1940_v53  ;;  %v1959_v11 = vsel %vm1956_vm5, %v1814_v54, %v1939_v52 }
  0xfc   : > { %v1844_v12 = vsel %vm1843_vm4, %v1840_v60, %v1842_v59  ;;  %v1848_v13 = vsel %vm1843_vm4, %v1842_v59, %v1840_v60  ;;  %v7204_v14 = vpack.c.bf16 %v1960_v62, %v1958_v61  ;;  %v7206_v17 = vpack.c.bf16 %v1959_v11, %v1957_v63  ;;  %v8450_v63 = vld [vmem:[%s1712_s11] sm:$0xff]  ;;  %s10888_s11 = sld [smem:[#allocation9_spill]] }
  0xfd   : > { %2549 = vrot.lane.b32.xlu1 %v8279_v8, %s10827_s7  ;;  %2547 = vrot.lane.b32.xlu0 %v8271_v7, %s10827_s7  ;;  %v1860_v23 = vmul.f32 %v8383_v56, %v1844_v12  ;;  %v1861_v24 = vmul.f32 %v8386_v57, %v1848_v13 }
  0xfe   : > { %7205 = vmatprep.subr.bf16.mxu0 %v7204_v14 }
  0xff   : > { %v1888_v25 = vpop.permute.xlu1 %1887  ;;  %7207 = vmatpush1.bf16.msra.mxu0 %v7206_v17  ;;  %v1886_v28 = vpop.permute.xlu0 %1885  ;;  %v1946_v37 = vrot.slane %v1860_v23, 4  ;;  %v1947_v38 = vrot.slane %v1861_v24, 4  ;;  %v8462_v17 = vcombine.high %v8450_v63, %v8450_v63 }
 0x100   : > { %v1890_v29 = vsel %vm1889_vm6, %v1886_v28, %v1888_v25  ;;  %v1894_v30 = vsel %vm1889_vm6, %v1888_v25, %v1886_v28 }
 0x101   : > { %v1906_v31 = vmul.f32 %v8398_v18, %v1890_v29  ;;  %v1907_v34 = vmul.f32 %v8401_v19, %v1894_v30  ;;  %2739 = vrot.lane.b32.xlu1 %v8295_v10, %s10836_s1  ;;  %2737 = vrot.lane.b32.xlu0 %v8287_v9, %s10836_s1  ;;  %v1962_v51 = vsel %vm1956_vm5, %v8169_v1, %v1947_v38 }
 0x102   : > { %v1961_v53 = vsel %vm1956_vm5, %v8161_v0, %v1946_v37 }
 0x103   : > { %v1865_v39 = vpop.permute.xlu1 %1864  ;;  %v1863_v40 = vpop.permute.xlu0 %1862  ;;  %v1952_v45 = vrot.slane %v1906_v31, 4  ;;  %v1953_v46 = vrot.slane %v1907_v34, 4 }
 0x104   : > { %v1867_v43 = vsel %vm1866_vm7, %v1863_v40, %v1865_v39  ;;  %v1871_v44 = vsel %vm1866_vm7, %v1865_v39, %v1863_v40  ;;  %v8478_v40 = vld [vmem:[%s1717_s18] sm:$0xff]  ;;  %s10889_s18 = sld [smem:[#allocation10_spill]] }
 0x105   : > { %v1883_v47 = vmul.f32 %v8415_v35, %v1867_v43  ;;  %v1884_v48 = vmul.f32 %v8418_v36, %v1871_v44  ;;  %2761 = vrot.lane.b32.xlu1 %v8295_v10, %s10827_s7  ;;  %2759 = vrot.lane.b32.xlu0 %v8287_v9, %s10827_s7 }
 0x107   : > { %v2072_v49 = vpop.permute.xlu1 %2071  ;;  %v2069_v50 = vpop.permute.xlu0 %2068  ;;  %v1964_v52 = vsel %vm1956_vm5, %v1884_v48, %v1953_v46  ;;  %v1963_v54 = vsel %vm1956_vm5, %v1883_v47, %v1952_v45 }
 0x108   : > { %v7208_v55 = vpack.c.bf16 %v1964_v52, %v1962_v51  ;;  %v7210_v58 = vpack.c.bf16 %v1963_v54, %v1961_v53  ;;  %v2073_v11 = vsel %vm1775_vm0, %v2072_v49, %v2069_v50  ;;  %v2076_v12 = vsel %vm1775_vm0, %v2069_v50, %v2072_v49 }
 0x109   : > { %2538 = vrot.lane.b32.xlu1 %v8279_v8, %s10834_s10  ;;  %2536 = vrot.lane.b32.xlu0 %v8271_v7, %s10834_s10  ;;  %v2077_v24 = vmul.f32 %v2076_v12, %v8328_v20  ;;  %v2078_v25 = vmul.f32 %v2073_v11, %v8331_v21  ;;  %v8491_v52 = vcombine.high %v8478_v40, %v8478_v40 }
 0x10a   : > { %7209 = vmatprep.subr.bf16.mxu0 %v7208_v55 }
 0x10b   : > { %v2094_v59 = vpop.permute.xlu1 %2093  ;;  %7211 = vmatpush1.bf16.msra.mxu0 %v7210_v58  ;;  %v2091_v1 = vpop.permute.xlu0 %2090  ;;  %v2147_v43 = vrot.slane %v2077_v24, 4  ;;  %v2148_v44 = vrot.slane %v2078_v25, 4 }
 0x10c   : > { %v2095_v13 = vsel %vm1821_vm1, %v2094_v59, %v2091_v1  ;;  %v2098_v14 = vsel %vm1821_vm1, %v2091_v1, %v2094_v59 }
 0x10d   : > { %2750 = vrot.lane.b32.xlu1 %v8295_v10, %s10834_s10  ;;  %2748 = vrot.lane.b32.xlu0 %v8287_v9, %s10834_s10  ;;  %v2099_v30 = vmul.f32 %v2098_v14, %v8341_v26  ;;  %v2100_v31 = vmul.f32 %v2095_v13, %v8344_v27 }
 0x10f   : > { %v2284_v0 = vpop.permute.xlu1 %2283  ;;  %v2281_v60 = vpop.permute.xlu0 %2280  ;;  %v2153_v47 = vrot.slane %v2099_v30, 4  ;;  %v2154_v48 = vrot.slane %v2100_v31, 4 }
 0x110   : > { %v2285_v11 = vsel %vm1775_vm0, %v2284_v0, %v2281_v60  ;;  %v2288_v24 = vsel %vm1775_vm0, %v2281_v60, %v2284_v0 }
 0x111   : > { %2560 = vrot.lane.b32.xlu1 %v8279_v8, %s10820_s16  ;;  %2558 = vrot.lane.b32.xlu0 %v8271_v7, %s10820_s16  ;;  %v2290_v25 = vmul.f32 %v2285_v11, %v8331_v21 }
 0x113   : > { %v2306_v61 = vpop.permute.xlu1 %2305  ;;  %v2303_v62 = vpop.permute.xlu0 %2302 }
 0x114   : > { %v2307_v51 = vsel %vm1821_vm1, %v2306_v61, %v2303_v62  ;;  %v2310_v12 = vsel %vm1821_vm1, %v2303_v62, %v2306_v61 }
 0x115   : > { %2772 = vrot.lane.b32.xlu1 %v8295_v10, %s10820_s16  ;;  %2770 = vrot.lane.b32.xlu0 %v8287_v9, %s10820_s16 }
 0x117   : > { %v2061_v22 = vpop.permute.xlu1 %2060  ;;  %v2058_v23 = vpop.permute.xlu0 %2057 }
 0x118   : > { %v2062_v28 = vsel %vm1752_vm2, %v2061_v22, %v2058_v23  ;;  %v2065_v29 = vsel %vm1752_vm2, %v2058_v23, %v2061_v22  ;;  %v2312_v22 = vmul.f32 %v2307_v51, %v8344_v27  ;;  %v7142_v23 = vld [vmem:[%s10882_s3 + $0x10] ss:$8 sm:$0x3]  ;;  %s10904_s3 = smov 1  }
 0x119   : > { %2919 = vrot.lane.b32.xlu1 %v8450_v63, %s10824_s23  ;;  %2916 = vrot.lane.b32.xlu0 %v8462_v17, %s10824_s23  ;;  %v2066_v34 = vmul.f32 %v2065_v29, %v8350_v32  ;;  %v2067_v37 = vmul.f32 %v2062_v28, %v8353_v33  ;;  %v2311_v28 = vmul.f32 %v2310_v12, %v8341_v26  ;;  %v1965_v12 = vld [vmem:[%s10884_s8] sm:$0xff]  ;;  %s10909_s8 = sld [smem:[#allocation8_spill]] }
 0x11a   : > { %v8516_v0 = vrot.slane %v7142_v23, %v8317_v15  ;;  %v8519_v60 = vrot.slane %v7142_v23, %v8319_v16 }
 0x11b   : > { %v2083_v38 = vpop.permute.xlu1 %2082  ;;  %v2080_v39 = vpop.permute.xlu0 %2079  ;;  %v2171_v55 = vsel %vm1956_vm5, %v2067_v37, %v2148_v44  ;;  %v2170_v59 = vsel %vm1956_vm5, %v2066_v34, %v2147_v43 }
 0x11c   : > { %v2084_v45 = vsel %vm1798_vm3, %v2083_v38, %v2080_v39  ;;  %v2087_v46 = vsel %vm1798_vm3, %v2080_v39, %v2083_v38  ;;  %v2289_v38 = vmul.f32 %v2288_v24, %v8328_v20  ;;  %v2366_v39 = vrot.slane %v2312_v22, 4 }
 0x11d   : > { %v2088_v49 = vmul.f32 %v2087_v46, %v8364_v41  ;;  %v2089_v50 = vmul.f32 %v2084_v45, %v8367_v42  ;;  %2941 = vrot.lane.b32.xlu1 %v8450_v63, %s10831_s22  ;;  %2938 = vrot.lane.b32.xlu0 %v8462_v17, %s10831_s22  ;;  %v2360_v45 = vrot.slane %v2290_v25, 4  ;;  %v2365_v46 = vrot.slane %v2311_v28, 4 }
 0x11f   : > { %v2273_v53 = vpop.permute.xlu1 %2272  ;;  %v2270_v54 = vpop.permute.xlu0 %2269  ;;  %v2173_v58 = vsel %vm1956_vm5, %v2089_v50, %v2154_v48  ;;  %v2172_v1 = vsel %vm1956_vm5, %v2088_v49, %v2153_v47 }
 0x120   : > { %v7212_v13 = vpack.c.bf16 %v2173_v58, %v2171_v55  ;;  %v7214_v14 = vpack.c.bf16 %v2172_v1, %v2170_v59  ;;  %v2274_v61 = vsel %vm1752_vm2, %v2273_v53, %v2270_v54  ;;  %v2277_v34 = vsel %vm1752_vm2, %v2270_v54, %v2273_v53 }
 0x121   : > { %3131 = vrot.lane.b32.xlu1 %v8478_v40, %s10824_s23  ;;  %3128 = vrot.lane.b32.xlu0 %v8491_v52, %s10824_s23  ;;  %v2279_v43 = vmul.f32 %v2274_v61, %v8353_v33  ;;  %v2278_v15 = vmul.f32 %v2277_v34, %v8350_v32  ;;  %v2359_v54 = vrot.slane %v2289_v38, 4 }
 0x122   : > { %7213 = vmatprep.subr.bf16.mxu1 %v7212_v13 }
 0x123   : > { %v2295_v62 = vpop.permute.xlu1 %2294  ;;  %7215 = vmatpush1.bf16.msra.mxu1 %v7214_v14  ;;  %v2292_v29 = vpop.permute.xlu0 %2291  ;;  %v2383_v55 = vsel %vm1956_vm5, %v2279_v43, %v2360_v45  ;;  %v2382_v13 = vsel %vm1956_vm5, %v2278_v15, %v2359_v54 }
 0x124   : > { %v2296_v30 = vsel %vm1798_vm3, %v2295_v62, %v2292_v29  ;;  %v2299_v31 = vsel %vm1798_vm3, %v2292_v29, %v2295_v62 }
 0x125   : > { %v2301_v37 = vmul.f32 %v2296_v30, %v8367_v42  ;;  %3153 = vrot.lane.b32.xlu1 %v8478_v40, %s10831_s22  ;;  %v2300_v44 = vmul.f32 %v2299_v31, %v8364_v41  ;;  %3150 = vrot.lane.b32.xlu0 %v8491_v52, %s10831_s22 }
 0x127   : > { %v1911_v47 = vpop.permute.xlu1 %1910  ;;  %v1909_v48 = vpop.permute.xlu0 %1908  ;;  %v2385_v50 = vsel %vm1956_vm5, %v2301_v37, %v2366_v39  ;;  %v2384_v58 = vsel %vm1956_vm5, %v2300_v44, %v2365_v46 }
 0x128   : > { %v1913_v16 = vsel %vm1912_vm8, %v1909_v48, %v1911_v47  ;;  %v1917_v49 = vsel %vm1912_vm8, %v1911_v47, %v1909_v48  ;;  %v7220_v11 = vpack.c.bf16 %v2385_v50, %v2383_v55  ;;  %v7222_v14 = vpack.c.bf16 %v2384_v58, %v2382_v13 }
 0x129   : > { %v1929_v51 = vmul.f32 %v8516_v0, %v1913_v16  ;;  %v1930_v53 = vmul.f32 %v8519_v60, %v1917_v49  ;;  %2908 = vrot.lane.b32.xlu1 %v8450_v63, %s10822_s26  ;;  %2905 = vrot.lane.b32.xlu0 %v8462_v17, %s10822_s26 }
 0x12b   : > { %v2104_v59 = vpop.permute.xlu1 %2103  ;;  %7143 = vmatprep.subr.msk.mxu0 %vm1956_vm5, %v1930_v53  ;;  %v2102_v1 = vpop.permute.xlu0 %2101 }
 0x12c   : > { %7144 = vmatpush1.msk.msra.mxu0 %vm1956_vm5, %v1929_v51  ;;  %v2105_v24 = vsel %vm1843_vm4, %v2102_v1, %v2104_v59  ;;  %v2109_v25 = vsel %vm1843_vm4, %v2104_v59, %v2102_v1 }
 0x12d   : > { %2930 = vrot.lane.b32.xlu1 %v8450_v63, %s10829_s28  ;;  %7221 = vmatprep.subr.bf16.mxu0 %v7220_v11  ;;  %v2110_v30 = vmul.f32 %v2105_v24, %v8383_v56  ;;  %v2111_v31 = vmul.f32 %v2109_v25, %v8386_v57 }
 0x12e   : > { %2927 = vrot.lane.b32.xlu0 %v8462_v17, %s10829_s28  ;;  %7145 = vmatmul.mubr.msk.f32.vlgmr.msra.gmra.mrb[0].mxu0 %vm1972_vm9, %v1965_v12 }
 0x12f   : > { %7223 = vmatpush1.bf16.msra.mxu0 %v7222_v14  ;;  %v2126_v22 = vpop.permute.xlu1 %2125  ;;  %v2124_v23 = vpop.permute.xlu0 %2123  ;;  %2470 = vmatprep.mubr.f32.mxu0 %v10818_v6  ;;  %v2160_v45 = vrot.slane %v2110_v30, 4  ;;  %v2161_v46 = vrot.slane %v2111_v31, 4 }
 0x130   : > { %v2127_v62 = vsel %vm1889_vm6, %v2124_v23, %v2126_v22  ;;  %v2131_v29 = vsel %vm1889_vm6, %v2126_v22, %v2124_v23 }
 0x131   : > { %3120 = vrot.lane.b32.xlu1 %v8478_v40, %s10822_s26  ;;  %v2132_v38 = vmul.f32 %v2127_v62, %v8398_v18  ;;  %v2133_v39 = vmul.f32 %v2131_v29, %v8401_v19  ;;  %v2175_v12 = vsel %vm1956_vm5, %v8201_v3, %v2161_v46  ;;  %v2174_v13 = vsel %vm1956_vm5, %v8193_v2, %v2160_v45 }
 0x132   : > { %3117 = vrot.lane.b32.xlu0 %v8491_v52, %s10822_s26 }
 0x133   : > { %v2316_v28 = vpop.permute.xlu1 %2315  ;;  %v2314_v61 = vpop.permute.xlu0 %2313  ;;  %v2166_v51 = vrot.slane %v2132_v38, 4  ;;  %v2167_v53 = vrot.slane %v2133_v39, 4 }
 0x134   : > { %v2317_v43 = vsel %vm1843_vm4, %v2314_v61, %v2316_v28  ;;  %v2321_v44 = vsel %vm1843_vm4, %v2316_v28, %v2314_v61 }
 0x135   : > { %3142 = vrot.lane.b32.xlu1 %v8478_v40, %s10829_s28  ;;  %v2322_v15 = vmul.f32 %v2317_v43, %v8383_v56  ;;  %v2323_v16 = vmul.f32 %v2321_v44, %v8386_v57 }
 0x136   : > { %3139 = vrot.lane.b32.xlu0 %v8491_v52, %s10829_s28 }
 0x137   : > { %v2338_v34 = vpop.permute.xlu1 %2337  ;;  %v2336_v37 = vpop.permute.xlu0 %2335  ;;  %v2372_v14 = vrot.slane %v2322_v15, 4  ;;  %v2373_v22 = vrot.slane %v2323_v16, 4 }
 0x138   : > { %v2339_v47 = vsel %vm1889_vm6, %v2336_v37, %v2338_v34  ;;  %v2343_v48 = vsel %vm1889_vm6, %v2338_v34, %v2336_v37 }
 0x139   : > { %2951 = vrot.lane.b32.xlu1 %v8462_v17, %s10836_s1  ;;  %v2344_v58 = vmul.f32 %v2339_v47, %v8398_v18  ;;  %v2345_v59 = vmul.f32 %v2343_v48, %v8401_v19  ;;  %v2387_v39 = vsel %vm1956_vm5, %v8217_v5, %v2373_v22  ;;  %v2386_v44 = vsel %vm1956_vm5, %v8209_v4, %v2372_v14  ;;  %v3027_v14 = vld [vmem:[%s10886_s6] sm:$0xff]  ;;  %s10908_s6 = sld [smem:[#allocation22_spill]] }
 0x13a   : > { %2949 = vrot.lane.b32.xlu0 %v8450_v63, %s10836_s1 }
 0x13b   : > { %v2115_v49 = vpop.permute.xlu1 %2114  ;;  %v2113_v50 = vpop.permute.xlu0 %2112  ;;  %v2378_v31 = vrot.slane %v2344_v58, 4  ;;  %v2379_v34 = vrot.slane %v2345_v59, 4  ;;  %v2603_v59 = vld [vmem:[%s7952_s20] sm:$0xff] }
 0x13c   : > { %v2116_v54 = vsel %vm1866_vm7, %v2113_v50, %v2115_v49  ;;  %v2120_v55 = vsel %vm1866_vm7, %v2115_v49, %v2113_v50  ;;  %v7868_v50 = vmov 0  }
 0x13d   : > { %v2121_v1 = vmul.f32 %v2116_v54, %v8415_v35  ;;  %v2122_v11 = vmul.f32 %v2120_v55, %v8418_v36  ;;  %2973 = vrot.lane.b32.xlu1 %v8462_v17, %s10827_s7  ;;  %7764 = vset.pattern.permute.xlu0 %v7868_v50  ;;  %v2815_v54 = vld [vmem:[%s10885_s4] sm:$0xff]  ;;  %s10906_s4 = sld [smem:[#allocation5_spill]] }
 0x13e   : > { %2971 = vrot.lane.b32.xlu0 %v8450_v63, %s10827_s7  ;;  %7765 = vset.pattern.permute.xlu1 %v7868_v50 }
 0x13f   : > { %v2327_v23 = vpop.permute.xlu1 %2326  ;;  %v2325_v24 = vpop.permute.xlu0 %2324  ;;  %v2177_v25 = vsel %vm1956_vm5, %v2122_v11, %v2167_v53  ;;  %v2176_v28 = vsel %vm1956_vm5, %v2121_v1, %v2166_v51 }
 0x140   : > { %v2328_v61 = vsel %vm1866_vm7, %v2325_v24, %v2327_v23  ;;  %v2332_v62 = vsel %vm1866_vm7, %v2327_v23, %v2325_v24  ;;  %v7216_v29 = vpack.c.bf16 %v2177_v25, %v2175_v12  ;;  %v7218_v30 = vpack.c.bf16 %v2176_v28, %v2174_v13  ;;  %v3239_v24 = vld [vmem:[%s7982_s27] sm:$0xff] }
 0x141   : > { %v2333_v3 = vmul.f32 %v2328_v61, %v8415_v35  ;;  %v2334_v2 = vmul.f32 %v2332_v62, %v8418_v36  ;;  %3163 = vrot.lane.b32.xlu1 %v8491_v52, %s10836_s1 }
 0x142   : > { %3161 = vrot.lane.b32.xlu0 %v8478_v40, %s10836_s1  ;;  %7217 = vmatprep.subr.bf16.mxu1 %v7216_v29 }
 0x143   : > { %v2496_v37 = vpop.permute.xlu1 %2495  ;;  %7219 = vmatpush1.bf16.msra.mxu1 %v7218_v30  ;;  %v2493_v38 = vpop.permute.xlu0 %2492  ;;  %v2389_v43 = vsel %vm1956_vm5, %v2334_v2, %v2379_v34  ;;  %v2388_v45 = vsel %vm1956_vm5, %v2333_v3, %v2378_v31 }
 0x144   : > { %v7224_v46 = vpack.c.bf16 %v2389_v43, %v2387_v39  ;;  %v7226_v47 = vpack.c.bf16 %v2388_v45, %v2386_v44  ;;  %v2500_v1 = vsel %vm1775_vm0, %v2493_v38, %v2496_v37  ;;  %v2497_v11 = vsel %vm1775_vm0, %v2496_v37, %v2493_v38 }
 0x145   : > { %3185 = vrot.lane.b32.xlu1 %v8491_v52, %s10827_s7  ;;  %v2501_v25 = vmul.f32 %v2500_v1, %v8328_v20  ;;  %v2502_v61 = vmul.f32 %v2497_v11, %v8331_v21 }
 0x146   : > { %3183 = vrot.lane.b32.xlu0 %v8478_v40, %s10827_s7  ;;  %7225 = vmatprep.subr.bf16.mxu0 %v7224_v46 }
 0x147   : > { %v2518_v48 = vpop.permute.xlu1 %2517  ;;  %7227 = vmatpush1.bf16.msra.mxu0 %v7226_v47  ;;  %v2515_v15 = vpop.permute.xlu0 %2514  ;;  %v2571_v39 = vrot.slane %v2501_v25, 4  ;;  %v2572_v46 = vrot.slane %v2502_v61, 4 }
 0x148   : > { %v2519_v12 = vsel %vm1821_vm1, %v2518_v48, %v2515_v15  ;;  %v2522_v13 = vsel %vm1821_vm1, %v2515_v15, %v2518_v48 }
 0x149   : > { %2962 = vrot.lane.b32.xlu1 %v8462_v17, %s10834_s10  ;;  %v2523_v62 = vmul.f32 %v2522_v13, %v8341_v26  ;;  %v2524_v29 = vmul.f32 %v2519_v12, %v8344_v27 }
 0x14a   : > { %2960 = vrot.lane.b32.xlu0 %v8450_v63, %s10834_s10 }
 0x14b   : > { %v2708_v4 = vpop.permute.xlu1 %2707  ;;  %v2705_v5 = vpop.permute.xlu0 %2704  ;;  %v2577_v47 = vrot.slane %v2523_v62, 4  ;;  %v2578_v48 = vrot.slane %v2524_v29, 4  ;;  %v2178_v29 = vld [vmem:[%s7927_s19] sm:$0xff] }
 0x14c   : > { %v2709_v31 = vsel %vm1775_vm0, %v2708_v4, %v2705_v5  ;;  %v2712_v15 = vsel %vm1775_vm0, %v2705_v5, %v2708_v4 }
 0x14d   : > { %3174 = vrot.lane.b32.xlu1 %v8491_v52, %s10834_s10  ;;  %v2714_v50 = vmul.f32 %v2709_v31, %v8331_v21 }
 0x14e   : > { %3172 = vrot.lane.b32.xlu0 %v8478_v40, %s10834_s10 }
 0x14f   : > { %v2730_v16 = vpop.permute.xlu1 %2729  ;;  %v2727_v49 = vpop.permute.xlu0 %2726 }
 0x150   : > { %v2734_v34 = vsel %vm1821_vm1, %v2727_v49, %v2730_v16  ;;  %v2731_v43 = vsel %vm1821_vm1, %v2730_v16, %v2727_v49 }
 0x151   : > { %2984 = vrot.lane.b32.xlu1 %v8462_v17, %s10820_s16 }
 0x152   : > { %2982 = vrot.lane.b32.xlu0 %v8450_v63, %s10820_s16 }
 0x153   : > { %v2485_v51 = vpop.permute.xlu1 %2484  ;;  %v2482_v53 = vpop.permute.xlu0 %2481 }
 0x154   : > { %v2486_v3 = vsel %vm1752_vm2, %v2485_v51, %v2482_v53  ;;  %v2489_v44 = vsel %vm1752_vm2, %v2482_v53, %v2485_v51 }
 0x155   : > { %3196 = vrot.lane.b32.xlu1 %v8491_v52, %s10820_s16  ;;  %v2490_v16 = vmul.f32 %v2489_v44, %v8350_v32 }
 0x156   : > { %3194 = vrot.lane.b32.xlu0 %v8478_v40, %s10820_s16 }
 0x157   : > { %v2507_v55 = vpop.permute.xlu1 %2506  ;;  %v2504_v58 = vpop.permute.xlu0 %2503 }
 0x158   : > { %v2508_v28 = vsel %vm1798_vm3, %v2507_v55, %v2504_v58  ;;  %v2511_v30 = vsel %vm1798_vm3, %v2504_v58, %v2507_v55  ;;  %v2491_v55 = vmul.f32 %v2486_v3, %v8353_v33 }
 0x159   : > { %2818 = vperm.xlu1 %7765, %v2815_v54   ;;  %v2513_v2 = vmul.f32 %v2508_v28, %v8367_v42  ;;  %v2512_v45 = vmul.f32 %v2511_v30, %v8364_v41  ;;  %v2735_v54 = vmul.f32 %v2734_v34, %v8341_v26  ;;  %v2713_v28 = vmul.f32 %v2712_v15, %v8328_v20 }
 0x15a   : > { %2606 = vperm.xlu0 %7764, %v2603_v59   ;;  %v2736_v59 = vmul.f32 %v2731_v43, %v8344_v27  ;;  %v2595_v62 = vsel %vm1956_vm5, %v2491_v55, %v2572_v46  ;;  %v2784_v43 = vrot.slane %v2714_v50, 4  ;;  %v2390_v55 = vld [vmem:[%s10887_s2] sm:$0xff]  ;;  %s10890_s2 = sld [smem:[#allocation12_spill]] }
 0x15b   : > { %v2697_v22 = vpop.permute.xlu1 %2696  ;;  %v2694_v23 = vpop.permute.xlu0 %2693  ;;  %v2597_v1 = vsel %vm1956_vm5, %v2513_v2, %v2578_v48  ;;  %v2596_v12 = vsel %vm1956_vm5, %v2512_v45, %v2577_v47  ;;  %v2789_v3 = vrot.slane %v2735_v54, 4  ;;  %v2783_v47 = vrot.slane %v2713_v28, 4 }
 0x15c   : > { %v2698_v4 = vsel %vm1752_vm2, %v2697_v22, %v2694_v23  ;;  %v2701_v13 = vsel %vm1752_vm2, %v2694_v23, %v2697_v22  ;;  %v2790_v30 = vrot.slane %v2736_v59, 4  ;;  %v7228_v22 = vpack.c.bf16 %v2597_v1, %v2595_v62 }
 0x15d   : > { %3030 = vperm.xlu1 %7765, %v3027_v14   ;;  %v2703_v31 = vmul.f32 %v2698_v4, %v8353_v33  ;;  %v2594_v23 = vsel %vm1956_vm5, %v2490_v16, %v2571_v39  ;;  %v2702_v2 = vmul.f32 %v2701_v13, %v8350_v32 }
 0x15e   : > { %3242 = vperm.xlu0 %7764, %v3239_v24  }
 0x15f   : > { %v2719_v37 = vpop.permute.xlu1 %2718  ;;  %v2716_v38 = vpop.permute.xlu0 %2715  ;;  %v2807_v54 = vsel %vm1956_vm5, %v2703_v31, %v2784_v43  ;;  %v2806_v16 = vsel %vm1956_vm5, %v2702_v2, %v2783_v47 }
 0x160   : > { %v2720_v58 = vsel %vm1798_vm3, %v2719_v37, %v2716_v38  ;;  %v2723_v49 = vsel %vm1798_vm3, %v2716_v38, %v2719_v37  ;;  %v7230_v38 = vpack.c.bf16 %v2596_v12, %v2594_v23 }
 0x161   : > { %v2725_v14 = vmul.f32 %v2720_v58, %v8367_v42  ;;  %v2724_v61 = vmul.f32 %v2723_v49, %v8364_v41 }
 0x163   : > { %v2137_v51 = vpop.permute.xlu1 %2136  ;;  %v2135_v53 = vpop.permute.xlu0 %2134  ;;  %v2809_v46 = vsel %vm1956_vm5, %v2725_v14, %v2790_v30  ;;  %v2808_v15 = vsel %vm1956_vm5, %v2724_v61, %v2789_v3 }
 0x164   : > { %v2138_v5 = vsel %vm1912_vm8, %v2135_v53, %v2137_v51  ;;  %v2142_v11 = vsel %vm1912_vm8, %v2137_v51, %v2135_v53  ;;  %v7236_v59 = vpack.c.bf16 %v2809_v46, %v2807_v54  ;;  %v7238_v49 = vpack.c.bf16 %v2808_v15, %v2806_v16 }
 0x165   : > { %v2143_v24 = vmul.f32 %v2138_v5, %v8516_v0  ;;  %v2144_v25 = vmul.f32 %v2142_v11, %v8519_v60 }
 0x167   : > { %v2349_v34 = vpop.permute.xlu1 %2348  ;;  %7146 = vmatprep.subr.msk.mxu1 %vm1956_vm5, %v2144_v25  ;;  %v2347_v37 = vpop.permute.xlu0 %2346 }
 0x168   : > { %7147 = vmatpush1.msk.msra.mxu1 %vm1956_vm5, %v2143_v24  ;;  %v2350_v44 = vsel %vm1912_vm8, %v2347_v37, %v2349_v34  ;;  %v2354_v45 = vsel %vm1912_vm8, %v2349_v34, %v2347_v37 }
 0x169   : > { %7229 = vmatprep.subr.bf16.mxu1 %v7228_v22  ;;  %7148 = vmatmul.mubr.msk.f32.vlgmr.msra.gmra.mrb[0].mxu1 %vm1972_vm9, %v2178_v29  ;;  %v2355_v39 = vmul.f32 %v2350_v44, %v8516_v0  ;;  %v2356_v48 = vmul.f32 %v2354_v45, %v8519_v60 }
 0x16a   : > { %7231 = vmatpush1.bf16.msra.mxu1 %v7230_v38  ;;  %2682 = vmatprep.mubr.f32.mxu1 %v10818_v6 }
 0x16b   : > { %v2528_v50 = vpop.permute.xlu1 %2527  ;;  %7149 = vmatprep.subr.msk.mxu0 %vm1956_vm5, %v2356_v48  ;;  %v2526_v58 = vpop.permute.xlu0 %2525 }
 0x16c   : > { %7150 = vmatpush1.msk.msra.mxu0 %vm1956_vm5, %v2355_v39  ;;  %v2529_v4 = vsel %vm1843_vm4, %v2526_v58, %v2528_v50  ;;  %v2533_v5 = vsel %vm1843_vm4, %v2528_v50, %v2526_v58 }
 0x16d   : > { %7237 = vmatprep.subr.bf16.mxu0 %v7236_v59  ;;  %7151 = vmatmul.mubr.msk.f32.vlgmr.msra.gmra.mrb[2].mxu0 %vm1972_vm9, %v2390_v55  ;;  %v2534_v14 = vmul.f32 %v2529_v4, %v8383_v56  ;;  %v2535_v24 = vmul.f32 %v2533_v5, %v8386_v57 }
 0x16e   : > { %7239 = vmatpush1.bf16.msra.mxu0 %v7238_v49  ;;  %2894 = vmatprep.mubr.f32.mxu0 %v10818_v6 }
 0x16f   : > { %v2550_v51 = vpop.permute.xlu1 %2549  ;;  %v2548_v53 = vpop.permute.xlu0 %2547  ;;  %v2584_v31 = vrot.slane %v2534_v14, 4  ;;  %v2585_v34 = vrot.slane %v2535_v24, 4 }
 0x170   : > { %v2551_v12 = vsel %vm1889_vm6, %v2548_v53, %v2550_v51  ;;  %v2555_v13 = vsel %vm1889_vm6, %v2550_v51, %v2548_v53 }
 0x171   : > { %v2556_v61 = vmul.f32 %v2551_v12, %v8398_v18  ;;  %v2557_v62 = vmul.f32 %v2555_v13, %v8401_v19  ;;  %v2599_v54 = vsel %vm1956_vm5, %v8279_v8, %v2585_v34  ;;  %v2598_v55 = vsel %vm1956_vm5, %v8271_v7, %v2584_v31 }
 0x173   : > { %v2740_v1 = vpop.permute.xlu1 %2739  ;;  %v2738_v11 = vpop.permute.xlu0 %2737  ;;  %v2590_v43 = vrot.slane %v2556_v61, 4  ;;  %v2591_v44 = vrot.slane %v2557_v62, 4 }
 0x174   : > { %v2741_v29 = vsel %vm1843_vm4, %v2738_v11, %v2740_v1  ;;  %v2745_v30 = vsel %vm1843_vm4, %v2740_v1, %v2738_v11 }
 0x175   : > { %v2746_v2 = vmul.f32 %v2741_v29, %v8383_v56  ;;  %v2747_v37 = vmul.f32 %v2745_v30, %v8386_v57 }
 0x177   : > { %v2762_v25 = vpop.permute.xlu1 %2761  ;;  %v2760_v28 = vpop.permute.xlu0 %2759  ;;  %v2796_v58 = vrot.slane %v2746_v2, 4  ;;  %v2797_v59 = vrot.slane %v2747_v37, 4 }
 0x178   : > { %v2763_v22 = vsel %vm1889_vm6, %v2760_v28, %v2762_v25  ;;  %v2767_v23 = vsel %vm1889_vm6, %v2762_v25, %v2760_v28 }
 0x179   : > { %v2768_v47 = vmul.f32 %v2763_v22, %v8398_v18  ;;  %v2769_v39 = vmul.f32 %v2767_v23, %v8401_v19  ;;  %v2811_v24 = vsel %vm1956_vm5, %v8295_v10, %v2797_v59  ;;  %v2810_v28 = vsel %vm1956_vm5, %v8287_v9, %v2796_v58  ;;  %v2602_v23 = vld [vmem:[%s10888_s11] sm:$0xff]  ;;  %s10891_s11 = sld [smem:[#allocation14_spill]] }
 0x17b   : > { %v2539_v3 = vpop.permute.xlu1 %2538  ;;  %v2537_v38 = vpop.permute.xlu0 %2536  ;;  %v2802_v11 = vrot.slane %v2768_v47, 4  ;;  %v2803_v12 = vrot.slane %v2769_v39, 4 }
 0x17c   : > { %v2540_v45 = vsel %vm1866_vm7, %v2537_v38, %v2539_v3  ;;  %v2544_v46 = vsel %vm1866_vm7, %v2539_v3, %v2537_v38 }
 0x17d   : > { %v2545_v48 = vmul.f32 %v2540_v45, %v8415_v35  ;;  %v2546_v15 = vmul.f32 %v2544_v46, %v8418_v36 }
 0x17f   : > { %v2751_v50 = vpop.permute.xlu1 %2750  ;;  %v2749_v16 = vpop.permute.xlu0 %2748  ;;  %v2601_v49 = vsel %vm1956_vm5, %v2546_v15, %v2591_v44  ;;  %v2600_v51 = vsel %vm1956_vm5, %v2545_v48, %v2590_v43  ;;  %v2814_v44 = vld [vmem:[%s10889_s18] sm:$0xff]  ;;  %s10892_s18 = sld [smem:[#allocation15_spill]] }
 0x180   : > { %v2752_v53 = vsel %vm1866_vm7, %v2749_v16, %v2751_v50  ;;  %v2756_v1 = vsel %vm1866_vm7, %v2751_v50, %v2749_v16  ;;  %v7232_v4 = vpack.c.bf16 %v2601_v49, %v2599_v54  ;;  %v7234_v5 = vpack.c.bf16 %v2600_v51, %v2598_v55 }
 0x181   : > { %v2757_v8 = vmul.f32 %v2752_v53, %v8415_v35  ;;  %v2758_v13 = vmul.f32 %v2756_v1, %v8418_v36 }
 0x182   : > { %7233 = vmatprep.subr.bf16.mxu1 %v7232_v4 }
 0x183   : > { %v2561_v7 = vpop.permute.xlu1 %2560  ;;  %7235 = vmatpush1.bf16.msra.mxu1 %v7234_v5  ;;  %v2559_v14 = vpop.permute.xlu0 %2558  ;;  %v2813_v25 = vsel %vm1956_vm5, %v2758_v13, %v2803_v12  ;;  %v2812_v61 = vsel %vm1956_vm5, %v2757_v8, %v2802_v11 }
 0x184   : > { %v2562_v62 = vsel %vm1912_vm8, %v2559_v14, %v2561_v7  ;;  %v2566_v29 = vsel %vm1912_vm8, %v2561_v7, %v2559_v14  ;;  %v7240_v30 = vpack.c.bf16 %v2813_v25, %v2811_v24  ;;  %v7242_v31 = vpack.c.bf16 %v2812_v61, %v2810_v28 }
 0x185   : > { %v2567_v34 = vmul.f32 %v2562_v62, %v8516_v0  ;;  %v2568_v22 = vmul.f32 %v2566_v29, %v8519_v60 }
 0x186   : > { %7241 = vmatprep.subr.bf16.mxu0 %v7240_v30 }
 0x187   : > { %v2773_v10 = vpop.permute.xlu1 %2772  ;;  %7152 = vmatprep.subr.msk.mxu1 %vm1956_vm5, %v2568_v22  ;;  %7243 = vmatpush1.bf16.msra.mxu0 %v7242_v31  ;;  %v2771_v9 = vpop.permute.xlu0 %2770 }
 0x188   : > { %v2774_v3 = vsel %vm1912_vm8, %v2771_v9, %v2773_v10  ;;  %v2778_v2 = vsel %vm1912_vm8, %v2773_v10, %v2771_v9  ;;  %7153 = vmatpush1.msk.msra.mxu1 %vm1956_vm5, %v2567_v34 }
 0x189   : > { %v2779_v37 = vmul.f32 %v2774_v3, %v8516_v0  ;;  %v2780_v38 = vmul.f32 %v2778_v2, %v8519_v60  ;;  %7154 = vmatmul.mubr.msk.f32.vlgmr.msra.gmra.mrb[2].mxu1 %vm1972_vm9, %v2602_v23 }
 0x18a   : > { %3106 = vmatprep.mubr.f32.mxu1 %v10818_v6 }
 0x18b   : > { %v2920_v43 = vpop.permute.xlu1 %2919  ;;  %7155 = vmatprep.subr.msk.mxu0 %vm1956_vm5, %v2780_v38  ;;  %v2917_v45 = vpop.permute.xlu0 %2916 }
 0x18c   : > { %7156 = vmatpush1.msk.msra.mxu0 %vm1956_vm5, %v2779_v37  ;;  %v2921_v54 = vsel %vm1775_vm0, %v2920_v43, %v2917_v45  ;;  %v2924_v55 = vsel %vm1775_vm0, %v2917_v45, %v2920_v43 }
 0x18d   : > { %7157 = vmatmul.mubr.msk.f32.vlgmr.msra.gmra.mrb[4].mxu0 %vm1972_vm9, %v2814_v44  ;;  %v2925_v51 = vmul.f32 %v2924_v55, %v8328_v20  ;;  %v2926_v53 = vmul.f32 %v2921_v54, %v8331_v21 }
 0x18e   : > { %3318 = vmatprep.mubr.f32.mxu0 %v10818_v6 }
 0x18f   : > { %v2942_v46 = vpop.permute.xlu1 %2941  ;;  %v2939_v47 = vpop.permute.xlu0 %2938  ;;  %v2995_v25 = vrot.slane %v2925_v51, 4  ;;  %v2996_v28 = vrot.slane %v2926_v53, 4 }
 0x190   : > { %v2943_v58 = vsel %vm1821_vm1, %v2942_v46, %v2939_v47  ;;  %v2946_v59 = vsel %vm1821_vm1, %v2939_v47, %v2942_v46 }
 0x191   : > { %v2947_v5 = vmul.f32 %v2946_v59, %v8341_v26  ;;  %v2948_v11 = vmul.f32 %v2943_v58, %v8344_v27 }
 0x193   : > { %v3132_v39 = vpop.permute.xlu1 %3131  ;;  %v3129_v48 = vpop.permute.xlu0 %3128  ;;  %v3001_v29 = vrot.slane %v2947_v5, 4  ;;  %v3002_v30 = vrot.slane %v2948_v11, 4 }
 0x194   : > { %v3133_v8 = vsel %vm1775_vm0, %v3132_v39, %v3129_v48  ;;  %v3136_v13 = vsel %vm1775_vm0, %v3129_v48, %v3132_v39 }
 0x195   : > { %v3137_v22 = vmul.f32 %v3136_v13, %v8328_v20  ;;  %v3138_v10 = vmul.f32 %v3133_v8, %v8331_v21 }
 0x197   : > { %v3154_v15 = vpop.permute.xlu1 %3153  ;;  %v3151_v50 = vpop.permute.xlu0 %3150  ;;  %v3207_v59 = vrot.slane %v3137_v22, 4 }
 0x198   : > { %v3155_v23 = vsel %vm1821_vm1, %v3154_v15, %v3151_v50  ;;  %v3158_v9 = vsel %vm1821_vm1, %v3151_v50, %v3154_v15 }
 0x199   : > { %v3159_v48 = vmul.f32 %v3158_v9, %v8341_v26  ;;  %v3160_v15 = vmul.f32 %v3155_v23, %v8344_v27 }
 0x19b   : > { %v2909_v16 = vpop.permute.xlu1 %2908  ;;  %v2906_v49 = vpop.permute.xlu0 %2905  ;;  %v3213_v53 = vrot.slane %v3159_v48, 4 }
 0x19c   : > { %v2910_v1 = vsel %vm1752_vm2, %v2909_v16, %v2906_v49  ;;  %v2913_v4 = vsel %vm1752_vm2, %v2906_v49, %v2909_v16  ;;  %v3208_v16 = vrot.slane %v3138_v10, 4 }
 0x19d   : > { %v2914_v7 = vmul.f32 %v2913_v4, %v8350_v32  ;;  %v2915_v14 = vmul.f32 %v2910_v1, %v8353_v33  ;;  %v3214_v1 = vrot.slane %v3160_v15, 4 }
 0x19f   : > { %v2931_v12 = vpop.permute.xlu1 %2930  ;;  %v3019_v37 = vsel %vm1956_vm5, %v2915_v14, %v2996_v28  ;;  %v3018_v43 = vsel %vm1956_vm5, %v2914_v7, %v2995_v25 }
 0x1a0   : > { %v2928_v24 = vpop.permute.xlu0 %2927 }
 0x1a1   : > { %v2932_v61 = vsel %vm1798_vm3, %v2931_v12, %v2928_v24  ;;  %v2935_v62 = vsel %vm1798_vm3, %v2928_v24, %v2931_v12 }
 0x1a2   : > { %v2936_v31 = vmul.f32 %v2935_v62, %v8364_v41  ;;  %v2937_v34 = vmul.f32 %v2932_v61, %v8367_v42 }
 0x1a3   : > { %v3121_v3 = vpop.permute.xlu1 %3120 }
 0x1a4   : > { %v3118_v2 = vpop.permute.xlu0 %3117  ;;  %v3021_v38 = vsel %vm1956_vm5, %v2937_v34, %v3002_v30  ;;  %v3020_v44 = vsel %vm1956_vm5, %v2936_v31, %v3001_v29 }
 0x1a5   : > { %v3122_v45 = vsel %vm1752_vm2, %v3121_v3, %v3118_v2  ;;  %v3125_v46 = vsel %vm1752_vm2, %v3118_v2, %v3121_v3  ;;  %v7244_v47 = vpack.c.bf16 %v3021_v38, %v3019_v37  ;;  %v7246_v39 = vpack.c.bf16 %v3020_v44, %v3018_v43 }
 0x1a6   : > { %v3126_v54 = vmul.f32 %v3125_v46, %v8350_v32  ;;  %v3127_v55 = vmul.f32 %v3122_v45, %v8353_v33 }
 0x1a7   : > { %7245 = vmatprep.subr.bf16.mxu1 %v7244_v47  ;;  %v3143_v50 = vpop.permute.xlu1 %3142 }
 0x1a8   : > { %7247 = vmatpush1.bf16.msra.mxu1 %v7246_v39  ;;  %v3140_v58 = vpop.permute.xlu0 %3139  ;;  %v3231_v8 = vsel %vm1956_vm5, %v3127_v55, %v3208_v16  ;;  %v3230_v7 = vsel %vm1956_vm5, %v3126_v54, %v3207_v59 }
 0x1a9   : > { %v3144_v49 = vsel %vm1798_vm3, %v3143_v50, %v3140_v58  ;;  %v3147_v51 = vsel %vm1798_vm3, %v3140_v58, %v3143_v50 }
 0x1aa   : > { %v3148_v4 = vmul.f32 %v3147_v51, %v8364_v41  ;;  %v3149_v5 = vmul.f32 %v3144_v49, %v8367_v42 }
 0x1ab   : > { %v2952_v11 = vpop.permute.xlu1 %2951 }
 0x1ac   : > { %v2950_v12 = vpop.permute.xlu0 %2949  ;;  %v3233_v13 = vsel %vm1956_vm5, %v3149_v5, %v3214_v1  ;;  %v3232_v14 = vsel %vm1956_vm5, %v3148_v4, %v3213_v53 }
 0x1ad   : > { %v7252_v24 = vpack.c.bf16 %v3233_v13, %v3231_v8  ;;  %v7254_v25 = vpack.c.bf16 %v3232_v14, %v3230_v7  ;;  %v2953_v29 = vsel %vm1843_vm4, %v2950_v12, %v2952_v11  ;;  %v2957_v30 = vsel %vm1843_vm4, %v2952_v11, %v2950_v12 }
 0x1ae   : > { %v2958_v34 = vmul.f32 %v2953_v29, %v8383_v56  ;;  %v2959_v22 = vmul.f32 %v2957_v30, %v8386_v57 }
 0x1af   : > { %7253 = vmatprep.subr.bf16.mxu0 %v7252_v24  ;;  %v2974_v28 = vpop.permute.xlu1 %2973 }
 0x1b0   : > { %7255 = vmatpush1.bf16.msra.mxu0 %v7254_v25  ;;  %v2972_v61 = vpop.permute.xlu0 %2971  ;;  %v3008_v46 = vrot.slane %v2958_v34, 4  ;;  %v3009_v47 = vrot.slane %v2959_v22, 4 }
 0x1b1   : > { %v2975_v10 = vsel %vm1889_vm6, %v2972_v61, %v2974_v28  ;;  %v2979_v23 = vsel %vm1889_vm6, %v2974_v28, %v2972_v61 }
 0x1b2   : > { %v2980_v44 = vmul.f32 %v2975_v10, %v8398_v18  ;;  %v2981_v45 = vmul.f32 %v2979_v23, %v8401_v19  ;;  %v3023_v11 = vsel %vm1956_vm5, %v8462_v17, %v3009_v47  ;;  %v3022_v12 = vsel %vm1956_vm5, %v8450_v63, %v3008_v46 }
 0x1b3   : > { %v3164_v62 = vpop.permute.xlu1 %3163 }
 0x1b4   : > { %v3162_v31 = vpop.permute.xlu0 %3161  ;;  %v3014_v16 = vrot.slane %v2980_v44, 4  ;;  %v3015_v49 = vrot.slane %v2981_v45, 4 }
 0x1b5   : > { %v3165_v3 = vsel %vm1843_vm4, %v3162_v31, %v3164_v62  ;;  %v3169_v2 = vsel %vm1843_vm4, %v3164_v62, %v3162_v31 }
 0x1b6   : > { %v3170_v39 = vmul.f32 %v3165_v3, %v8383_v56  ;;  %v3171_v48 = vmul.f32 %v3169_v2, %v8386_v57 }
 0x1b7   : > { %v3186_v9 = vpop.permute.xlu1 %3185 }
 0x1b8   : > { %v3184_v37 = vpop.permute.xlu0 %3183  ;;  %v3220_v1 = vrot.slane %v3170_v39, 4  ;;  %v3221_v4 = vrot.slane %v3171_v48, 4  ;;  %v3238_v39 = vld [vmem:[%s10891_s11] sm:$0xff]  ;;  %s10894_s11 = sld [smem:[#allocation20_spill]] }
 0x1b9   : > { %v3187_v38 = vsel %vm1889_vm6, %v3184_v37, %v3186_v9  ;;  %v3191_v43 = vsel %vm1889_vm6, %v3186_v9, %v3184_v37 }
 0x1ba   : > { %v3192_v50 = vmul.f32 %v3187_v38, %v8398_v18  ;;  %v3193_v54 = vmul.f32 %v3191_v43, %v8401_v19  ;;  %v3235_v31 = vsel %vm1956_vm5, %v8491_v52, %v3221_v4  ;;  %v3234_v22 = vsel %vm1956_vm5, %v8478_v40, %v3220_v1  ;;  %v3026_v43 = vld [vmem:[%s10890_s2] sm:$0xff]  ;;  %s10893_s2 = sld [smem:[#allocation16_spill]] }
 0x1bb   : > { %v2963_v15 = vpop.permute.xlu1 %2962 }
 0x1bc   : > { %v2961_v55 = vpop.permute.xlu0 %2960  ;;  %v3226_v8 = vrot.slane %v3192_v50, 4  ;;  %v3227_v13 = vrot.slane %v3193_v54, 4 }
 0x1bd   : > { %v2964_v58 = vsel %vm1866_vm7, %v2961_v55, %v2963_v15  ;;  %v2968_v59 = vsel %vm1866_vm7, %v2963_v15, %v2961_v55 }
 0x1be   : > { %v2969_v51 = vmul.f32 %v2964_v58, %v8415_v35  ;;  %v2970_v53 = vmul.f32 %v2968_v59, %v8418_v36 }
 0x1bf   : > { %v3175_v5 = vpop.permute.xlu1 %3174 }
 0x1c0   : > { %v3173_v7 = vpop.permute.xlu0 %3172  ;;  %v3025_v14 = vsel %vm1956_vm5, %v2970_v53, %v3015_v49  ;;  %v3024_v24 = vsel %vm1956_vm5, %v2969_v51, %v3014_v16 }
 0x1c1   : > { %v3176_v25 = vsel %vm1866_vm7, %v3173_v7, %v3175_v5  ;;  %v3180_v28 = vsel %vm1866_vm7, %v3175_v5, %v3173_v7  ;;  %v7248_v61 = vpack.c.bf16 %v3025_v14, %v3023_v11  ;;  %v7250_v62 = vpack.c.bf16 %v3024_v24, %v3022_v12 }
 0x1c2   : > { %v3181_v29 = vmul.f32 %v3176_v25, %v8415_v35  ;;  %v3182_v17 = vmul.f32 %v3180_v28, %v8418_v36 }
 0x1c3   : > { %7249 = vmatprep.subr.bf16.mxu1 %v7248_v61  ;;  %v2985_v63 = vpop.permute.xlu1 %2984 }
 0x1c4   : > { %7251 = vmatpush1.bf16.msra.mxu1 %v7250_v62  ;;  %v2983_v30 = vpop.permute.xlu0 %2982  ;;  %v3237_v34 = vsel %vm1956_vm5, %v3182_v17, %v3227_v13  ;;  %v3236_v10 = vsel %vm1956_vm5, %v3181_v29, %v3226_v8  ;;  %v3508_v62 = vld [vmem:[%s10892_s18 + $0x8] sm:$0xff] }
 0x1c5   : > { %v2986_v23 = vsel %vm1912_vm8, %v2983_v30, %v2985_v63  ;;  %v2990_v9 = vsel %vm1912_vm8, %v2985_v63, %v2983_v30  ;;  %v7256_v3 = vpack.c.bf16 %v3237_v34, %v3235_v31  ;;  %v7258_v2 = vpack.c.bf16 %v3236_v10, %v3234_v22 }
 0x1c6   : > { %v2991_v37 = vmul.f32 %v2986_v23, %v8516_v0  ;;  %v2992_v38 = vmul.f32 %v2990_v9, %v8519_v60 }
 0x1c7   : > { %7257 = vmatprep.subr.bf16.mxu0 %v7256_v3  ;;  %v3197_v52 = vpop.permute.xlu1 %3196 }
 0x1c8   : > { %7158 = vmatprep.subr.msk.mxu1 %vm1956_vm5, %v2992_v38  ;;  %7259 = vmatpush1.bf16.msra.mxu0 %v7258_v2  ;;  %v3195_v40 = vpop.permute.xlu0 %3194 }
 0x1c9   : > { %v3198_v44 = vsel %vm1912_vm8, %v3195_v40, %v3197_v52  ;;  %v3202_v45 = vsel %vm1912_vm8, %v3197_v52, %v3195_v40  ;;  %7159 = vmatpush1.msk.msra.mxu1 %vm1956_vm5, %v2991_v37 }
 0x1ca   : > { %v3203_v46 = vmul.f32 %v3198_v44, %v8516_v0  ;;  %v3204_v47 = vmul.f32 %v3202_v45, %v8519_v60  ;;  %7160 = vmatmul.mubr.msk.f32.vlgmr.msra.gmra.mrb[4].mxu1 %vm1972_vm9, %v3026_v43 }
 0x1cb   : > { %7164 = vmatprep.mubr.msk.f32.mxu1 %vm1775_vm0, %v3508_v62 }
 0x1cc   : > { %7161 = vmatprep.subr.msk.mxu0 %vm1956_vm5, %v3204_v47  ;;  %v3511_v47 = vld [vmem:[%s10893_s2] sm:$0xff] }
 0x1cd   : > { %7162 = vmatpush1.msk.msra.mxu0 %vm1956_vm5, %v3203_v46 }
 0x1ce   : > { %7163 = vmatmul.mubr.msk.f32.vlgmr.msra.gmra.mrb[6].mxu0 %vm1972_vm9, %v3238_v39 }
 0x1d8   : > { %v2819_v1 = vpop.permute.xlu1 %2818 }
 0x1d9   : > { %v2607_v59 = vpop.permute.xlu0 %2606 }
 0x1dc   : > { %v3031_v28 = vpop.permute.xlu1 %3030 }
 0x1dd   : > { %v3243_v31 = vpop.permute.xlu0 %3242 }
 0x201   : > { %v8832_v48 = vpop.f32.mrb[0].mxu0 }
 0x202   : > { %v8834_v15 = vpop.f32.mrb[1].mxu0 }
 0x23c   : > { %v8836_v50 = vpop.f32.mrb[0].mxu1 }
 0x23d   : > { %v8838_v54 = vpop.f32.mrb[1].mxu1 }
 0x240   : > { %v8840_v55 = vpop.f32.mrb[2].mxu0 }
 0x241   : > { %v8842_v58 = vpop.f32.mrb[3].mxu0 }
 0x25c   : > { %v2684_v16 = vpop.f32.mrb[2].mxu1 }
 0x25d   : > { %v2685_v49 = vadd.f32 %v2684_v16, %v2607_v59  ;;  %v2686_v51 = vpop.f32.mrb[3].mxu1 }
 0x25e   : > { %v2687_v53 = vadd.f32 %v2686_v51, %v2607_v59  ;;  %v3512_v59 = vld [vmem:[%s10893_s2 + $0x8] sm:$0xff]  ;;  %s10900_s2 = smov 16  }
 0x25f   : > { %v8844_v4 = vmax.f32 %v2685_v49, 0.0  ;;  %v4070_v49 = vld [vmem:[%s10894_s11] sm:$0xff] }
 0x260   : > { %v8846_v5 = vmax.f32 %v2687_v53, 0.0  ;;  %v2896_v11 = vpop.f32.mrb[4].mxu0  ;;  %v4071_v53 = vld [vmem:[%s10894_s11 + $0x8] sm:$0xff] }
 0x261   : > { %v2897_v12 = vadd.f32 %v2896_v11, %v2819_v1  ;;  %v2898_v8 = vpop.f32.mrb[5].mxu0  ;;  %3337 = vrot.lane.b32.xlu1 %v8844_v4, %s10822_s26 }
 0x262   : > { %v2899_v13 = vadd.f32 %v2898_v8, %v2819_v1  ;;  %3421 = vrot.lane.b32.xlu0 %v8846_v5, %s10836_s1 }
 0x263   : > { %v8852_v7 = vmax.f32 %v2897_v12, 0.0 }
 0x264   : > { %v8854_v14 = vmax.f32 %v2899_v13, 0.0 }
 0x265   : > { %3359 = vrot.lane.b32.xlu1 %v8844_v4, %s10824_s23  ;;  %v7278_v24 = vpack.c.bf16 %v8852_v7, %v8844_v4 }
 0x266   : > { %3443 = vrot.lane.b32.xlu0 %v8846_v5, %s10834_s10  ;;  %v7276_v25 = vpack.c.bf16 %v8854_v14, %v8846_v5 }
 0x269   : > { %3381 = vrot.lane.b32.xlu1 %v8844_v4, %s10829_s28 }
 0x26a   : > { %3465 = vrot.lane.b32.xlu0 %v8846_v5, %s10827_s7 }
 0x26d   : > { %3403 = vrot.lane.b32.xlu1 %v8844_v4, %s10831_s22 }
 0x26e   : > { %3487 = vrot.lane.b32.xlu0 %v8846_v5, %s10820_s16 }
 0x271   : > { %3419 = vrot.lane.b32.xlu1 %v8844_v4, %s10836_s1 }
 0x272   : > { %3339 = vrot.lane.b32.xlu0 %v8852_v7, %s10822_s26 }
 0x275   : > { %3441 = vrot.lane.b32.xlu1 %v8844_v4, %s10834_s10 }
 0x276   : > { %3361 = vrot.lane.b32.xlu0 %v8852_v7, %s10824_s23 }
 0x279   : > { %3463 = vrot.lane.b32.xlu1 %v8844_v4, %s10827_s7 }
 0x27a   : > { %3383 = vrot.lane.b32.xlu0 %v8852_v7, %s10829_s28 }
 0x27d   : > { %3485 = vrot.lane.b32.xlu1 %v8844_v4, %s10820_s16 }
 0x27e   : > { %3405 = vrot.lane.b32.xlu0 %v8852_v7, %s10831_s22 }
 0x281   : > { %3329 = vrot.lane.b32.xlu1 %v8846_v5, %s10822_s26 }
 0x282   : > { %3331 = vrot.lane.b32.xlu0 %v8854_v14, %s10822_s26 }
 0x285   : > { %3353 = vrot.lane.b32.xlu1 %v8846_v5, %s10824_s23 }
 0x286   : > { %3355 = vrot.lane.b32.xlu0 %v8854_v14, %s10824_s23 }
 0x289   : > { %3375 = vrot.lane.b32.xlu1 %v8846_v5, %s10829_s28 }
 0x28a   : > { %3377 = vrot.lane.b32.xlu0 %v8854_v14, %s10829_s28 }
 0x28d   : > { %3397 = vrot.lane.b32.xlu1 %v8846_v5, %s10831_s22 }
 0x28e   : > { %3399 = vrot.lane.b32.xlu0 %v8854_v14, %s10831_s22 }
 0x291   : > { %3423 = vrot.lane.b32.xlu1 %v8852_v7, %s10836_s1 }
 0x292   : > { %3425 = vrot.lane.b32.xlu0 %v8854_v14, %s10836_s1 }
 0x295   : > { %3445 = vrot.lane.b32.xlu1 %v8852_v7, %s10834_s10 }
 0x296   : > { %3447 = vrot.lane.b32.xlu0 %v8854_v14, %s10834_s10 }
 0x299   : > { %3467 = vrot.lane.b32.xlu1 %v8852_v7, %s10827_s7 }
 0x29a   : > { %3469 = vrot.lane.b32.xlu0 %v8854_v14, %s10827_s7 }
 0x29d   : > { %v3108_v61 = vpop.f32.mrb[4].mxu1  ;;  %3489 = vrot.lane.b32.xlu1 %v8852_v7, %s10820_s16 }
 0x29e   : > { %v3109_v29 = vadd.f32 %v3108_v61, %v3031_v28  ;;  %v3110_v17 = vpop.f32.mrb[5].mxu1  ;;  %3491 = vrot.lane.b32.xlu0 %v8854_v14, %s10820_s16 }
 0x29f   : > { %v3111_v63 = vadd.f32 %v3110_v17, %v3031_v28 }
 0x2a0   : > { %v8922_v30 = vmax.f32 %v3109_v29, 0.0 }
 0x2a1   : > { %v8924_v34 = vmax.f32 %v3111_v63, 0.0  ;;  %v3320_v22 = vpop.f32.mrb[6].mxu0 }
 0x2a2   : > { %v3321_v10 = vadd.f32 %v3320_v22, %v3243_v31  ;;  %v3322_v23 = vpop.f32.mrb[7].mxu0  ;;  %3896 = vrot.lane.b32.xlu1 %v8922_v30, %s10822_s26 }
 0x2a3   : > { %v3323_v9 = vadd.f32 %v3322_v23, %v3243_v31  ;;  %3980 = vrot.lane.b32.xlu0 %v8924_v34, %s10836_s1 }
 0x2a4   : > { %v8930_v3 = vmax.f32 %v3321_v10, 0.0 }
 0x2a5   : > { %v8932_v2 = vmax.f32 %v3323_v9, 0.0 }
 0x2a6   : > { %3918 = vrot.lane.b32.xlu1 %v8922_v30, %s10824_s23 }
 0x2a7   : > { %4002 = vrot.lane.b32.xlu0 %v8924_v34, %s10834_s10  ;;  %v7348_v38 = vpack.c.bf16 %v8932_v2, %v8924_v34 }
 0x2aa   : > { %3940 = vrot.lane.b32.xlu1 %v8922_v30, %s10829_s28 }
 0x2ab   : > { %4024 = vrot.lane.b32.xlu0 %v8924_v34, %s10827_s7 }
 0x2ae   : > { %3962 = vrot.lane.b32.xlu1 %v8922_v30, %s10831_s22 }
 0x2af   : > { %3898 = vrot.lane.b32.xlu0 %v8930_v3, %s10822_s26 }
 0x2b2   : > { %3978 = vrot.lane.b32.xlu1 %v8922_v30, %s10836_s1 }
 0x2b3   : > { %3920 = vrot.lane.b32.xlu0 %v8930_v3, %s10824_s23 }
 0x2b6   : > { %4000 = vrot.lane.b32.xlu1 %v8922_v30, %s10834_s10 }
 0x2b7   : > { %3942 = vrot.lane.b32.xlu0 %v8930_v3, %s10829_s28 }
 0x2ba   : > { %4022 = vrot.lane.b32.xlu1 %v8922_v30, %s10827_s7 }
 0x2bb   : > { %3964 = vrot.lane.b32.xlu0 %v8930_v3, %s10831_s22 }
 0x2be   : > { %3888 = vrot.lane.b32.xlu1 %v8924_v34, %s10822_s26 }
 0x2bf   : > { %3890 = vrot.lane.b32.xlu0 %v8932_v2, %s10822_s26 }
 0x2c2   : > { %3912 = vrot.lane.b32.xlu1 %v8924_v34, %s10824_s23 }
 0x2c3   : > { %3914 = vrot.lane.b32.xlu0 %v8932_v2, %s10824_s23 }
 0x2c6   : > { %3934 = vrot.lane.b32.xlu1 %v8924_v34, %s10829_s28 }
 0x2c7   : > { %3936 = vrot.lane.b32.xlu0 %v8932_v2, %s10829_s28 }
 0x2ca   : > { %3956 = vrot.lane.b32.xlu1 %v8924_v34, %s10831_s22 }
 0x2cb   : > { %3958 = vrot.lane.b32.xlu0 %v8932_v2, %s10831_s22 }
 0x2ce   : > { %4044 = vrot.lane.b32.xlu1 %v8922_v30, %s10820_s16 }
 0x2cf   : > { %4046 = vrot.lane.b32.xlu0 %v8924_v34, %s10820_s16 }
 0x2d2   : > { %3982 = vrot.lane.b32.xlu1 %v8930_v3, %s10836_s1 }
 0x2d3   : > { %3984 = vrot.lane.b32.xlu0 %v8932_v2, %s10836_s1  ;;  %v3338_v52 = vpop.permute.xlu1 %3337 }
 0x2d4   : > { %v8986_v43 = vpop.permute.xlu0 %3421 }
 0x2d6   : > { %4004 = vrot.lane.b32.xlu1 %v8930_v3, %s10834_s10 }
 0x2d7   : > { %4006 = vrot.lane.b32.xlu0 %v8932_v2, %s10834_s10  ;;  %v3360_v40 = vpop.permute.xlu1 %3359 }
 0x2d8   : > { %v8992_v44 = vpop.permute.xlu0 %3443 }
 0x2da   : > { %4026 = vrot.lane.b32.xlu1 %v8930_v3, %s10827_s7 }
 0x2db   : > { %4028 = vrot.lane.b32.xlu0 %v8932_v2, %s10827_s7  ;;  %v3382_v45 = vpop.permute.xlu1 %3381 }
 0x2dc   : > { %v8998_v46 = vpop.permute.xlu0 %3465 }
 0x2de   : > { %4048 = vrot.lane.b32.xlu1 %v8930_v3, %s10820_s16 }
 0x2df   : > { %4050 = vrot.lane.b32.xlu0 %v8932_v2, %s10820_s16  ;;  %v3404_v39 = vpop.permute.xlu1 %3403  ;;  %s10895_s16 = sld [smem:[#allocation19_spill]] }
 0x2e0   : > { %v9006_v16 = vpop.permute.xlu0 %3487 }
 0x2e2   : > { %3515 = vperm.xlu1 %7765, %v3511_v47  }
 0x2e3   : > { %3520 = vperm.xlu0 %7764, %v3512_v59   ;;  %v9009_v51 = vpop.permute.xlu1 %3419 }
 0x2e4   : > { %v3340_v1 = vpop.permute.xlu0 %3339 }
 0x2e6   : > { %4074 = vperm.xlu1 %7765, %v4070_v49  }
 0x2e7   : > { %4079 = vperm.xlu0 %7764, %v4071_v53   ;;  %v9012_v11 = vpop.permute.xlu1 %3441 }
 0x2e8   : > { %v3362_v12 = vpop.permute.xlu0 %3361  ;;  %v3449_v5 = vsel %vm1866_vm7, %v9012_v11, %v8992_v44 }
 0x2eb   : > { %v9014_v8 = vpop.permute.xlu1 %3463 }
 0x2ec   : > { %v3384_v13 = vpop.permute.xlu0 %3383 }
 0x2ef   : > { %v9016_v28 = vpop.permute.xlu1 %3485 }
 0x2f0   : > { %v3406_v61 = vpop.permute.xlu0 %3405 }
 0x2f3   : > { %v3330_v62 = vpop.permute.xlu1 %3329 }
 0x2f4   : > { %v3341_v29 = vsel %vm1752_vm2, %v3338_v52, %v3330_v62  ;;  %v3347_v17 = vsel %vm1752_vm2, %v3330_v62, %v3338_v52  ;;  %v3332_v63 = vpop.permute.xlu0 %3331 }
 0x2f5   : > { %v3349_v31 = vmul.f32 %v3347_v17, %v8350_v32  ;;  %v3350_v22 = vmul.f32 %v3341_v29, %v8353_v33  ;;  %v3342_v10 = vsel %vm1752_vm2, %v3340_v1, %v3332_v63  ;;  %v3348_v23 = vsel %vm1752_vm2, %v3332_v63, %v3340_v1 }
 0x2f6   : > { %v3351_v9 = vmul.f32 %v3348_v23, %v8350_v32  ;;  %v3352_v47 = vmul.f32 %v3342_v10, %v8353_v33 }
 0x2f7   : > { %v3354_v59 = vpop.permute.xlu1 %3353 }
 0x2f8   : > { %v7262_v49 = vpack.c.bf16 %v3351_v9, %v3349_v31  ;;  %v3363_v53 = vsel %vm1775_vm0, %v3360_v40, %v3354_v59  ;;  %v3369_v6 = vsel %vm1775_vm0, %v3354_v59, %v3360_v40  ;;  %v3356_v52 = vpop.permute.xlu0 %3355  ;;  %v7260_v62 = vpack.c.bf16 %v3352_v47, %v3350_v22 }
 0x2f9   : > { %v3371_v17 = vmul.f32 %v3369_v6, %v8328_v20  ;;  %v3372_v29 = vmul.f32 %v3363_v53, %v8331_v21  ;;  %v3364_v37 = vsel %vm1775_vm0, %v3362_v12, %v3356_v52  ;;  %v3370_v1 = vsel %vm1775_vm0, %v3356_v52, %v3362_v12 }
 0x2fa   : > { %v3373_v63 = vmul.f32 %v3370_v1, %v8328_v20  ;;  %v3374_v10 = vmul.f32 %v3364_v37, %v8331_v21  ;;  %7261 = vmatprep.subr.bf16.mxu1 %v7260_v62 }
 0x2fb   : > { %v3376_v31 = vpop.permute.xlu1 %3375  ;;  %7263 = vmatpush1.bf16.msra.mxu1 %v7262_v49 }
 0x2fc   : > { %v7266_v23 = vpack.c.bf16 %v3373_v63, %v3371_v17  ;;  %v3385_v40 = vsel %vm1798_vm3, %v3382_v45, %v3376_v31  ;;  %v3391_v22 = vsel %vm1798_vm3, %v3376_v31, %v3382_v45  ;;  %v3378_v9 = vpop.permute.xlu0 %3377  ;;  %v7264_v6 = vpack.c.bf16 %v3374_v10, %v3372_v29 }
 0x2fd   : > { %v3393_v47 = vmul.f32 %v3391_v22, %v8364_v41  ;;  %v3394_v59 = vmul.f32 %v3385_v40, %v8367_v42  ;;  %v3386_v12 = vsel %vm1798_vm3, %v3384_v13, %v3378_v9  ;;  %v3392_v53 = vsel %vm1798_vm3, %v3378_v9, %v3384_v13 }
 0x2fe   : > { %v3395_v37 = vmul.f32 %v3392_v53, %v8364_v41  ;;  %v3396_v52 = vmul.f32 %v3386_v12, %v8367_v42  ;;  %7265 = vmatprep.subr.bf16.mxu1 %v7264_v6 }
 0x2ff   : > { %v3398_v49 = vpop.permute.xlu1 %3397  ;;  %7267 = vmatpush1.bf16.msra.mxu1 %v7266_v23 }
 0x300   : > { %v7270_v62 = vpack.c.bf16 %v3395_v37, %v3393_v47  ;;  %v3407_v45 = vsel %vm1821_vm1, %v3404_v39, %v3398_v49  ;;  %v3413_v17 = vsel %vm1821_vm1, %v3398_v49, %v3404_v39  ;;  %v3400_v29 = vpop.permute.xlu0 %3399  ;;  %v7268_v1 = vpack.c.bf16 %v3396_v52, %v3394_v59 }
 0x301   : > { %v3415_v63 = vmul.f32 %v3413_v17, %v8341_v26  ;;  %v3416_v10 = vmul.f32 %v3407_v45, %v8344_v27  ;;  %v3408_v13 = vsel %vm1821_vm1, %v3406_v61, %v3400_v29  ;;  %v3414_v31 = vsel %vm1821_vm1, %v3400_v29, %v3406_v61 }
 0x302   : > { %v3417_v40 = vmul.f32 %v3414_v31, %v8341_v26  ;;  %v3418_v22 = vmul.f32 %v3408_v13, %v8344_v27  ;;  %7269 = vmatprep.subr.bf16.mxu1 %v7268_v1  ;;  %v3435_v47 = vsel %vm1843_vm4, %v8986_v43, %v9009_v51  ;;  %v3427_v37 = vsel %vm1843_vm4, %v9009_v51, %v8986_v43 }
 0x303   : > { %v3424_v23 = vpop.permute.xlu1 %3423  ;;  %7271 = vmatpush1.bf16.msra.mxu1 %v7270_v62  ;;  %v3438_v52 = vmul.f32 %v3435_v47, %v8386_v57  ;;  %v3457_v62 = vsel %vm1866_vm7, %v8992_v44, %v9012_v11  ;;  %v3437_v51 = vmul.f32 %v3427_v37, %v8383_v56  ;;  %v3459_v44 = vmul.f32 %v3449_v5, %v8415_v35  ;;  %v3510_v5 = vld [vmem:[%s10892_s18 + $0x18] sm:$0xff] }
 0x304   : > { %v7274_v9 = vpack.c.bf16 %v3417_v40, %v3415_v63  ;;  %v3426_v6 = vpop.permute.xlu0 %3425  ;;  %v7272_v39 = vpack.c.bf16 %v3418_v22, %v3416_v10  ;;  %v3460_v14 = vmul.f32 %v3457_v62, %v8418_v36  ;;  %v3479_v10 = vsel %vm1889_vm6, %v8998_v46, %v9014_v8 }
 0x305   : > { %v3436_v59 = vsel %vm1843_vm4, %v3426_v6, %v3424_v23  ;;  %v3428_v12 = vsel %vm1843_vm4, %v3424_v23, %v3426_v6  ;;  %v3471_v22 = vsel %vm1889_vm6, %v9014_v8, %v8998_v46  ;;  %v3482_v23 = vmul.f32 %v3479_v10, %v8401_v19 }
 0x306   : > { %v3440_v61 = vmul.f32 %v3436_v59, %v8386_v57  ;;  %7273 = vmatprep.subr.bf16.mxu1 %v7272_v39  ;;  %v3439_v45 = vmul.f32 %v3428_v12, %v8383_v56  ;;  %v3501_v6 = vsel %vm1912_vm8, %v9006_v16, %v9016_v28  ;;  %v3481_v46 = vmul.f32 %v3471_v22, %v8398_v18 }
 0x307   : > { %v3446_v53 = vpop.permute.xlu1 %3445  ;;  %7275 = vmatpush1.bf16.msra.mxu1 %v7274_v9  ;;  %v3493_v37 = vsel %vm1912_vm8, %v9016_v28, %v9006_v16 }
 0x308   : > { %7277 = vmatprep.subr.bf16.mxu1 %v7276_v25  ;;  %v3448_v49 = vpop.permute.xlu0 %3447  ;;  %v7280_v43 = vpack.c.bf16 %v3440_v61, %v3438_v52  ;;  %v7282_v13 = vpack.c.bf16 %v3439_v45, %v3437_v51  ;;  %v3504_v52 = vmul.f32 %v3501_v6, %v8519_v60  ;;  %v3507_v51 = vld [vmem:[%s10892_s18] sm:$0xff] }
 0x309   : > { %v3458_v17 = vsel %vm1866_vm7, %v3448_v49, %v3446_v53  ;;  %v3450_v29 = vsel %vm1866_vm7, %v3446_v53, %v3448_v49 }
 0x30a   : > { %v3462_v1 = vmul.f32 %v3458_v17, %v8418_v36  ;;  %v3461_v31 = vmul.f32 %v3450_v29, %v8415_v35  ;;  %v3503_v29 = vmul.f32 %v3493_v37, %v8516_v0 }
 0x30b   : > { %v3468_v63 = vpop.permute.xlu1 %3467  ;;  %7279 = vmatpush1.bf16.msra.mxu1 %v7278_v24 }
 0x30c   : > { %7281 = vmatprep.subr.bf16.mxu1 %v7280_v43  ;;  %v3470_v25 = vpop.permute.xlu0 %3469  ;;  %v7284_v24 = vpack.c.bf16 %v3462_v1, %v3460_v14  ;;  %v7286_v39 = vpack.c.bf16 %v3461_v31, %v3459_v44 }
 0x30d   : > { %v3480_v40 = vsel %vm1889_vm6, %v3470_v25, %v3468_v63  ;;  %v3472_v4 = vsel %vm1889_vm6, %v3468_v63, %v3470_v25  ;;  %v3509_v25 = vld [vmem:[%s10892_s18 + $0x10] sm:$0xff] }
 0x30e   : > { %v3484_v7 = vmul.f32 %v3480_v40, %v8401_v19  ;;  %v3483_v47 = vmul.f32 %v3472_v4, %v8398_v18 }
 0x30f   : > { %v3490_v11 = vpop.permute.xlu1 %3489  ;;  %7283 = vmatpush1.bf16.msra.mxu1 %v7282_v13  ;;  %v4067_v13 = vld [vmem:[%s10895_s16 + $0x8] sm:$0xff] }
 0x310   : > { %7285 = vmatprep.subr.bf16.mxu1 %v7284_v24  ;;  %v3492_v9 = vpop.permute.xlu0 %3491  ;;  %v7288_v53 = vpack.c.bf16 %v3484_v7, %v3482_v23  ;;  %v7290_v62 = vpack.c.bf16 %v3483_v47, %v3481_v46 }
 0x311   : > { %v3502_v59 = vsel %vm1912_vm8, %v3492_v9, %v3490_v11  ;;  %v3494_v12 = vsel %vm1912_vm8, %v3490_v11, %v3492_v9 }
 0x312   : > { %v3506_v61 = vmul.f32 %v3502_v59, %v8519_v60  ;;  %v3505_v45 = vmul.f32 %v3494_v12, %v8516_v0 }
 0x313   : > { %7287 = vmatpush1.bf16.msra.mxu1 %v7286_v39 }
 0x314   : > { %v3897_v8 = vpop.permute.xlu1 %3896  ;;  %7289 = vmatprep.subr.bf16.mxu1 %v7288_v53  ;;  %v7292_v17 = vpack.c.bf16 %v3506_v61, %v3504_v52  ;;  %v7294_v16 = vpack.c.bf16 %v3505_v45, %v3503_v29 }
 0x315   : > { %v9102_v49 = vpop.permute.xlu0 %3980 }
 0x317   : > { %7291 = vmatpush1.bf16.msra.mxu1 %v7290_v62 }
 0x318   : > { %v3919_v1 = vpop.permute.xlu1 %3918  ;;  %7293 = vmatprep.subr.bf16.mxu1 %v7292_v17 }
 0x319   : > { %v9106_v43 = vpop.permute.xlu0 %4002 }
 0x31b   : > { %7295 = vmatpush1.bf16.msra.mxu1 %v7294_v16 }
 0x31c   : > { %v3941_v28 = vpop.permute.xlu1 %3940 }
 0x31d   : > { %v9109_v63 = vpop.permute.xlu0 %4024 }
 0x31e   : > { %3594 = vmatmul.mubr.f32.vlgmr.msra.gmra.mrb[6].mxu1 %v3507_v51 }
 0x31f   : > { %7165 = vmatprep.mubr.msk.f32.mxu1 %vm1775_vm0, %v3510_v5 }
 0x320   : > { %v3963_v14 = vpop.permute.xlu1 %3962 }
 0x321   : > { %v3899_v10 = vpop.permute.xlu0 %3898 }
 0x322   : > { %3600 = vmatmul.mubr.f32.gmra.mrb[8].mxu1 %v3509_v25 }
 0x323   : > { %7169 = vmatprep.mubr.msk.f32.mxu1 %vm1775_vm0, %v4067_v13 }
 0x324   : > { %v9115_v31 = vpop.permute.xlu1 %3978 }
 0x325   : > { %v3921_v40 = vpop.permute.xlu0 %3920 }
 0x328   : > { %v9118_v4 = vpop.permute.xlu1 %4000 }
 0x329   : > { %v3943_v7 = vpop.permute.xlu0 %3942  ;;  %v4016_v34 = vsel %vm1866_vm7, %v9106_v43, %v9118_v4 }
 0x32c   : > { %v9120_v24 = vpop.permute.xlu1 %4022 }
 0x32d   : > { %v3965_v44 = vpop.permute.xlu0 %3964 }
 0x330   : > { %v3889_v11 = vpop.permute.xlu1 %3888 }
 0x331   : > { %v3900_v22 = vsel %vm1752_vm2, %v3897_v8, %v3889_v11  ;;  %v3906_v23 = vsel %vm1752_vm2, %v3889_v11, %v3897_v8  ;;  %v3891_v9 = vpop.permute.xlu0 %3890 }
 0x332   : > { %v3908_v6 = vmul.f32 %v3906_v23, %v8350_v32  ;;  %v3909_v39 = vmul.f32 %v3900_v22, %v8353_v33  ;;  %v3901_v47 = vsel %vm1752_vm2, %v3899_v10, %v3891_v9  ;;  %v3907_v59 = vsel %vm1752_vm2, %v3891_v9, %v3899_v10 }
 0x333   : > { %v3910_v12 = vmul.f32 %v3907_v59, %v8350_v32  ;;  %v3911_v61 = vmul.f32 %v3901_v47, %v8353_v33 }
 0x334   : > { %v3913_v53 = vpop.permute.xlu1 %3912 }
 0x335   : > { %v7334_v46 = vpack.c.bf16 %v3910_v12, %v3908_v6  ;;  %v3922_v37 = vsel %vm1775_vm0, %v3919_v1, %v3913_v53  ;;  %v3928_v52 = vsel %vm1775_vm0, %v3913_v53, %v3919_v1  ;;  %v3915_v8 = vpop.permute.xlu0 %3914  ;;  %v7332_v62 = vpack.c.bf16 %v3911_v61, %v3909_v39 }
 0x336   : > { %v3930_v45 = vmul.f32 %v3928_v52, %v8328_v20  ;;  %v3931_v17 = vmul.f32 %v3922_v37, %v8331_v21  ;;  %v3923_v29 = vsel %vm1775_vm0, %v3921_v40, %v3915_v8  ;;  %v3929_v16 = vsel %vm1775_vm0, %v3915_v8, %v3921_v40 }
 0x337   : > { %v3932_v51 = vmul.f32 %v3929_v16, %v8328_v20  ;;  %v3933_v5 = vmul.f32 %v3923_v29, %v8331_v21  ;;  %7333 = vmatprep.subr.bf16.mxu1 %v7332_v62 }
 0x338   : > { %v3935_v25 = vpop.permute.xlu1 %3934  ;;  %7335 = vmatpush1.bf16.msra.mxu1 %v7334_v46 }
 0x339   : > { %v7338_v10 = vpack.c.bf16 %v3932_v51, %v3930_v45  ;;  %v3944_v1 = vsel %vm1798_vm3, %v3941_v28, %v3935_v25  ;;  %v3950_v13 = vsel %vm1798_vm3, %v3935_v25, %v3941_v28  ;;  %v3937_v11 = vpop.permute.xlu0 %3936  ;;  %v7336_v22 = vpack.c.bf16 %v3933_v5, %v3931_v17 }
 0x33a   : > { %v3952_v23 = vmul.f32 %v3950_v13, %v8364_v41  ;;  %v3953_v9 = vmul.f32 %v3944_v1, %v8367_v42  ;;  %v3945_v40 = vsel %vm1798_vm3, %v3943_v7, %v3937_v11  ;;  %v3951_v6 = vsel %vm1798_vm3, %v3937_v11, %v3943_v7 }
 0x33b   : > { %v3954_v39 = vmul.f32 %v3951_v6, %v8364_v41  ;;  %v3955_v47 = vmul.f32 %v3945_v40, %v8367_v42  ;;  %7337 = vmatprep.subr.bf16.mxu1 %v7336_v22  ;;  %v3986_v51 = vsel %vm1843_vm4, %v9115_v31, %v9102_v49  ;;  %v3994_v5 = vsel %vm1843_vm4, %v9102_v49, %v9115_v31 }
 0x33c   : > { %v3957_v59 = vpop.permute.xlu1 %3956  ;;  %7339 = vmatpush1.bf16.msra.mxu1 %v7338_v10  ;;  %v3996_v13 = vmul.f32 %v3986_v51, %v8383_v56  ;;  %v3997_v11 = vmul.f32 %v3994_v5, %v8386_v57  ;;  %v4008_v49 = vsel %vm1866_vm7, %v9118_v4, %v9106_v43 }
 0x33d   : > { %v7342_v12 = vpack.c.bf16 %v3954_v39, %v3952_v23  ;;  %v3966_v28 = vsel %vm1821_vm1, %v3963_v14, %v3957_v59  ;;  %v3972_v61 = vsel %vm1821_vm1, %v3957_v59, %v3963_v14  ;;  %v3959_v53 = vpop.permute.xlu0 %3958  ;;  %v7340_v46 = vpack.c.bf16 %v3955_v47, %v3953_v9 }
 0x33e   : > { %v3974_v37 = vmul.f32 %v3972_v61, %v8341_v26  ;;  %v3975_v52 = vmul.f32 %v3966_v28, %v8344_v27  ;;  %v3967_v7 = vsel %vm1821_vm1, %v3965_v44, %v3959_v53  ;;  %v3973_v8 = vsel %vm1821_vm1, %v3959_v53, %v3965_v44 }
 0x33f   : > { %v3976_v62 = vmul.f32 %v3973_v8, %v8341_v26  ;;  %v3977_v45 = vmul.f32 %v3967_v7, %v8344_v27  ;;  %7341 = vmatprep.subr.bf16.mxu1 %v7340_v46  ;;  %v4018_v47 = vmul.f32 %v4008_v49, %v8415_v35  ;;  %v4019_v59 = vmul.f32 %v4016_v34, %v8418_v36 }
 0x340   : > { %v4045_v17 = vpop.permute.xlu1 %4044  ;;  %7343 = vmatpush1.bf16.msra.mxu1 %v7342_v12  ;;  %v10897_v49 = vmov 0.0  }
 0x341   : > { %v7346_v29 = vpack.c.bf16 %v3976_v62, %v3974_v37  ;;  %v4047_v16 = vpop.permute.xlu0 %4046  ;;  %v7344_v14 = vpack.c.bf16 %v3977_v45, %v3975_v52 }
 0x343   : > { %7345 = vmatprep.subr.bf16.mxu1 %v7344_v14 }
 0x344   : > { %v3983_v44 = vpop.permute.xlu1 %3982  ;;  %7347 = vmatpush1.bf16.msra.mxu1 %v7346_v29 }
 0x345   : > { %7349 = vmatprep.subr.bf16.mxu1 %v7348_v38  ;;  %v3985_v25 = vpop.permute.xlu0 %3984  ;;  %v10896_v38 = vpack.c.bf16 %v8930_v3, %v8922_v30  ;;  %v4030_v30 = vsel %vm1889_vm6, %v9120_v24, %v9109_v63  ;;  %v4038_v3 = vsel %vm1889_vm6, %v9109_v63, %v9120_v24  ;;  %v4052_v63 = vsel %vm1912_vm8, %v4045_v17, %v4047_v16 }
 0x346   : > { %v3987_v10 = vsel %vm1843_vm4, %v3983_v44, %v3985_v25  ;;  %v3995_v1 = vsel %vm1843_vm4, %v3985_v25, %v3983_v44  ;;  %v4040_v52 = vmul.f32 %v4030_v30, %v8398_v18  ;;  %v4041_v7 = vmul.f32 %v4038_v3, %v8401_v19 }
 0x347   : > { %v3998_v22 = vmul.f32 %v3987_v10, %v8383_v56  ;;  %v3999_v23 = vmul.f32 %v3995_v1, %v8386_v57  ;;  %v4060_v24 = vsel %vm1912_vm8, %v4047_v16, %v4045_v17  ;;  %v4062_v25 = vmul.f32 %v4052_v63, %v8516_v0 }
 0x348   : > { %v4005_v2 = vpop.permute.xlu1 %4004  ;;  %7351 = vmatpush1.bf16.msra.mxu1 %v10896_v38  ;;  %v4063_v10 = vmul.f32 %v4060_v24, %v8519_v60 }
 0x349   : > { %v7354_v31 = vpack.c.bf16 %v3998_v22, %v3996_v13  ;;  %v4007_v9 = vpop.permute.xlu0 %4006  ;;  %v7352_v40 = vpack.c.bf16 %v3999_v23, %v3997_v11  ;;  %v4066_v11 = vld [vmem:[%s10895_s16] sm:$0xff]  ;;  %v4069_v22 = vld [vmem:[%s10895_s16 + $0x18] sm:$0xff]  ;;  %v4068_v23 = vld [vmem:[%s10895_s16 + $0x10] sm:$0xff] }
 0x34a   : > { %v4009_v6 = vsel %vm1866_vm7, %v4005_v2, %v4007_v9  ;;  %v4017_v39 = vsel %vm1866_vm7, %v4007_v9, %v4005_v2 }
 0x34b   : > { %v4020_v12 = vmul.f32 %v4009_v6, %v8415_v35  ;;  %v4021_v43 = vmul.f32 %v4017_v39, %v8418_v36  ;;  %7353 = vmatprep.subr.bf16.mxu1 %v7352_v40 }
 0x34c   : > { %v4027_v4 = vpop.permute.xlu1 %4026  ;;  %7355 = vmatpush1.bf16.msra.mxu1 %v7354_v31 }
 0x34d   : > { %v7358_v28 = vpack.c.bf16 %v4020_v12, %v4018_v47  ;;  %v4029_v61 = vpop.permute.xlu0 %4028  ;;  %v7356_v53 = vpack.c.bf16 %v4021_v43, %v4019_v59 }
 0x34e   : > { %v4031_v46 = vsel %vm1889_vm6, %v4027_v4, %v4029_v61  ;;  %v4039_v37 = vsel %vm1889_vm6, %v4029_v61, %v4027_v4 }
 0x34f   : > { %v4042_v8 = vmul.f32 %v4031_v46, %v8398_v18  ;;  %v4043_v62 = vmul.f32 %v4039_v37, %v8401_v19  ;;  %7357 = vmatprep.subr.bf16.mxu1 %v7356_v53 }
 0x350   : > { %v4049_v45 = vpop.permute.xlu1 %4048  ;;  %7359 = vmatpush1.bf16.msra.mxu1 %v7358_v28 }
 0x351   : > { %v7362_v29 = vpack.c.bf16 %v4042_v8, %v4040_v52  ;;  %v4051_v14 = vpop.permute.xlu0 %4050  ;;  %v7360_v51 = vpack.c.bf16 %v4043_v62, %v4041_v7 }
 0x352   : > { %v4053_v5 = vsel %vm1912_vm8, %v4049_v45, %v4051_v14  ;;  %v4061_v44 = vsel %vm1912_vm8, %v4051_v14, %v4049_v45 }
 0x353   : > { %v4064_v1 = vmul.f32 %v4053_v5, %v8516_v0  ;;  %v4065_v17 = vmul.f32 %v4061_v44, %v8519_v60  ;;  %7361 = vmatprep.subr.bf16.mxu1 %v7360_v51 }
 0x354   : > { %7363 = vmatpush1.bf16.msra.mxu1 %v7362_v29 }
 0x355   : > { %v7366_v16 = vpack.c.bf16 %v4064_v1, %v4062_v25  ;;  %v7364_v13 = vpack.c.bf16 %v4065_v17, %v4063_v10 }
 0x357   : > { %7365 = vmatprep.subr.bf16.mxu1 %v7364_v13 }
 0x358   : > { %7367 = vmatpush1.bf16.msra.mxu1 %v7366_v16 }
 0x35b   : > { %4153 = vmatmul.mubr.f32.vlgmr.msra.gmra.mrb[10].mxu1 %v4066_v11 }
 0x35c   : > { %7170 = vmatprep.mubr.msk.f32.mxu1 %vm1775_vm0, %v4069_v22 }
 0x35f   : > { %4159 = vmatmul.mubr.f32.gmra.mrb[12].mxu1 %v4068_v23 }
 0x360   : > { %4870 = vmatprep.mubr.f32.mxu1 %v10897_v49 }
 0x361   : > { %v3516_v34 = vpop.permute.xlu1 %3515 }
 0x362   : > { %v3521_v6 = vpop.permute.xlu0 %3520 }
 0x365   : > { %v4075_v46 = vpop.permute.xlu1 %4074 }
 0x366   : > { %v4080_v52 = vpop.permute.xlu0 %4079 }
 0x3f1   : > { %v3595_v2 = vpop.f32.mrb[6].mxu1 }
 0x3f2   : > { %v3596_v38 = vadd.f32 %v3595_v2, %v3516_v34  ;;  %v3597_v31 = vpop.f32.mrb[7].mxu1 }
 0x3f3   : > { %v3598_v9 = vadd.f32 %v3597_v31, %v3516_v34  ;;  %v1966_v34 = vld [vmem:[%s10906_s4] sm:$0xff]  ;;  %s10914_s4 = sld [smem:[#allocation24_spill]] }
 0x3f4   : > { %v9209_v40 = vmax.f32 %v3596_v38, 0.0  ;;  %v4351_v38 = vld [vmem:[%s10908_s6] sm:$0xff]  ;;  %s10913_s6 = sld [smem:[#allocation6_spill]] }
 0x3f5   : > { %v9211_v39 = vmax.f32 %v3598_v9, 0.0  ;;  %v3601_v47 = vpop.f32.mrb[8].mxu1  ;;  %v2391_v9 = vld [vmem:[%s10909_s8] sm:$0xff]  ;;  %s10910_s8 = sld [smem:[#allocation21_spill]] }
 0x3f6   : > { %v3602_v59 = vadd.f32 %v3601_v47, %v3521_v6  ;;  %v3603_v12 = vpop.f32.mrb[9].mxu1  ;;  %3620 = vrot.lane.b32.xlu1 %v9209_v40, %s10822_s26  ;;  %s10898_s26 = smov 111  }
 0x3f7   : > { %v3604_v43 = vadd.f32 %v3603_v12, %v3521_v6  ;;  %3704 = vrot.lane.b32.xlu0 %v9211_v39, %s10836_s1 }
 0x3f8   : > { %v9217_v30 = vmax.f32 %v3602_v59, 0.0 }
 0x3f9   : > { %v9219_v3 = vmax.f32 %v3604_v43, 0.0 }
 0x3fa   : > { %3642 = vrot.lane.b32.xlu1 %v9209_v40, %s10824_s23  ;;  %v7314_v4 = vpack.c.bf16 %v9217_v30, %v9209_v40  ;;  %s10899_s23 = smov 17  }
 0x3fb   : > { %3726 = vrot.lane.b32.xlu0 %v9211_v39, %s10834_s10  ;;  %v7312_v28 = vpack.c.bf16 %v9219_v3, %v9211_v39 }
 0x3fe   : > { %3664 = vrot.lane.b32.xlu1 %v9209_v40, %s10829_s28 }
 0x3ff   : > { %3748 = vrot.lane.b32.xlu0 %v9211_v39, %s10827_s7 }
 0x402   : > { %3686 = vrot.lane.b32.xlu1 %v9209_v40, %s10831_s22 }
 0x403   : > { %3770 = vrot.lane.b32.xlu0 %v9211_v39, %s10898_s26 }
 0x406   : > { %3702 = vrot.lane.b32.xlu1 %v9209_v40, %s10836_s1 }
 0x407   : > { %3622 = vrot.lane.b32.xlu0 %v9217_v30, %s10899_s23 }
 0x40a   : > { %3724 = vrot.lane.b32.xlu1 %v9209_v40, %s10834_s10 }
 0x40b   : > { %3644 = vrot.lane.b32.xlu0 %v9217_v30, %s10900_s2 }
 0x40e   : > { %3746 = vrot.lane.b32.xlu1 %v9209_v40, %s10827_s7  ;;  %s10901_s7 = sld [smem:[#allocation17_spill]] }
 0x40f   : > { %3666 = vrot.lane.b32.xlu0 %v9217_v30, %s10829_s28 }
 0x412   : > { %3768 = vrot.lane.b32.xlu1 %v9209_v40, %s10898_s26 }
 0x413   : > { %3688 = vrot.lane.b32.xlu0 %v9217_v30, %s10831_s22 }
 0x414   : > { %v3791_v62 = vld [vmem:[%s10901_s7 + $0x8] sm:$0xff] }
 0x415   : > { %7166 = vmatprep.mubr.msk.f32.mxu0 %vm1775_vm0, %v3791_v62 }
 0x416   : > { %3612 = vrot.lane.b32.xlu1 %v9211_v39, %s10899_s23 }
 0x417   : > { %3614 = vrot.lane.b32.xlu0 %v9219_v3, %s10899_s23 }
 0x41a   : > { %3636 = vrot.lane.b32.xlu1 %v9211_v39, %s10900_s2 }
 0x41b   : > { %3638 = vrot.lane.b32.xlu0 %v9219_v3, %s10900_s2 }
 0x41e   : > { %3658 = vrot.lane.b32.xlu1 %v9211_v39, %s10829_s28 }
 0x41f   : > { %3660 = vrot.lane.b32.xlu0 %v9219_v3, %s10829_s28  ;;  %s10902_s28 = smov 112  }
 0x422   : > { %3680 = vrot.lane.b32.xlu1 %v9211_v39, %s10831_s22 }
 0x423   : > { %3682 = vrot.lane.b32.xlu0 %v9219_v3, %s10831_s22  ;;  %s10903_s22 = smov 15  }
 0x426   : > { %3706 = vrot.lane.b32.xlu1 %v9217_v30, %s10836_s1 }
 0x427   : > { %3708 = vrot.lane.b32.xlu0 %v9219_v3, %s10836_s1 }
 0x42a   : > { %3728 = vrot.lane.b32.xlu1 %v9217_v30, %s10834_s10 }
 0x42b   : > { %3730 = vrot.lane.b32.xlu0 %v9219_v3, %s10834_s10 }
 0x42e   : > { %v4154_v61 = vpop.f32.mrb[10].mxu1  ;;  %3750 = vrot.lane.b32.xlu1 %v9217_v30, %s10902_s28 }
 0x42f   : > { %v4156_v53 = vpop.f32.mrb[11].mxu1  ;;  %3752 = vrot.lane.b32.xlu0 %v9219_v3, %s10902_s28  ;;  %v4155_v37 = vadd.f32 %v4154_v61, %v4075_v46 }
 0x430   : > { %v4157_v7 = vadd.f32 %v4156_v53, %v4075_v46 }
 0x431   : > { %v9287_v29 = vmax.f32 %v4155_v37, 0.0 }
 0x432   : > { %v4160_v8 = vpop.f32.mrb[12].mxu1  ;;  %3772 = vrot.lane.b32.xlu1 %v9217_v30, %s10898_s26  ;;  %v9291_v51 = vmax.f32 %v4157_v7, 0.0 }
 0x433   : > { %v4161_v63 = vadd.f32 %v4160_v8, %v4080_v52  ;;  %v4162_v24 = vpop.f32.mrb[13].mxu1  ;;  %3774 = vrot.lane.b32.xlu0 %v9219_v3, %s10898_s26 }
 0x434   : > { %v4163_v45 = vadd.f32 %v4162_v24, %v4080_v52 }
 0x435   : > { %v9289_v14 = vmax.f32 %v4161_v63, 0.0 }
 0x436   : > { %v9293_v5 = vmax.f32 %v4163_v45, 0.0  ;;  %4179 = vrot.lane.b32.xlu1 %v9287_v29, %s10899_s23 }
 0x437   : > { %4263 = vrot.lane.b32.xlu0 %v9291_v51, %s10836_s1 }
 0x43a   : > { %4201 = vrot.lane.b32.xlu1 %v9287_v29, %s10900_s2 }
 0x43b   : > { %4285 = vrot.lane.b32.xlu0 %v9291_v51, %s10834_s10 }
 0x43e   : > { %4223 = vrot.lane.b32.xlu1 %v9287_v29, %s10903_s22 }
 0x43f   : > { %4307 = vrot.lane.b32.xlu0 %v9291_v51, %s10902_s28 }
 0x442   : > { %4245 = vrot.lane.b32.xlu1 %v9287_v29, %s10904_s3 }
 0x443   : > { %4181 = vrot.lane.b32.xlu0 %v9289_v14, %s10899_s23 }
 0x446   : > { %4261 = vrot.lane.b32.xlu1 %v9287_v29, %s10836_s1 }
 0x447   : > { %4203 = vrot.lane.b32.xlu0 %v9289_v14, %s10900_s2 }
 0x44a   : > { %4283 = vrot.lane.b32.xlu1 %v9287_v29, %s10834_s10  ;;  %s10905_s10 = sld [smem:[#allocation18_spill]] }
 0x44b   : > { %4225 = vrot.lane.b32.xlu0 %v9289_v14, %s10903_s22 }
 0x44e   : > { %4305 = vrot.lane.b32.xlu1 %v9287_v29, %s10902_s28 }
 0x44f   : > { %4247 = vrot.lane.b32.xlu0 %v9289_v14, %s10904_s3 }
 0x450   : > { %v3792_v22 = vld [vmem:[%s10905_s10] sm:$0xff]  ;;  %s10915_s10 = sld [smem:[#allocation26_spill]] }
 0x452   : > { %4171 = vrot.lane.b32.xlu1 %v9291_v51, %s10899_s23 }
 0x453   : > { %4173 = vrot.lane.b32.xlu0 %v9293_v5, %s10899_s23 }
 0x456   : > { %4195 = vrot.lane.b32.xlu1 %v9291_v51, %s10900_s2 }
 0x457   : > { %4197 = vrot.lane.b32.xlu0 %v9293_v5, %s10900_s2 }
 0x45a   : > { %4217 = vrot.lane.b32.xlu1 %v9291_v51, %s10903_s22 }
 0x45b   : > { %4219 = vrot.lane.b32.xlu0 %v9293_v5, %s10903_s22 }
 0x45e   : > { %4239 = vrot.lane.b32.xlu1 %v9291_v51, %s10904_s3 }
 0x45f   : > { %4241 = vrot.lane.b32.xlu0 %v9293_v5, %s10904_s3 }
 0x462   : > { %4327 = vrot.lane.b32.xlu1 %v9287_v29, %s10898_s26 }
 0x463   : > { %4329 = vrot.lane.b32.xlu0 %v9291_v51, %s10898_s26 }
 0x466   : > { %4265 = vrot.lane.b32.xlu1 %v9289_v14, %s10836_s1 }
 0x467   : > { %4267 = vrot.lane.b32.xlu0 %v9293_v5, %s10836_s1 }
 0x468   : > { %v3621_v10 = vpop.permute.xlu1 %3620 }
 0x469   : > { %v9351_v1 = vpop.permute.xlu0 %3704 }
 0x46a   : > { %4287 = vrot.lane.b32.xlu1 %v9289_v14, %s10907_s5 }
 0x46b   : > { %4289 = vrot.lane.b32.xlu0 %v9293_v5, %s10907_s5 }
 0x46c   : > { %v3643_v17 = vpop.permute.xlu1 %3642 }
 0x46d   : > { %v9357_v16 = vpop.permute.xlu0 %3726 }
 0x46e   : > { %4309 = vrot.lane.b32.xlu1 %v9289_v14, %s10902_s28 }
 0x46f   : > { %4311 = vrot.lane.b32.xlu0 %v9293_v5, %s10902_s28 }
 0x470   : > { %v3665_v13 = vpop.permute.xlu1 %3664 }
 0x471   : > { %v9363_v11 = vpop.permute.xlu0 %3748 }
 0x472   : > { %4331 = vrot.lane.b32.xlu1 %v9289_v14, %s10898_s26 }
 0x473   : > { %4333 = vrot.lane.b32.xlu0 %v9293_v5, %s10898_s26 }
 0x474   : > { %v3687_v23 = vpop.permute.xlu1 %3686 }
 0x475   : > { %v9371_v2 = vpop.permute.xlu0 %3770 }
 0x476   : > { %3795 = vperm.xlu1 %7765, %v3792_v22  }
 0x477   : > { %1969 = vperm.xlu0 %7764, %v1966_v34  }
 0x478   : > { %v9374_v31 = vpop.permute.xlu1 %3702 }
 0x479   : > { %v3623_v6 = vpop.permute.xlu0 %3622 }
 0x47a   : > { %4354 = vperm.xlu1 %7765, %v4351_v38  }
 0x47b   : > { %2394 = vperm.xlu0 %7764, %v2391_v9  }
 0x47c   : > { %v9377_v47 = vpop.permute.xlu1 %3724 }
 0x47d   : > { %v3645_v59 = vpop.permute.xlu0 %3644  ;;  %v3732_v39 = vsel %vm1866_vm7, %v9377_v47, %v9357_v16 }
 0x480   : > { %v9379_v12 = vpop.permute.xlu1 %3746 }
 0x481   : > { %v3667_v43 = vpop.permute.xlu0 %3666 }
 0x484   : > { %v9381_v61 = vpop.permute.xlu1 %3768 }
 0x485   : > { %v3689_v53 = vpop.permute.xlu0 %3688 }
 0x488   : > { %v3613_v46 = vpop.permute.xlu1 %3612 }
 0x489   : > { %v3624_v37 = vsel %vm1752_vm2, %v3621_v10, %v3613_v46  ;;  %v3630_v52 = vsel %vm1752_vm2, %v3613_v46, %v3621_v10  ;;  %v3615_v7 = vpop.permute.xlu0 %3614 }
 0x48a   : > { %v3632_v8 = vmul.f32 %v3630_v52, %v8350_v32  ;;  %v3633_v62 = vmul.f32 %v3624_v37, %v8353_v33  ;;  %v3625_v63 = vsel %vm1752_vm2, %v3623_v6, %v3615_v7  ;;  %v3631_v24 = vsel %vm1752_vm2, %v3615_v7, %v3623_v6 }
 0x48b   : > { %v3634_v45 = vmul.f32 %v3631_v24, %v8350_v32  ;;  %v3635_v22 = vmul.f32 %v3625_v63, %v8353_v33 }
 0x48c   : > { %v3637_v34 = vpop.permute.xlu1 %3636 }
 0x48d   : > { %v7298_v38 = vpack.c.bf16 %v3634_v45, %v3632_v8  ;;  %v3646_v9 = vsel %vm1775_vm0, %v3643_v17, %v3637_v34  ;;  %v3652_v44 = vsel %vm1775_vm0, %v3637_v34, %v3643_v17  ;;  %v3639_v10 = vpop.permute.xlu0 %3638  ;;  %v7296_v46 = vpack.c.bf16 %v3635_v22, %v3633_v62 }
 0x48e   : > { %v3654_v52 = vmul.f32 %v3652_v44, %v8328_v20  ;;  %v3655_v37 = vmul.f32 %v3646_v9, %v8331_v21  ;;  %v3647_v25 = vsel %vm1775_vm0, %v3645_v59, %v3639_v10  ;;  %v3653_v6 = vsel %vm1775_vm0, %v3639_v10, %v3645_v59 }
 0x48f   : > { %v3656_v7 = vmul.f32 %v3653_v6, %v8328_v20  ;;  %v3657_v63 = vmul.f32 %v3647_v25, %v8331_v21  ;;  %7297 = vmatprep.subr.bf16.mxu0 %v7296_v46 }
 0x490   : > { %v3659_v8 = vpop.permute.xlu1 %3658  ;;  %7299 = vmatpush1.bf16.msra.mxu0 %v7298_v38 }
 0x491   : > { %v7302_v24 = vpack.c.bf16 %v3656_v7, %v3654_v52  ;;  %v3668_v17 = vsel %vm1798_vm3, %v3665_v13, %v3659_v8  ;;  %v3674_v62 = vsel %vm1798_vm3, %v3659_v8, %v3665_v13  ;;  %v3661_v45 = vpop.permute.xlu0 %3660  ;;  %v7300_v44 = vpack.c.bf16 %v3657_v63, %v3655_v37 }
 0x492   : > { %v3676_v22 = vmul.f32 %v3674_v62, %v8364_v41  ;;  %v3677_v34 = vmul.f32 %v3668_v17, %v8367_v42  ;;  %v3669_v59 = vsel %vm1798_vm3, %v3667_v43, %v3661_v45  ;;  %v3675_v9 = vsel %vm1798_vm3, %v3661_v45, %v3667_v43 }
 0x493   : > { %v3678_v25 = vmul.f32 %v3675_v9, %v8364_v41  ;;  %v3679_v10 = vmul.f32 %v3669_v59, %v8367_v42  ;;  %7301 = vmatprep.subr.bf16.mxu0 %v7300_v44 }
 0x494   : > { %v3681_v38 = vpop.permute.xlu1 %3680  ;;  %7303 = vmatpush1.bf16.msra.mxu0 %v7302_v24 }
 0x495   : > { %v7306_v46 = vpack.c.bf16 %v3678_v25, %v3676_v22  ;;  %v3690_v13 = vsel %vm1821_vm1, %v3687_v23, %v3681_v38  ;;  %v3696_v52 = vsel %vm1821_vm1, %v3681_v38, %v3687_v23  ;;  %v3683_v37 = vpop.permute.xlu0 %3682  ;;  %v7304_v6 = vpack.c.bf16 %v3679_v10, %v3677_v34 }
 0x496   : > { %v3698_v7 = vmul.f32 %v3696_v52, %v8341_v26  ;;  %v3699_v63 = vmul.f32 %v3690_v13, %v8344_v27  ;;  %v3691_v43 = vsel %vm1821_vm1, %v3689_v53, %v3683_v37  ;;  %v3697_v8 = vsel %vm1821_vm1, %v3683_v37, %v3689_v53 }
 0x497   : > { %v3700_v17 = vmul.f32 %v3697_v8, %v8341_v26  ;;  %v3701_v62 = vmul.f32 %v3691_v43, %v8344_v27  ;;  %7305 = vmatprep.subr.bf16.mxu0 %v7304_v6  ;;  %v3718_v22 = vsel %vm1843_vm4, %v9351_v1, %v9374_v31  ;;  %v3710_v25 = vsel %vm1843_vm4, %v9374_v31, %v9351_v1 }
 0x498   : > { %v3707_v24 = vpop.permute.xlu1 %3706  ;;  %7307 = vmatpush1.bf16.msra.mxu0 %v7306_v46  ;;  %v3721_v10 = vmul.f32 %v3718_v22, %v8386_v57  ;;  %v3740_v46 = vsel %vm1866_vm7, %v9357_v16, %v9377_v47  ;;  %v3720_v31 = vmul.f32 %v3710_v25, %v8383_v56  ;;  %v3742_v16 = vmul.f32 %v3732_v39, %v8415_v35  ;;  %v4350_v39 = vld [vmem:[%s10910_s8 + $0x8] sm:$0xff] }
 0x499   : > { %v7310_v45 = vpack.c.bf16 %v3700_v17, %v3698_v7  ;;  %v3709_v44 = vpop.permute.xlu0 %3708  ;;  %v7308_v23 = vpack.c.bf16 %v3701_v62, %v3699_v63  ;;  %v3743_v3 = vmul.f32 %v3740_v46, %v8418_v36  ;;  %v3762_v63 = vsel %vm1889_vm6, %v9363_v11, %v9379_v12 }
 0x49a   : > { %v3719_v34 = vsel %vm1843_vm4, %v3709_v44, %v3707_v24  ;;  %v3711_v59 = vsel %vm1843_vm4, %v3707_v24, %v3709_v44  ;;  %v3754_v62 = vsel %vm1889_vm6, %v9379_v12, %v9363_v11  ;;  %v3765_v24 = vmul.f32 %v3762_v63, %v8401_v19 }
 0x49b   : > { %v3723_v53 = vmul.f32 %v3719_v34, %v8386_v57  ;;  %7309 = vmatprep.subr.bf16.mxu0 %v7308_v23  ;;  %v3722_v13 = vmul.f32 %v3711_v59, %v8383_v56  ;;  %v3784_v44 = vsel %vm1912_vm8, %v9371_v2, %v9381_v61  ;;  %v3764_v11 = vmul.f32 %v3754_v62, %v8398_v18 }
 0x49c   : > { %v3729_v9 = vpop.permute.xlu1 %3728  ;;  %7311 = vmatpush1.bf16.msra.mxu0 %v7310_v45  ;;  %v3776_v25 = vsel %vm1912_vm8, %v9381_v61, %v9371_v2  ;;  %v3790_v2 = vld [vmem:[%s10901_s7] sm:$0xff]  ;;  %s10917_s7 = smov 127  }
 0x49d   : > { %7313 = vmatprep.subr.bf16.mxu0 %v7312_v28  ;;  %v3731_v38 = vpop.permute.xlu0 %3730  ;;  %v7316_v1 = vpack.c.bf16 %v3723_v53, %v3721_v10  ;;  %v7318_v43 = vpack.c.bf16 %v3722_v13, %v3720_v31  ;;  %v3787_v10 = vmul.f32 %v3784_v44, %v8519_v60 }
 0x49e   : > { %v3741_v52 = vsel %vm1866_vm7, %v3731_v38, %v3729_v9  ;;  %v3733_v37 = vsel %vm1866_vm7, %v3729_v9, %v3731_v38 }
 0x49f   : > { %v3745_v6 = vmul.f32 %v3741_v52, %v8418_v36  ;;  %v3744_v8 = vmul.f32 %v3733_v37, %v8415_v35  ;;  %v3786_v37 = vmul.f32 %v3776_v25, %v8516_v0 }
 0x4a0   : > { %v3751_v7 = vpop.permute.xlu1 %3750  ;;  %7315 = vmatpush1.bf16.msra.mxu0 %v7314_v4 }
 0x4a1   : > { %7317 = vmatprep.subr.bf16.mxu0 %v7316_v1  ;;  %v3753_v28 = vpop.permute.xlu0 %3752  ;;  %v7320_v4 = vpack.c.bf16 %v3745_v6, %v3743_v3  ;;  %v7322_v23 = vpack.c.bf16 %v3744_v8, %v3742_v16 }
 0x4a2   : > { %v3763_v17 = vsel %vm1889_vm6, %v3753_v28, %v3751_v7  ;;  %v3755_v40 = vsel %vm1889_vm6, %v3751_v7, %v3753_v28 }
 0x4a3   : > { %v3767_v30 = vmul.f32 %v3763_v17, %v8401_v19  ;;  %v3766_v22 = vmul.f32 %v3755_v40, %v8398_v18 }
 0x4a4   : > { %v3773_v47 = vpop.permute.xlu1 %3772  ;;  %7319 = vmatpush1.bf16.msra.mxu0 %v7318_v43 }
 0x4a5   : > { %7321 = vmatprep.subr.bf16.mxu0 %v7320_v4  ;;  %v3775_v45 = vpop.permute.xlu0 %3774  ;;  %v7324_v9 = vpack.c.bf16 %v3767_v30, %v3765_v24  ;;  %v7326_v46 = vpack.c.bf16 %v3766_v22, %v3764_v11 }
 0x4a6   : > { %v3785_v34 = vsel %vm1912_vm8, %v3775_v45, %v3773_v47  ;;  %v3777_v59 = vsel %vm1912_vm8, %v3773_v47, %v3775_v45 }
 0x4a7   : > { %v3789_v53 = vmul.f32 %v3785_v34, %v8519_v60  ;;  %v3788_v13 = vmul.f32 %v3777_v59, %v8516_v0 }
 0x4a8   : > { %v4180_v12 = vpop.permute.xlu1 %4179  ;;  %7323 = vmatpush1.bf16.msra.mxu0 %v7322_v23 }
 0x4a9   : > { %7325 = vmatprep.subr.bf16.mxu0 %v7324_v9  ;;  %v9467_v38 = vpop.permute.xlu0 %4263  ;;  %v7328_v52 = vpack.c.bf16 %v3789_v53, %v3787_v10  ;;  %v7330_v31 = vpack.c.bf16 %v3788_v13, %v3786_v37 }
 0x4ac   : > { %v4202_v6 = vpop.permute.xlu1 %4201  ;;  %7327 = vmatpush1.bf16.msra.mxu0 %v7326_v46 }
 0x4ad   : > { %7329 = vmatprep.subr.bf16.mxu0 %v7328_v52  ;;  %v9471_v1 = vpop.permute.xlu0 %4285 }
 0x4b0   : > { %v4224_v7 = vpop.permute.xlu1 %4223  ;;  %7331 = vmatpush1.bf16.msra.mxu0 %v7330_v31 }
 0x4b1   : > { %v9474_v61 = vpop.permute.xlu0 %4307 }
 0x4b3   : > { %3866 = vmatmul.mubr.f32.vlgmr.msra.gmra.mrb[8].mxu0 %v3790_v2 }
 0x4b4   : > { %v4246_v3 = vpop.permute.xlu1 %4245  ;;  %7171 = vmatprep.mubr.msk.f32.mxu0 %vm1775_vm0, %v4350_v39 }
 0x4b5   : > { %v4182_v28 = vpop.permute.xlu0 %4181 }
 0x4b8   : > { %v9478_v63 = vpop.permute.xlu1 %4261 }
 0x4b9   : > { %v4204_v43 = vpop.permute.xlu0 %4203 }
 0x4bc   : > { %v9480_v8 = vpop.permute.xlu1 %4283 }
 0x4bd   : > { %v4226_v17 = vpop.permute.xlu0 %4225 }
 0x4c0   : > { %v9482_v40 = vpop.permute.xlu1 %4305 }
 0x4c1   : > { %v4248_v30 = vpop.permute.xlu0 %4247 }
 0x4c4   : > { %v4172_v4 = vpop.permute.xlu1 %4171 }
 0x4c5   : > { %v4183_v16 = vsel %vm1752_vm2, %v4180_v12, %v4172_v4  ;;  %v4189_v47 = vsel %vm1752_vm2, %v4172_v4, %v4180_v12  ;;  %v4174_v62 = vpop.permute.xlu0 %4173 }
 0x4c6   : > { %v4191_v24 = vmul.f32 %v4189_v47, %v8350_v32  ;;  %v4192_v45 = vmul.f32 %v4183_v16, %v8353_v33  ;;  %v4184_v44 = vsel %vm1752_vm2, %v4182_v28, %v4174_v62  ;;  %v4190_v23 = vsel %vm1752_vm2, %v4174_v62, %v4182_v28 }
 0x4c7   : > { %v4193_v22 = vmul.f32 %v4190_v23, %v8350_v32  ;;  %v4194_v34 = vmul.f32 %v4184_v44, %v8353_v33 }
 0x4c8   : > { %v4196_v59 = vpop.permute.xlu1 %4195 }
 0x4c9   : > { %v7370_v53 = vpack.c.bf16 %v4193_v22, %v4191_v24  ;;  %v4205_v9 = vsel %vm1775_vm0, %v4202_v6, %v4196_v59  ;;  %v4211_v11 = vsel %vm1775_vm0, %v4196_v59, %v4202_v6  ;;  %v4198_v12 = vpop.permute.xlu0 %4197  ;;  %v7368_v25 = vpack.c.bf16 %v4194_v34, %v4192_v45 }
 0x4ca   : > { %v4213_v10 = vmul.f32 %v4211_v11, %v8328_v20  ;;  %v4214_v46 = vmul.f32 %v4205_v9, %v8331_v21  ;;  %v4206_v13 = vsel %vm1775_vm0, %v4204_v43, %v4198_v12  ;;  %v4212_v52 = vsel %vm1775_vm0, %v4198_v12, %v4204_v43 }
 0x4cb   : > { %v4215_v37 = vmul.f32 %v4212_v52, %v8328_v20  ;;  %v4216_v31 = vmul.f32 %v4206_v13, %v8331_v21  ;;  %7369 = vmatprep.subr.bf16.mxu0 %v7368_v25 }
 0x4cc   : > { %v4218_v2 = vpop.permute.xlu1 %4217  ;;  %7371 = vmatpush1.bf16.msra.mxu0 %v7370_v53 }
 0x4cd   : > { %v7374_v39 = vpack.c.bf16 %v4215_v37, %v4213_v10  ;;  %v4227_v6 = vsel %vm1798_vm3, %v4224_v7, %v4218_v2  ;;  %v4233_v28 = vsel %vm1798_vm3, %v4218_v2, %v4224_v7  ;;  %v4220_v4 = vpop.permute.xlu0 %4219  ;;  %v7372_v16 = vpack.c.bf16 %v4216_v31, %v4214_v46 }
 0x4ce   : > { %v4235_v47 = vmul.f32 %v4233_v28, %v8364_v41  ;;  %v4236_v62 = vmul.f32 %v4227_v6, %v8367_v42  ;;  %v4228_v43 = vsel %vm1798_vm3, %v4226_v17, %v4220_v4  ;;  %v4234_v24 = vsel %vm1798_vm3, %v4220_v4, %v4226_v17 }
 0x4cf   : > { %v4237_v45 = vmul.f32 %v4234_v24, %v8364_v41  ;;  %v4238_v44 = vmul.f32 %v4228_v43, %v8367_v42  ;;  %7373 = vmatprep.subr.bf16.mxu0 %v7372_v16  ;;  %v4269_v37 = vsel %vm1843_vm4, %v9478_v63, %v9467_v38  ;;  %v4277_v31 = vsel %vm1843_vm4, %v9467_v38, %v9478_v63 }
 0x4d0   : > { %v4240_v23 = vpop.permute.xlu1 %4239  ;;  %7375 = vmatpush1.bf16.msra.mxu0 %v7374_v39  ;;  %v10911_v2 = vpack.c.bf16 %v9293_v5, %v9291_v51  ;;  %v4279_v4 = vmul.f32 %v4269_v37, %v8383_v56  ;;  %v4280_v16 = vmul.f32 %v4277_v31, %v8386_v57  ;;  %v4291_v38 = vsel %vm1866_vm7, %v9480_v8, %v9471_v1 }
 0x4d1   : > { %v7378_v22 = vpack.c.bf16 %v4237_v45, %v4235_v47  ;;  %v4249_v7 = vsel %vm1821_vm1, %v4246_v3, %v4240_v23  ;;  %v4255_v34 = vsel %vm1821_vm1, %v4240_v23, %v4246_v3  ;;  %v4242_v59 = vpop.permute.xlu0 %4241  ;;  %v7376_v53 = vpack.c.bf16 %v4238_v44, %v4236_v62 }
 0x4d2   : > { %v4257_v9 = vmul.f32 %v4255_v34, %v8341_v26  ;;  %v4258_v11 = vmul.f32 %v4249_v7, %v8344_v27  ;;  %v4250_v17 = vsel %vm1821_vm1, %v4248_v30, %v4242_v59  ;;  %v4256_v12 = vsel %vm1821_vm1, %v4242_v59, %v4248_v30 }
 0x4d3   : > { %v4259_v25 = vmul.f32 %v4256_v12, %v8341_v26  ;;  %v4260_v10 = vmul.f32 %v4250_v17, %v8344_v27  ;;  %7377 = vmatprep.subr.bf16.mxu0 %v7376_v53  ;;  %v4299_v51 = vsel %vm1866_vm7, %v9471_v1, %v9480_v8  ;;  %v10912_v63 = vpack.c.bf16 %v9289_v14, %v9287_v29 }
 0x4d4   : > { %v4328_v46 = vpop.permute.xlu1 %4327  ;;  %7379 = vmatpush1.bf16.msra.mxu0 %v7378_v22  ;;  %v4301_v22 = vmul.f32 %v4291_v38, %v8415_v35  ;;  %v4302_v7 = vmul.f32 %v4299_v51, %v8418_v36  ;;  %v4313_v29 = vsel %vm1889_vm6, %v9482_v40, %v9474_v61  ;;  %v4321_v14 = vsel %vm1889_vm6, %v9474_v61, %v9482_v40 }
 0x4d5   : > { %v7382_v13 = vpack.c.bf16 %v4259_v25, %v4257_v9  ;;  %v4330_v52 = vpop.permute.xlu0 %4329  ;;  %v7380_v3 = vpack.c.bf16 %v4260_v10, %v4258_v11  ;;  %v4323_v12 = vmul.f32 %v4313_v29, %v8398_v18  ;;  %v4324_v25 = vmul.f32 %v4321_v14, %v8401_v19 }
 0x4d6   : > { %v4335_v61 = vsel %vm1912_vm8, %v4328_v46, %v4330_v52  ;;  %v4343_v40 = vsel %vm1912_vm8, %v4330_v52, %v4328_v46 }
 0x4d7   : > { %7381 = vmatprep.subr.bf16.mxu0 %v7380_v3 }
 0x4d8   : > { %v4266_v30 = vpop.permute.xlu1 %4265  ;;  %7383 = vmatpush1.bf16.msra.mxu0 %v7382_v13 }
 0x4d9   : > { %7385 = vmatprep.subr.bf16.mxu0 %v10911_v2  ;;  %v4268_v39 = vpop.permute.xlu0 %4267 }
 0x4da   : > { %v4270_v6 = vsel %vm1843_vm4, %v4266_v30, %v4268_v39  ;;  %v4278_v28 = vsel %vm1843_vm4, %v4268_v39, %v4266_v30 }
 0x4db   : > { %v4281_v47 = vmul.f32 %v4270_v6, %v8383_v56  ;;  %v4282_v62 = vmul.f32 %v4278_v28, %v8386_v57  ;;  %v4345_v6 = vmul.f32 %v4335_v61, %v8516_v0  ;;  %v4346_v28 = vmul.f32 %v4343_v40, %v8519_v60 }
 0x4dc   : > { %v4288_v5 = vpop.permute.xlu1 %4287  ;;  %7387 = vmatpush1.bf16.msra.mxu0 %v10912_v63 }
 0x4dd   : > { %v7390_v43 = vpack.c.bf16 %v4281_v47, %v4279_v4  ;;  %v4290_v24 = vpop.permute.xlu0 %4289  ;;  %v7388_v45 = vpack.c.bf16 %v4282_v62, %v4280_v16  ;;  %v4349_v47 = vld [vmem:[%s10910_s8] sm:$0xff]  ;;  %s10918_s8 = sld [smem:[#allocation30_spill]] }
 0x4de   : > { %v4292_v44 = vsel %vm1866_vm7, %v4288_v5, %v4290_v24  ;;  %v4300_v23 = vsel %vm1866_vm7, %v4290_v24, %v4288_v5 }
 0x4df   : > { %v4303_v34 = vmul.f32 %v4292_v44, %v8415_v35  ;;  %v4304_v1 = vmul.f32 %v4300_v23, %v8418_v36  ;;  %7389 = vmatprep.subr.bf16.mxu0 %v7388_v45 }
 0x4e0   : > { %v4310_v8 = vpop.permute.xlu1 %4309  ;;  %7391 = vmatpush1.bf16.msra.mxu0 %v7390_v43 }
 0x4e1   : > { %v7394_v59 = vpack.c.bf16 %v4303_v34, %v4301_v22  ;;  %v4312_v53 = vpop.permute.xlu0 %4311  ;;  %v7392_v9 = vpack.c.bf16 %v4304_v1, %v4302_v7 }
 0x4e2   : > { %v4314_v11 = vsel %vm1889_vm6, %v4310_v8, %v4312_v53  ;;  %v4322_v17 = vsel %vm1889_vm6, %v4312_v53, %v4310_v8 }
 0x4e3   : > { %v4325_v10 = vmul.f32 %v4314_v11, %v8398_v18  ;;  %v4326_v13 = vmul.f32 %v4322_v17, %v8401_v19  ;;  %7393 = vmatprep.subr.bf16.mxu0 %v7392_v9 }
 0x4e4   : > { %v4332_v3 = vpop.permute.xlu1 %4331  ;;  %7395 = vmatpush1.bf16.msra.mxu0 %v7394_v59 }
 0x4e5   : > { %v7398_v37 = vpack.c.bf16 %v4325_v10, %v4323_v12  ;;  %v4334_v31 = vpop.permute.xlu0 %4333  ;;  %v7396_v30 = vpack.c.bf16 %v4326_v13, %v4324_v25 }
 0x4e6   : > { %v4336_v2 = vsel %vm1912_vm8, %v4332_v3, %v4334_v31  ;;  %v4344_v39 = vsel %vm1912_vm8, %v4334_v31, %v4332_v3 }
 0x4e7   : > { %v4347_v4 = vmul.f32 %v4336_v2, %v8516_v0  ;;  %v4348_v16 = vmul.f32 %v4344_v39, %v8519_v60  ;;  %7397 = vmatprep.subr.bf16.mxu0 %v7396_v30 }
 0x4e8   : > { %7399 = vmatpush1.bf16.msra.mxu0 %v7398_v37 }
 0x4e9   : > { %v7402_v46 = vpack.c.bf16 %v4347_v4, %v4345_v6  ;;  %v7400_v52 = vpack.c.bf16 %v4348_v16, %v4346_v28 }
 0x4eb   : > { %7401 = vmatprep.subr.bf16.mxu0 %v7400_v52 }
 0x4ec   : > { %7403 = vmatpush1.bf16.msra.mxu0 %v7402_v46  ;;  %v4622_v46 = vld [vmem:[%s10915_s10] sm:$0xff]  ;;  %s10923_s10 = sld [smem:[#allocation32_spill]] }
 0x4ef   : > { %4425 = vmatmul.mubr.f32.vlgmr.msra.gmra.mrb[10].mxu0 %v4349_v47  ;;  %v4882_v47 = vld [vmem:[%s10918_s8] sm:$0xff]  ;;  %s10920_s8 = sld [smem:[#allocation25_spill]] }
 0x4f0   : > { %4610 = vmatprep.mubr.f32.mxu0 %v10897_v49 }
 0x4f5   : > { %v3796_v62 = vpop.permute.xlu1 %3795 }
 0x4f6   : > { %v1970_v7 = vpop.permute.xlu0 %1969 }
 0x4f7   : > { %v2049_v34 = vadd.f32 %v8832_v48, %v1970_v7  ;;  %v2051_v1 = vadd.f32 %v8834_v15, %v1970_v7 }
 0x4f9   : > { %v2053_v29 = vmax.f32 %v2049_v34, 0.0  ;;  %v2054_v8 = vmax.f32 %v2051_v1, 0.0  ;;  %v4355_v48 = vpop.permute.xlu1 %4354 }
 0x4fa   : > { %v2395_v37 = vpop.permute.xlu0 %2394 }
 0x4fb   : > { %v2473_v31 = vadd.f32 %v8840_v55, %v2395_v37  ;;  %v2475_v30 = vadd.f32 %v8842_v58, %v2395_v37  ;;  %v2179_v55 = vld [vmem:[%s10913_s6] sm:$0xff]  ;;  %s10921_s6 = sld [smem:[#allocation27_spill]] }
 0x4fc   : > { %v4536_v58 = vld [vmem:[%s10914_s4] sm:$0xff]  ;;  %s10922_s4 = sld [smem:[#allocation29_spill]] }
 0x4fd   : > { %v2477_v2 = vmax.f32 %v2473_v31, 0.0  ;;  %v2478_v6 = vmax.f32 %v2475_v30, 0.0 }
 0x586   : > { %v3867_v38 = vpop.f32.mrb[8].mxu0 }
 0x587   : > { %v3868_v51 = vadd.f32 %v3867_v38, %v3796_v62  ;;  %v3869_v5 = vpop.f32.mrb[9].mxu0 }
 0x588   : > { %v3870_v63 = vadd.f32 %v3869_v5, %v3796_v62 }
 0x589   : > { %v7167_v43 = vmul.f32 -1.442695, %v3868_v51 }
 0x58a   : > { %v7168_v24 = vmul.f32 -1.442695, %v3870_v63 }
 0x58b   : > { %7773 = vpow2.f32 %v7167_v43 }
 0x58c   : > { %7775 = vpow2.f32 %v7168_v24 }
 0x595   : > { %v7774_v45 = vpop.eup %7773 }
 0x596   : > { %v7776_v44 = vpop.eup %7775  ;;  %v3878_v23 = vadd.f32 1.0, %v7774_v45 }
 0x597   : > { %v3879_v22 = vadd.f32 1.0, %v7776_v44 }
 0x598   : > { %7777 = vrcp.f32 %v3878_v23 }
 0x599   : > { %7779 = vrcp.f32 %v3879_v22 }
 0x5a2   : > { %v7778_v14 = vpop.eup %7777 }
 0x5a3   : > { %v7780_v59 = vpop.eup %7779  ;;  %v9570_v53 = vmul.f32 %v7778_v14, %v2053_v29 }
 0x5a4   : > { %v9572_v9 = vmul.f32 %v7780_v59, %v2054_v8 }
 0x5a5   : > { %4491 = vrot.lane.b32.xlu1 %v9570_v53, %s10836_s1  ;;  %4450 = vrot.lane.b32.xlu0 %v9570_v53, %s10899_s23 }
 0x5a9   : > { %4446 = vrot.lane.b32.xlu1 %v9572_v9, %s10899_s23  ;;  %4461 = vrot.lane.b32.xlu0 %v9570_v53, %s10900_s2 }
 0x5ad   : > { %4458 = vrot.lane.b32.xlu1 %v9572_v9, %s10900_s2  ;;  %4472 = vrot.lane.b32.xlu0 %v9570_v53, %s10903_s22 }
 0x5b1   : > { %4469 = vrot.lane.b32.xlu1 %v9572_v9, %s10903_s22  ;;  %4483 = vrot.lane.b32.xlu0 %v9570_v53, %s10904_s3 }
 0x5b5   : > { %4480 = vrot.lane.b32.xlu1 %v9572_v9, %s10904_s3  ;;  %4493 = vrot.lane.b32.xlu0 %v9572_v9, %s10836_s1 }
 0x5b9   : > { %4502 = vrot.lane.b32.xlu1 %v9570_v53, %s10907_s5  ;;  %4504 = vrot.lane.b32.xlu0 %v9572_v9, %s10907_s5 }
 0x5bd   : > { %4513 = vrot.lane.b32.xlu1 %v9570_v53, %s10902_s28  ;;  %4515 = vrot.lane.b32.xlu0 %v9572_v9, %s10902_s28 }
 0x5c1   : > { %4524 = vrot.lane.b32.xlu1 %v9570_v53, %s10898_s26  ;;  %4526 = vrot.lane.b32.xlu0 %v9572_v9, %s10898_s26 }
 0x5c2   : > { %v4426_v15 = vpop.f32.mrb[10].mxu0 }
 0x5c3   : > { %v4427_v11 = vadd.f32 %v4426_v15, %v4355_v48  ;;  %v4428_v17 = vpop.f32.mrb[11].mxu0 }
 0x5c4   : > { %v4429_v12 = vadd.f32 %v4428_v17, %v4355_v48 }
 0x5c5   : > { %v7172_v25 = vmul.f32 -1.442695, %v4427_v11 }
 0x5c6   : > { %v7173_v10 = vmul.f32 -1.442695, %v4429_v12 }
 0x5c7   : > { %7781 = vpow2.f32 %v7172_v25 }
 0x5c8   : > { %7783 = vpow2.f32 %v7173_v10 }
 0x5d1   : > { %v7782_v13 = vpop.eup %7781 }
 0x5d2   : > { %v7784_v61 = vpop.eup %7783  ;;  %v4437_v40 = vadd.f32 1.0, %v7782_v13 }
 0x5d3   : > { %v4438_v3 = vadd.f32 1.0, %v7784_v61 }
 0x5d4   : > { %7785 = vrcp.f32 %v4437_v40 }
 0x5d5   : > { %7787 = vrcp.f32 %v4438_v3 }
 0x5de   : > { %v7786_v39 = vpop.eup %7785 }
 0x5df   : > { %v7788_v28 = vpop.eup %7787  ;;  %v9608_v4 = vmul.f32 %v7786_v39, %v2477_v2 }
 0x5e0   : > { %v9610_v16 = vmul.f32 %v7788_v28, %v2478_v6 }
 0x5e1   : > { %4752 = vrot.lane.b32.xlu1 %v9608_v4, %s10836_s1  ;;  %4711 = vrot.lane.b32.xlu0 %v9608_v4, %s10899_s23  ;;  %s10916_s1 = sld [smem:[#allocation28_spill]] }
 0x5e5   : > { %4707 = vrot.lane.b32.xlu1 %v9610_v16, %s10899_s23  ;;  %4722 = vrot.lane.b32.xlu0 %v9608_v4, %s10900_s2 }
 0x5e7   : > { %v4797_v52 = vld [vmem:[%s10916_s1] sm:$0xff]  ;;  %s10919_s1 = sld [smem:[#allocation23_spill]] }
 0x5e9   : > { %4719 = vrot.lane.b32.xlu1 %v9610_v16, %s10900_s2  ;;  %4733 = vrot.lane.b32.xlu0 %v9608_v4, %s10903_s22 }
 0x5ed   : > { %4730 = vrot.lane.b32.xlu1 %v9610_v16, %s10903_s22  ;;  %4744 = vrot.lane.b32.xlu0 %v9608_v4, %s10904_s3 }
 0x5f1   : > { %4741 = vrot.lane.b32.xlu1 %v9610_v16, %s10904_s3  ;;  %4754 = vrot.lane.b32.xlu0 %v9610_v16, %s10917_s7 }
 0x5f5   : > { %4763 = vrot.lane.b32.xlu1 %v9608_v4, %s10907_s5  ;;  %4765 = vrot.lane.b32.xlu0 %v9610_v16, %s10907_s5 }
 0x5f9   : > { %4774 = vrot.lane.b32.xlu1 %v9608_v4, %s10902_s28  ;;  %4776 = vrot.lane.b32.xlu0 %v9610_v16, %s10902_s28 }
 0x5fd   : > { %4785 = vrot.lane.b32.xlu1 %v9608_v4, %s10898_s26  ;;  %4787 = vrot.lane.b32.xlu0 %v9610_v16, %s10898_s26 }
 0x601   : > { %2182 = vperm.xlu1 %7765, %v2179_v55   ;;  %4539 = vperm.xlu0 %7764, %v4536_v58  }
 0x605   : > { %4625 = vperm.xlu1 %7765, %v4622_v46   ;;  %4800 = vperm.xlu0 %7764, %v4797_v52  }
 0x609   : > { %4885 = vperm.xlu1 %7765, %v4882_v47  }
 0x617   : > { %v4492_v62 = vpop.permute.xlu1 %4491  ;;  %v4451_v38 = vpop.permute.xlu0 %4450 }
 0x61b   : > { %v4447_v51 = vpop.permute.xlu1 %4446  ;;  %v4462_v5 = vpop.permute.xlu0 %4461 }
 0x61c   : > { %v4452_v63 = vsel %vm1752_vm2, %v4451_v38, %v4447_v51  ;;  %v4455_v43 = vsel %vm1752_vm2, %v4447_v51, %v4451_v38 }
 0x61d   : > { %v4456_v22 = vmul.f32 %v4455_v43, %v8350_v32  ;;  %v4457_v7 = vmul.f32 %v4452_v63, %v8353_v33 }
 0x61f   : > { %v4459_v24 = vpop.permute.xlu1 %4458  ;;  %v4473_v45 = vpop.permute.xlu0 %4472 }
 0x620   : > { %v4463_v44 = vsel %vm1775_vm0, %v4462_v5, %v4459_v24  ;;  %v4466_v23 = vsel %vm1775_vm0, %v4459_v24, %v4462_v5 }
 0x621   : > { %v4467_v34 = vmul.f32 %v4466_v23, %v8328_v20  ;;  %v4468_v1 = vmul.f32 %v4463_v44, %v8331_v21 }
 0x623   : > { %v7406_v29 = vpack.c.bf16 %v4467_v34, %v4456_v22  ;;  %v4470_v14 = vpop.permute.xlu1 %4469  ;;  %v4484_v8 = vpop.permute.xlu0 %4483  ;;  %v7404_v59 = vpack.c.bf16 %v4468_v1, %v4457_v7  ;;  %v4535_v1 = vld [vmem:[%s10919_s1] sm:$0xff]  ;;  %s10924_s1 = sld [smem:[#allocation36_spill]] }
 0x624   : > { %v4477_v48 = vsel %vm1798_vm3, %v4470_v14, %v4473_v45  ;;  %v4474_v15 = vsel %vm1798_vm3, %v4473_v45, %v4470_v14  ;;  %v4621_v14 = vld [vmem:[%s10920_s8] sm:$0xff]  ;;  %s10925_s8 = sld [smem:[#allocation31_spill]] }
 0x625   : > { %7405 = vmatprep.subr.bf16.mxu0 %v7404_v59  ;;  %v4478_v11 = vmul.f32 %v4477_v48, %v8364_v41  ;;  %v4479_v25 = vmul.f32 %v4474_v15, %v8367_v42 }
 0x626   : > { %7407 = vmatpush1.bf16.msra.mxu0 %v7406_v29 }
 0x627   : > { %v4481_v17 = vpop.permute.xlu1 %4480  ;;  %v4494_v12 = vpop.permute.xlu0 %4493 }
 0x628   : > { %v4485_v10 = vsel %vm1821_vm1, %v4484_v8, %v4481_v17  ;;  %v4488_v13 = vsel %vm1821_vm1, %v4481_v17, %v4484_v8  ;;  %v4499_v61 = vsel %vm1843_vm4, %v4494_v12, %v4492_v62  ;;  %v4495_v37 = vsel %vm1843_vm4, %v4492_v62, %v4494_v12 }
 0x629   : > { %v4489_v40 = vmul.f32 %v4488_v13, %v8341_v26  ;;  %v4490_v3 = vmul.f32 %v4485_v10, %v8344_v27  ;;  %v4501_v31 = vmul.f32 %v4499_v61, %v8386_v57  ;;  %v4500_v28 = vmul.f32 %v4495_v37, %v8383_v56 }
 0x62b   : > { %v7410_v30 = vpack.c.bf16 %v4489_v40, %v4478_v11  ;;  %v4503_v2 = vpop.permute.xlu1 %4502  ;;  %v4505_v39 = vpop.permute.xlu0 %4504  ;;  %v7408_v6 = vpack.c.bf16 %v4490_v3, %v4479_v25  ;;  %v7412_v55 = vpack.c.bf16 %v4501_v31, %v9572_v9  ;;  %v7414_v62 = vpack.c.bf16 %v4500_v28, %v9570_v53 }
 0x62c   : > { %v4506_v58 = vsel %vm1866_vm7, %v4503_v2, %v4505_v39  ;;  %v4510_v46 = vsel %vm1866_vm7, %v4505_v39, %v4503_v2 }
 0x62d   : > { %7409 = vmatprep.subr.bf16.mxu0 %v7408_v6  ;;  %v4511_v5 = vmul.f32 %v4506_v58, %v8415_v35  ;;  %v4512_v63 = vmul.f32 %v4510_v46, %v8418_v36 }
 0x62e   : > { %7411 = vmatpush1.bf16.msra.mxu0 %v7410_v30 }
 0x62f   : > { %v4514_v52 = vpop.permute.xlu1 %4513  ;;  %7413 = vmatprep.subr.bf16.mxu0 %v7412_v55  ;;  %v4516_v47 = vpop.permute.xlu0 %4515 }
 0x630   : > { %v4517_v38 = vsel %vm1889_vm6, %v4514_v52, %v4516_v47  ;;  %v4521_v51 = vsel %vm1889_vm6, %v4516_v47, %v4514_v52 }
 0x631   : > { %v4522_v9 = vmul.f32 %v4517_v38, %v8398_v18  ;;  %v4523_v43 = vmul.f32 %v4521_v51, %v8401_v19 }
 0x632   : > { %7415 = vmatpush1.bf16.msra.mxu0 %v7414_v62 }
 0x633   : > { %v7418_v24 = vpack.c.bf16 %v4522_v9, %v4511_v5  ;;  %v4525_v45 = vpop.permute.xlu1 %4524  ;;  %v4527_v44 = vpop.permute.xlu0 %4526  ;;  %v7416_v23 = vpack.c.bf16 %v4523_v43, %v4512_v63 }
 0x634   : > { %v4532_v53 = vsel %vm1912_vm8, %v4527_v44, %v4525_v45  ;;  %v4528_v22 = vsel %vm1912_vm8, %v4525_v45, %v4527_v44 }
 0x635   : > { %7417 = vmatprep.subr.bf16.mxu0 %v7416_v23  ;;  %v4534_v7 = vmul.f32 %v4532_v53, %v8519_v60  ;;  %v4533_v34 = vmul.f32 %v4528_v22, %v8516_v0 }
 0x636   : > { %7419 = vmatpush1.bf16.msra.mxu0 %v7418_v24 }
 0x637   : > { %4562 = vmatprep.subr.mxu0 %v4534_v7 }
 0x63a   : > { %4563 = vmatpush1.msra.mxu0 %v4533_v34 }
 0x63b   : > { %7174 = vmatmul.mubr.msk.f32.vlgmr.msra.gmra.mrb[12].mxu0 %vm4542_vm10, %v4535_v1  ;;  %7421 = vmatprep.subr.bf16.mxu0 %v7404_v59 }
 0x63c   : > { %7423 = vmatpush1.bf16.msra.mxu0 %v7406_v29  ;;  %4695 = vmatprep.mubr.f32.mxu0 %v10897_v49 }
 0x63d   : > { %7425 = vmatprep.subr.bf16.mxu0 %v7408_v6 }
 0x640   : > { %7427 = vmatpush1.bf16.msra.mxu0 %v7410_v30 }
 0x641   : > { %7429 = vmatprep.subr.bf16.mxu0 %v7412_v55 }
 0x644   : > { %7431 = vmatpush1.bf16.msra.mxu0 %v7414_v62 }
 0x645   : > { %7433 = vmatprep.subr.bf16.mxu0 %v7416_v23 }
 0x648   : > { %7435 = vmatpush1.bf16.msra.mxu0 %v7418_v24 }
 0x649   : > { %4647 = vmatprep.subr.mxu0 %v4534_v7 }
 0x64c   : > { %4648 = vmatpush1.msra.mxu0 %v4533_v34 }
 0x64d   : > { %7175 = vmatmul.mubr.msk.f32.vlgmr.msra.gmra.mrb[14].mxu0 %vm4542_vm10, %v4621_v14 }
 0x64e   : > { %4955 = vmatprep.mubr.f32.mxu0 %v10897_v49 }
 0x653   : > { %v4753_v8 = vpop.permute.xlu1 %4752  ;;  %v4712_v48 = vpop.permute.xlu0 %4711 }
 0x657   : > { %v4708_v15 = vpop.permute.xlu1 %4707  ;;  %v4723_v59 = vpop.permute.xlu0 %4722 }
 0x658   : > { %v4713_v29 = vsel %vm1752_vm2, %v4712_v48, %v4708_v15  ;;  %v4716_v11 = vsel %vm1752_vm2, %v4708_v15, %v4712_v48 }
 0x659   : > { %v4717_v13 = vmul.f32 %v4716_v11, %v8350_v32  ;;  %v4718_v61 = vmul.f32 %v4713_v29, %v8353_v33 }
 0x65b   : > { %v4720_v17 = vpop.permute.xlu1 %4719  ;;  %v4734_v12 = vpop.permute.xlu0 %4733 }
 0x65c   : > { %v4724_v25 = vsel %vm1775_vm0, %v4723_v59, %v4720_v17  ;;  %v4727_v10 = vsel %vm1775_vm0, %v4720_v17, %v4723_v59 }
 0x65d   : > { %v4728_v40 = vmul.f32 %v4727_v10, %v8328_v20  ;;  %v4729_v3 = vmul.f32 %v4724_v25, %v8331_v21 }
 0x65f   : > { %v7438_v37 = vpack.c.bf16 %v4728_v40, %v4717_v13  ;;  %v4731_v31 = vpop.permute.xlu1 %4730  ;;  %v4745_v30 = vpop.permute.xlu0 %4744  ;;  %v7436_v2 = vpack.c.bf16 %v4729_v3, %v4718_v61  ;;  %v4796_v61 = vld [vmem:[%s10921_s6] sm:$0xff]  ;;  %s10926_s6 = sld [smem:[#allocation35_spill]] }
 0x660   : > { %v4738_v39 = vsel %vm1798_vm3, %v4731_v31, %v4734_v12  ;;  %v4735_v6 = vsel %vm1798_vm3, %v4734_v12, %v4731_v31  ;;  %v4881_v40 = vld [vmem:[%s10922_s4] sm:$0xff]  ;;  %s10927_s4 = sld [smem:[#allocation34_spill]] }
 0x661   : > { %7437 = vmatprep.subr.bf16.mxu1 %v7436_v2  ;;  %7453 = vmatprep.subr.bf16.mxu0 %v7436_v2  ;;  %v4739_v28 = vmul.f32 %v4738_v39, %v8364_v41  ;;  %v4740_v46 = vmul.f32 %v4735_v6, %v8367_v42 }
 0x662   : > { %7439 = vmatpush1.bf16.msra.mxu1 %v7438_v37  ;;  %7455 = vmatpush1.bf16.msra.mxu0 %v7438_v37 }
 0x663   : > { %v4742_v55 = vpop.permute.xlu1 %4741  ;;  %v4755_v58 = vpop.permute.xlu0 %4754 }
 0x664   : > { %v4746_v52 = vsel %vm1821_vm1, %v4745_v30, %v4742_v55  ;;  %v4749_v47 = vsel %vm1821_vm1, %v4742_v55, %v4745_v30  ;;  %v4760_v62 = vsel %vm1843_vm4, %v4755_v58, %v4753_v8  ;;  %v4756_v5 = vsel %vm1843_vm4, %v4753_v8, %v4755_v58 }
 0x665   : > { %v4750_v38 = vmul.f32 %v4749_v47, %v8341_v26  ;;  %v4751_v51 = vmul.f32 %v4746_v52, %v8344_v27  ;;  %v4762_v63 = vmul.f32 %v4760_v62, %v8386_v57  ;;  %v4761_v44 = vmul.f32 %v4756_v5, %v8383_v56 }
 0x667   : > { %v7442_v9 = vpack.c.bf16 %v4750_v38, %v4739_v28  ;;  %v4764_v43 = vpop.permute.xlu1 %4763  ;;  %v4766_v24 = vpop.permute.xlu0 %4765  ;;  %v7440_v45 = vpack.c.bf16 %v4751_v51, %v4740_v46  ;;  %v7444_v23 = vpack.c.bf16 %v4762_v63, %v9610_v16  ;;  %v7446_v1 = vpack.c.bf16 %v4761_v44, %v9608_v4 }
 0x668   : > { %v4767_v53 = vsel %vm1866_vm7, %v4764_v43, %v4766_v24  ;;  %v4771_v22 = vsel %vm1866_vm7, %v4766_v24, %v4764_v43 }
 0x669   : > { %7441 = vmatprep.subr.bf16.mxu1 %v7440_v45  ;;  %7457 = vmatprep.subr.bf16.mxu0 %v7440_v45  ;;  %v4772_v48 = vmul.f32 %v4767_v53, %v8415_v35  ;;  %v4773_v16 = vmul.f32 %v4771_v22, %v8418_v36 }
 0x66a   : > { %7443 = vmatpush1.bf16.msra.mxu1 %v7442_v9  ;;  %7459 = vmatpush1.bf16.msra.mxu0 %v7442_v9 }
 0x66b   : > { %v4775_v7 = vpop.permute.xlu1 %4774  ;;  %7445 = vmatprep.subr.bf16.mxu1 %v7444_v23  ;;  %7461 = vmatprep.subr.bf16.mxu0 %v7444_v23  ;;  %v4777_v34 = vpop.permute.xlu0 %4776 }
 0x66c   : > { %v4778_v14 = vsel %vm1889_vm6, %v4775_v7, %v4777_v34  ;;  %v4782_v8 = vsel %vm1889_vm6, %v4777_v34, %v4775_v7 }
 0x66d   : > { %v4783_v15 = vmul.f32 %v4778_v14, %v8398_v18  ;;  %v4784_v59 = vmul.f32 %v4782_v8, %v8401_v19 }
 0x66e   : > { %7447 = vmatpush1.bf16.msra.mxu1 %v7446_v1  ;;  %7463 = vmatpush1.bf16.msra.mxu0 %v7446_v1 }
 0x66f   : > { %v7450_v29 = vpack.c.bf16 %v4783_v15, %v4772_v48  ;;  %v4786_v11 = vpop.permute.xlu1 %4785  ;;  %v4788_v17 = vpop.permute.xlu0 %4787  ;;  %v7448_v4 = vpack.c.bf16 %v4784_v59, %v4773_v16 }
 0x670   : > { %v4793_v12 = vsel %vm1912_vm8, %v4788_v17, %v4786_v11  ;;  %v4789_v25 = vsel %vm1912_vm8, %v4786_v11, %v4788_v17 }
 0x671   : > { %7449 = vmatprep.subr.bf16.mxu1 %v7448_v4  ;;  %7465 = vmatprep.subr.bf16.mxu0 %v7448_v4  ;;  %v4795_v10 = vmul.f32 %v4793_v12, %v8519_v60  ;;  %v4794_v13 = vmul.f32 %v4789_v25, %v8516_v0  ;;  %v5057_v12 = vld [vmem:[%s10923_s10] sm:$0xff]  ;;  %s10928_s10 = sld [smem:[#allocation38_spill]] }
 0x672   : > { %7451 = vmatpush1.bf16.msra.mxu1 %v7450_v29  ;;  %7467 = vmatpush1.bf16.msra.mxu0 %v7450_v29  ;;  %v5403_v25 = vld [vmem:[%s10924_s1] sm:$0xff]  ;;  %s10929_s1 = sld [smem:[#allocation33_spill]] }
 0x673   : > { %4822 = vmatprep.subr.mxu1 %v4795_v10  ;;  %4907 = vmatprep.subr.mxu0 %v4795_v10 }
 0x676   : > { %4823 = vmatpush1.msra.mxu1 %v4794_v13  ;;  %4908 = vmatpush1.msra.mxu0 %v4794_v13 }
 0x677   : > { %7176 = vmatmul.mubr.msk.f32.vlgmr.msra.gmra.mrb[14].mxu1 %vm4542_vm10, %v4796_v61  ;;  %7177 = vmatmul.mubr.msk.f32.vlgmr.msra.gmra.mrb[16].mxu0 %vm4542_vm10, %v4881_v40 }
 0x678   : > { %5130 = vmatprep.mubr.f32.mxu1 %v10897_v49  ;;  %5303 = vmatprep.mubr.f32.mxu0 %v10897_v49 }
 0x680   : > { %v2183_v31 = vpop.permute.xlu1 %2182  ;;  %v4540_v30 = vpop.permute.xlu0 %4539 }
 0x681   : > { %v2261_v6 = vadd.f32 %v8836_v50, %v2183_v31  ;;  %v2263_v28 = vadd.f32 %v8838_v54, %v2183_v31 }
 0x683   : > { %v9731_v47 = vmax.f32 %v2261_v6, 0.0  ;;  %v9733_v51 = vmax.f32 %v2263_v28, 0.0 }
 0x684   : > { %v4626_v58 = vpop.permute.xlu1 %4625  ;;  %v4801_v45 = vpop.permute.xlu0 %4800 }
 0x688   : > { %v4886_v44 = vpop.permute.xlu1 %4885 }
 0x70e   : > { %v4612_v3 = vpop.f32.mrb[12].mxu0 }
 0x70f   : > { %v4614_v37 = vpop.f32.mrb[13].mxu0  ;;  %v4613_v2 = vadd.f32 %v4612_v3, %v4540_v30 }
 0x710   : > { %v4615_v39 = vadd.f32 %v4614_v37, %v4540_v30 }
 0x711   : > { %v4617_v55 = vmax.f32 %v4613_v2, 0.0 }
 0x712   : > { %v4618_v46 = vmax.f32 %v4615_v39, 0.0 }
 0x713   : > { %v4619_v63 = vmul.f32 %v4617_v55, %v9731_v47 }
 0x714   : > { %v4620_v43 = vmul.f32 %v4618_v46, %v9733_v51 }
 0x720   : > { %v4697_v52 = vpop.f32.mrb[14].mxu0 }
 0x721   : > { %v4698_v62 = vadd.f32 %v4697_v52, %v4626_v58  ;;  %v4699_v38 = vpop.f32.mrb[15].mxu0 }
 0x722   : > { %v4700_v5 = vadd.f32 %v4699_v38, %v4626_v58 }
 0x723   : > { %v4702_v9 = vmax.f32 %v4698_v62, 0.0 }
 0x724   : > { %v4703_v24 = vmax.f32 %v4700_v5, 0.0 }
 0x725   : > { %v9737_v50 = vadd.f32 %v4702_v9, %v4619_v63 }
 0x726   : > { %v9739_v54 = vadd.f32 %v4703_v24, %v4620_v43 }
 0x727   : > { %5012 = vrot.lane.b32.xlu0 %v9737_v50, %s10917_s7  ;;  %4971 = vrot.lane.b32.xlu1 %v9737_v50, %s10899_s23 }
 0x72b   : > { %5023 = vrot.lane.b32.xlu0 %v9737_v50, %s10907_s5  ;;  %4982 = vrot.lane.b32.xlu1 %v9737_v50, %s10900_s2 }
 0x72f   : > { %5034 = vrot.lane.b32.xlu0 %v9737_v50, %s10902_s28  ;;  %4993 = vrot.lane.b32.xlu1 %v9737_v50, %s10903_s22 }
 0x733   : > { %5045 = vrot.lane.b32.xlu0 %v9737_v50, %s10898_s26  ;;  %5004 = vrot.lane.b32.xlu1 %v9737_v50, %s10904_s3 }
 0x737   : > { %4967 = vrot.lane.b32.xlu0 %v9739_v54, %s10899_s23  ;;  %5014 = vrot.lane.b32.xlu1 %v9739_v54, %s10917_s7 }
 0x73b   : > { %4979 = vrot.lane.b32.xlu0 %v9739_v54, %s10900_s2  ;;  %5025 = vrot.lane.b32.xlu1 %v9739_v54, %s10907_s5 }
 0x73f   : > { %4990 = vrot.lane.b32.xlu0 %v9739_v54, %s10903_s22  ;;  %5036 = vrot.lane.b32.xlu1 %v9739_v54, %s10902_s28 }
 0x743   : > { %5001 = vrot.lane.b32.xlu0 %v9739_v54, %s10904_s3  ;;  %5047 = vrot.lane.b32.xlu1 %v9739_v54, %s10898_s26 }
 0x74a   : > { %v4872_v23 = vpop.f32.mrb[14].mxu1  ;;  %v4957_v53 = vpop.f32.mrb[16].mxu0 }
 0x74b   : > { %v4873_v22 = vadd.f32 %v4872_v23, %v4801_v45  ;;  %v4958_v7 = vadd.f32 %v4957_v53, %v4886_v44  ;;  %v4874_v34 = vpop.f32.mrb[15].mxu1  ;;  %v4959_v1 = vpop.f32.mrb[17].mxu0 }
 0x74c   : > { %v4875_v14 = vadd.f32 %v4874_v34, %v4801_v45  ;;  %v4960_v8 = vadd.f32 %v4959_v1, %v4886_v44 }
 0x74d   : > { %v4877_v48 = vmax.f32 %v4873_v22, 0.0  ;;  %v4962_v59 = vmax.f32 %v4958_v7, 0.0 }
 0x74e   : > { %v4878_v16 = vmax.f32 %v4875_v14, 0.0  ;;  %v4963_v11 = vmax.f32 %v4960_v8, 0.0 }
 0x74f   : > { %v4879_v15 = vmul.f32 %v4877_v48, %v9731_v47 }
 0x750   : > { %v4880_v29 = vmul.f32 %v4878_v16, %v9733_v51 }
 0x751   : > { %v9775_v17 = vadd.f32 %v4962_v59, %v4879_v15 }
 0x752   : > { %v9777_v4 = vadd.f32 %v4963_v11, %v4880_v29 }
 0x753   : > { %5358 = vrot.lane.b32.xlu0 %v9775_v17, %s10917_s7  ;;  %5317 = vrot.lane.b32.xlu1 %v9775_v17, %s10899_s23 }
 0x757   : > { %5313 = vrot.lane.b32.xlu0 %v9777_v4, %s10899_s23  ;;  %5328 = vrot.lane.b32.xlu1 %v9775_v17, %s10900_s2 }
 0x75b   : > { %5325 = vrot.lane.b32.xlu0 %v9777_v4, %s10900_s2  ;;  %5339 = vrot.lane.b32.xlu1 %v9775_v17, %s10903_s22 }
 0x75f   : > { %5336 = vrot.lane.b32.xlu0 %v9777_v4, %s10903_s22  ;;  %5350 = vrot.lane.b32.xlu1 %v9775_v17, %s10904_s3 }
 0x763   : > { %5347 = vrot.lane.b32.xlu0 %v9777_v4, %s10904_s3  ;;  %5360 = vrot.lane.b32.xlu1 %v9777_v4, %s10917_s7 }
 0x767   : > { %5369 = vrot.lane.b32.xlu0 %v9775_v17, %s10907_s5  ;;  %5371 = vrot.lane.b32.xlu1 %v9777_v4, %s10907_s5 }
 0x76b   : > { %5380 = vrot.lane.b32.xlu0 %v9775_v17, %s10902_s28  ;;  %5382 = vrot.lane.b32.xlu1 %v9777_v4, %s10902_s28 }
 0x76f   : > { %5391 = vrot.lane.b32.xlu0 %v9775_v17, %s10898_s26  ;;  %5393 = vrot.lane.b32.xlu1 %v9777_v4, %s10898_s26 }
 0x773   : > { %5060 = vperm.xlu0 %7764, %v5057_v12   ;;  %5406 = vperm.xlu1 %7765, %v5403_v25  }
 0x799   : > { %v4972_v10 = vpop.permute.xlu1 %4971  ;;  %v5013_v13 = vpop.permute.xlu0 %5012 }
 0x79d   : > { %v4983_v61 = vpop.permute.xlu1 %4982  ;;  %v5024_v40 = vpop.permute.xlu0 %5023 }
 0x7a1   : > { %v4994_v3 = vpop.permute.xlu1 %4993  ;;  %v5035_v37 = vpop.permute.xlu0 %5034 }
 0x7a5   : > { %v5005_v31 = vpop.permute.xlu1 %5004  ;;  %v5046_v30 = vpop.permute.xlu0 %5045 }
 0x7a9   : > { %v5015_v2 = vpop.permute.xlu1 %5014  ;;  %v4968_v39 = vpop.permute.xlu0 %4967 }
 0x7aa   : > { %v4973_v6 = vsel %vm1752_vm2, %v4972_v10, %v4968_v39  ;;  %v4976_v28 = vsel %vm1752_vm2, %v4968_v39, %v4972_v10  ;;  %v5020_v45 = vsel %vm1843_vm4, %v5015_v2, %v5013_v13  ;;  %v5016_v7 = vsel %vm1843_vm4, %v5013_v13, %v5015_v2 }
 0x7ab   : > { %v4977_v52 = vmul.f32 %v4976_v28, %v8350_v32  ;;  %v4978_v62 = vmul.f32 %v4973_v6, %v8353_v33  ;;  %v5022_v34 = vmul.f32 %v5020_v45, %v8386_v57  ;;  %v5021_v12 = vmul.f32 %v5016_v7, %v8383_v56 }
 0x7ad   : > { %v4980_v55 = vpop.permute.xlu0 %4979  ;;  %v5026_v38 = vpop.permute.xlu1 %5025  ;;  %v7478_v39 = vpack.c.bf16 %v5021_v12, %v9737_v50 }
 0x7ae   : > { %v4984_v58 = vsel %vm1775_vm0, %v4983_v61, %v4980_v55  ;;  %v4987_v46 = vsel %vm1775_vm0, %v4980_v55, %v4983_v61  ;;  %v5031_v25 = vsel %vm1866_vm7, %v5026_v38, %v5024_v40  ;;  %v7476_v61 = vpack.c.bf16 %v5022_v34, %v9739_v54 }
 0x7af   : > { %v4988_v5 = vmul.f32 %v4987_v46, %v8328_v20  ;;  %v4989_v63 = vmul.f32 %v4984_v58, %v8331_v21 }
 0x7b1   : > { %v7470_v9 = vpack.c.bf16 %v4988_v5, %v4977_v52  ;;  %v4991_v43 = vpop.permute.xlu0 %4990  ;;  %v7468_v24 = vpack.c.bf16 %v4989_v63, %v4978_v62  ;;  %v5037_v53 = vpop.permute.xlu1 %5036  ;;  %v5056_v62 = vld [vmem:[%s10925_s8] sm:$0xff]  ;;  %s10930_s8 = sld [smem:[#allocation37_spill]] }
 0x7b2   : > { %v4995_v44 = vsel %vm1798_vm3, %v4994_v3, %v4991_v43  ;;  %v4998_v23 = vsel %vm1798_vm3, %v4991_v43, %v4994_v3  ;;  %v5042_v59 = vsel %vm1889_vm6, %v5037_v53, %v5035_v37  ;;  %v5038_v10 = vsel %vm1889_vm6, %v5035_v37, %v5037_v53 }
 0x7b3   : > { %7469 = vmatprep.subr.bf16.mxu1 %v7468_v24  ;;  %v4999_v8 = vmul.f32 %v4998_v23, %v8364_v41  ;;  %v5000_v48 = vmul.f32 %v4995_v44, %v8367_v42  ;;  %v5044_v13 = vmul.f32 %v5042_v59, %v8401_v19  ;;  %v5027_v3 = vsel %vm1866_vm7, %v5024_v40, %v5026_v38 }
 0x7b4   : > { %7471 = vmatpush1.bf16.msra.mxu1 %v7470_v9  ;;  %v5043_v6 = vmul.f32 %v5038_v10, %v8398_v18  ;;  %v5032_v37 = vmul.f32 %v5027_v3, %v8415_v35 }
 0x7b5   : > { %v5002_v22 = vpop.permute.xlu0 %5001  ;;  %v5048_v2 = vpop.permute.xlu1 %5047 }
 0x7b6   : > { %v5006_v1 = vsel %vm1821_vm1, %v5005_v31, %v5002_v22  ;;  %v5009_v14 = vsel %vm1821_vm1, %v5002_v22, %v5005_v31  ;;  %v5033_v31 = vmul.f32 %v5031_v25, %v8418_v36  ;;  %v5053_v55 = vsel %vm1912_vm8, %v5048_v2, %v5046_v30 }
 0x7b7   : > { %v5010_v16 = vmul.f32 %v5009_v14, %v8341_v26  ;;  %v5011_v15 = vmul.f32 %v5006_v1, %v8344_v27  ;;  %v7482_v54 = vpack.c.bf16 %v5043_v6, %v5032_v37  ;;  %v5049_v58 = vsel %vm1912_vm8, %v5046_v30, %v5048_v2 }
 0x7b8   : > { %v7480_v28 = vpack.c.bf16 %v5044_v13, %v5033_v31  ;;  %v5055_v40 = vmul.f32 %v5053_v55, %v8519_v60  ;;  %v5054_v50 = vmul.f32 %v5049_v58, %v8516_v0 }
 0x7b9   : > { %v7474_v29 = vpack.c.bf16 %v5010_v16, %v4999_v8  ;;  %v7472_v11 = vpack.c.bf16 %v5011_v15, %v5000_v48 }
 0x7bb   : > { %7473 = vmatprep.subr.bf16.mxu1 %v7472_v11 }
 0x7bc   : > { %7475 = vmatpush1.bf16.msra.mxu1 %v7474_v29 }
 0x7bd   : > { %7477 = vmatprep.subr.bf16.mxu1 %v7476_v61 }
 0x7c0   : > { %7479 = vmatpush1.bf16.msra.mxu1 %v7478_v39 }
 0x7c1   : > { %7481 = vmatprep.subr.bf16.mxu1 %v7480_v28 }
 0x7c4   : > { %7483 = vmatpush1.bf16.msra.mxu1 %v7482_v54 }
 0x7c5   : > { %v5318_v46 = vpop.permute.xlu1 %5317  ;;  %5082 = vmatprep.subr.mxu1 %v5055_v40  ;;  %v5359_v52 = vpop.permute.xlu0 %5358 }
 0x7c8   : > { %5083 = vmatpush1.msra.mxu1 %v5054_v50 }
 0x7c9   : > { %v5329_v38 = vpop.permute.xlu1 %5328  ;;  %7178 = vmatmul.mubr.msk.f32.vlgmr.msra.gmra.mrb[16].mxu1 %vm4542_vm10, %v5056_v62  ;;  %v5314_v5 = vpop.permute.xlu0 %5313 }
 0x7ca   : > { %5476 = vmatprep.mubr.f32.mxu1 %v10897_v49  ;;  %v5319_v63 = vsel %vm1752_vm2, %v5318_v46, %v5314_v5  ;;  %v5322_v30 = vsel %vm1752_vm2, %v5314_v5, %v5318_v46 }
 0x7cb   : > { %v5323_v44 = vmul.f32 %v5322_v30, %v8350_v32  ;;  %v5324_v23 = vmul.f32 %v5319_v63, %v8353_v33 }
 0x7cd   : > { %v5340_v9 = vpop.permute.xlu1 %5339  ;;  %v5326_v43 = vpop.permute.xlu0 %5325 }
 0x7ce   : > { %v5330_v24 = vsel %vm1775_vm0, %v5329_v38, %v5326_v43  ;;  %v5333_v45 = vsel %vm1775_vm0, %v5326_v43, %v5329_v38 }
 0x7cf   : > { %v5334_v53 = vmul.f32 %v5333_v45, %v8328_v20  ;;  %v5335_v22 = vmul.f32 %v5330_v24, %v8331_v21 }
 0x7d1   : > { %v7502_v7 = vpack.c.bf16 %v5334_v53, %v5323_v44  ;;  %v5351_v34 = vpop.permute.xlu1 %5350  ;;  %v5337_v1 = vpop.permute.xlu0 %5336  ;;  %v7500_v14 = vpack.c.bf16 %v5335_v22, %v5324_v23  ;;  %v5402_v23 = vld [vmem:[%s10926_s6] sm:$0xff]  ;;  %s10931_s6 = sld [smem:[#allocation39_spill]] }
 0x7d2   : > { %v5344_v8 = vsel %vm1798_vm3, %v5337_v1, %v5340_v9  ;;  %v5341_v48 = vsel %vm1798_vm3, %v5340_v9, %v5337_v1 }
 0x7d3   : > { %7501 = vmatprep.subr.bf16.mxu1 %v7500_v14  ;;  %v5345_v16 = vmul.f32 %v5344_v8, %v8364_v41  ;;  %v5346_v29 = vmul.f32 %v5341_v48, %v8367_v42 }
 0x7d4   : > { %7503 = vmatpush1.bf16.msra.mxu1 %v7502_v7 }
 0x7d5   : > { %v5361_v15 = vpop.permute.xlu1 %5360  ;;  %v5348_v59 = vpop.permute.xlu0 %5347 }
 0x7d6   : > { %v5366_v11 = vsel %vm1843_vm4, %v5361_v15, %v5359_v52  ;;  %v5352_v12 = vsel %vm1821_vm1, %v5351_v34, %v5348_v59  ;;  %v5355_v25 = vsel %vm1821_vm1, %v5348_v59, %v5351_v34  ;;  %v5362_v10 = vsel %vm1843_vm4, %v5359_v52, %v5361_v15 }
 0x7d7   : > { %v5368_v13 = vmul.f32 %v5366_v11, %v8386_v57  ;;  %v5356_v61 = vmul.f32 %v5355_v25, %v8341_v26  ;;  %v5357_v3 = vmul.f32 %v5352_v12, %v8344_v27  ;;  %v5367_v28 = vmul.f32 %v5362_v10, %v8383_v56  ;;  %v5230_v25 = vld [vmem:[%s10927_s4] sm:$0xff]  ;;  %s10932_s4 = sld [smem:[#allocation40_spill]] }
 0x7d8   : > { %v5576_v10 = vld [vmem:[%s10928_s10] sm:$0xff]  ;;  %s10933_s10 = sld [smem:[#allocation41_spill]] }
 0x7d9   : > { %v7506_v31 = vpack.c.bf16 %v5356_v61, %v5345_v16  ;;  %v5372_v2 = vpop.permute.xlu1 %5371  ;;  %v5370_v39 = vpop.permute.xlu0 %5369  ;;  %v7504_v6 = vpack.c.bf16 %v5357_v3, %v5346_v29  ;;  %v7508_v37 = vpack.c.bf16 %v5368_v13, %v9777_v4  ;;  %v7510_v46 = vpack.c.bf16 %v5367_v28, %v9775_v17 }
 0x7da   : > { %v5373_v55 = vsel %vm1866_vm7, %v5370_v39, %v5372_v2  ;;  %v5377_v54 = vsel %vm1866_vm7, %v5372_v2, %v5370_v39 }
 0x7db   : > { %7505 = vmatprep.subr.bf16.mxu1 %v7504_v6  ;;  %v5378_v62 = vmul.f32 %v5373_v55, %v8415_v35  ;;  %v5379_v38 = vmul.f32 %v5377_v54, %v8418_v36 }
 0x7dc   : > { %7507 = vmatpush1.bf16.msra.mxu1 %v7506_v31 }
 0x7dd   : > { %v5383_v58 = vpop.permute.xlu1 %5382  ;;  %7509 = vmatprep.subr.bf16.mxu1 %v7508_v37  ;;  %v5381_v40 = vpop.permute.xlu0 %5380 }
 0x7de   : > { %v5384_v52 = vsel %vm1889_vm6, %v5381_v40, %v5383_v58  ;;  %v5388_v50 = vsel %vm1889_vm6, %v5383_v58, %v5381_v40 }
 0x7df   : > { %v5389_v4 = vmul.f32 %v5384_v52, %v8398_v18  ;;  %v5390_v5 = vmul.f32 %v5388_v50, %v8401_v19 }
 0x7e0   : > { %7511 = vmatpush1.bf16.msra.mxu1 %v7510_v46 }
 0x7e1   : > { %v7514_v63 = vpack.c.bf16 %v5389_v4, %v5378_v62  ;;  %v5394_v30 = vpop.permute.xlu1 %5393  ;;  %v5392_v9 = vpop.permute.xlu0 %5391  ;;  %v7512_v43 = vpack.c.bf16 %v5390_v5, %v5379_v38 }
 0x7e2   : > { %v5399_v17 = vsel %vm1912_vm8, %v5394_v30, %v5392_v9  ;;  %v5395_v24 = vsel %vm1912_vm8, %v5392_v9, %v5394_v30 }
 0x7e3   : > { %7513 = vmatprep.subr.bf16.mxu1 %v7512_v43  ;;  %v5401_v45 = vmul.f32 %v5399_v17, %v8519_v60  ;;  %v5400_v44 = vmul.f32 %v5395_v24, %v8516_v0 }
 0x7e4   : > { %7515 = vmatpush1.bf16.msra.mxu1 %v7514_v63 }
 0x7e5   : > { %5428 = vmatprep.subr.mxu1 %v5401_v45 }
 0x7e8   : > { %5429 = vmatpush1.msra.mxu1 %v5400_v44 }
 0x7e9   : > { %7180 = vmatmul.mubr.msk.f32.vlgmr.msra.gmra.mrb[18].mxu1 %vm4542_vm10, %v5402_v23 }
 0x7f2   : > { %v5061_v53 = vpop.permute.xlu0 %5060  ;;  %v5407_v48 = vpop.permute.xlu1 %5406 }
 0x89c   : > { %v5132_v22 = vpop.f32.mrb[16].mxu1 }
 0x89d   : > { %v5133_v7 = vadd.f32 %v5132_v22, %v5061_v53  ;;  %v5134_v34 = vpop.f32.mrb[17].mxu1 }
 0x89e   : > { %v5135_v14 = vadd.f32 %v5134_v34, %v5061_v53 }
 0x89f   : > { %v9886_v1 = vmax.f32 %v5133_v7, 0.0 }
 0x8a0   : > { %v9904_v8 = vmax.f32 %v5135_v14, 0.0 }
 0x8a1   : > { %5185 = vrot.lane.b32.xlu0 %v9886_v1, %s10917_s7  ;;  %5144 = vrot.lane.b32.xlu1 %v9886_v1, %s10899_s23 }
 0x8a5   : > { %5196 = vrot.lane.b32.xlu0 %v9886_v1, %s10907_s5  ;;  %5155 = vrot.lane.b32.xlu1 %v9886_v1, %s10900_s2 }
 0x8a9   : > { %5207 = vrot.lane.b32.xlu0 %v9886_v1, %s10902_s28  ;;  %5166 = vrot.lane.b32.xlu1 %v9886_v1, %s10903_s22 }
 0x8ad   : > { %5218 = vrot.lane.b32.xlu0 %v9886_v1, %s10898_s26  ;;  %5177 = vrot.lane.b32.xlu1 %v9886_v1, %s10904_s3 }
 0x8b1   : > { %5140 = vrot.lane.b32.xlu0 %v9904_v8, %s10899_s23  ;;  %5187 = vrot.lane.b32.xlu1 %v9904_v8, %s10917_s7 }
 0x8b5   : > { %5152 = vrot.lane.b32.xlu0 %v9904_v8, %s10900_s2  ;;  %5198 = vrot.lane.b32.xlu1 %v9904_v8, %s10907_s5 }
 0x8b9   : > { %5163 = vrot.lane.b32.xlu0 %v9904_v8, %s10903_s22  ;;  %5209 = vrot.lane.b32.xlu1 %v9904_v8, %s10902_s28 }
 0x8bc   : > { %v5478_v16 = vpop.f32.mrb[18].mxu1 }
 0x8bd   : > { %v5479_v15 = vadd.f32 %v5478_v16, %v5407_v48  ;;  %v5480_v59 = vpop.f32.mrb[19].mxu1  ;;  %5174 = vrot.lane.b32.xlu0 %v9904_v8, %s10904_s3  ;;  %5220 = vrot.lane.b32.xlu1 %v9904_v8, %s10898_s26 }
 0x8be   : > { %v5481_v11 = vadd.f32 %v5480_v59, %v5407_v48 }
 0x8bf   : > { %v9922_v29 = vmax.f32 %v5479_v15, 0.0 }
 0x8c0   : > { %v9928_v12 = vmax.f32 %v5481_v11, 0.0 }
 0x8c1   : > { %5531 = vrot.lane.b32.xlu0 %v9922_v29, %s10917_s7  ;;  %5490 = vrot.lane.b32.xlu1 %v9922_v29, %s10899_s23 }
 0x8c5   : > { %5486 = vrot.lane.b32.xlu0 %v9928_v12, %s10899_s23  ;;  %5501 = vrot.lane.b32.xlu1 %v9922_v29, %s10900_s2 }
 0x8c9   : > { %5498 = vrot.lane.b32.xlu0 %v9928_v12, %s10900_s2  ;;  %5512 = vrot.lane.b32.xlu1 %v9922_v29, %s10903_s22 }
 0x8cd   : > { %5509 = vrot.lane.b32.xlu0 %v9928_v12, %s10903_s22  ;;  %5523 = vrot.lane.b32.xlu1 %v9922_v29, %s10904_s3 }
 0x8d1   : > { %5520 = vrot.lane.b32.xlu0 %v9928_v12, %s10904_s3  ;;  %5533 = vrot.lane.b32.xlu1 %v9928_v12, %s10917_s7 }
 0x8d5   : > { %5542 = vrot.lane.b32.xlu0 %v9922_v29, %s10907_s5  ;;  %5544 = vrot.lane.b32.xlu1 %v9928_v12, %s10907_s5 }
 0x8d9   : > { %5553 = vrot.lane.b32.xlu0 %v9922_v29, %s10902_s28  ;;  %5555 = vrot.lane.b32.xlu1 %v9928_v12, %s10902_s28 }
 0x8dd   : > { %5564 = vrot.lane.b32.xlu0 %v9922_v29, %s10898_s26  ;;  %5566 = vrot.lane.b32.xlu1 %v9928_v12, %s10898_s26 }
 0x8e1   : > { %5233 = vperm.xlu0 %7764, %v5230_v25   ;;  %5579 = vperm.xlu1 %7765, %v5576_v10  }
 0x8e5   : > { %5665 = vrot.lane.b32.xlu0 %v9733_v51, %s10899_s23  ;;  %5677 = vrot.lane.b32.xlu1 %v9731_v47, %s10899_s23 }
 0x8e9   : > { %5734 = vrot.lane.b32.xlu0 %v9733_v51, %s10903_s22  ;;  %5701 = vrot.lane.b32.xlu1 %v9733_v51, %s10900_s2 }
 0x8ed   : > { %5710 = vrot.lane.b32.xlu1 %v9731_v47, %s10900_s2 }
 0x8f1   : > { %5743 = vrot.lane.b32.xlu1 %v9731_v47, %s10903_s22 }
 0x8f5   : > { %5767 = vrot.lane.b32.xlu1 %v9733_v51, %s10904_s3 }
 0x8f9   : > { %5776 = vrot.lane.b32.xlu1 %v9731_v47, %s10904_s3 }
 0x913   : > { %v5186_v13 = vpop.permute.xlu0 %5185  ;;  %v5145_v61 = vpop.permute.xlu1 %5144 }
 0x917   : > { %v5197_v3 = vpop.permute.xlu0 %5196  ;;  %v5156_v31 = vpop.permute.xlu1 %5155 }
 0x91b   : > { %v5208_v2 = vpop.permute.xlu0 %5207  ;;  %v5167_v39 = vpop.permute.xlu1 %5166 }
 0x91f   : > { %v9976_v6 = vpop.permute.xlu0 %5218  ;;  %v5178_v28 = vpop.permute.xlu1 %5177 }
 0x923   : > { %v5141_v37 = vpop.permute.xlu0 %5140  ;;  %v5188_v55 = vpop.permute.xlu1 %5187 }
 0x924   : > { %v5146_v54 = vsel %vm1752_vm2, %v5145_v61, %v5141_v37  ;;  %v5149_v58 = vsel %vm1752_vm2, %v5141_v37, %v5145_v61  ;;  %v5193_v17 = vsel %vm1843_vm4, %v5188_v55, %v5186_v13  ;;  %v5189_v53 = vsel %vm1843_vm4, %v5186_v13, %v5188_v55 }
 0x925   : > { %v5150_v62 = vmul.f32 %v5149_v58, %v8350_v32  ;;  %v5151_v38 = vmul.f32 %v5146_v54, %v8353_v33  ;;  %v5195_v22 = vmul.f32 %v5193_v17, %v8386_v57  ;;  %v5194_v61 = vmul.f32 %v5189_v53, %v8383_v56 }
 0x927   : > { %v5153_v40 = vpop.permute.xlu0 %5152  ;;  %v5199_v46 = vpop.permute.xlu1 %5198  ;;  %v7492_v37 = vpack.c.bf16 %v5195_v22, %v9904_v8 }
 0x928   : > { %v5157_v52 = vsel %vm1775_vm0, %v5156_v31, %v5153_v40  ;;  %v5160_v50 = vsel %vm1775_vm0, %v5153_v40, %v5156_v31  ;;  %v5204_v31 = vsel %vm1866_vm7, %v5199_v46, %v5197_v3  ;;  %v5200_v55 = vsel %vm1866_vm7, %v5197_v3, %v5199_v46 }
 0x929   : > { %v5161_v4 = vmul.f32 %v5160_v50, %v8328_v20  ;;  %v5162_v5 = vmul.f32 %v5157_v52, %v8331_v21  ;;  %v5206_v54 = vmul.f32 %v5204_v31, %v8418_v36  ;;  %v7494_v52 = vpack.c.bf16 %v5194_v61, %v9886_v1 }
 0x92b   : > { %v7486_v63 = vpack.c.bf16 %v5161_v4, %v5150_v62  ;;  %v5164_v30 = vpop.permute.xlu0 %5163  ;;  %v5210_v9 = vpop.permute.xlu1 %5209  ;;  %v7484_v43 = vpack.c.bf16 %v5162_v5, %v5151_v38 }
 0x92c   : > { %v5168_v24 = vsel %vm1798_vm3, %v5167_v39, %v5164_v30  ;;  %v5171_v45 = vsel %vm1798_vm3, %v5164_v30, %v5167_v39  ;;  %v5215_v59 = vsel %vm1889_vm6, %v5210_v9, %v5208_v2  ;;  %v5211_v39 = vsel %vm1889_vm6, %v5208_v2, %v5210_v9 }
 0x92d   : > { %7485 = vmatprep.subr.bf16.mxu0 %v7484_v43  ;;  %v5172_v14 = vmul.f32 %v5171_v45, %v8364_v41  ;;  %v5173_v48 = vmul.f32 %v5168_v24, %v8367_v42  ;;  %v5216_v50 = vmul.f32 %v5211_v39, %v8398_v18  ;;  %v5205_v2 = vmul.f32 %v5200_v55, %v8415_v35 }
 0x92e   : > { %7487 = vmatpush1.bf16.msra.mxu0 %v7486_v63 }
 0x92f   : > { %v5175_v44 = vpop.permute.xlu0 %5174  ;;  %v5221_v23 = vpop.permute.xlu1 %5220  ;;  %v7498_v3 = vpack.c.bf16 %v5216_v50, %v5205_v2 }
 0x930   : > { %v5179_v7 = vsel %vm1821_vm1, %v5178_v28, %v5175_v44  ;;  %v5182_v34 = vsel %vm1821_vm1, %v5175_v44, %v5178_v28  ;;  %v5217_v28 = vmul.f32 %v5215_v59, %v8401_v19  ;;  %v5226_v38 = vsel %vm1912_vm8, %v5221_v23, %v9976_v6 }
 0x931   : > { %v5183_v16 = vmul.f32 %v5182_v34, %v8341_v26  ;;  %v5184_v15 = vmul.f32 %v5179_v7, %v8344_v27  ;;  %v5222_v63 = vsel %vm1912_vm8, %v9976_v6, %v5221_v23  ;;  %v5228_v43 = vmul.f32 %v5226_v38, %v8519_v60  ;;  %v5229_v23 = vld [vmem:[%s10929_s1] sm:$0xff]  ;;  %s10934_s1 = sld [smem:[#allocation42_spill]] }
 0x932   : > { %v7496_v62 = vpack.c.bf16 %v5217_v28, %v5206_v54  ;;  %v5227_v53 = vmul.f32 %v5222_v63, %v8516_v0 }
 0x933   : > { %v7490_v11 = vpack.c.bf16 %v5183_v16, %v5172_v14  ;;  %v5532_v25 = vpop.permute.xlu0 %5531  ;;  %v5491_v10 = vpop.permute.xlu1 %5490  ;;  %v7488_v13 = vpack.c.bf16 %v5184_v15, %v5173_v48 }
 0x935   : > { %7489 = vmatprep.subr.bf16.mxu0 %v7488_v13 }
 0x936   : > { %7491 = vmatpush1.bf16.msra.mxu0 %v7490_v11 }
 0x937   : > { %v5487_v58 = vpop.permute.xlu0 %5486  ;;  %7493 = vmatprep.subr.bf16.mxu0 %v7492_v37  ;;  %v5502_v40 = vpop.permute.xlu1 %5501 }
 0x938   : > { %v5492_v46 = vsel %vm1752_vm2, %v5491_v10, %v5487_v58  ;;  %v5495_v30 = vsel %vm1752_vm2, %v5487_v58, %v5491_v10 }
 0x939   : > { %v5497_v24 = vmul.f32 %v5492_v46, %v8353_v33  ;;  %v5496_v22 = vmul.f32 %v5495_v30, %v8350_v32 }
 0x93a   : > { %7495 = vmatpush1.bf16.msra.mxu0 %v7494_v52 }
 0x93b   : > { %v5499_v8 = vpop.permute.xlu0 %5498  ;;  %7497 = vmatprep.subr.bf16.mxu0 %v7496_v62  ;;  %v5513_v4 = vpop.permute.xlu1 %5512 }
 0x93c   : > { %v5503_v5 = vsel %vm1775_vm0, %v5502_v40, %v5499_v8  ;;  %v5506_v1 = vsel %vm1775_vm0, %v5499_v8, %v5502_v40 }
 0x93d   : > { %v5508_v9 = vmul.f32 %v5503_v5, %v8331_v21  ;;  %v5507_v17 = vmul.f32 %v5506_v1, %v8328_v20 }
 0x93e   : > { %7499 = vmatpush1.bf16.msra.mxu0 %v7498_v3 }
 0x93f   : > { %v5510_v45 = vpop.permute.xlu0 %5509  ;;  %5255 = vmatprep.subr.mxu0 %v5228_v43  ;;  %v5524_v44 = vpop.permute.xlu1 %5523  ;;  %v7516_v34 = vpack.c.bf16 %v5508_v9, %v5497_v24  ;;  %v7518_v14 = vpack.c.bf16 %v5507_v17, %v5496_v22 }
 0x940   : > { %v5517_v6 = vsel %vm1798_vm3, %v5510_v45, %v5513_v4  ;;  %v5514_v7 = vsel %vm1798_vm3, %v5513_v4, %v5510_v45  ;;  %v5575_v45 = vld [vmem:[%s10930_s8] sm:$0xff] }
 0x941   : > { %v5518_v48 = vmul.f32 %v5517_v6, %v8364_v41  ;;  %v5519_v59 = vmul.f32 %v5514_v7, %v8367_v42 }
 0x942   : > { %5256 = vmatpush1.msra.mxu0 %v5227_v53 }
 0x943   : > { %v5521_v16 = vpop.permute.xlu0 %5520  ;;  %7179 = vmatmul.mubr.msk.f32.vlgmr.msra.gmra.mrb[18].mxu0 %vm4542_vm10, %v5229_v23  ;;  %7517 = vmatprep.subr.bf16.mxu0 %v7516_v34  ;;  %v5534_v15 = vpop.permute.xlu1 %5533 }
 0x944   : > { %v5525_v11 = vsel %vm1821_vm1, %v5524_v44, %v5521_v16  ;;  %v5528_v10 = vsel %vm1821_vm1, %v5521_v16, %v5524_v44  ;;  %v5539_v13 = vsel %vm1843_vm4, %v5534_v15, %v5532_v25  ;;  %7519 = vmatpush1.bf16.msra.mxu0 %v7518_v14  ;;  %v5535_v39 = vsel %vm1843_vm4, %v5532_v25, %v5534_v15 }
 0x945   : > { %v5529_v61 = vmul.f32 %v5528_v10, %v8341_v26  ;;  %v5530_v31 = vmul.f32 %v5525_v11, %v8344_v27  ;;  %v5541_v28 = vmul.f32 %v5539_v13, %v8386_v57  ;;  %5649 = vmatprep.mubr.f32.mxu0 %v10897_v49  ;;  %v5540_v40 = vmul.f32 %v5535_v39, %v8383_v56  ;;  %v5934_v39 = vld [vmem:[%s10932_s4] sm:$0xff] }
 0x947   : > { %v7522_v37 = vpack.c.bf16 %v5529_v61, %v5518_v48  ;;  %v5543_v55 = vpop.permute.xlu0 %5542  ;;  %v5545_v54 = vpop.permute.xlu1 %5544  ;;  %v7520_v58 = vpack.c.bf16 %v5530_v31, %v5519_v59  ;;  %v7524_v52 = vpack.c.bf16 %v5541_v28, %v9928_v12  ;;  %v7526_v38 = vpack.c.bf16 %v5540_v40, %v9922_v29  ;;  %v5929_v61 = vld [vmem:[%s10931_s6 + $0x8] sm:$0xff]  ;;  %v5936_v28 = vld [vmem:[%s10932_s4 + $0x10] sm:$0xff] }
 0x948   : > { %v5546_v50 = vsel %vm1866_vm7, %v5543_v55, %v5545_v54  ;;  %v5550_v62 = vsel %vm1866_vm7, %v5545_v54, %v5543_v55  ;;  %7182 = vmatprep.mubr.msk.f32.mxu1 %vm5952_vm11, %v5929_v61  ;;  %v5935_v31 = vld [vmem:[%s10932_s4 + $0x8] sm:$0xff] }
 0x949   : > { %7521 = vmatprep.subr.bf16.mxu0 %v7520_v58  ;;  %v5551_v3 = vmul.f32 %v5546_v50, %v8415_v35  ;;  %v5552_v46 = vmul.f32 %v5550_v62, %v8418_v36 }
 0x94a   : > { %7523 = vmatpush1.bf16.msra.mxu0 %v7522_v37 }
 0x94b   : > { %v5554_v2 = vpop.permute.xlu0 %5553  ;;  %7525 = vmatprep.subr.bf16.mxu0 %v7524_v52  ;;  %v5556_v25 = vpop.permute.xlu1 %5555 }
 0x94c   : > { %v5557_v8 = vsel %vm1889_vm6, %v5554_v2, %v5556_v25  ;;  %v5561_v4 = vsel %vm1889_vm6, %v5556_v25, %v5554_v2 }
 0x94d   : > { %v5562_v12 = vmul.f32 %v5557_v8, %v8398_v18  ;;  %v5563_v5 = vmul.f32 %v5561_v4, %v8401_v19 }
 0x94e   : > { %7527 = vmatpush1.bf16.msra.mxu0 %v7526_v38 }
 0x94f   : > { %v7530_v1 = vpack.c.bf16 %v5562_v12, %v5551_v3  ;;  %v5565_v63 = vpop.permute.xlu0 %5564  ;;  %v5567_v30 = vpop.permute.xlu1 %5566  ;;  %v7528_v9 = vpack.c.bf16 %v5563_v5, %v5552_v46 }
 0x950   : > { %v5572_v29 = vsel %vm1912_vm8, %v5567_v30, %v5565_v63  ;;  %v5568_v43 = vsel %vm1912_vm8, %v5565_v63, %v5567_v30 }
 0x951   : > { %7529 = vmatprep.subr.bf16.mxu0 %v7528_v9  ;;  %v5574_v17 = vmul.f32 %v5572_v29, %v8519_v60  ;;  %v5573_v24 = vmul.f32 %v5568_v43, %v8516_v0 }
 0x952   : > { %7531 = vmatpush1.bf16.msra.mxu0 %v7530_v1 }
 0x953   : > { %5601 = vmatprep.subr.mxu0 %v5574_v17 }
 0x956   : > { %5602 = vmatpush1.msra.mxu0 %v5573_v24 }
 0x957   : > { %7181 = vmatmul.mubr.msk.f32.vlgmr.msra.gmra.mrb[20].mxu0 %vm4542_vm10, %v5575_v45 }
 0x960   : > { %v5234_v44 = vpop.permute.xlu0 %5233  ;;  %v5580_v14 = vpop.permute.xlu1 %5579 }
 0x964   : > { %v5678_v37 = vpop.permute.xlu1 %5677  ;;  %v5666_v58 = vpop.permute.xlu0 %5665 }
 0x965   : > { %v5681_v43 = vsel %vm1752_vm2, %v5678_v37, %v5666_v58 }
 0x968   : > { %v5702_v55 = vpop.permute.xlu1 %5701  ;;  %v10150_v52 = vpop.permute.xlu0 %5734 }
 0x96c   : > { %v5711_v54 = vpop.permute.xlu1 %5710 }
 0x970   : > { %v10148_v40 = vpop.permute.xlu1 %5743 }
 0x974   : > { %v10152_v50 = vpop.permute.xlu1 %5767 }
 0x978   : > { %v10154_v25 = vpop.permute.xlu1 %5776 }
 0xa16   : > { %v5305_v53 = vpop.f32.mrb[18].mxu0 }
 0xa17   : > { %v5306_v22 = vadd.f32 %v5305_v53, %v5234_v44  ;;  %v5307_v6 = vpop.f32.mrb[19].mxu0 }
 0xa18   : > { %v5308_v7 = vadd.f32 %v5307_v6, %v5234_v44 }
 0xa19   : > { %v10053_v23 = vmax.f32 %v5306_v22, 0.0 }
 0xa1a   : > { %v10065_v34 = vmax.f32 %v5308_v7, 0.0 }
 0xa1b   : > { %5706 = vrot.lane.b32.xlu1 %v10053_v23, %s10900_s2  ;;  %5673 = vrot.lane.b32.xlu0 %v10053_v23, %s10899_s23 }
 0xa1f   : > { %5772 = vrot.lane.b32.xlu1 %v10053_v23, %s10904_s3  ;;  %5739 = vrot.lane.b32.xlu0 %v10053_v23, %s10903_s22 }
 0xa23   : > { %5796 = vrot.lane.b32.xlu0 %v10053_v23, %s10917_s7 }
 0xa27   : > { %5661 = vrot.lane.b32.xlu0 %v10065_v34, %s10899_s23 }
 0xa2a   : > { %v5651_v48 = vpop.f32.mrb[20].mxu0 }
 0xa2b   : > { %v5652_v16 = vadd.f32 %v5651_v48, %v5580_v14  ;;  %5697 = vrot.lane.b32.xlu0 %v10065_v34, %s10900_s2  ;;  %v5653_v15 = vpop.f32.mrb[21].mxu0 }
 0xa2c   : > { %v5654_v59 = vadd.f32 %v5653_v15, %v5580_v14  ;;  %v5696_v15 = vmul.f32 %v5681_v43, %v8353_v33 }
 0xa2d   : > { %v10071_v11 = vmax.f32 %v5652_v16, 0.0  ;;  %v5690_v16 = vsel %vm1752_vm2, %v5666_v58, %v5678_v37  ;;  %v5714_v37 = vsel %vm1775_vm0, %v5711_v54, %v5702_v55  ;;  %v5723_v58 = vsel %vm1775_vm0, %v5702_v55, %v5711_v54 }
 0xa2e   : > { %v10073_v10 = vmax.f32 %v5654_v59, 0.0 }
 0xa2f   : > { %5730 = vrot.lane.b32.xlu0 %v10065_v34, %s10903_s22  ;;  %5675 = vrot.lane.b32.xlu1 %v10071_v11, %s10899_s23 }
 0xa30   : > { %v7556_v13 = vpack.c.bf16 %v10073_v10, %v10065_v34 }
 0xa33   : > { %5763 = vrot.lane.b32.xlu0 %v10065_v34, %s10904_s3  ;;  %5741 = vrot.lane.b32.xlu1 %v10071_v11, %s10903_s22 }
 0xa37   : > { %5708 = vrot.lane.b32.xlu0 %v10071_v11, %s10900_s2  ;;  %5663 = vrot.lane.b32.xlu1 %v10073_v10, %s10899_s23 }
 0xa3b   : > { %5774 = vrot.lane.b32.xlu0 %v10071_v11, %s10904_s3  ;;  %5798 = vrot.lane.b32.xlu1 %v10065_v34, %s10917_s7 }
 0xa3f   : > { %5800 = vrot.lane.b32.xlu0 %v10071_v11, %s10917_s7  ;;  %5806 = vrot.lane.b32.xlu1 %v9733_v51, %s10917_s7 }
 0xa43   : > { %5699 = vrot.lane.b32.xlu0 %v10073_v10, %s10900_s2  ;;  %5732 = vrot.lane.b32.xlu1 %v10073_v10, %s10903_s22 }
 0xa47   : > { %5804 = vrot.lane.b32.xlu0 %v9731_v47, %s10917_s7  ;;  %5831 = vrot.lane.b32.xlu1 %v10065_v34, %s10907_s5 }
 0xa4b   : > { %5829 = vrot.lane.b32.xlu0 %v10053_v23, %s10907_s5  ;;  %5839 = vrot.lane.b32.xlu1 %v9733_v51, %s10907_s5 }
 0xa4f   : > { %5765 = vrot.lane.b32.xlu0 %v10073_v10, %s10904_s3  ;;  %5864 = vrot.lane.b32.xlu1 %v10065_v34, %s10902_s28 }
 0xa53   : > { %5833 = vrot.lane.b32.xlu0 %v10071_v11, %s10907_s5  ;;  %5872 = vrot.lane.b32.xlu1 %v9733_v51, %s10902_s28 }
 0xa57   : > { %5837 = vrot.lane.b32.xlu0 %v9731_v47, %s10907_s5  ;;  %5802 = vrot.lane.b32.xlu1 %v10073_v10, %s10917_s7 }
 0xa5b   : > { %5862 = vrot.lane.b32.xlu0 %v10053_v23, %s10902_s28  ;;  %5835 = vrot.lane.b32.xlu1 %v10073_v10, %s10907_s5 }
 0xa5f   : > { %5866 = vrot.lane.b32.xlu0 %v10071_v11, %s10902_s28  ;;  %5897 = vrot.lane.b32.xlu1 %v10065_v34, %s10898_s26 }
 0xa63   : > { %5870 = vrot.lane.b32.xlu0 %v9731_v47, %s10902_s28  ;;  %5868 = vrot.lane.b32.xlu1 %v10073_v10, %s10902_s28 }
 0xa67   : > { %5895 = vrot.lane.b32.xlu0 %v10053_v23, %s10898_s26  ;;  %5901 = vrot.lane.b32.xlu1 %v10073_v10, %s10898_s26 }
 0xa6b   : > { %5899 = vrot.lane.b32.xlu0 %v10071_v11, %s10898_s26  ;;  %5905 = vrot.lane.b32.xlu1 %v9733_v51, %s10898_s26 }
 0xa6f   : > { %5903 = vrot.lane.b32.xlu0 %v9731_v47, %s10898_s26  ;;  %5944 = vperm.xlu1 %7765, %v5935_v31  }
 0xa73   : > { %5939 = vperm.xlu0 %7764, %v5934_v39  }
 0xa77   : > { %5949 = vperm.xlu0 %7764, %v5936_v28  }
 0xa8d   : > { %v5674_v62 = vpop.permute.xlu0 %5673  ;;  %v5707_v8 = vpop.permute.xlu1 %5706 }
 0xa91   : > { %v5740_v2 = vpop.permute.xlu0 %5739  ;;  %v5773_v3 = vpop.permute.xlu1 %5772 }
 0xa95   : > { %v10156_v38 = vpop.permute.xlu0 %5796 }
 0xa99   : > { %v5662_v4 = vpop.permute.xlu0 %5661 }
 0xa9a   : > { %v5679_v30 = vsel %vm1752_vm2, %v5674_v62, %v5662_v4  ;;  %v5688_v9 = vsel %vm1752_vm2, %v5662_v4, %v5674_v62 }
 0xa9b   : > { %v5691_v45 = vmul.f32 %v5688_v9, %v8350_v32  ;;  %v5692_v44 = vmul.f32 %v5679_v30, %v8353_v33  ;;  %v5728_v30 = vmul.f32 %v5723_v58, %v8328_v20  ;;  %v5729_v9 = vmul.f32 %v5714_v37, %v8331_v21 }
 0xa9d   : > { %v5698_v46 = vpop.permute.xlu0 %5697 }
 0xa9e   : > { %v5712_v29 = vsel %vm1775_vm0, %v5707_v8, %v5698_v46  ;;  %v5721_v6 = vsel %vm1775_vm0, %v5698_v46, %v5707_v8  ;;  %v5695_v8 = vmul.f32 %v5690_v16, %v8350_v32 }
 0xa9f   : > { %v5725_v7 = vmul.f32 %v5712_v29, %v8331_v21  ;;  %v5724_v28 = vmul.f32 %v5721_v6, %v8328_v20 }
 0xaa1   : > { %v5731_v12 = vpop.permute.xlu0 %5730  ;;  %v5676_v5 = vpop.permute.xlu1 %5675  ;;  %v7536_v62 = vpack.c.bf16 %v5725_v7, %v5696_v15 }
 0xaa5   : > { %v5764_v1 = vpop.permute.xlu0 %5763  ;;  %v5742_v63 = vpop.permute.xlu1 %5741 }
 0xaa6   : > { %v5778_v7 = vsel %vm1821_vm1, %v5773_v3, %v5764_v1 }
 0xaa9   : > { %v5709_v17 = vpop.permute.xlu0 %5708  ;;  %v5664_v24 = vpop.permute.xlu1 %5663 }
 0xaaa   : > { %v5680_v53 = vsel %vm1752_vm2, %v5676_v5, %v5664_v24  ;;  %v5689_v22 = vsel %vm1752_vm2, %v5664_v24, %v5676_v5  ;;  %v7538_v5 = vpack.c.bf16 %v5724_v28, %v5695_v8  ;;  %v5745_v24 = vsel %vm1798_vm3, %v5740_v2, %v5731_v12 }
 0xaab   : > { %v5693_v14 = vmul.f32 %v5689_v22, %v8350_v32  ;;  %v5694_v48 = vmul.f32 %v5680_v53, %v8353_v33 }
 0xaad   : > { %v7534_v59 = vpack.c.bf16 %v5693_v14, %v5691_v45  ;;  %v5775_v61 = vpop.permute.xlu0 %5774  ;;  %v10172_v31 = vpop.permute.xlu1 %5798  ;;  %v7532_v39 = vpack.c.bf16 %v5694_v48, %v5692_v44  ;;  %v5754_v14 = vsel %vm1798_vm3, %v5731_v12, %v5740_v2  ;;  %v5758_v48 = vmul.f32 %v5745_v24, %v8367_v42 }
 0xaae   : > { %v5757_v2 = vmul.f32 %v5754_v14, %v8364_v41  ;;  %v5756_v12 = vsel %vm1798_vm3, %v10150_v52, %v10148_v40 }
 0xaaf   : > { %7533 = vmatprep.subr.bf16.mxu1 %v7532_v39  ;;  %v5747_v39 = vsel %vm1798_vm3, %v10148_v40, %v10150_v52  ;;  %v5789_v40 = vsel %vm1821_vm1, %v10152_v50, %v10154_v25 }
 0xab0   : > { %7535 = vmatpush1.bf16.msra.mxu1 %v7534_v59  ;;  %v5762_v37 = vmul.f32 %v5747_v39, %v8367_v42 }
 0xab1   : > { %v10176_v4 = vpop.permute.xlu0 %5800  ;;  %7537 = vmatprep.subr.bf16.mxu1 %v7536_v62  ;;  %v10178_v46 = vpop.permute.xlu1 %5806  ;;  %v5791_v62 = vmul.f32 %v5778_v7, %v8344_v27 }
 0xab4   : > { %7539 = vmatpush1.bf16.msra.mxu1 %v7538_v5 }
 0xab5   : > { %v5700_v29 = vpop.permute.xlu0 %5699  ;;  %v5733_v43 = vpop.permute.xlu1 %5732 }
 0xab6   : > { %v5713_v45 = vsel %vm1775_vm0, %v5709_v17, %v5700_v29  ;;  %v5722_v44 = vsel %vm1775_vm0, %v5700_v29, %v5709_v17  ;;  %v5746_v53 = vsel %vm1798_vm3, %v5742_v63, %v5733_v43  ;;  %v5755_v54 = vsel %vm1798_vm3, %v5733_v43, %v5742_v63 }
 0xab7   : > { %v5726_v22 = vmul.f32 %v5722_v44, %v8328_v20  ;;  %v5727_v55 = vmul.f32 %v5713_v45, %v8331_v21  ;;  %v5760_v6 = vmul.f32 %v5746_v53, %v8367_v42  ;;  %v5759_v28 = vmul.f32 %v5755_v54, %v8364_v41 }
 0xab8   : > { %v5787_v63 = vsel %vm1821_vm1, %v5764_v1, %v5773_v3  ;;  %v7548_v1 = vpack.c.bf16 %v5791_v62, %v5762_v37  ;;  %v5780_v29 = vsel %vm1821_vm1, %v10154_v25, %v10152_v50  ;;  %v5794_v53 = vmul.f32 %v5789_v40, %v8341_v26 }
 0xab9   : > { %v7542_v16 = vpack.c.bf16 %v5728_v30, %v5726_v22  ;;  %v5805_v15 = vpop.permute.xlu0 %5804  ;;  %v10195_v59 = vpop.permute.xlu1 %5831  ;;  %v7540_v17 = vpack.c.bf16 %v5729_v9, %v5727_v55  ;;  %v7544_v8 = vpack.c.bf16 %v5760_v6, %v5758_v48  ;;  %v5790_v30 = vmul.f32 %v5787_v63, %v8341_v26 }
 0xaba   : > { %v7546_v3 = vpack.c.bf16 %v5759_v28, %v5757_v2  ;;  %v5761_v9 = vmul.f32 %v5756_v12, %v8364_v41  ;;  %v5795_v22 = vmul.f32 %v5780_v29, %v8344_v27  ;;  %v5820_v50 = vsel %vm1843_vm4, %v10172_v31, %v10156_v38 }
 0xabb   : > { %7541 = vmatprep.subr.bf16.mxu1 %v7540_v17  ;;  %v5824_v48 = vmul.f32 %v5820_v50, %v8386_v57  ;;  %v5822_v28 = vsel %vm1843_vm4, %v10178_v46, %v5805_v15  ;;  %v5810_v10 = vsel %vm1843_vm4, %v5805_v15, %v10178_v46 }
 0xabc   : > { %7543 = vmatpush1.bf16.msra.mxu1 %v7542_v16  ;;  %v7550_v24 = vpack.c.bf16 %v5790_v30, %v5761_v9  ;;  %v5827_v30 = vmul.f32 %v5810_v10, %v8383_v56 }
 0xabd   : > { %v5830_v58 = vpop.permute.xlu0 %5829  ;;  %7545 = vmatprep.subr.bf16.mxu1 %v7544_v8  ;;  %v10208_v5 = vpop.permute.xlu1 %5839  ;;  %v7560_v34 = vpack.c.bf16 %v5824_v48, %v9733_v51 }
 0xac0   : > { %7547 = vmatpush1.bf16.msra.mxu1 %v7546_v3 }
 0xac1   : > { %v5766_v52 = vpop.permute.xlu0 %5765  ;;  %7549 = vmatprep.subr.bf16.mxu1 %v7548_v1  ;;  %v5865_v43 = vpop.permute.xlu1 %5864 }
 0xac2   : > { %v5779_v45 = vsel %vm1821_vm1, %v5775_v61, %v5766_v52  ;;  %v5788_v44 = vsel %vm1821_vm1, %v5766_v52, %v5775_v61  ;;  %v5808_v61 = vsel %vm1843_vm4, %v10156_v38, %v10172_v31  ;;  %v7558_v38 = vpack.c.bf16 %v10071_v11, %v10053_v23 }
 0xac3   : > { %v5792_v55 = vmul.f32 %v5788_v44, %v8341_v26  ;;  %v5793_v54 = vmul.f32 %v5779_v45, %v8344_v27  ;;  %v5823_v39 = vmul.f32 %v5808_v61, %v8383_v56  ;;  %v5853_v23 = vsel %vm1866_vm7, %v10195_v59, %v5830_v58 }
 0xac4   : > { %7551 = vmatpush1.bf16.msra.mxu1 %v7550_v24  ;;  %v5857_v3 = vmul.f32 %v5853_v23, %v8418_v36 }
 0xac5   : > { %v7554_v25 = vpack.c.bf16 %v5794_v53, %v5792_v55  ;;  %v5834_v6 = vpop.permute.xlu0 %5833  ;;  %v5873_v7 = vpop.permute.xlu1 %5872  ;;  %v7552_v14 = vpack.c.bf16 %v5795_v22, %v5793_v54  ;;  %v7562_v12 = vpack.c.bf16 %v5823_v39, %v9731_v47  ;;  %v5841_v47 = vsel %vm1866_vm7, %v5830_v58, %v10195_v59 }
 0xac6   : > { %v5856_v53 = vmul.f32 %v5841_v47, %v8415_v35 }
 0xac7   : > { %7553 = vmatprep.subr.bf16.mxu1 %v7552_v14 }
 0xac8   : > { %7555 = vmatpush1.bf16.msra.mxu1 %v7554_v25 }
 0xac9   : > { %v5838_v16 = vpop.permute.xlu0 %5837  ;;  %7557 = vmatprep.subr.bf16.mxu1 %v7556_v13  ;;  %v5803_v17 = vpop.permute.xlu1 %5802  ;;  %v5828_v13 = vmul.f32 %v5822_v28, %v8386_v57 }
 0xaca   : > { %v5821_v63 = vsel %vm1843_vm4, %v5803_v17, %v10176_v4  ;;  %v5809_v31 = vsel %vm1843_vm4, %v10176_v4, %v5803_v17  ;;  %v5855_v1 = vsel %vm1866_vm7, %v10208_v5, %v5838_v16  ;;  %v5843_v58 = vsel %vm1866_vm7, %v5838_v16, %v10208_v5 }
 0xacb   : > { %v5826_v62 = vmul.f32 %v5821_v63, %v8386_v57  ;;  %v5825_v11 = vmul.f32 %v5809_v31, %v8383_v56  ;;  %v5861_v59 = vmul.f32 %v5855_v1, %v8418_v36  ;;  %v5860_v5 = vmul.f32 %v5843_v58, %v8415_v35  ;;  %v5928_v1 = vld [vmem:[%s10931_s6] sm:$0xff] }
 0xacc   : > { %7559 = vmatpush1.bf16.msra.mxu1 %v7558_v38 }
 0xacd   : > { %v5863_v8 = vpop.permute.xlu0 %5862  ;;  %7561 = vmatprep.subr.bf16.mxu1 %v7560_v34  ;;  %v5836_v2 = vpop.permute.xlu1 %5835  ;;  %v7564_v15 = vpack.c.bf16 %v5828_v13, %v5826_v62  ;;  %v7566_v40 = vpack.c.bf16 %v5827_v30, %v5825_v11 }
 0xace   : > { %v5854_v4 = vsel %vm1866_vm7, %v5836_v2, %v5834_v6  ;;  %v5886_v51 = vsel %vm1889_vm6, %v5865_v43, %v5863_v8  ;;  %v5842_v37 = vsel %vm1866_vm7, %v5834_v6, %v5836_v2  ;;  %v5874_v52 = vsel %vm1889_vm6, %v5863_v8, %v5865_v43 }
 0xacf   : > { %v5859_v46 = vmul.f32 %v5854_v4, %v8418_v36  ;;  %v5890_v24 = vmul.f32 %v5886_v51, %v8401_v19  ;;  %v5858_v45 = vmul.f32 %v5842_v37, %v8415_v35  ;;  %v5889_v22 = vmul.f32 %v5874_v52, %v8398_v18  ;;  %v5932_v52 = vld [vmem:[%s10931_s6 + $0x20] sm:$0xff] }
 0xad0   : > { %7563 = vmatpush1.bf16.msra.mxu1 %v7562_v12 }
 0xad1   : > { %v5867_v9 = vpop.permute.xlu0 %5866  ;;  %7565 = vmatprep.subr.bf16.mxu1 %v7564_v15  ;;  %v5898_v29 = vpop.permute.xlu1 %5897  ;;  %v7568_v44 = vpack.c.bf16 %v5859_v46, %v5857_v3  ;;  %v7570_v50 = vpack.c.bf16 %v5858_v45, %v5856_v53  ;;  %v7572_v6 = vpack.c.bf16 %v5890_v24, %v5861_v59  ;;  %v7574_v39 = vpack.c.bf16 %v5889_v22, %v5860_v5 }
 0xad4   : > { %7567 = vmatpush1.bf16.msra.mxu1 %v7566_v40  ;;  %v5933_v40 = vld [vmem:[%s10931_s6 + $0x28] sm:$0xff] }
 0xad5   : > { %v5871_v55 = vpop.permute.xlu0 %5870  ;;  %7569 = vmatprep.subr.bf16.mxu1 %v7568_v44  ;;  %v5869_v54 = vpop.permute.xlu1 %5868 }
 0xad6   : > { %v5888_v43 = vsel %vm1889_vm6, %v5873_v7, %v5871_v55  ;;  %v5887_v25 = vsel %vm1889_vm6, %v5869_v54, %v5867_v9  ;;  %v5876_v14 = vsel %vm1889_vm6, %v5871_v55, %v5873_v7  ;;  %v5875_v48 = vsel %vm1889_vm6, %v5867_v9, %v5869_v54  ;;  %v5931_v9 = vld [vmem:[%s10931_s6 + $0x18] sm:$0xff] }
 0xad7   : > { %v5894_v61 = vmul.f32 %v5888_v43, %v8401_v19  ;;  %v5892_v17 = vmul.f32 %v5887_v25, %v8401_v19  ;;  %v5893_v28 = vmul.f32 %v5876_v14, %v8398_v18  ;;  %v5891_v63 = vmul.f32 %v5875_v48, %v8398_v18 }
 0xad8   : > { %7571 = vmatpush1.bf16.msra.mxu1 %v7570_v50 }
 0xad9   : > { %v5896_v16 = vpop.permute.xlu0 %5895  ;;  %7573 = vmatprep.subr.bf16.mxu1 %v7572_v6  ;;  %v5902_v38 = vpop.permute.xlu1 %5901  ;;  %v7576_v31 = vpack.c.bf16 %v5894_v61, %v5892_v17  ;;  %v7578_v10 = vpack.c.bf16 %v5893_v28, %v5891_v63  ;;  %v6322_v63 = vld [vmem:[%s10933_s10 + $0x8] sm:$0xff] }
 0xada   : > { %v5907_v7 = vsel %vm1912_vm8, %v5896_v16, %v5898_v29  ;;  %v5919_v62 = vsel %vm1912_vm8, %v5898_v29, %v5896_v16  ;;  %v5930_v29 = vld [vmem:[%s10931_s6 + $0x10] sm:$0xff]  ;;  %7185 = vmatprep.mubr.msk.f32.mxu0 %vm5952_vm11, %v6322_v63 }
 0xadb   : > { %v5922_v2 = vmul.f32 %v5907_v7, %v8516_v0  ;;  %v5923_v12 = vmul.f32 %v5919_v62, %v8519_v60  ;;  %v6329_v7 = vld [vmem:[%s10934_s1 + $0x10] sm:$0xff] }
 0xadc   : > { %7575 = vmatpush1.bf16.msra.mxu1 %v7574_v39 }
 0xadd   : > { %v5900_v34 = vpop.permute.xlu0 %5899  ;;  %7577 = vmatprep.subr.bf16.mxu1 %v7576_v31  ;;  %v5906_v51 = vpop.permute.xlu1 %5905  ;;  %v6328_v31 = vld [vmem:[%s10934_s1 + $0x8] sm:$0xff] }
 0xade   : > { %v5908_v13 = vsel %vm1912_vm8, %v5900_v34, %v5902_v38  ;;  %v5920_v8 = vsel %vm1912_vm8, %v5902_v38, %v5900_v34  ;;  %v6327_v38 = vld [vmem:[%s10934_s1] sm:$0xff] }
 0xadf   : > { %v5924_v23 = vmul.f32 %v5908_v13, %v8516_v0  ;;  %v5925_v11 = vmul.f32 %v5920_v8, %v8519_v60 }
 0xae0   : > { %7579 = vmatpush1.bf16.msra.mxu1 %v7578_v10 }
 0xae1   : > { %v7582_v4 = vpack.c.bf16 %v5924_v23, %v5922_v2  ;;  %v5904_v37 = vpop.permute.xlu0 %5903  ;;  %v7580_v46 = vpack.c.bf16 %v5925_v11, %v5923_v12 }
 0xae2   : > { %v5921_v15 = vsel %vm1912_vm8, %v5906_v51, %v5904_v37  ;;  %v5909_v30 = vsel %vm1912_vm8, %v5904_v37, %v5906_v51 }
 0xae3   : > { %7581 = vmatprep.subr.bf16.mxu1 %v7580_v46  ;;  %v5927_v47 = vmul.f32 %v5921_v15, %v8519_v60  ;;  %v5926_v3 = vmul.f32 %v5909_v30, %v8516_v0 }
 0xae4   : > { %7583 = vmatpush1.bf16.msra.mxu1 %v7582_v4 }
 0xae5   : > { %6014 = vmatprep.subr.mxu1 %v5927_v47 }
 0xae8   : > { %6015 = vmatpush1.msra.mxu1 %v5926_v3 }
 0xae9   : > { %6027 = vmatmul.mubr.f32.vlgmr.msra.gmra.mrb[20].mxu1 %v5928_v1 }
 0xaea   : > { %7183 = vmatprep.mubr.msk.f32.mxu1 %vm5952_vm11, %v5931_v9 }
 0xaed   : > { %6033 = vmatmul.mubr.f32.gmra.mrb[22].mxu1 %v5930_v29 }
 0xaee   : > { %7184 = vmatprep.mubr.msk.f32.mxu1 %vm5952_vm11, %v5933_v40  ;;  %v5945_v43 = vpop.permute.xlu1 %5944 }
 0xaf1   : > { %6039 = vmatmul.mubr.f32.gmra.mrb[24].mxu1 %v5932_v52 }
 0xaf2   : > { %v5940_v24 = vpop.permute.xlu0 %5939 }
 0xaf6   : > { %v5950_v17 = vpop.permute.xlu0 %5949 }
 0xbbc   : > { %v6028_v45 = vpop.f32.mrb[20].mxu1 }
 0xbbd   : > { %v6029_v44 = vadd.f32 %v6028_v45, %v5940_v24  ;;  %v6030_v53 = vpop.f32.mrb[21].mxu1 }
 0xbbe   : > { %v6031_v55 = vadd.f32 %v6030_v53, %v5940_v24 }
 0xbbf   : > { %v10298_v59 = vmax.f32 %v6029_v44, 0.0 }
 0xbc0   : > { %v6034_v58 = vpop.f32.mrb[22].mxu1  ;;  %v10308_v25 = vmax.f32 %v6031_v55, 0.0 }
 0xbc1   : > { %v6036_v22 = vpop.f32.mrb[23].mxu1  ;;  %6099 = vrot.lane.b32.xlu0 %v10298_v59, %s10900_s2  ;;  %6066 = vrot.lane.b32.xlu1 %v10298_v59, %s10899_s23  ;;  %v6035_v6 = vadd.f32 %v6034_v58, %v5945_v43 }
 0xbc2   : > { %v6037_v61 = vadd.f32 %v6036_v22, %v5945_v43 }
 0xbc3   : > { %v10314_v14 = vmax.f32 %v6035_v6, 0.0 }
 0xbc4   : > { %v6040_v54 = vpop.f32.mrb[24].mxu1  ;;  %v10324_v48 = vmax.f32 %v6037_v61, 0.0 }
 0xbc5   : > { %v6042_v50 = vpop.f32.mrb[25].mxu1  ;;  %6165 = vrot.lane.b32.xlu0 %v10298_v59, %s10904_s3  ;;  %6132 = vrot.lane.b32.xlu1 %v10298_v59, %s10903_s22  ;;  %v6041_v5 = vadd.f32 %v6040_v54, %v5950_v17 }
 0xbc6   : > { %v6043_v39 = vadd.f32 %v6042_v50, %v5950_v17 }
 0xbc7   : > { %v10334_v16 = vmax.f32 %v6041_v5, 0.0 }
 0xbc8   : > { %v10352_v28 = vmax.f32 %v6043_v39, 0.0 }
 0xbc9   : > { %6191 = vrot.lane.b32.xlu0 %v10308_v25, %s10917_s7  ;;  %6189 = vrot.lane.b32.xlu1 %v10298_v59, %s10917_s7 }
 0xbcd   : > { %6054 = vrot.lane.b32.xlu1 %v10308_v25, %s10899_s23  ;;  %6068 = vrot.lane.b32.xlu0 %v10314_v14, %s10899_s23 }
 0xbd1   : > { %6090 = vrot.lane.b32.xlu1 %v10308_v25, %s10900_s2  ;;  %6134 = vrot.lane.b32.xlu0 %v10314_v14, %s10903_s22 }
 0xbd5   : > { %6123 = vrot.lane.b32.xlu1 %v10308_v25, %s10903_s22  ;;  %6056 = vrot.lane.b32.xlu0 %v10324_v48, %s10899_s23 }
 0xbd9   : > { %6156 = vrot.lane.b32.xlu1 %v10308_v25, %s10904_s3  ;;  %6125 = vrot.lane.b32.xlu0 %v10324_v48, %s10903_s22 }
 0xbdd   : > { %6101 = vrot.lane.b32.xlu1 %v10314_v14, %s10900_s2  ;;  %6070 = vrot.lane.b32.xlu0 %v10334_v16, %s10899_s23 }
 0xbe1   : > { %6167 = vrot.lane.b32.xlu1 %v10314_v14, %s10904_s3  ;;  %6103 = vrot.lane.b32.xlu0 %v10334_v16, %s10900_s2 }
 0xbe5   : > { %6092 = vrot.lane.b32.xlu1 %v10324_v48, %s10900_s2  ;;  %6136 = vrot.lane.b32.xlu0 %v10334_v16, %s10903_s22 }
 0xbe9   : > { %6158 = vrot.lane.b32.xlu1 %v10324_v48, %s10904_s3  ;;  %6169 = vrot.lane.b32.xlu0 %v10334_v16, %s10904_s3 }
 0xbed   : > { %6058 = vrot.lane.b32.xlu1 %v10352_v28, %s10899_s23  ;;  %6195 = vrot.lane.b32.xlu0 %v10324_v48, %s10917_s7 }
 0xbf1   : > { %6193 = vrot.lane.b32.xlu1 %v10314_v14, %s10917_s7  ;;  %6094 = vrot.lane.b32.xlu0 %v10352_v28, %s10900_s2 }
 0xbf5   : > { %6197 = vrot.lane.b32.xlu1 %v10334_v16, %s10917_s7  ;;  %6224 = vrot.lane.b32.xlu0 %v10308_v25, %s10907_s5 }
 0xbf9   : > { %6127 = vrot.lane.b32.xlu1 %v10352_v28, %s10903_s22  ;;  %6228 = vrot.lane.b32.xlu0 %v10324_v48, %s10907_s5 }
 0xbfd   : > { %6222 = vrot.lane.b32.xlu1 %v10298_v59, %s10907_s5  ;;  %6160 = vrot.lane.b32.xlu0 %v10352_v28, %s10904_s3 }
 0xc01   : > { %6226 = vrot.lane.b32.xlu1 %v10314_v14, %s10907_s5  ;;  %6257 = vrot.lane.b32.xlu0 %v10308_v25, %s10902_s28 }
 0xc05   : > { %6230 = vrot.lane.b32.xlu1 %v10334_v16, %s10907_s5  ;;  %6261 = vrot.lane.b32.xlu0 %v10324_v48, %s10902_s28 }
 0xc09   : > { %6255 = vrot.lane.b32.xlu1 %v10298_v59, %s10902_s28  ;;  %6199 = vrot.lane.b32.xlu0 %v10352_v28, %s10917_s7 }
 0xc0d   : > { %6259 = vrot.lane.b32.xlu1 %v10314_v14, %s10902_s28  ;;  %6290 = vrot.lane.b32.xlu0 %v10308_v25, %s10898_s26 }
 0xc11   : > { %6263 = vrot.lane.b32.xlu1 %v10334_v16, %s10902_s28  ;;  %6232 = vrot.lane.b32.xlu0 %v10352_v28, %s10907_s5 }
 0xc15   : > { %6288 = vrot.lane.b32.xlu1 %v10298_v59, %s10898_s26  ;;  %6265 = vrot.lane.b32.xlu0 %v10352_v28, %s10902_s28 }
 0xc19   : > { %6292 = vrot.lane.b32.xlu1 %v10314_v14, %s10898_s26  ;;  %6294 = vrot.lane.b32.xlu0 %v10324_v48, %s10898_s26 }
 0xc1d   : > { %6296 = vrot.lane.b32.xlu1 %v10334_v16, %s10898_s26  ;;  %6298 = vrot.lane.b32.xlu0 %v10352_v28, %s10898_s26 }
 0xc21   : > { %6332 = vperm.xlu1 %7765, %v6327_v38   ;;  %6337 = vperm.xlu0 %7764, %v6328_v31  }
 0xc25   : > { %6342 = vperm.xlu1 %7765, %v6329_v7  }
 0xc33   : > { %v6100_v62 = vpop.permute.xlu0 %6099  ;;  %v6067_v34 = vpop.permute.xlu1 %6066 }
 0xc37   : > { %v10411_v10 = vpop.permute.xlu0 %6165  ;;  %v6133_v13 = vpop.permute.xlu1 %6132 }
 0xc3b   : > { %v10413_v8 = vpop.permute.xlu0 %6191  ;;  %v10415_v2 = vpop.permute.xlu1 %6189 }
 0xc3f   : > { %v6069_v12 = vpop.permute.xlu0 %6068  ;;  %v6055_v23 = vpop.permute.xlu1 %6054 }
 0xc40   : > { %v6072_v51 = vsel %vm1752_vm2, %v6067_v34, %v6055_v23  ;;  %v6081_v37 = vsel %vm1752_vm2, %v6055_v23, %v6067_v34 }
 0xc41   : > { %v6084_v3 = vmul.f32 %v6081_v37, %v8350_v32  ;;  %v6085_v1 = vmul.f32 %v6072_v51, %v8353_v33 }
 0xc43   : > { %v6135_v11 = vpop.permute.xlu0 %6134  ;;  %v6091_v4 = vpop.permute.xlu1 %6090 }
 0xc44   : > { %v6114_v6 = vsel %vm1775_vm0, %v6091_v4, %v6100_v62  ;;  %v6105_v61 = vsel %vm1775_vm0, %v6100_v62, %v6091_v4 }
 0xc45   : > { %v6117_v39 = vmul.f32 %v6114_v6, %v8328_v20  ;;  %v6118_v31 = vmul.f32 %v6105_v61, %v8331_v21 }
 0xc47   : > { %v6057_v46 = vpop.permute.xlu0 %6056  ;;  %v6124_v15 = vpop.permute.xlu1 %6123 }
 0xc48   : > { %v6073_v30 = vsel %vm1752_vm2, %v6069_v12, %v6057_v46  ;;  %v6082_v47 = vsel %vm1752_vm2, %v6057_v46, %v6069_v12  ;;  %v6138_v4 = vsel %vm1798_vm3, %v6133_v13, %v6124_v15 }
 0xc49   : > { %v6086_v9 = vmul.f32 %v6082_v47, %v8350_v32  ;;  %v6087_v29 = vmul.f32 %v6073_v30, %v8353_v33 }
 0xc4b   : > { %v7586_v40 = vpack.c.bf16 %v6086_v9, %v6084_v3  ;;  %v6126_v52 = vpop.permute.xlu0 %6125  ;;  %v6157_v24 = vpop.permute.xlu1 %6156  ;;  %v7584_v45 = vpack.c.bf16 %v6087_v29, %v6085_v1 }
 0xc4c   : > { %v6139_v7 = vsel %vm1798_vm3, %v6135_v11, %v6126_v52  ;;  %v6148_v47 = vsel %vm1798_vm3, %v6126_v52, %v6135_v11  ;;  %v6151_v11 = vmul.f32 %v6138_v4, %v8367_v42 }
 0xc4d   : > { %7585 = vmatprep.subr.bf16.mxu0 %v7584_v45  ;;  %v6153_v3 = vmul.f32 %v6139_v7, %v8367_v42  ;;  %v6152_v61 = vmul.f32 %v6148_v47, %v8364_v41 }
 0xc4e   : > { %7587 = vmatpush1.bf16.msra.mxu0 %v7586_v40 }
 0xc4f   : > { %v6071_v44 = vpop.permute.xlu0 %6070  ;;  %v6102_v53 = vpop.permute.xlu1 %6101 }
 0xc53   : > { %v6104_v58 = vpop.permute.xlu0 %6103  ;;  %v6168_v22 = vpop.permute.xlu1 %6167 }
 0xc57   : > { %v6137_v55 = vpop.permute.xlu0 %6136  ;;  %v6093_v54 = vpop.permute.xlu1 %6092 }
 0xc58   : > { %v6106_v23 = vsel %vm1775_vm0, %v6102_v53, %v6093_v54  ;;  %v6115_v62 = vsel %vm1775_vm0, %v6093_v54, %v6102_v53  ;;  %v6147_v53 = vsel %vm1798_vm3, %v6124_v15, %v6133_v13  ;;  %v6180_v13 = vsel %vm1821_vm1, %v6157_v24, %v10411_v10 }
 0xc59   : > { %v6119_v29 = vmul.f32 %v6115_v62, %v8328_v20  ;;  %v6120_v40 = vmul.f32 %v6106_v23, %v8331_v21 }
 0xc5b   : > { %v6170_v50 = vpop.permute.xlu0 %6169  ;;  %v6159_v43 = vpop.permute.xlu1 %6158 }
 0xc5f   : > { %v10427_v17 = vpop.permute.xlu0 %6195  ;;  %v6059_v5 = vpop.permute.xlu1 %6058 }
 0xc60   : > { %v6074_v63 = vsel %vm1752_vm2, %v6071_v44, %v6059_v5  ;;  %v6083_v38 = vsel %vm1752_vm2, %v6059_v5, %v6071_v44  ;;  %v7596_v5 = vpack.c.bf16 %v6153_v3, %v6151_v11 }
 0xc61   : > { %v6088_v34 = vmul.f32 %v6083_v38, %v8350_v32  ;;  %v6089_v12 = vmul.f32 %v6074_v63, %v8353_v33  ;;  %v6171_v63 = vsel %vm1821_vm1, %v10411_v10, %v6157_v24  ;;  %v6181_v10 = vsel %vm1821_vm1, %v6159_v43, %v6168_v22 }
 0xc62   : > { %v6184_v23 = vmul.f32 %v6171_v63, %v8344_v27  ;;  %v7610_v63 = vpack.c.bf16 %v10314_v14, %v10298_v59 }
 0xc63   : > { %v7590_v51 = vpack.c.bf16 %v6117_v39, %v6088_v34  ;;  %v6095_v37 = vpop.permute.xlu0 %6094  ;;  %v10439_v46 = vpop.permute.xlu1 %6193  ;;  %v7588_v30 = vpack.c.bf16 %v6118_v31, %v6089_v12  ;;  %v6150_v39 = vmul.f32 %v6147_v53, %v8364_v41  ;;  %v6183_v12 = vmul.f32 %v6180_v13, %v8341_v26 }
 0xc64   : > { %v6107_v1 = vsel %vm1775_vm0, %v6104_v58, %v6095_v37  ;;  %v6116_v9 = vsel %vm1775_vm0, %v6095_v37, %v6104_v58 }
 0xc65   : > { %v6121_v45 = vmul.f32 %v6116_v9, %v8328_v20  ;;  %v6122_v44 = vmul.f32 %v6107_v1, %v8331_v21  ;;  %7589 = vmatprep.subr.bf16.mxu0 %v7588_v30  ;;  %v7598_v31 = vpack.c.bf16 %v6152_v61, %v6150_v39  ;;  %v6185_v1 = vmul.f32 %v6181_v10, %v8341_v26 }
 0xc66   : > { %7591 = vmatpush1.bf16.msra.mxu0 %v7590_v51  ;;  %v6172_v51 = vsel %vm1821_vm1, %v6168_v22, %v6159_v43  ;;  %v6213_v22 = vsel %vm1843_vm4, %v10413_v8, %v10415_v2  ;;  %v6202_v39 = vsel %vm1843_vm4, %v10439_v46, %v10427_v17 }
 0xc67   : > { %v7594_v52 = vpack.c.bf16 %v6121_v45, %v6119_v29  ;;  %v10451_v54 = vpop.permute.xlu0 %6224  ;;  %v10453_v6 = vpop.permute.xlu1 %6197  ;;  %v7592_v58 = vpack.c.bf16 %v6122_v44, %v6120_v40  ;;  %v6186_v9 = vmul.f32 %v6172_v51, %v8344_v27  ;;  %v6217_v11 = vmul.f32 %v6213_v22, %v8386_v57 }
 0xc68   : > { %v6218_v13 = vmul.f32 %v6202_v39, %v8383_v56 }
 0xc69   : > { %7593 = vmatprep.subr.bf16.mxu0 %v7592_v58 }
 0xc6a   : > { %7595 = vmatpush1.bf16.msra.mxu0 %v7594_v52  ;;  %v7608_v52 = vpack.c.bf16 %v10324_v48, %v10308_v25 }
 0xc6b   : > { %v6229_v15 = vpop.permute.xlu0 %6228  ;;  %7597 = vmatprep.subr.bf16.mxu0 %v7596_v5  ;;  %v6128_v38 = vpop.permute.xlu1 %6127 }
 0xc6c   : > { %v6140_v7 = vsel %vm1798_vm3, %v6137_v55, %v6128_v38  ;;  %v6149_v34 = vsel %vm1798_vm3, %v6128_v38, %v6137_v55 }
 0xc6d   : > { %v6154_v62 = vmul.f32 %v6149_v34, %v8364_v41  ;;  %v6155_v4 = vmul.f32 %v6140_v7, %v8367_v42 }
 0xc6e   : > { %7599 = vmatpush1.bf16.msra.mxu0 %v7598_v31 }
 0xc6f   : > { %v7602_v24 = vpack.c.bf16 %v6183_v12, %v6154_v62  ;;  %v6161_v37 = vpop.permute.xlu0 %6160  ;;  %v6223_v30 = vpop.permute.xlu1 %6222  ;;  %v7600_v47 = vpack.c.bf16 %v6184_v23, %v6155_v4 }
 0xc70   : > { %v6173_v3 = vsel %vm1821_vm1, %v6170_v50, %v6161_v37  ;;  %v6182_v55 = vsel %vm1821_vm1, %v6161_v37, %v6170_v50  ;;  %v6201_v50 = vsel %vm1843_vm4, %v10415_v2, %v10413_v8  ;;  %v6214_v8 = vsel %vm1843_vm4, %v10427_v17, %v10439_v46 }
 0xc71   : > { %v6187_v29 = vmul.f32 %v6182_v55, %v8341_v26  ;;  %v6188_v40 = vmul.f32 %v6173_v3, %v8344_v27  ;;  %7601 = vmatprep.subr.bf16.mxu0 %v7600_v47  ;;  %v6216_v58 = vmul.f32 %v6201_v50, %v8383_v56  ;;  %v7612_v2 = vpack.c.bf16 %v6217_v11, %v10352_v28 }
 0xc72   : > { %7603 = vmatpush1.bf16.msra.mxu0 %v7602_v24  ;;  %v6219_v7 = vmul.f32 %v6214_v8, %v8386_v57  ;;  %v6246_v59 = vsel %vm1866_vm7, %v10451_v54, %v6223_v30  ;;  %v6234_v12 = vsel %vm1866_vm7, %v6223_v30, %v10451_v54 }
 0xc73   : > { %v7606_v43 = vpack.c.bf16 %v6187_v29, %v6185_v1  ;;  %v6258_v45 = vpop.permute.xlu0 %6257  ;;  %v6227_v44 = vpop.permute.xlu1 %6226  ;;  %v7604_v53 = vpack.c.bf16 %v6188_v40, %v6186_v9  ;;  %v7614_v48 = vpack.c.bf16 %v6216_v58, %v10334_v16  ;;  %v6250_v23 = vmul.f32 %v6246_v59, %v8418_v36 }
 0xc74   : > { %v6247_v25 = vsel %vm1866_vm7, %v6229_v15, %v6227_v44  ;;  %v6235_v17 = vsel %vm1866_vm7, %v6227_v44, %v6229_v15  ;;  %v6249_v24 = vmul.f32 %v6234_v12, %v8415_v35 }
 0xc75   : > { %7605 = vmatprep.subr.bf16.mxu0 %v7604_v53  ;;  %v6252_v16 = vmul.f32 %v6247_v25, %v8418_v36 }
 0xc76   : > { %7607 = vmatpush1.bf16.msra.mxu0 %v7606_v43 }
 0xc77   : > { %v6262_v61 = vpop.permute.xlu0 %6261  ;;  %7609 = vmatprep.subr.bf16.mxu0 %v7608_v52  ;;  %v6231_v5 = vpop.permute.xlu1 %6230  ;;  %v7620_v15 = vpack.c.bf16 %v6252_v16, %v6250_v23 }
 0xc7a   : > { %7611 = vmatpush1.bf16.msra.mxu0 %v7610_v63 }
 0xc7b   : > { %v6200_v38 = vpop.permute.xlu0 %6199  ;;  %7613 = vmatprep.subr.bf16.mxu0 %v7612_v2  ;;  %v6256_v31 = vpop.permute.xlu1 %6255 }
 0xc7c   : > { %v6203_v14 = vsel %vm1843_vm4, %v10453_v6, %v6200_v38  ;;  %v6215_v28 = vsel %vm1843_vm4, %v6200_v38, %v10453_v6  ;;  %v6251_v6 = vmul.f32 %v6235_v17, %v8415_v35  ;;  %v6267_v37 = vsel %vm1889_vm6, %v6256_v31, %v6258_v45 }
 0xc7d   : > { %v6220_v46 = vmul.f32 %v6203_v14, %v8383_v56  ;;  %v6221_v34 = vmul.f32 %v6215_v28, %v8386_v57  ;;  %v6279_v47 = vsel %vm1889_vm6, %v6258_v45, %v6256_v31  ;;  %v6282_v9 = vmul.f32 %v6267_v37, %v8398_v18  ;;  %v6325_v37 = vld [vmem:[%s10933_s10 + $0x20] sm:$0xff] }
 0xc7e   : > { %7615 = vmatpush1.bf16.msra.mxu0 %v7614_v48  ;;  %v7622_v30 = vpack.c.bf16 %v6251_v6, %v6249_v24  ;;  %v6283_v29 = vmul.f32 %v6279_v47, %v8401_v19  ;;  %v6324_v6 = vld [vmem:[%s10933_s10 + $0x18] sm:$0xff]  ;;  %v6326_v24 = vld [vmem:[%s10933_s10 + $0x28] sm:$0xff] }
 0xc7f   : > { %v7618_v62 = vpack.c.bf16 %v6220_v46, %v6218_v13  ;;  %v6291_v4 = vpop.permute.xlu0 %6290  ;;  %v6260_v51 = vpop.permute.xlu1 %6259  ;;  %v7616_v10 = vpack.c.bf16 %v6221_v34, %v6219_v7 }
 0xc80   : > { %v6268_v43 = vsel %vm1889_vm6, %v6260_v51, %v6262_v61  ;;  %v6280_v45 = vsel %vm1889_vm6, %v6262_v61, %v6260_v51 }
 0xc81   : > { %7617 = vmatprep.subr.bf16.mxu0 %v7616_v10  ;;  %v6285_v39 = vmul.f32 %v6280_v45, %v8401_v19  ;;  %v6321_v10 = vld [vmem:[%s10933_s10] sm:$0xff] }
 0xc82   : > { %7619 = vmatpush1.bf16.msra.mxu0 %v7618_v62 }
 0xc83   : > { %v6233_v3 = vpop.permute.xlu0 %6232  ;;  %7621 = vmatprep.subr.bf16.mxu0 %v7620_v15  ;;  %v6264_v54 = vpop.permute.xlu1 %6263  ;;  %v6323_v15 = vld [vmem:[%s10933_s10 + $0x10] sm:$0xff] }
 0xc84   : > { %v6236_v55 = vsel %vm1866_vm7, %v6231_v5, %v6233_v3  ;;  %v6248_v1 = vsel %vm1866_vm7, %v6233_v3, %v6231_v5  ;;  %v6284_v5 = vmul.f32 %v6268_v43, %v8398_v18 }
 0xc85   : > { %v6253_v40 = vmul.f32 %v6236_v55, %v8415_v35  ;;  %v6254_v22 = vmul.f32 %v6248_v1, %v8418_v36 }
 0xc86   : > { %7623 = vmatpush1.bf16.msra.mxu0 %v7622_v30 }
 0xc87   : > { %v7626_v44 = vpack.c.bf16 %v6282_v9, %v6253_v40  ;;  %v6266_v53 = vpop.permute.xlu0 %6265  ;;  %v6289_v50 = vpop.permute.xlu1 %6288  ;;  %v7624_v11 = vpack.c.bf16 %v6283_v29, %v6254_v22 }
 0xc88   : > { %v6269_v52 = vsel %vm1889_vm6, %v6264_v54, %v6266_v53  ;;  %v6281_v58 = vsel %vm1889_vm6, %v6266_v53, %v6264_v54  ;;  %v6300_v61 = vsel %vm1912_vm8, %v6289_v50, %v6291_v4  ;;  %v6312_v2 = vsel %vm1912_vm8, %v6291_v4, %v6289_v50 }
 0xc89   : > { %v6286_v63 = vmul.f32 %v6269_v52, %v8398_v18  ;;  %v6287_v8 = vmul.f32 %v6281_v58, %v8401_v19  ;;  %7625 = vmatprep.subr.bf16.mxu0 %v7624_v11  ;;  %v6315_v59 = vmul.f32 %v6300_v61, %v8516_v0  ;;  %v6316_v14 = vmul.f32 %v6312_v2, %v8519_v60  ;;  %v6720_v61 = vld [vmem:[%s8132_s12 + $0x8] sm:$0xff]  ;;  %v6721_v2 = vld [vmem:[%s8132_s12 + $0x10] sm:$0xff] }
 0xc8a   : > { %7627 = vmatpush1.bf16.msra.mxu0 %v7626_v44 }
 0xc8b   : > { %v7630_v25 = vpack.c.bf16 %v6286_v63, %v6284_v5  ;;  %v6295_v48 = vpop.permute.xlu0 %6294  ;;  %v6293_v13 = vpop.permute.xlu1 %6292  ;;  %v7628_v38 = vpack.c.bf16 %v6287_v8, %v6285_v39  ;;  %v6719_v8 = vld [vmem:[%s8132_s12] sm:$0xff] }
 0xc8c   : > { %v6301_v31 = vsel %vm1912_vm8, %v6293_v13, %v6295_v48  ;;  %v6313_v7 = vsel %vm1912_vm8, %v6295_v48, %v6293_v13 }
 0xc8d   : > { %v6317_v28 = vmul.f32 %v6301_v31, %v8516_v0  ;;  %v6318_v17 = vmul.f32 %v6313_v7, %v8519_v60  ;;  %7629 = vmatprep.subr.bf16.mxu0 %v7628_v38 }
 0xc8e   : > { %7631 = vmatpush1.bf16.msra.mxu0 %v7630_v25  ;;  %v6836_v25 = vld [vmem:[%s8142_s30] sm:$0xf] }
 0xc8f   : > { %v7634_v16 = vpack.c.bf16 %v6317_v28, %v6315_v59  ;;  %v6299_v46 = vpop.permute.xlu0 %6298  ;;  %v6297_v34 = vpop.permute.xlu1 %6296  ;;  %v7632_v12 = vpack.c.bf16 %v6318_v17, %v6316_v14 }
 0xc90   : > { %v6314_v23 = vsel %vm1912_vm8, %v6299_v46, %v6297_v34  ;;  %v6302_v62 = vsel %vm1912_vm8, %v6297_v34, %v6299_v46 }
 0xc91   : > { %v6320_v4 = vmul.f32 %v6314_v23, %v8519_v60  ;;  %7633 = vmatprep.subr.bf16.mxu0 %v7632_v12  ;;  %v6319_v51 = vmul.f32 %v6302_v62, %v8516_v0 }
 0xc92   : > { %7635 = vmatpush1.bf16.msra.mxu0 %v7634_v16 }
 0xc93   : > { %6406 = vmatprep.subr.mxu0 %v6320_v4 }
 0xc96   : > { %6407 = vmatpush1.msra.mxu0 %v6319_v51 }
 0xc97   : > { %6419 = vmatmul.mubr.f32.vlgmr.msra.gmra.mrb[22].mxu0 %v6321_v10 }
 0xc98   : > { %7186 = vmatprep.mubr.msk.f32.mxu0 %vm5952_vm11, %v6324_v6 }
 0xc9b   : > { %6425 = vmatmul.mubr.f32.gmra.mrb[24].mxu0 %v6323_v15 }
 0xc9c   : > { %7187 = vmatprep.mubr.msk.f32.mxu0 %vm5952_vm11, %v6326_v24 }
 0xc9f   : > { %6431 = vmatmul.mubr.f32.gmra.mrb[26].mxu0 %v6325_v37 }
 0xca0   : > { %6910 = vmatprep.mubr.f32.mxu0 %v10897_v49  ;;  %v6333_v47 = vpop.permute.xlu1 %6332  ;;  %v6338_v49 = vpop.permute.xlu0 %6337 }
 0xca4   : > { %v6343_v11 = vpop.permute.xlu1 %6342 }
 0xd6a   : > { %v6420_v3 = vpop.f32.mrb[22].mxu0 }
 0xd6b   : > { %v6421_v54 = vadd.f32 %v6420_v3, %v6333_v47  ;;  %v6422_v30 = vpop.f32.mrb[23].mxu0 }
 0xd6c   : > { %v6423_v29 = vadd.f32 %v6422_v30, %v6333_v47 }
 0xd6d   : > { %v10549_v55 = vmax.f32 %v6421_v54, 0.0 }
 0xd6e   : > { %v6426_v1 = vpop.f32.mrb[24].mxu0  ;;  %v10559_v43 = vmax.f32 %v6423_v29, 0.0 }
 0xd6f   : > { %v6428_v9 = vpop.f32.mrb[25].mxu0  ;;  %6491 = vrot.lane.b32.xlu1 %v10549_v55, %s10900_s2  ;;  %6458 = vrot.lane.b32.xlu0 %v10549_v55, %s10899_s23  ;;  %v6427_v45 = vadd.f32 %v6426_v1, %v6338_v49 }
 0xd70   : > { %v6429_v53 = vadd.f32 %v6428_v9, %v6338_v49 }
 0xd71   : > { %v10565_v44 = vmax.f32 %v6427_v45, 0.0 }
 0xd72   : > { %v6432_v40 = vpop.f32.mrb[26].mxu0  ;;  %v10575_v50 = vmax.f32 %v6429_v53, 0.0 }
 0xd73   : > { %v6434_v22 = vpop.f32.mrb[27].mxu0  ;;  %6557 = vrot.lane.b32.xlu1 %v10549_v55, %s10904_s3  ;;  %6524 = vrot.lane.b32.xlu0 %v10549_v55, %s10903_s22  ;;  %v6433_v52 = vadd.f32 %v6432_v40, %v6343_v11 }
 0xd74   : > { %v6435_v5 = vadd.f32 %v6434_v22, %v6343_v11 }
 0xd75   : > { %v10585_v58 = vmax.f32 %v6433_v52, 0.0 }
 0xd76   : > { %v10603_v39 = vmax.f32 %v6435_v5, 0.0 }
 0xd77   : > { %6583 = vrot.lane.b32.xlu1 %v10559_v43, %s10917_s7  ;;  %6581 = vrot.lane.b32.xlu0 %v10549_v55, %s10917_s7 }
 0xd7b   : > { %6460 = vrot.lane.b32.xlu1 %v10565_v44, %s10899_s23  ;;  %6446 = vrot.lane.b32.xlu0 %v10559_v43, %s10899_s23 }
 0xd7f   : > { %6526 = vrot.lane.b32.xlu1 %v10565_v44, %s10903_s22  ;;  %6482 = vrot.lane.b32.xlu0 %v10559_v43, %s10900_s2 }
 0xd83   : > { %6448 = vrot.lane.b32.xlu1 %v10575_v50, %s10899_s23  ;;  %6515 = vrot.lane.b32.xlu0 %v10559_v43, %s10903_s22 }
 0xd87   : > { %6517 = vrot.lane.b32.xlu1 %v10575_v50, %s10903_s22  ;;  %6548 = vrot.lane.b32.xlu0 %v10559_v43, %s10904_s3 }
 0xd8b   : > { %6493 = vrot.lane.b32.xlu0 %v10565_v44, %s10900_s2  ;;  %6462 = vrot.lane.b32.xlu1 %v10585_v58, %s10899_s23 }
 0xd8f   : > { %6559 = vrot.lane.b32.xlu0 %v10565_v44, %s10904_s3  ;;  %6495 = vrot.lane.b32.xlu1 %v10585_v58, %s10900_s2 }
 0xd93   : > { %6484 = vrot.lane.b32.xlu0 %v10575_v50, %s10900_s2  ;;  %6528 = vrot.lane.b32.xlu1 %v10585_v58, %s10903_s22 }
 0xd97   : > { %6550 = vrot.lane.b32.xlu0 %v10575_v50, %s10904_s3  ;;  %6561 = vrot.lane.b32.xlu1 %v10585_v58, %s10904_s3 }
 0xd9b   : > { %6450 = vrot.lane.b32.xlu0 %v10603_v39, %s10899_s23  ;;  %6587 = vrot.lane.b32.xlu1 %v10575_v50, %s10917_s7  ;;  %s10935_s23 = sld [smem:[#allocation43_spill]] }
 0xd9f   : > { %6585 = vrot.lane.b32.xlu0 %v10565_v44, %s10917_s7  ;;  %6486 = vrot.lane.b32.xlu1 %v10603_v39, %s10900_s2 }
 0xda1   : > { %v6714_v63 = vld [vmem:[%s10935_s23 + $0x8] sm:$0xff] }
 0xda2   : > { %7188 = vmatprep.mubr.msk.f32.mxu1 %vm5952_vm11, %v6714_v63 }
 0xda3   : > { %6589 = vrot.lane.b32.xlu0 %v10585_v58, %s10917_s7  ;;  %6616 = vrot.lane.b32.xlu1 %v10559_v43, %s10907_s5 }
 0xda7   : > { %6519 = vrot.lane.b32.xlu0 %v10603_v39, %s10903_s22  ;;  %6620 = vrot.lane.b32.xlu1 %v10575_v50, %s10907_s5 }
 0xdab   : > { %6614 = vrot.lane.b32.xlu0 %v10549_v55, %s10907_s5  ;;  %6552 = vrot.lane.b32.xlu1 %v10603_v39, %s10904_s3 }
 0xdaf   : > { %6618 = vrot.lane.b32.xlu0 %v10565_v44, %s10907_s5  ;;  %6649 = vrot.lane.b32.xlu1 %v10559_v43, %s10902_s28 }
 0xdb3   : > { %6622 = vrot.lane.b32.xlu0 %v10585_v58, %s10907_s5  ;;  %6653 = vrot.lane.b32.xlu1 %v10575_v50, %s10902_s28 }
 0xdb7   : > { %6647 = vrot.lane.b32.xlu0 %v10549_v55, %s10902_s28  ;;  %6591 = vrot.lane.b32.xlu1 %v10603_v39, %s10917_s7 }
 0xdbb   : > { %6651 = vrot.lane.b32.xlu0 %v10565_v44, %s10902_s28  ;;  %6682 = vrot.lane.b32.xlu1 %v10559_v43, %s10898_s26 }
 0xdbf   : > { %6655 = vrot.lane.b32.xlu0 %v10585_v58, %s10902_s28  ;;  %6624 = vrot.lane.b32.xlu1 %v10603_v39, %s10907_s5  ;;  %s1722_s5 = scalar_lea.vmem %s8147_s24, %s8157_s0 }
 0xdc3   : > { %6680 = vrot.lane.b32.xlu0 %v10549_v55, %s10898_s26  ;;  %6657 = vrot.lane.b32.xlu1 %v10603_v39, %s10902_s28 }
 0xdc7   : > { %6684 = vrot.lane.b32.xlu0 %v10565_v44, %s10898_s26  ;;  %6686 = vrot.lane.b32.xlu1 %v10575_v50, %s10898_s26 }
 0xdcb   : > { %6688 = vrot.lane.b32.xlu0 %v10585_v58, %s10898_s26  ;;  %6690 = vrot.lane.b32.xlu1 %v10603_v39, %s10898_s26 }
 0xdcf   : > { %6724 = vperm.xlu0 %7764, %v6719_v8   ;;  %6729 = vperm.xlu1 %7765, %v6720_v61  }
 0xdd3   : > { %6734 = vperm.xlu0 %7764, %v6721_v2   ;;  %6839 = vperm.xlu1 %7765, %v6836_v25  }
 0xde1   : > { %v6459_v48 = vpop.permute.xlu0 %6458  ;;  %v6492_v13 = vpop.permute.xlu1 %6491 }
 0xde5   : > { %v6525_v38 = vpop.permute.xlu0 %6524  ;;  %v10663_v31 = vpop.permute.xlu1 %6557 }
 0xde9   : > { %v10665_v7 = vpop.permute.xlu0 %6581  ;;  %v10667_v59 = vpop.permute.xlu1 %6583 }
 0xded   : > { %v6447_v14 = vpop.permute.xlu0 %6446  ;;  %v6461_v28 = vpop.permute.xlu1 %6460 }
 0xdee   : > { %v6464_v46 = vsel %vm1752_vm2, %v6459_v48, %v6447_v14  ;;  %v6473_v34 = vsel %vm1752_vm2, %v6447_v14, %v6459_v48 }
 0xdef   : > { %v6476_v51 = vmul.f32 %v6473_v34, %v8350_v32  ;;  %v6477_v10 = vmul.f32 %v6464_v46, %v8353_v33 }
 0xdf1   : > { %v6483_v17 = vpop.permute.xlu0 %6482  ;;  %v6527_v16 = vpop.permute.xlu1 %6526 }
 0xdf2   : > { %v6506_v45 = vsel %vm1775_vm0, %v6483_v17, %v6492_v13  ;;  %v6497_v53 = vsel %vm1775_vm0, %v6492_v13, %v6483_v17 }
 0xdf3   : > { %v6509_v5 = vmul.f32 %v6506_v45, %v8328_v20  ;;  %v6510_v61 = vmul.f32 %v6497_v53, %v8331_v21 }
 0xdf5   : > { %v6516_v12 = vpop.permute.xlu0 %6515  ;;  %v6449_v23 = vpop.permute.xlu1 %6448 }
 0xdf6   : > { %v6465_v62 = vsel %vm1752_vm2, %v6461_v28, %v6449_v23  ;;  %v6474_v4 = vsel %vm1752_vm2, %v6449_v23, %v6461_v28  ;;  %v6530_v28 = vsel %vm1798_vm3, %v6525_v38, %v6516_v12 }
 0xdf7   : > { %v6478_v6 = vmul.f32 %v6474_v4, %v8350_v32  ;;  %v6479_v15 = vmul.f32 %v6465_v62, %v8353_v33 }
 0xdf9   : > { %v7638_v24 = vpack.c.bf16 %v6478_v6, %v6476_v51  ;;  %v6549_v37 = vpop.permute.xlu0 %6548  ;;  %v6518_v47 = vpop.permute.xlu1 %6517  ;;  %v7636_v3 = vpack.c.bf16 %v6479_v15, %v6477_v10 }
 0xdfa   : > { %v6531_v2 = vsel %vm1798_vm3, %v6527_v16, %v6518_v47  ;;  %v6540_v62 = vsel %vm1798_vm3, %v6518_v47, %v6527_v16  ;;  %v6543_v16 = vmul.f32 %v6530_v28, %v8367_v42 }
 0xdfb   : > { %7637 = vmatprep.subr.bf16.mxu1 %v7636_v3  ;;  %v6545_v4 = vmul.f32 %v6531_v2, %v8367_v42 }
 0xdfc   : > { %7639 = vmatpush1.bf16.msra.mxu1 %v7638_v24  ;;  %v6539_v24 = vsel %vm1798_vm3, %v6516_v12, %v6525_v38  ;;  %v6572_v38 = vsel %vm1821_vm1, %v6549_v37, %v10663_v31 }
 0xdfd   : > { %v6494_v54 = vpop.permute.xlu0 %6493  ;;  %v6463_v30 = vpop.permute.xlu1 %6462 }
 0xe01   : > { %v6560_v1 = vpop.permute.xlu0 %6559  ;;  %v6496_v9 = vpop.permute.xlu1 %6495 }
 0xe05   : > { %v6485_v29 = vpop.permute.xlu0 %6484  ;;  %v6529_v40 = vpop.permute.xlu1 %6528 }
 0xe06   : > { %v6498_v14 = vsel %vm1775_vm0, %v6494_v54, %v6485_v29  ;;  %v6507_v13 = vsel %vm1775_vm0, %v6485_v29, %v6494_v54  ;;  %v7648_v29 = vpack.c.bf16 %v6545_v4, %v6543_v16 }
 0xe07   : > { %v6512_v10 = vmul.f32 %v6498_v14, %v8331_v21 }
 0xe09   : > { %v6551_v22 = vpop.permute.xlu0 %6550  ;;  %v6562_v49 = vpop.permute.xlu1 %6561 }
 0xe0d   : > { %v6451_v11 = vpop.permute.xlu0 %6450  ;;  %v10679_v52 = vpop.permute.xlu1 %6587 }
 0xe0e   : > { %v6466_v63 = vsel %vm1752_vm2, %v6463_v30, %v6451_v11  ;;  %v6475_v8 = vsel %vm1752_vm2, %v6451_v11, %v6463_v30 }
 0xe0f   : > { %v6480_v25 = vmul.f32 %v6475_v8, %v8350_v32  ;;  %v6481_v48 = vmul.f32 %v6466_v63, %v8353_v33  ;;  %v6511_v33 = vmul.f32 %v6507_v13, %v8328_v20  ;;  %v6575_v63 = vmul.f32 %v6572_v38, %v8341_v26 }
 0xe11   : > { %v7642_v17 = vpack.c.bf16 %v6509_v5, %v6480_v25  ;;  %v10691_v46 = vpop.permute.xlu0 %6585  ;;  %v6487_v34 = vpop.permute.xlu1 %6486  ;;  %v7640_v23 = vpack.c.bf16 %v6510_v61, %v6481_v48  ;;  %v6564_v25 = vsel %vm1821_vm1, %v6560_v1, %v6551_v22 }
 0xe12   : > { %v6499_v51 = vsel %vm1775_vm0, %v6496_v9, %v6487_v34  ;;  %v6508_v32 = vsel %vm1775_vm0, %v6487_v34, %v6496_v9  ;;  %v6544_v9 = vmul.f32 %v6540_v62, %v8364_v41  ;;  %v6578_v34 = vmul.f32 %v6564_v25, %v8344_v27 }
 0xe13   : > { %v6513_v6 = vmul.f32 %v6508_v32, %v8328_v20  ;;  %v6514_v15 = vmul.f32 %v6499_v51, %v8331_v21  ;;  %7641 = vmatprep.subr.bf16.mxu1 %v7640_v23  ;;  %v6542_v20 = vmul.f32 %v6539_v24, %v8364_v41  ;;  %v6563_v21 = vsel %vm1821_vm1, %v10663_v31, %v6549_v37 }
 0xe14   : > { %7643 = vmatpush1.bf16.msra.mxu1 %v7642_v17  ;;  %v6576_v8 = vmul.f32 %v6563_v21, %v8344_v27  ;;  %v6573_v31 = vsel %vm1821_vm1, %v6551_v22, %v6560_v1  ;;  %v6605_v1 = vsel %vm1843_vm4, %v10667_v59, %v10665_v7 }
 0xe15   : > { %v7646_v47 = vpack.c.bf16 %v6513_v6, %v6511_v33  ;;  %v10703_v3 = vpop.permute.xlu0 %6589  ;;  %v10705_v54 = vpop.permute.xlu1 %6616  ;;  %v7644_v30 = vpack.c.bf16 %v6514_v15, %v6512_v10  ;;  %v7650_v53 = vpack.c.bf16 %v6544_v9, %v6542_v20  ;;  %v6577_v17 = vmul.f32 %v6573_v31, %v8341_v26 }
 0xe16   : > { %v6609_v51 = vmul.f32 %v6605_v1, %v8386_v57  ;;  %v6594_v10 = vsel %vm1843_vm4, %v10691_v46, %v10679_v52  ;;  %v7662_v6 = vpack.c.bf16 %v10565_v44, %v10549_v55 }
 0xe17   : > { %7645 = vmatprep.subr.bf16.mxu1 %v7644_v30  ;;  %v6610_v15 = vmul.f32 %v6594_v10, %v8383_v56 }
 0xe18   : > { %7647 = vmatpush1.bf16.msra.mxu1 %v7646_v47 }
 0xe19   : > { %v6520_v12 = vpop.permute.xlu0 %6519  ;;  %7649 = vmatprep.subr.bf16.mxu1 %v7648_v29  ;;  %v6621_v45 = vpop.permute.xlu1 %6620 }
 0xe1a   : > { %v6532_v11 = vsel %vm1798_vm3, %v6529_v40, %v6520_v12  ;;  %v6541_v5 = vsel %vm1798_vm3, %v6520_v12, %v6529_v40 }
 0xe1b   : > { %v6546_v61 = vmul.f32 %v6541_v5, %v8364_v41  ;;  %v6547_v2 = vmul.f32 %v6532_v11, %v8367_v42 }
 0xe1c   : > { %7651 = vmatpush1.bf16.msra.mxu1 %v7650_v53 }
 0xe1d   : > { %v7654_v37 = vpack.c.bf16 %v6575_v63, %v6546_v61  ;;  %v6615_v48 = vpop.permute.xlu0 %6614  ;;  %v6553_v14 = vpop.permute.xlu1 %6552  ;;  %v7652_v13 = vpack.c.bf16 %v6576_v8, %v6547_v2 }
 0xe1e   : > { %v6565_v28 = vsel %vm1821_vm1, %v6562_v49, %v6553_v14  ;;  %v6574_v40 = vsel %vm1821_vm1, %v6553_v14, %v6562_v49  ;;  %v6593_v49 = vsel %vm1843_vm4, %v10665_v7, %v10667_v59  ;;  %v6606_v7 = vsel %vm1843_vm4, %v10679_v52, %v10691_v46 }
 0xe1f   : > { %v6579_v41 = vmul.f32 %v6574_v40, %v8341_v26  ;;  %v6580_v42 = vmul.f32 %v6565_v28, %v8344_v27  ;;  %7653 = vmatprep.subr.bf16.mxu1 %v7652_v13  ;;  %v7660_v26 = vpack.c.bf16 %v10575_v50, %v10559_v43  ;;  %v6608_v27 = vmul.f32 %v6593_v49, %v8383_v56 }
 0xe20   : > { %7655 = vmatpush1.bf16.msra.mxu1 %v7654_v37  ;;  %v7664_v59 = vpack.c.bf16 %v6609_v51, %v10603_v39  ;;  %v6611_v47 = vmul.f32 %v6606_v7, %v8386_v57  ;;  %v6638_v55 = vsel %vm1866_vm7, %v10705_v54, %v6615_v48  ;;  %v6626_v9 = vsel %vm1866_vm7, %v6615_v48, %v10705_v54 }
 0xe21   : > { %v7658_v22 = vpack.c.bf16 %v6579_v41, %v6577_v17  ;;  %v6619_v23 = vpop.permute.xlu0 %6618  ;;  %v6650_v62 = vpop.permute.xlu1 %6649  ;;  %v7656_v4 = vpack.c.bf16 %v6580_v42, %v6578_v34  ;;  %v7666_v50 = vpack.c.bf16 %v6608_v27, %v10585_v58  ;;  %v6642_v29 = vmul.f32 %v6638_v55, %v8418_v36  ;;  %v6718_v55 = vld [vmem:[%s10935_s23 + $0x28] sm:$0xff] }
 0xe22   : > { %v6639_v43 = vsel %vm1866_vm7, %v6621_v45, %v6619_v23  ;;  %v6627_v52 = vsel %vm1866_vm7, %v6619_v23, %v6621_v45  ;;  %v6641_v53 = vmul.f32 %v6626_v9, %v8415_v35 }
 0xe23   : > { %7657 = vmatprep.subr.bf16.mxu1 %v7656_v4  ;;  %v6644_v58 = vmul.f32 %v6639_v43, %v8418_v36 }
 0xe24   : > { %7659 = vmatpush1.bf16.msra.mxu1 %v7658_v22 }
 0xe25   : > { %v6623_v32 = vpop.permute.xlu0 %6622  ;;  %7661 = vmatprep.subr.bf16.mxu1 %v7660_v26  ;;  %v6654_v33 = vpop.permute.xlu1 %6653  ;;  %v7672_v45 = vpack.c.bf16 %v6644_v58, %v6642_v29 }
 0xe28   : > { %7663 = vmatpush1.bf16.msra.mxu1 %v7662_v6 }
 0xe29   : > { %v6648_v24 = vpop.permute.xlu0 %6647  ;;  %7665 = vmatprep.subr.bf16.mxu1 %v7664_v59  ;;  %v6592_v16 = vpop.permute.xlu1 %6591 }
 0xe2a   : > { %v6595_v44 = vsel %vm1843_vm4, %v10703_v3, %v6592_v16  ;;  %v6607_v39 = vsel %vm1843_vm4, %v6592_v16, %v10703_v3  ;;  %v6643_v3 = vmul.f32 %v6627_v52, %v8415_v35  ;;  %v6716_v16 = vld [vmem:[%s10935_s23 + $0x18] sm:$0xff] }
 0xe2b   : > { %v6612_v46 = vmul.f32 %v6595_v44, %v8383_v56  ;;  %v6613_v30 = vmul.f32 %v6607_v39, %v8386_v57  ;;  %v6659_v56 = vsel %vm1889_vm6, %v6648_v24, %v6650_v62  ;;  %v6671_v57 = vsel %vm1889_vm6, %v6650_v62, %v6648_v24  ;;  %v6713_v24 = vld [vmem:[%s10935_s23] sm:$0xff] }
 0xe2c   : > { %7667 = vmatpush1.bf16.msra.mxu1 %v7666_v50  ;;  %v7674_v5 = vpack.c.bf16 %v6643_v3, %v6641_v53  ;;  %v6674_v61 = vmul.f32 %v6659_v56, %v8398_v18  ;;  %v6675_v2 = vmul.f32 %v6671_v57, %v8401_v19  ;;  %v6717_v44 = vld [vmem:[%s10935_s23 + $0x20] sm:$0xff] }
 0xe2d   : > { %v7670_v20 = vpack.c.bf16 %v6612_v46, %v6610_v15  ;;  %v6652_v21 = vpop.permute.xlu0 %6651  ;;  %v6683_v38 = vpop.permute.xlu1 %6682  ;;  %v7668_v12 = vpack.c.bf16 %v6613_v30, %v6611_v47  ;;  %v6715_v47 = vld [vmem:[%s10935_s23 + $0x10] sm:$0xff] }
 0xe2e   : > { %v6660_v37 = vsel %vm1889_vm6, %v6652_v21, %v6654_v33  ;;  %v6672_v48 = vsel %vm1889_vm6, %v6654_v33, %v6652_v21 }
 0xe2f   : > { %7669 = vmatprep.subr.bf16.mxu1 %v7668_v12  ;;  %v6676_v41 = vmul.f32 %v6660_v37, %v8398_v18  ;;  %v6677_v42 = vmul.f32 %v6672_v48, %v8401_v19 }
 0xe30   : > { %7671 = vmatpush1.bf16.msra.mxu1 %v7670_v20 }
 0xe31   : > { %v6656_v11 = vpop.permute.xlu0 %6655  ;;  %7673 = vmatprep.subr.bf16.mxu1 %v7672_v45  ;;  %v6625_v54 = vpop.permute.xlu1 %6624 }
 0xe32   : > { %v6628_v63 = vsel %vm1866_vm7, %v6623_v32, %v6625_v54  ;;  %v6640_v8 = vsel %vm1866_vm7, %v6625_v54, %v6623_v32 }
 0xe33   : > { %v6645_v25 = vmul.f32 %v6628_v63, %v8415_v35  ;;  %v6646_v31 = vmul.f32 %v6640_v8, %v8418_v36 }
 0xe34   : > { %7675 = vmatpush1.bf16.msra.mxu1 %v7674_v5 }
 0xe35   : > { %v7678_v14 = vpack.c.bf16 %v6674_v61, %v6645_v25  ;;  %v6681_v13 = vpop.permute.xlu0 %6680  ;;  %v6658_v28 = vpop.permute.xlu1 %6657  ;;  %v7676_v40 = vpack.c.bf16 %v6675_v2, %v6646_v31  ;;  %v6835_v61 = vld [vmem:[%s8137_s14] sm:$0xf] }
 0xe36   : > { %v6661_v17 = vsel %vm1889_vm6, %v6656_v11, %v6658_v28  ;;  %v6673_v34 = vsel %vm1889_vm6, %v6658_v28, %v6656_v11  ;;  %v6692_v1 = vsel %vm1912_vm8, %v6681_v13, %v6683_v38  ;;  %v6704_v22 = vsel %vm1912_vm8, %v6683_v38, %v6681_v13 }
 0xe37   : > { %v6678_v35 = vmul.f32 %v6661_v17, %v8398_v18  ;;  %v6679_v36 = vmul.f32 %v6673_v34, %v8401_v19  ;;  %7677 = vmatprep.subr.bf16.mxu1 %v7676_v40  ;;  %v6707_v27 = vmul.f32 %v6692_v1, %v8516_v0  ;;  %v6708_v18 = vmul.f32 %v6704_v22, %v8519_v60 }
 0xe38   : > { %7679 = vmatpush1.bf16.msra.mxu1 %v7678_v14 }
 0xe39   : > { %v7682_v23 = vpack.c.bf16 %v6678_v35, %v6676_v41  ;;  %v6685_v62 = vpop.permute.xlu0 %6684  ;;  %v6687_v4 = vpop.permute.xlu1 %6686  ;;  %v7680_v49 = vpack.c.bf16 %v6679_v36, %v6677_v42 }
 0xe3a   : > { %v6693_v51 = vsel %vm1912_vm8, %v6685_v62, %v6687_v4  ;;  %v6705_v26 = vsel %vm1912_vm8, %v6687_v4, %v6685_v62 }
 0xe3b   : > { %v6709_v19 = vmul.f32 %v6693_v51, %v8516_v0  ;;  %v6710_v32 = vmul.f32 %v6705_v26, %v8519_v60  ;;  %7681 = vmatprep.subr.bf16.mxu1 %v7680_v49 }
 0xe3c   : > { %7683 = vmatpush1.bf16.msra.mxu1 %v7682_v23 }
 0xe3d   : > { %v7686_v33 = vpack.c.bf16 %v6709_v19, %v6707_v27  ;;  %v6689_v10 = vpop.permute.xlu0 %6688  ;;  %v6691_v6 = vpop.permute.xlu1 %6690  ;;  %v7684_v7 = vpack.c.bf16 %v6710_v32, %v6708_v18 }
 0xe3e   : > { %v6706_v59 = vsel %vm1912_vm8, %v6691_v6, %v6689_v10  ;;  %v6694_v43 = vsel %vm1912_vm8, %v6689_v10, %v6691_v6 }
 0xe3f   : > { %v6712_v50 = vmul.f32 %v6706_v59, %v8519_v60  ;;  %7685 = vmatprep.subr.bf16.mxu1 %v7684_v7  ;;  %v6711_v15 = vmul.f32 %v6694_v43, %v8516_v0 }
 0xe40   : > { %7687 = vmatpush1.bf16.msra.mxu1 %v7686_v33 }
 0xe41   : > { %6798 = vmatprep.subr.mxu1 %v6712_v50 }
 0xe44   : > { %6799 = vmatpush1.msra.mxu1 %v6711_v15 }
 0xe45   : > { %6811 = vmatmul.mubr.f32.vlgmr.msra.gmra.mrb[26].mxu1 %v6713_v24 }
 0xe46   : > { %7189 = vmatprep.mubr.msk.f32.mxu1 %vm5952_vm11, %v6716_v16 }
 0xe49   : > { %6817 = vmatmul.mubr.f32.gmra.mrb[28].mxu1 %v6715_v47 }
 0xe4a   : > { %7190 = vmatprep.mubr.msk.f32.mxu1 %vm5952_vm11, %v6718_v55 }
 0xe4d   : > { %6823 = vmatmul.mubr.f32.gmra.mrb[30].mxu1 %v6717_v44 }
 0xe4e   : > { %v6725_v52 = vpop.permute.xlu0 %6724  ;;  %v6730_v46 = vpop.permute.xlu1 %6729 }
 0xe52   : > { %v6735_v53 = vpop.permute.xlu0 %6734  ;;  %v6840_v2 = vpop.permute.xlu1 %6839 }
 0xf18   : > { %v6812_v39 = vpop.f32.mrb[26].mxu1 }
 0xf19   : > { %v6814_v60 = vpop.f32.mrb[27].mxu1  ;;  %v6813_v58 = vadd.f32 %v6812_v39, %v6725_v52 }
 0xf1a   : > { %v6815_v30 = vadd.f32 %v6814_v60, %v6725_v52 }
 0xf1b   : > { %v6829_v21 = vmax.f32 %v6813_v58, 0.0 }
 0xf1c   : > { %v6818_v0 = vpop.f32.mrb[28].mxu1  ;;  %v6830_v12 = vmax.f32 %v6815_v30, 0.0 }
 0xf1d   : > { %v6819_v9 = vadd.f32 %v6818_v0, %v6730_v46  ;;  %v6820_v29 = vpop.f32.mrb[29].mxu1 }
 0xf1e   : > { %v6821_v20 = vadd.f32 %v6820_v29, %v6730_v46 }
 0xf1f   : > { %v6831_v38 = vmax.f32 %v6819_v9, 0.0 }
 0xf20   : > { %v6832_v3 = vmax.f32 %v6821_v20, 0.0  ;;  %v6824_v45 = vpop.f32.mrb[30].mxu1 }
 0xf21   : > { %v7690_v56 = vpack.c.bf16 %v6831_v38, %v6829_v21  ;;  %v6826_v57 = vpop.f32.mrb[31].mxu1  ;;  %v6825_v5 = vadd.f32 %v6824_v45, %v6735_v53 }
 0xf22   : > { %v7688_v11 = vpack.c.bf16 %v6832_v3, %v6830_v12  ;;  %v6827_v54 = vadd.f32 %v6826_v57, %v6735_v53 }
 0xf23   : > { %v6833_v8 = vmax.f32 %v6825_v5, 0.0 }
 0xf24   : > { %v6834_v63 = vmax.f32 %v6827_v54, 0.0  ;;  %7689 = vmatprep.subr.bf16.mxu0 %v7688_v11 }
 0xf25   : > { %7691 = vmatpush1.bf16.msra.mxu0 %v7690_v56 }
 0xf26   : > { %6850 = vmatprep.subr.mxu0 %v6834_v63 }
 0xf29   : > { %6851 = vmatpush1.msra.mxu0 %v6833_v8 }
 0xf2a   : > { %7191 = vmatmul.mubr.msk.f32.vlgmr.msra.gmra.mrb[28].mxu0 %vm6842_vm12, %v6835_v61 }
 0xffd   : > { %v6912_v25 = vpop.f32.mrb[28].mxu0 }
 0xffe   : > { %v6913_v31 = vadd.f32 %v6912_v25, %v6840_v2  ;;  %v6914_v37 = vpop.f32.mrb[29].mxu0 }
 0xfff   : > { %v6915_v48 = vadd.f32 %v6914_v37, %v6840_v2 }
0x1000   : > { %v7192_v14 = vmul.f32 -1.442695, %v6913_v31 }
0x1001   : > { %v7193_v13 = vmul.f32 -1.442695, %v6915_v48 }
0x1002   : > { %7789 = vpow2.f32 %v7192_v14 }
0x1003   : > { %7791 = vpow2.f32 %v7193_v13 }
0x100c   : > { %v7790_v28 = vpop.eup %7789 }
0x100d   : > { %v7792_v40 = vpop.eup %7791  ;;  %v6923_v17 = vadd.f32 1.0, %v7790_v28 }
0x100e   : > { %v6924_v34 = vadd.f32 1.0, %v7792_v40 }
0x100f   : > { %7793 = vrcp.f32 %v6923_v17 }
0x1010   : > { %7795 = vrcp.f32 %v6924_v34 }
0x1019   : > { %v7794_v41 = vpop.eup %7793 }
0x101a   : > { %v7796_v42 = vpop.eup %7795 }
0x101b   : > { %v6931_v35 = vcombine.low %v7794_v41, %v7796_v42 }
0x101d   : > { %6933 = vst [vmem:[%s1722_s5] sm:$0xff] %v6931_v35 }
0x101e PF: > { %s119_s15 = sadd.s32 1, %s7803_s15  }
0x101f   : > { %p116_p4 = scmp.ge.s32.totalorder %s119_s15, 4  }
0x1021   :  { %118 = sbr.rel (!%p116_p4) target bundleno = 105 (0x69), region = 345 }

</bundles_post_ra>
